<compile_context>
chip_gen: v7x
topology: tpu7x:2x2x1
jax: 0.10.0
libtpu: 0.0.40
codegen_flags: <defaults>
</compile_context>

<pallas_src>
import functools

import jax
import jax.numpy as jnp
from jax.experimental import pallas as pl
from jax.experimental.pallas import tpu as pltpu


_LANES = 128


def _round_up(x, m):
    return (x + m - 1) // m * m


def _conv3x3_from_slab(slab_ref, w_ref, *, m, wp, marg):
    """3x3 conv as nine matmuls whose LHS are pure row-offset views of `slab_ref`.

    slab_ref: (m + 2*marg, C_p) VMEM ref; rows [marg, marg+m) hold the
              spatially padded (padding=1) image, flattened; everything else 0.
    w_ref:    (9, C_p, Cout_p) per-tap weights, tap index t = dy*3 + dx.
    Returns an f32 (m, Cout_p) accumulator over the padded output domain
    (only interior rows are meaningful).
    """
    cout_p = w_ref.shape[-1]
    acc = jnp.zeros((m, cout_p), jnp.float32)
    for dy in range(3):
        for dx in range(3):
            start = marg - (1 - dy) * wp - (1 - dx)   # static, always in-bounds
            tap = slab_ref[pl.ds(start, m), :]        # view/load, no shifts/concat
            acc = acc + jnp.dot(tap, w_ref[dy * 3 + dx],
                                preferred_element_type=jnp.float32)
    return acc


def _fpn_seg_head_kernel(x_ref, w0_ref, w1_ref, o_ref, x_slab, mid_slab, *,
                         h, w, in_ch, out_ch):
    # x_ref:    (h*w, in_ch)          raw input rows (no padding, no cast yet)
    # w0_ref:   (9, Cin_p, Cmid_p)    per-tap weights, layer 0
    # w1_ref:   (9, Cmid_p, Cout_p)   per-tap weights, layer 1
    # o_ref:    (h*w, out_ch)         interior-only, out_ch-only output
    # x_slab:   VMEM (m + 2*marg, Cin_p)   padded/margined input slab
    # mid_slab: VMEM (m + 2*marg, Cmid_p)  padded/margined fused intermediate
    hp, wp = h + 2, w + 2
    m = hp * wp
    marg = wp + 1   # zero-row margin so every tap offset is an in-bounds view

    # One memset per slab gives: the padding=1 ring, the tap margins and the
    # zero channel lanes.  Re-done every grid step so the kernel stays correct
    # when the "parallel" batch axis is split across TensorCores.
    x_slab[...] = jnp.zeros(x_slab.shape, x_slab.dtype)
    mid_slab[...] = jnp.zeros(mid_slab.shape, mid_slab.dtype)

    # Scatter raw input rows into the slab interior (spatial pad + channel pad
    # + compute-dtype cast all happen here, in VMEM, not as an HBM pass).
    for r in range(h):
        row = x_ref[pl.ds(r * w, w), :].astype(x_slab.dtype)          # (w, in_ch)
        x_slab[pl.ds(marg + (r + 1) * wp + 1, w), pl.ds(0, in_ch)] = row

    # ---- layer 0: conv3x3 + ReLU -------------------------------------------
    acc0 = jnp.maximum(_conv3x3_from_slab(x_slab, w0_ref, m=m, wp=wp, marg=marg), 0.0)
    # Store only interior rows; the slab's zeroed border ring is exactly the
    # padding=1 input layer 1 expects (no full-slab mask pass needed).
    for r in range(h):
        base = (r + 1) * wp + 1
        mid_slab[pl.ds(marg + base, w), :] = acc0[base:base + w, :].astype(mid_slab.dtype)

    # ---- layer 1: conv3x3 + ReLU on the VMEM-resident intermediate ----------
    acc1 = jnp.maximum(_conv3x3_from_slab(mid_slab, w1_ref, m=m, wp=wp, marg=marg), 0.0)

    # Interior-only, out_ch-only store: no padded rows/cols/lanes reach HBM.
    for r in range(h):
        base = (r + 1) * wp + 1
        o_ref[pl.ds(r * w, w), :] = acc1[base:base + w, :out_ch].astype(o_ref.dtype)


def fpn_seg_head_forward_nhwc(params, x_nhwc, *, compute_dtype=jnp.bfloat16,
                              out_dtype=None):
    """Fused FPNSegHead forward, NHWC in / NHWC out (out dtype = compute dtype)."""
    w0 = params["w0"]  # (3, 3, in_ch, mid_ch) HWIO
    w1 = params["w1"]  # (3, 3, mid_ch, out_ch) HWIO
    n, h, w, in_ch = x_nhwc.shape
    mid_ch, out_ch = w0.shape[-1], w1.shape[-1]
    out_dtype = compute_dtype if out_dtype is None else out_dtype

    cin_p = _round_up(in_ch, _LANES)
    cmid_p = _round_up(mid_ch, _LANES)
    cout_p = _round_up(out_ch, _LANES)
    hp, wp = h + 2, w + 2
    m = hp * wp
    marg = wp + 1
    slab_rows = m + 2 * marg

    # Raw activations, flattened spatially (metadata-only reshape, no HBM pass).
    x_flat = x_nhwc.reshape(n, h * w, in_ch)

    def tap_weights(wt, ci, ci_p, co, co_p):
        wt = jnp.pad(wt, ((0, 0), (0, 0), (0, ci_p - ci), (0, co_p - co)))
        return wt.reshape(9, ci_p, co_p).astype(compute_dtype)   # t = dy*3 + dx

    w0_t = tap_weights(w0, in_ch, cin_p, mid_ch, cmid_p)
    w1_t = tap_weights(w1, mid_ch, cmid_p, out_ch, cout_p)

    # Honest VMEM estimate: double-buffered I/O blocks, weight buffers, slabs,
    # f32 accumulators + transients.  Capped per generation below physical VMEM.
    cb = jnp.dtype(compute_dtype).itemsize
    est = (2 * h * w * in_ch * x_flat.dtype.itemsize
           + 2 * h * w * out_ch * jnp.dtype(out_dtype).itemsize
           + 2 * 9 * cin_p * cmid_p * cb
           + 2 * 9 * cmid_p * cout_p * cb
           + slab_rows * (cin_p + cmid_p) * cb
           + 3 * m * cmid_p * 4
           + 3 * m * cout_p * 4)
    try:
        vmem_cap = int(pltpu.get_tpu_info().vmem_capacity_bytes)
    except Exception:
        vmem_cap = 128 * 2 ** 20
    # ~72% of physical: ~46 MiB on v7x (64 MiB), ~92 MiB on v5e/v6e (128 MiB).
    vmem_limit = int(min(int(0.72 * vmem_cap), max(4 * 2 ** 20, int(1.3 * est))))

    kernel = functools.partial(_fpn_seg_head_kernel, h=h, w=w,
                               in_ch=in_ch, out_ch=out_ch)
    out = pl.pallas_call(
        kernel,
        out_shape=jax.ShapeDtypeStruct((n, h * w, out_ch), out_dtype),
        grid=(n,),
        in_specs=[
            pl.BlockSpec((None, h * w, in_ch), lambda i: (i, 0, 0)),
            pl.BlockSpec((9, cin_p, cmid_p), lambda i: (0, 0, 0)),   # VMEM-resident
            pl.BlockSpec((9, cmid_p, cout_p), lambda i: (0, 0, 0)),  # VMEM-resident
        ],
        out_specs=pl.BlockSpec((None, h * w, out_ch), lambda i: (i, 0, 0)),
        scratch_shapes=[
            pltpu.VMEM((slab_rows, cin_p), compute_dtype),
            pltpu.VMEM((slab_rows, cmid_p), compute_dtype),
        ],
        compiler_params=pltpu.CompilerParams(
            dimension_semantics=("parallel",),
            vmem_limit_bytes=vmem_limit,
        ),
    )(x_flat, w0_t, w1_t)

    return out.reshape(n, h, w, out_ch)


def fpn_seg_head_forward(params, x_nchw, *, compute_dtype=jnp.bfloat16,
                         out_dtype=None):
    """Matches FPNSegHead.forward (NCHW in / NCHW out)."""
    x = jnp.transpose(x_nchw, (0, 2, 3, 1))      # NCHW -> NHWC
    y = fpn_seg_head_forward_nhwc(params, x, compute_dtype=compute_dtype,
                                  out_dtype=out_dtype)
    return jnp.transpose(y, (0, 3, 1, 2))        # NHWC -> NCHW


def init_fpn_seg_head_params(key, in_ch, out_ch, mid_ch, dtype=jnp.float32):
    """Deterministic synthetic weights, stored HWIO: (3, 3, Cin, Cout)."""
    k0, k1 = jax.random.split(key)
    scale0 = 1.0 / jnp.sqrt(9.0 * in_ch)
    scale1 = 1.0 / jnp.sqrt(9.0 * mid_ch)
    w0 = jax.random.normal(k0, (3, 3, in_ch, mid_ch), dtype) * scale0
    w1 = jax.random.normal(k1, (3, 3, mid_ch, out_ch), dtype) * scale1
    return {"w0": w0, "w1": w1}


def _reference_forward(params, x_nchw):
    """Pure-JAX reference using lax.conv (for correctness check)."""
    def conv(x, wt):
        y = jax.lax.conv_general_dilated(
            x, wt, window_strides=(1, 1), padding=((1, 1), (1, 1)),
            dimension_numbers=("NCHW", "HWIO", "NCHW"),
        )
        return jnp.maximum(y, 0.0)
    return conv(conv(x_nchw, params["w0"]), params["w1"])


if __name__ == "__main__":
    key = jax.random.PRNGKey(0)
    k_x, k_p = jax.random.split(key)

    N, in_ch, H, W = 2, 4, 16, 16
    mid_ch, out_ch = 8, 4

    x = jax.random.normal(k_x, (N, in_ch, H, W), jnp.float32)
    params = init_fpn_seg_head_params(k_p, in_ch, out_ch, mid_ch)

    ref = _reference_forward(params, x)

    # Default bf16 MXU path (fast): loose tolerance.
    out_bf16 = jax.block_until_ready(fpn_seg_head_forward(params, x))
    assert out_bf16.shape == (N, out_ch, H, W)
    assert jnp.allclose(out_bf16.astype(jnp.float32), ref, atol=1e-1, rtol=1e-1)

    # f32 compute path: tight check of the conv semantics.
    out_f32 = jax.block_until_ready(
        fpn_seg_head_forward(params, x, compute_dtype=jnp.float32))
    assert out_f32.shape == (N, out_ch, H, W)
    assert out_f32.dtype == jnp.float32
    assert jnp.allclose(out_f32, ref, atol=2e-3, rtol=2e-3)

    print("KERNEL_OK")
</pallas_src>

<mosaic_0001>
module attributes {stable_mosaic.version = 11 : i64} {
  func.func @_fpn_seg_head_kernel(%arg0: i32, %arg1: memref<1x256x4xf32, #tpu.memory_space<vmem>>, %arg2: memref<9x128x128xbf16, #tpu.memory_space<vmem>>, %arg3: memref<9x128x128xbf16, #tpu.memory_space<vmem>>, %arg4: memref<1x256x4xbf16, #tpu.memory_space<vmem>>, %arg5: memref<362x128xbf16, #tpu.memory_space<vmem>>, %arg6: memref<362x128xbf16, #tpu.memory_space<vmem>>) attributes {dimension_semantics = [#tpu.dimension_semantics<parallel>], iteration_bounds = array<i64: 2>, scalar_prefetch = 0 : i64, scratch_operands = 2 : i64, tpu.core_type = #tpu.core_type<tc>, window_params = [{transform_indices = @transform_0, window_bounds = array<i64: 1, 256, 4>}, {pipeline_mode = #tpu.pipeline_mode<synchronous>, transform_indices = @transform_1, window_bounds = array<i64: 9, 128, 128>}, {pipeline_mode = #tpu.pipeline_mode<synchronous>, transform_indices = @transform_2, window_bounds = array<i64: 9, 128, 128>}, {transform_indices = @transform_3, window_bounds = array<i64: 1, 256, 4>}]} {
    %cst = arith.constant 0.000000e+00 : bf16
    %0 = vector.broadcast %cst : bf16 to vector<362x128xbf16>
    %c0 = arith.constant 0 : index
    %c0_0 = arith.constant 0 : index
    %1 = vector.load %arg5[%c0, %c0_0] : memref<362x128xbf16, #tpu.memory_space<vmem>>, vector<362x128xbf16>
    tpu.vector_store %arg5[%c0, %c0_0], %0 {strides = array<i32>} : memref<362x128xbf16, #tpu.memory_space<vmem>>, vector<362x128xbf16>,
    %cst_1 = arith.constant 0.000000e+00 : bf16
    %2 = vector.broadcast %cst_1 : bf16 to vector<362x128xbf16>
    %c0_2 = arith.constant 0 : index
    %c0_3 = arith.constant 0 : index
    %3 = vector.load %arg6[%c0_2, %c0_3] : memref<362x128xbf16, #tpu.memory_space<vmem>>, vector<362x128xbf16>
    tpu.vector_store %arg6[%c0_2, %c0_3], %2 {strides = array<i32>} : memref<362x128xbf16, #tpu.memory_space<vmem>>, vector<362x128xbf16>,
    %c0_4 = arith.constant 0 : index
    %c0_5 = arith.constant 0 : index
    %c0_6 = arith.constant 0 : index
    %4 = vector.load %arg1[%c0_4, %c0_5, %c0_6] : memref<1x256x4xf32, #tpu.memory_space<vmem>>, vector<1x16x4xf32>
    %5 = vector.shape_cast %4 : vector<1x16x4xf32> to vector<16x4xf32>
    %6 = arith.truncf %5 : vector<16x4xf32> to vector<16x4xbf16>
    %c38 = arith.constant 38 : index
    %c0_7 = arith.constant 0 : index
    %7 = vector.load %arg5[%c38, %c0_7] : memref<362x128xbf16, #tpu.memory_space<vmem>>, vector<16x4xbf16>
    tpu.vector_store %arg5[%c38, %c0_7], %6 {strides = array<i32>} : memref<362x128xbf16, #tpu.memory_space<vmem>>, vector<16x4xbf16>,
    %c0_8 = arith.constant 0 : index
    %c16 = arith.constant 16 : index
    %c0_9 = arith.constant 0 : index
    %8 = vector.load %arg1[%c0_8, %c16, %c0_9] : memref<1x256x4xf32, #tpu.memory_space<vmem>>, vector<1x16x4xf32>
    %9 = vector.shape_cast %8 : vector<1x16x4xf32> to vector<16x4xf32>
    %10 = arith.truncf %9 : vector<16x4xf32> to vector<16x4xbf16>
    %c56 = arith.constant 56 : index
    %c0_10 = arith.constant 0 : index
    %11 = vector.load %arg5[%c56, %c0_10] : memref<362x128xbf16, #tpu.memory_space<vmem>>, vector<16x4xbf16>
    tpu.vector_store %arg5[%c56, %c0_10], %10 {strides = array<i32>} : memref<362x128xbf16, #tpu.memory_space<vmem>>, vector<16x4xbf16>,
    %c0_11 = arith.constant 0 : index
    %c32 = arith.constant 32 : index
    %c0_12 = arith.constant 0 : index
    %12 = vector.load %arg1[%c0_11, %c32, %c0_12] : memref<1x256x4xf32, #tpu.memory_space<vmem>>, vector<1x16x4xf32>
    %13 = vector.shape_cast %12 : vector<1x16x4xf32> to vector<16x4xf32>
    %14 = arith.truncf %13 : vector<16x4xf32> to vector<16x4xbf16>
    %c74 = arith.constant 74 : index
    %c0_13 = arith.constant 0 : index
    %15 = vector.load %arg5[%c74, %c0_13] : memref<362x128xbf16, #tpu.memory_space<vmem>>, vector<16x4xbf16>
    tpu.vector_store %arg5[%c74, %c0_13], %14 {strides = array<i32>} : memref<362x128xbf16, #tpu.memory_space<vmem>>, vector<16x4xbf16>,
    %c0_14 = arith.constant 0 : index
    %c48 = arith.constant 48 : index
    %c0_15 = arith.constant 0 : index
    %16 = vector.load %arg1[%c0_14, %c48, %c0_15] : memref<1x256x4xf32, #tpu.memory_space<vmem>>, vector<1x16x4xf32>
    %17 = vector.shape_cast %16 : vector<1x16x4xf32> to vector<16x4xf32>
    %18 = arith.truncf %17 : vector<16x4xf32> to vector<16x4xbf16>
    %c92 = arith.constant 92 : index
    %c0_16 = arith.constant 0 : index
    %19 = vector.load %arg5[%c92, %c0_16] : memref<362x128xbf16, #tpu.memory_space<vmem>>, vector<16x4xbf16>
    tpu.vector_store %arg5[%c92, %c0_16], %18 {strides = array<i32>} : memref<362x128xbf16, #tpu.memory_space<vmem>>, vector<16x4xbf16>,
    %c0_17 = arith.constant 0 : index
    %c64 = arith.constant 64 : index
    %c0_18 = arith.constant 0 : index
    %20 = vector.load %arg1[%c0_17, %c64, %c0_18] : memref<1x256x4xf32, #tpu.memory_space<vmem>>, vector<1x16x4xf32>
    %21 = vector.shape_cast %20 : vector<1x16x4xf32> to vector<16x4xf32>
    %22 = arith.truncf %21 : vector<16x4xf32> to vector<16x4xbf16>
    %c110 = arith.constant 110 : index
    %c0_19 = arith.constant 0 : index
    %23 = vector.load %arg5[%c110, %c0_19] : memref<362x128xbf16, #tpu.memory_space<vmem>>, vector<16x4xbf16>
    tpu.vector_store %arg5[%c110, %c0_19], %22 {strides = array<i32>} : memref<362x128xbf16, #tpu.memory_space<vmem>>, vector<16x4xbf16>,
    %c0_20 = arith.constant 0 : index
    %c80 = arith.constant 80 : index
    %c0_21 = arith.constant 0 : index
    %24 = vector.load %arg1[%c0_20, %c80, %c0_21] : memref<1x256x4xf32, #tpu.memory_space<vmem>>, vector<1x16x4xf32>
    %25 = vector.shape_cast %24 : vector<1x16x4xf32> to vector<16x4xf32>
    %26 = arith.truncf %25 : vector<16x4xf32> to vector<16x4xbf16>
    %c128 = arith.constant 128 : index
    %c0_22 = arith.constant 0 : index
    %27 = vector.load %arg5[%c128, %c0_22] : memref<362x128xbf16, #tpu.memory_space<vmem>>, vector<16x4xbf16>
    tpu.vector_store %arg5[%c128, %c0_22], %26 {strides = array<i32>} : memref<362x128xbf16, #tpu.memory_space<vmem>>, vector<16x4xbf16>,
    %c0_23 = arith.constant 0 : index
    %c96 = arith.constant 96 : index
    %c0_24 = arith.constant 0 : index
    %28 = vector.load %arg1[%c0_23, %c96, %c0_24] : memref<1x256x4xf32, #tpu.memory_space<vmem>>, vector<1x16x4xf32>
    %29 = vector.shape_cast %28 : vector<1x16x4xf32> to vector<16x4xf32>
    %30 = arith.truncf %29 : vector<16x4xf32> to vector<16x4xbf16>
    %c146 = arith.constant 146 : index
    %c0_25 = arith.constant 0 : index
    %31 = vector.load %arg5[%c146, %c0_25] : memref<362x128xbf16, #tpu.memory_space<vmem>>, vector<16x4xbf16>
    tpu.vector_store %arg5[%c146, %c0_25], %30 {strides = array<i32>} : memref<362x128xbf16, #tpu.memory_space<vmem>>, vector<16x4xbf16>,
    %c0_26 = arith.constant 0 : index
    %c112 = arith.constant 112 : index
    %c0_27 = arith.constant 0 : index
    %32 = vector.load %arg1[%c0_26, %c112, %c0_27] : memref<1x256x4xf32, #tpu.memory_space<vmem>>, vector<1x16x4xf32>
    %33 = vector.shape_cast %32 : vector<1x16x4xf32> to vector<16x4xf32>
    %34 = arith.truncf %33 : vector<16x4xf32> to vector<16x4xbf16>
    %c164 = arith.constant 164 : index
    %c0_28 = arith.constant 0 : index
    %35 = vector.load %arg5[%c164, %c0_28] : memref<362x128xbf16, #tpu.memory_space<vmem>>, vector<16x4xbf16>
    tpu.vector_store %arg5[%c164, %c0_28], %34 {strides = array<i32>} : memref<362x128xbf16, #tpu.memory_space<vmem>>, vector<16x4xbf16>,
    %c0_29 = arith.constant 0 : index
    %c128_30 = arith.constant 128 : index
    %c0_31 = arith.constant 0 : index
    %36 = vector.load %arg1[%c0_29, %c128_30, %c0_31] : memref<1x256x4xf32, #tpu.memory_space<vmem>>, vector<1x16x4xf32>
    %37 = vector.shape_cast %36 : vector<1x16x4xf32> to vector<16x4xf32>
    %38 = arith.truncf %37 : vector<16x4xf32> to vector<16x4xbf16>
    %c182 = arith.constant 182 : index
    %c0_32 = arith.constant 0 : index
    %39 = vector.load %arg5[%c182, %c0_32] : memref<362x128xbf16, #tpu.memory_space<vmem>>, vector<16x4xbf16>
    tpu.vector_store %arg5[%c182, %c0_32], %38 {strides = array<i32>} : memref<362x128xbf16, #tpu.memory_space<vmem>>, vector<16x4xbf16>,
    %c0_33 = arith.constant 0 : index
    %c144 = arith.constant 144 : index
    %c0_34 = arith.constant 0 : index
    %40 = vector.load %arg1[%c0_33, %c144, %c0_34] : memref<1x256x4xf32, #tpu.memory_space<vmem>>, vector<1x16x4xf32>
    %41 = vector.shape_cast %40 : vector<1x16x4xf32> to vector<16x4xf32>
    %42 = arith.truncf %41 : vector<16x4xf32> to vector<16x4xbf16>
    %c200 = arith.constant 200 : index
    %c0_35 = arith.constant 0 : index
    %43 = vector.load %arg5[%c200, %c0_35] : memref<362x128xbf16, #tpu.memory_space<vmem>>, vector<16x4xbf16>
    tpu.vector_store %arg5[%c200, %c0_35], %42 {strides = array<i32>} : memref<362x128xbf16, #tpu.memory_space<vmem>>, vector<16x4xbf16>,
    %c0_36 = arith.constant 0 : index
    %c160 = arith.constant 160 : index
    %c0_37 = arith.constant 0 : index
    %44 = vector.load %arg1[%c0_36, %c160, %c0_37] : memref<1x256x4xf32, #tpu.memory_space<vmem>>, vector<1x16x4xf32>
    %45 = vector.shape_cast %44 : vector<1x16x4xf32> to vector<16x4xf32>
    %46 = arith.truncf %45 : vector<16x4xf32> to vector<16x4xbf16>
    %c218 = arith.constant 218 : index
    %c0_38 = arith.constant 0 : index
    %47 = vector.load %arg5[%c218, %c0_38] : memref<362x128xbf16, #tpu.memory_space<vmem>>, vector<16x4xbf16>
    tpu.vector_store %arg5[%c218, %c0_38], %46 {strides = array<i32>} : memref<362x128xbf16, #tpu.memory_space<vmem>>, vector<16x4xbf16>,
    %c0_39 = arith.constant 0 : index
    %c176 = arith.constant 176 : index
    %c0_40 = arith.constant 0 : index
    %48 = vector.load %arg1[%c0_39, %c176, %c0_40] : memref<1x256x4xf32, #tpu.memory_space<vmem>>, vector<1x16x4xf32>
    %49 = vector.shape_cast %48 : vector<1x16x4xf32> to vector<16x4xf32>
    %50 = arith.truncf %49 : vector<16x4xf32> to vector<16x4xbf16>
    %c236 = arith.constant 236 : index
    %c0_41 = arith.constant 0 : index
    %51 = vector.load %arg5[%c236, %c0_41] : memref<362x128xbf16, #tpu.memory_space<vmem>>, vector<16x4xbf16>
    tpu.vector_store %arg5[%c236, %c0_41], %50 {strides = array<i32>} : memref<362x128xbf16, #tpu.memory_space<vmem>>, vector<16x4xbf16>,
    %c0_42 = arith.constant 0 : index
    %c192 = arith.constant 192 : index
    %c0_43 = arith.constant 0 : index
    %52 = vector.load %arg1[%c0_42, %c192, %c0_43] : memref<1x256x4xf32, #tpu.memory_space<vmem>>, vector<1x16x4xf32>
    %53 = vector.shape_cast %52 : vector<1x16x4xf32> to vector<16x4xf32>
    %54 = arith.truncf %53 : vector<16x4xf32> to vector<16x4xbf16>
    %c254 = arith.constant 254 : index
    %c0_44 = arith.constant 0 : index
    %55 = vector.load %arg5[%c254, %c0_44] : memref<362x128xbf16, #tpu.memory_space<vmem>>, vector<16x4xbf16>
    tpu.vector_store %arg5[%c254, %c0_44], %54 {strides = array<i32>} : memref<362x128xbf16, #tpu.memory_space<vmem>>, vector<16x4xbf16>,
    %c0_45 = arith.constant 0 : index
    %c208 = arith.constant 208 : index
    %c0_46 = arith.constant 0 : index
    %56 = vector.load %arg1[%c0_45, %c208, %c0_46] : memref<1x256x4xf32, #tpu.memory_space<vmem>>, vector<1x16x4xf32>
    %57 = vector.shape_cast %56 : vector<1x16x4xf32> to vector<16x4xf32>
    %58 = arith.truncf %57 : vector<16x4xf32> to vector<16x4xbf16>
    %c272 = arith.constant 272 : index
    %c0_47 = arith.constant 0 : index
    %59 = vector.load %arg5[%c272, %c0_47] : memref<362x128xbf16, #tpu.memory_space<vmem>>, vector<16x4xbf16>
    tpu.vector_store %arg5[%c272, %c0_47], %58 {strides = array<i32>} : memref<362x128xbf16, #tpu.memory_space<vmem>>, vector<16x4xbf16>,
    %c0_48 = arith.constant 0 : index
    %c224 = arith.constant 224 : index
    %c0_49 = arith.constant 0 : index
    %60 = vector.load %arg1[%c0_48, %c224, %c0_49] : memref<1x256x4xf32, #tpu.memory_space<vmem>>, vector<1x16x4xf32>
    %61 = vector.shape_cast %60 : vector<1x16x4xf32> to vector<16x4xf32>
    %62 = arith.truncf %61 : vector<16x4xf32> to vector<16x4xbf16>
    %c290 = arith.constant 290 : index
    %c0_50 = arith.constant 0 : index
    %63 = vector.load %arg5[%c290, %c0_50] : memref<362x128xbf16, #tpu.memory_space<vmem>>, vector<16x4xbf16>
    tpu.vector_store %arg5[%c290, %c0_50], %62 {strides = array<i32>} : memref<362x128xbf16, #tpu.memory_space<vmem>>, vector<16x4xbf16>,
    %c0_51 = arith.constant 0 : index
    %c240 = arith.constant 240 : index
    %c0_52 = arith.constant 0 : index
    %64 = vector.load %arg1[%c0_51, %c240, %c0_52] : memref<1x256x4xf32, #tpu.memory_space<vmem>>, vector<1x16x4xf32>
    %65 = vector.shape_cast %64 : vector<1x16x4xf32> to vector<16x4xf32>
    %66 = arith.truncf %65 : vector<16x4xf32> to vector<16x4xbf16>
    %c308 = arith.constant 308 : index
    %c0_53 = arith.constant 0 : index
    %67 = vector.load %arg5[%c308, %c0_53] : memref<362x128xbf16, #tpu.memory_space<vmem>>, vector<16x4xbf16>
    tpu.vector_store %arg5[%c308, %c0_53], %66 {strides = array<i32>} : memref<362x128xbf16, #tpu.memory_space<vmem>>, vector<16x4xbf16>,
    %cst_54 = arith.constant 0.000000e+00 : f32
    %68 = vector.broadcast %cst_54 : f32 to vector<324x128xf32>
    %c0_55 = arith.constant 0 : index
    %c0_56 = arith.constant 0 : index
    %69 = vector.load %arg5[%c0_55, %c0_56] : memref<362x128xbf16, #tpu.memory_space<vmem>>, vector<324x128xbf16>
    %c0_57 = arith.constant 0 : index
    %c0_58 = arith.constant 0 : index
    %c0_59 = arith.constant 0 : index
    %70 = vector.load %arg2[%c0_57, %c0_58, %c0_59] : memref<9x128x128xbf16, #tpu.memory_space<vmem>>, vector<1x128x128xbf16>
    %71 = vector.shape_cast %70 : vector<1x128x128xbf16> to vector<128x128xbf16>
    %cst_60 = arith.constant dense<0.000000e+00> : vector<324x128xf32>
    %72 = tpu.matmul %69, %71, %cst_60 {dimension_numbers = #tpu.dot_dimension_numbers<[1], [0], [0], [1], [0, 0, 1, 1], [], []>} : vector<324x128xbf16>, vector<128x128xbf16>, vector<324x128xf32> -> vector<324x128xf32>
    %73 = arith.addf %68, %72 : vector<324x128xf32>
    %c1 = arith.constant 1 : index
    %c0_61 = arith.constant 0 : index
    %74 = vector.load %arg5[%c1, %c0_61] : memref<362x128xbf16, #tpu.memory_space<vmem>>, vector<324x128xbf16>
    %c1_62 = arith.constant 1 : index
    %c0_63 = arith.constant 0 : index
    %c0_64 = arith.constant 0 : index
    %75 = vector.load %arg2[%c1_62, %c0_63, %c0_64] : memref<9x128x128xbf16, #tpu.memory_space<vmem>>, vector<1x128x128xbf16>
    %76 = vector.shape_cast %75 : vector<1x128x128xbf16> to vector<128x128xbf16>
    %cst_65 = arith.constant dense<0.000000e+00> : vector<324x128xf32>
    %77 = tpu.matmul %74, %76, %cst_65 {dimension_numbers = #tpu.dot_dimension_numbers<[1], [0], [0], [1], [0, 0, 1, 1], [], []>} : vector<324x128xbf16>, vector<128x128xbf16>, vector<324x128xf32> -> vector<324x128xf32>
    %78 = arith.addf %73, %77 : vector<324x128xf32>
    %c2 = arith.constant 2 : index
    %c0_66 = arith.constant 0 : index
    %79 = vector.load %arg5[%c2, %c0_66] : memref<362x128xbf16, #tpu.memory_space<vmem>>, vector<324x128xbf16>
    %c2_67 = arith.constant 2 : index
    %c0_68 = arith.constant 0 : index
    %c0_69 = arith.constant 0 : index
    %80 = vector.load %arg2[%c2_67, %c0_68, %c0_69] : memref<9x128x128xbf16, #tpu.memory_space<vmem>>, vector<1x128x128xbf16>
    %81 = vector.shape_cast %80 : vector<1x128x128xbf16> to vector<128x128xbf16>
    %cst_70 = arith.constant dense<0.000000e+00> : vector<324x128xf32>
    %82 = tpu.matmul %79, %81, %cst_70 {dimension_numbers = #tpu.dot_dimension_numbers<[1], [0], [0], [1], [0, 0, 1, 1], [], []>} : vector<324x128xbf16>, vector<128x128xbf16>, vector<324x128xf32> -> vector<324x128xf32>
    %83 = arith.addf %78, %82 : vector<324x128xf32>
    %c18 = arith.constant 18 : index
    %c0_71 = arith.constant 0 : index
    %84 = vector.load %arg5[%c18, %c0_71] : memref<362x128xbf16, #tpu.memory_space<vmem>>, vector<324x128xbf16>
    %c3 = arith.constant 3 : index
    %c0_72 = arith.constant 0 : index
    %c0_73 = arith.constant 0 : index
    %85 = vector.load %arg2[%c3, %c0_72, %c0_73] : memref<9x128x128xbf16, #tpu.memory_space<vmem>>, vector<1x128x128xbf16>
    %86 = vector.shape_cast %85 : vector<1x128x128xbf16> to vector<128x128xbf16>
    %cst_74 = arith.constant dense<0.000000e+00> : vector<324x128xf32>
    %87 = tpu.matmul %84, %86, %cst_74 {dimension_numbers = #tpu.dot_dimension_numbers<[1], [0], [0], [1], [0, 0, 1, 1], [], []>} : vector<324x128xbf16>, vector<128x128xbf16>, vector<324x128xf32> -> vector<324x128xf32>
    %88 = arith.addf %83, %87 : vector<324x128xf32>
    %c19 = arith.constant 19 : index
    %c0_75 = arith.constant 0 : index
    %89 = vector.load %arg5[%c19, %c0_75] : memref<362x128xbf16, #tpu.memory_space<vmem>>, vector<324x128xbf16>
    %c4 = arith.constant 4 : index
    %c0_76 = arith.constant 0 : index
    %c0_77 = arith.constant 0 : index
    %90 = vector.load %arg2[%c4, %c0_76, %c0_77] : memref<9x128x128xbf16, #tpu.memory_space<vmem>>, vector<1x128x128xbf16>
    %91 = vector.shape_cast %90 : vector<1x128x128xbf16> to vector<128x128xbf16>
    %cst_78 = arith.constant dense<0.000000e+00> : vector<324x128xf32>
    %92 = tpu.matmul %89, %91, %cst_78 {dimension_numbers = #tpu.dot_dimension_numbers<[1], [0], [0], [1], [0, 0, 1, 1], [], []>} : vector<324x128xbf16>, vector<128x128xbf16>, vector<324x128xf32> -> vector<324x128xf32>
    %93 = arith.addf %88, %92 : vector<324x128xf32>
    %c20 = arith.constant 20 : index
    %c0_79 = arith.constant 0 : index
    %94 = vector.load %arg5[%c20, %c0_79] : memref<362x128xbf16, #tpu.memory_space<vmem>>, vector<324x128xbf16>
    %c5 = arith.constant 5 : index
    %c0_80 = arith.constant 0 : index
    %c0_81 = arith.constant 0 : index
    %95 = vector.load %arg2[%c5, %c0_80, %c0_81] : memref<9x128x128xbf16, #tpu.memory_space<vmem>>, vector<1x128x128xbf16>
    %96 = vector.shape_cast %95 : vector<1x128x128xbf16> to vector<128x128xbf16>
    %cst_82 = arith.constant dense<0.000000e+00> : vector<324x128xf32>
    %97 = tpu.matmul %94, %96, %cst_82 {dimension_numbers = #tpu.dot_dimension_numbers<[1], [0], [0], [1], [0, 0, 1, 1], [], []>} : vector<324x128xbf16>, vector<128x128xbf16>, vector<324x128xf32> -> vector<324x128xf32>
    %98 = arith.addf %93, %97 : vector<324x128xf32>
    %c36 = arith.constant 36 : index
    %c0_83 = arith.constant 0 : index
    %99 = vector.load %arg5[%c36, %c0_83] : memref<362x128xbf16, #tpu.memory_space<vmem>>, vector<324x128xbf16>
    %c6 = arith.constant 6 : index
    %c0_84 = arith.constant 0 : index
    %c0_85 = arith.constant 0 : index
    %100 = vector.load %arg2[%c6, %c0_84, %c0_85] : memref<9x128x128xbf16, #tpu.memory_space<vmem>>, vector<1x128x128xbf16>
    %101 = vector.shape_cast %100 : vector<1x128x128xbf16> to vector<128x128xbf16>
    %cst_86 = arith.constant dense<0.000000e+00> : vector<324x128xf32>
    %102 = tpu.matmul %99, %101, %cst_86 {dimension_numbers = #tpu.dot_dimension_numbers<[1], [0], [0], [1], [0, 0, 1, 1], [], []>} : vector<324x128xbf16>, vector<128x128xbf16>, vector<324x128xf32> -> vector<324x128xf32>
    %103 = arith.addf %98, %102 : vector<324x128xf32>
    %c37 = arith.constant 37 : index
    %c0_87 = arith.constant 0 : index
    %104 = vector.load %arg5[%c37, %c0_87] : memref<362x128xbf16, #tpu.memory_space<vmem>>, vector<324x128xbf16>
    %c7 = arith.constant 7 : index
    %c0_88 = arith.constant 0 : index
    %c0_89 = arith.constant 0 : index
    %105 = vector.load %arg2[%c7, %c0_88, %c0_89] : memref<9x128x128xbf16, #tpu.memory_space<vmem>>, vector<1x128x128xbf16>
    %106 = vector.shape_cast %105 : vector<1x128x128xbf16> to vector<128x128xbf16>
    %cst_90 = arith.constant dense<0.000000e+00> : vector<324x128xf32>
    %107 = tpu.matmul %104, %106, %cst_90 {dimension_numbers = #tpu.dot_dimension_numbers<[1], [0], [0], [1], [0, 0, 1, 1], [], []>} : vector<324x128xbf16>, vector<128x128xbf16>, vector<324x128xf32> -> vector<324x128xf32>
    %108 = arith.addf %103, %107 : vector<324x128xf32>
    %c38_91 = arith.constant 38 : index
    %c0_92 = arith.constant 0 : index
    %109 = vector.load %arg5[%c38_91, %c0_92] : memref<362x128xbf16, #tpu.memory_space<vmem>>, vector<324x128xbf16>
    %c8 = arith.constant 8 : index
    %c0_93 = arith.constant 0 : index
    %c0_94 = arith.constant 0 : index
    %110 = vector.load %arg2[%c8, %c0_93, %c0_94] : memref<9x128x128xbf16, #tpu.memory_space<vmem>>, vector<1x128x128xbf16>
    %111 = vector.shape_cast %110 : vector<1x128x128xbf16> to vector<128x128xbf16>
    %cst_95 = arith.constant dense<0.000000e+00> : vector<324x128xf32>
    %112 = tpu.matmul %109, %111, %cst_95 {dimension_numbers = #tpu.dot_dimension_numbers<[1], [0], [0], [1], [0, 0, 1, 1], [], []>} : vector<324x128xbf16>, vector<128x128xbf16>, vector<324x128xf32> -> vector<324x128xf32>
    %113 = arith.addf %108, %112 : vector<324x128xf32>
    %cst_96 = arith.constant 0.000000e+00 : f32
    %114 = vector.broadcast %cst_96 : f32 to vector<324x128xf32>
    %115 = arith.maximumf %113, %114 : vector<324x128xf32>
    %116 = vector.extract_strided_slice %115 {offsets = [19, 0], sizes = [16, 128], strides = [1, 1]} : vector<324x128xf32> to vector<16x128xf32>
    %117 = arith.truncf %116 : vector<16x128xf32> to vector<16x128xbf16>
    %c38_97 = arith.constant 38 : index
    %c0_98 = arith.constant 0 : index
    %118 = vector.load %arg6[%c38_97, %c0_98] : memref<362x128xbf16, #tpu.memory_space<vmem>>, vector<16x128xbf16>
    tpu.vector_store %arg6[%c38_97, %c0_98], %117 {strides = array<i32>} : memref<362x128xbf16, #tpu.memory_space<vmem>>, vector<16x128xbf16>,
    %119 = vector.extract_strided_slice %115 {offsets = [37, 0], sizes = [16, 128], strides = [1, 1]} : vector<324x128xf32> to vector<16x128xf32>
    %120 = arith.truncf %119 : vector<16x128xf32> to vector<16x128xbf16>
    %c56_99 = arith.constant 56 : index
    %c0_100 = arith.constant 0 : index
    %121 = vector.load %arg6[%c56_99, %c0_100] : memref<362x128xbf16, #tpu.memory_space<vmem>>, vector<16x128xbf16>
    tpu.vector_store %arg6[%c56_99, %c0_100], %120 {strides = array<i32>} : memref<362x128xbf16, #tpu.memory_space<vmem>>, vector<16x128xbf16>,
    %122 = vector.extract_strided_slice %115 {offsets = [55, 0], sizes = [16, 128], strides = [1, 1]} : vector<324x128xf32> to vector<16x128xf32>
    %123 = arith.truncf %122 : vector<16x128xf32> to vector<16x128xbf16>
    %c74_101 = arith.constant 74 : index
    %c0_102 = arith.constant 0 : index
    %124 = vector.load %arg6[%c74_101, %c0_102] : memref<362x128xbf16, #tpu.memory_space<vmem>>, vector<16x128xbf16>
    tpu.vector_store %arg6[%c74_101, %c0_102], %123 {strides = array<i32>} : memref<362x128xbf16, #tpu.memory_space<vmem>>, vector<16x128xbf16>,
    %125 = vector.extract_strided_slice %115 {offsets = [73, 0], sizes = [16, 128], strides = [1, 1]} : vector<324x128xf32> to vector<16x128xf32>
    %126 = arith.truncf %125 : vector<16x128xf32> to vector<16x128xbf16>
    %c92_103 = arith.constant 92 : index
    %c0_104 = arith.constant 0 : index
    %127 = vector.load %arg6[%c92_103, %c0_104] : memref<362x128xbf16, #tpu.memory_space<vmem>>, vector<16x128xbf16>
    tpu.vector_store %arg6[%c92_103, %c0_104], %126 {strides = array<i32>} : memref<362x128xbf16, #tpu.memory_space<vmem>>, vector<16x128xbf16>,
    %128 = vector.extract_strided_slice %115 {offsets = [91, 0], sizes = [16, 128], strides = [1, 1]} : vector<324x128xf32> to vector<16x128xf32>
    %129 = arith.truncf %128 : vector<16x128xf32> to vector<16x128xbf16>
    %c110_105 = arith.constant 110 : index
    %c0_106 = arith.constant 0 : index
    %130 = vector.load %arg6[%c110_105, %c0_106] : memref<362x128xbf16, #tpu.memory_space<vmem>>, vector<16x128xbf16>
    tpu.vector_store %arg6[%c110_105, %c0_106], %129 {strides = array<i32>} : memref<362x128xbf16, #tpu.memory_space<vmem>>, vector<16x128xbf16>,
    %131 = vector.extract_strided_slice %115 {offsets = [109, 0], sizes = [16, 128], strides = [1, 1]} : vector<324x128xf32> to vector<16x128xf32>
    %132 = arith.truncf %131 : vector<16x128xf32> to vector<16x128xbf16>
    %c128_107 = arith.constant 128 : index
    %c0_108 = arith.constant 0 : index
    %133 = vector.load %arg6[%c128_107, %c0_108] : memref<362x128xbf16, #tpu.memory_space<vmem>>, vector<16x128xbf16>
    tpu.vector_store %arg6[%c128_107, %c0_108], %132 {strides = array<i32>} : memref<362x128xbf16, #tpu.memory_space<vmem>>, vector<16x128xbf16>,
    %134 = vector.extract_strided_slice %115 {offsets = [127, 0], sizes = [16, 128], strides = [1, 1]} : vector<324x128xf32> to vector<16x128xf32>
    %135 = arith.truncf %134 : vector<16x128xf32> to vector<16x128xbf16>
    %c146_109 = arith.constant 146 : index
    %c0_110 = arith.constant 0 : index
    %136 = vector.load %arg6[%c146_109, %c0_110] : memref<362x128xbf16, #tpu.memory_space<vmem>>, vector<16x128xbf16>
    tpu.vector_store %arg6[%c146_109, %c0_110], %135 {strides = array<i32>} : memref<362x128xbf16, #tpu.memory_space<vmem>>, vector<16x128xbf16>,
    %137 = vector.extract_strided_slice %115 {offsets = [145, 0], sizes = [16, 128], strides = [1, 1]} : vector<324x128xf32> to vector<16x128xf32>
    %138 = arith.truncf %137 : vector<16x128xf32> to vector<16x128xbf16>
    %c164_111 = arith.constant 164 : index
    %c0_112 = arith.constant 0 : index
    %139 = vector.load %arg6[%c164_111, %c0_112] : memref<362x128xbf16, #tpu.memory_space<vmem>>, vector<16x128xbf16>
    tpu.vector_store %arg6[%c164_111, %c0_112], %138 {strides = array<i32>} : memref<362x128xbf16, #tpu.memory_space<vmem>>, vector<16x128xbf16>,
    %140 = vector.extract_strided_slice %115 {offsets = [163, 0], sizes = [16, 128], strides = [1, 1]} : vector<324x128xf32> to vector<16x128xf32>
    %141 = arith.truncf %140 : vector<16x128xf32> to vector<16x128xbf16>
    %c182_113 = arith.constant 182 : index
    %c0_114 = arith.constant 0 : index
    %142 = vector.load %arg6[%c182_113, %c0_114] : memref<362x128xbf16, #tpu.memory_space<vmem>>, vector<16x128xbf16>
    tpu.vector_store %arg6[%c182_113, %c0_114], %141 {strides = array<i32>} : memref<362x128xbf16, #tpu.memory_space<vmem>>, vector<16x128xbf16>,
    %143 = vector.extract_strided_slice %115 {offsets = [181, 0], sizes = [16, 128], strides = [1, 1]} : vector<324x128xf32> to vector<16x128xf32>
    %144 = arith.truncf %143 : vector<16x128xf32> to vector<16x128xbf16>
    %c200_115 = arith.constant 200 : index
    %c0_116 = arith.constant 0 : index
    %145 = vector.load %arg6[%c200_115, %c0_116] : memref<362x128xbf16, #tpu.memory_space<vmem>>, vector<16x128xbf16>
    tpu.vector_store %arg6[%c200_115, %c0_116], %144 {strides = array<i32>} : memref<362x128xbf16, #tpu.memory_space<vmem>>, vector<16x128xbf16>,
    %146 = vector.extract_strided_slice %115 {offsets = [199, 0], sizes = [16, 128], strides = [1, 1]} : vector<324x128xf32> to vector<16x128xf32>
    %147 = arith.truncf %146 : vector<16x128xf32> to vector<16x128xbf16>
    %c218_117 = arith.constant 218 : index
    %c0_118 = arith.constant 0 : index
    %148 = vector.load %arg6[%c218_117, %c0_118] : memref<362x128xbf16, #tpu.memory_space<vmem>>, vector<16x128xbf16>
    tpu.vector_store %arg6[%c218_117, %c0_118], %147 {strides = array<i32>} : memref<362x128xbf16, #tpu.memory_space<vmem>>, vector<16x128xbf16>,
    %149 = vector.extract_strided_slice %115 {offsets = [217, 0], sizes = [16, 128], strides = [1, 1]} : vector<324x128xf32> to vector<16x128xf32>
    %150 = arith.truncf %149 : vector<16x128xf32> to vector<16x128xbf16>
    %c236_119 = arith.constant 236 : index
    %c0_120 = arith.constant 0 : index
    %151 = vector.load %arg6[%c236_119, %c0_120] : memref<362x128xbf16, #tpu.memory_space<vmem>>, vector<16x128xbf16>
    tpu.vector_store %arg6[%c236_119, %c0_120], %150 {strides = array<i32>} : memref<362x128xbf16, #tpu.memory_space<vmem>>, vector<16x128xbf16>,
    %152 = vector.extract_strided_slice %115 {offsets = [235, 0], sizes = [16, 128], strides = [1, 1]} : vector<324x128xf32> to vector<16x128xf32>
    %153 = arith.truncf %152 : vector<16x128xf32> to vector<16x128xbf16>
    %c254_121 = arith.constant 254 : index
    %c0_122 = arith.constant 0 : index
    %154 = vector.load %arg6[%c254_121, %c0_122] : memref<362x128xbf16, #tpu.memory_space<vmem>>, vector<16x128xbf16>
    tpu.vector_store %arg6[%c254_121, %c0_122], %153 {strides = array<i32>} : memref<362x128xbf16, #tpu.memory_space<vmem>>, vector<16x128xbf16>,
    %155 = vector.extract_strided_slice %115 {offsets = [253, 0], sizes = [16, 128], strides = [1, 1]} : vector<324x128xf32> to vector<16x128xf32>
    %156 = arith.truncf %155 : vector<16x128xf32> to vector<16x128xbf16>
    %c272_123 = arith.constant 272 : index
    %c0_124 = arith.constant 0 : index
    %157 = vector.load %arg6[%c272_123, %c0_124] : memref<362x128xbf16, #tpu.memory_space<vmem>>, vector<16x128xbf16>
    tpu.vector_store %arg6[%c272_123, %c0_124], %156 {strides = array<i32>} : memref<362x128xbf16, #tpu.memory_space<vmem>>, vector<16x128xbf16>,
    %158 = vector.extract_strided_slice %115 {offsets = [271, 0], sizes = [16, 128], strides = [1, 1]} : vector<324x128xf32> to vector<16x128xf32>
    %159 = arith.truncf %158 : vector<16x128xf32> to vector<16x128xbf16>
    %c290_125 = arith.constant 290 : index
    %c0_126 = arith.constant 0 : index
    %160 = vector.load %arg6[%c290_125, %c0_126] : memref<362x128xbf16, #tpu.memory_space<vmem>>, vector<16x128xbf16>
    tpu.vector_store %arg6[%c290_125, %c0_126], %159 {strides = array<i32>} : memref<362x128xbf16, #tpu.memory_space<vmem>>, vector<16x128xbf16>,
    %161 = vector.extract_strided_slice %115 {offsets = [289, 0], sizes = [16, 128], strides = [1, 1]} : vector<324x128xf32> to vector<16x128xf32>
    %162 = arith.truncf %161 : vector<16x128xf32> to vector<16x128xbf16>
    %c308_127 = arith.constant 308 : index
    %c0_128 = arith.constant 0 : index
    %163 = vector.load %arg6[%c308_127, %c0_128] : memref<362x128xbf16, #tpu.memory_space<vmem>>, vector<16x128xbf16>
    tpu.vector_store %arg6[%c308_127, %c0_128], %162 {strides = array<i32>} : memref<362x128xbf16, #tpu.memory_space<vmem>>, vector<16x128xbf16>,
    %cst_129 = arith.constant 0.000000e+00 : f32
    %164 = vector.broadcast %cst_129 : f32 to vector<324x128xf32>
    %c0_130 = arith.constant 0 : index
    %c0_131 = arith.constant 0 : index
    %165 = vector.load %arg6[%c0_130, %c0_131] : memref<362x128xbf16, #tpu.memory_space<vmem>>, vector<324x128xbf16>
    %c0_132 = arith.constant 0 : index
    %c0_133 = arith.constant 0 : index
    %c0_134 = arith.constant 0 : index
    %166 = vector.load %arg3[%c0_132, %c0_133, %c0_134] : memref<9x128x128xbf16, #tpu.memory_space<vmem>>, vector<1x128x128xbf16>
    %167 = vector.shape_cast %166 : vector<1x128x128xbf16> to vector<128x128xbf16>
    %cst_135 = arith.constant dense<0.000000e+00> : vector<324x128xf32>
    %168 = tpu.matmul %165, %167, %cst_135 {dimension_numbers = #tpu.dot_dimension_numbers<[1], [0], [0], [1], [0, 0, 1, 1], [], []>} : vector<324x128xbf16>, vector<128x128xbf16>, vector<324x128xf32> -> vector<324x128xf32>
    %169 = arith.addf %164, %168 : vector<324x128xf32>
    %c1_136 = arith.constant 1 : index
    %c0_137 = arith.constant 0 : index
    %170 = vector.load %arg6[%c1_136, %c0_137] : memref<362x128xbf16, #tpu.memory_space<vmem>>, vector<324x128xbf16>
    %c1_138 = arith.constant 1 : index
    %c0_139 = arith.constant 0 : index
    %c0_140 = arith.constant 0 : index
    %171 = vector.load %arg3[%c1_138, %c0_139, %c0_140] : memref<9x128x128xbf16, #tpu.memory_space<vmem>>, vector<1x128x128xbf16>
    %172 = vector.shape_cast %171 : vector<1x128x128xbf16> to vector<128x128xbf16>
    %cst_141 = arith.constant dense<0.000000e+00> : vector<324x128xf32>
    %173 = tpu.matmul %170, %172, %cst_141 {dimension_numbers = #tpu.dot_dimension_numbers<[1], [0], [0], [1], [0, 0, 1, 1], [], []>} : vector<324x128xbf16>, vector<128x128xbf16>, vector<324x128xf32> -> vector<324x128xf32>
    %174 = arith.addf %169, %173 : vector<324x128xf32>
    %c2_142 = arith.constant 2 : index
    %c0_143 = arith.constant 0 : index
    %175 = vector.load %arg6[%c2_142, %c0_143] : memref<362x128xbf16, #tpu.memory_space<vmem>>, vector<324x128xbf16>
    %c2_144 = arith.constant 2 : index
    %c0_145 = arith.constant 0 : index
    %c0_146 = arith.constant 0 : index
    %176 = vector.load %arg3[%c2_144, %c0_145, %c0_146] : memref<9x128x128xbf16, #tpu.memory_space<vmem>>, vector<1x128x128xbf16>
    %177 = vector.shape_cast %176 : vector<1x128x128xbf16> to vector<128x128xbf16>
    %cst_147 = arith.constant dense<0.000000e+00> : vector<324x128xf32>
    %178 = tpu.matmul %175, %177, %cst_147 {dimension_numbers = #tpu.dot_dimension_numbers<[1], [0], [0], [1], [0, 0, 1, 1], [], []>} : vector<324x128xbf16>, vector<128x128xbf16>, vector<324x128xf32> -> vector<324x128xf32>
    %179 = arith.addf %174, %178 : vector<324x128xf32>
    %c18_148 = arith.constant 18 : index
    %c0_149 = arith.constant 0 : index
    %180 = vector.load %arg6[%c18_148, %c0_149] : memref<362x128xbf16, #tpu.memory_space<vmem>>, vector<324x128xbf16>
    %c3_150 = arith.constant 3 : index
    %c0_151 = arith.constant 0 : index
    %c0_152 = arith.constant 0 : index
    %181 = vector.load %arg3[%c3_150, %c0_151, %c0_152] : memref<9x128x128xbf16, #tpu.memory_space<vmem>>, vector<1x128x128xbf16>
    %182 = vector.shape_cast %181 : vector<1x128x128xbf16> to vector<128x128xbf16>
    %cst_153 = arith.constant dense<0.000000e+00> : vector<324x128xf32>
    %183 = tpu.matmul %180, %182, %cst_153 {dimension_numbers = #tpu.dot_dimension_numbers<[1], [0], [0], [1], [0, 0, 1, 1], [], []>} : vector<324x128xbf16>, vector<128x128xbf16>, vector<324x128xf32> -> vector<324x128xf32>
    %184 = arith.addf %179, %183 : vector<324x128xf32>
    %c19_154 = arith.constant 19 : index
    %c0_155 = arith.constant 0 : index
    %185 = vector.load %arg6[%c19_154, %c0_155] : memref<362x128xbf16, #tpu.memory_space<vmem>>, vector<324x128xbf16>
    %c4_156 = arith.constant 4 : index
    %c0_157 = arith.constant 0 : index
    %c0_158 = arith.constant 0 : index
    %186 = vector.load %arg3[%c4_156, %c0_157, %c0_158] : memref<9x128x128xbf16, #tpu.memory_space<vmem>>, vector<1x128x128xbf16>
    %187 = vector.shape_cast %186 : vector<1x128x128xbf16> to vector<128x128xbf16>
    %cst_159 = arith.constant dense<0.000000e+00> : vector<324x128xf32>
    %188 = tpu.matmul %185, %187, %cst_159 {dimension_numbers = #tpu.dot_dimension_numbers<[1], [0], [0], [1], [0, 0, 1, 1], [], []>} : vector<324x128xbf16>, vector<128x128xbf16>, vector<324x128xf32> -> vector<324x128xf32>
    %189 = arith.addf %184, %188 : vector<324x128xf32>
    %c20_160 = arith.constant 20 : index
    %c0_161 = arith.constant 0 : index
    %190 = vector.load %arg6[%c20_160, %c0_161] : memref<362x128xbf16, #tpu.memory_space<vmem>>, vector<324x128xbf16>
    %c5_162 = arith.constant 5 : index
    %c0_163 = arith.constant 0 : index
    %c0_164 = arith.constant 0 : index
    %191 = vector.load %arg3[%c5_162, %c0_163, %c0_164] : memref<9x128x128xbf16, #tpu.memory_space<vmem>>, vector<1x128x128xbf16>
    %192 = vector.shape_cast %191 : vector<1x128x128xbf16> to vector<128x128xbf16>
    %cst_165 = arith.constant dense<0.000000e+00> : vector<324x128xf32>
    %193 = tpu.matmul %190, %192, %cst_165 {dimension_numbers = #tpu.dot_dimension_numbers<[1], [0], [0], [1], [0, 0, 1, 1], [], []>} : vector<324x128xbf16>, vector<128x128xbf16>, vector<324x128xf32> -> vector<324x128xf32>
    %194 = arith.addf %189, %193 : vector<324x128xf32>
    %c36_166 = arith.constant 36 : index
    %c0_167 = arith.constant 0 : index
    %195 = vector.load %arg6[%c36_166, %c0_167] : memref<362x128xbf16, #tpu.memory_space<vmem>>, vector<324x128xbf16>
    %c6_168 = arith.constant 6 : index
    %c0_169 = arith.constant 0 : index
    %c0_170 = arith.constant 0 : index
    %196 = vector.load %arg3[%c6_168, %c0_169, %c0_170] : memref<9x128x128xbf16, #tpu.memory_space<vmem>>, vector<1x128x128xbf16>
    %197 = vector.shape_cast %196 : vector<1x128x128xbf16> to vector<128x128xbf16>
    %cst_171 = arith.constant dense<0.000000e+00> : vector<324x128xf32>
    %198 = tpu.matmul %195, %197, %cst_171 {dimension_numbers = #tpu.dot_dimension_numbers<[1], [0], [0], [1], [0, 0, 1, 1], [], []>} : vector<324x128xbf16>, vector<128x128xbf16>, vector<324x128xf32> -> vector<324x128xf32>
    %199 = arith.addf %194, %198 : vector<324x128xf32>
    %c37_172 = arith.constant 37 : index
    %c0_173 = arith.constant 0 : index
    %200 = vector.load %arg6[%c37_172, %c0_173] : memref<362x128xbf16, #tpu.memory_space<vmem>>, vector<324x128xbf16>
    %c7_174 = arith.constant 7 : index
    %c0_175 = arith.constant 0 : index
    %c0_176 = arith.constant 0 : index
    %201 = vector.load %arg3[%c7_174, %c0_175, %c0_176] : memref<9x128x128xbf16, #tpu.memory_space<vmem>>, vector<1x128x128xbf16>
    %202 = vector.shape_cast %201 : vector<1x128x128xbf16> to vector<128x128xbf16>
    %cst_177 = arith.constant dense<0.000000e+00> : vector<324x128xf32>
    %203 = tpu.matmul %200, %202, %cst_177 {dimension_numbers = #tpu.dot_dimension_numbers<[1], [0], [0], [1], [0, 0, 1, 1], [], []>} : vector<324x128xbf16>, vector<128x128xbf16>, vector<324x128xf32> -> vector<324x128xf32>
    %204 = arith.addf %199, %203 : vector<324x128xf32>
    %c38_178 = arith.constant 38 : index
    %c0_179 = arith.constant 0 : index
    %205 = vector.load %arg6[%c38_178, %c0_179] : memref<362x128xbf16, #tpu.memory_space<vmem>>, vector<324x128xbf16>
    %c8_180 = arith.constant 8 : index
    %c0_181 = arith.constant 0 : index
    %c0_182 = arith.constant 0 : index
    %206 = vector.load %arg3[%c8_180, %c0_181, %c0_182] : memref<9x128x128xbf16, #tpu.memory_space<vmem>>, vector<1x128x128xbf16>
    %207 = vector.shape_cast %206 : vector<1x128x128xbf16> to vector<128x128xbf16>
    %cst_183 = arith.constant dense<0.000000e+00> : vector<324x128xf32>
    %208 = tpu.matmul %205, %207, %cst_183 {dimension_numbers = #tpu.dot_dimension_numbers<[1], [0], [0], [1], [0, 0, 1, 1], [], []>} : vector<324x128xbf16>, vector<128x128xbf16>, vector<324x128xf32> -> vector<324x128xf32>
    %209 = arith.addf %204, %208 : vector<324x128xf32>
    %cst_184 = arith.constant 0.000000e+00 : f32
    %210 = vector.broadcast %cst_184 : f32 to vector<324x128xf32>
    %211 = arith.maximumf %209, %210 : vector<324x128xf32>
    %212 = vector.extract_strided_slice %211 {offsets = [19, 0], sizes = [16, 4], strides = [1, 1]} : vector<324x128xf32> to vector<16x4xf32>
    %213 = arith.truncf %212 : vector<16x4xf32> to vector<16x4xbf16>
    %c0_185 = arith.constant 0 : index
    %c0_186 = arith.constant 0 : index
    %c0_187 = arith.constant 0 : index
    %214 = vector.load %arg4[%c0_185, %c0_186, %c0_187] : memref<1x256x4xbf16, #tpu.memory_space<vmem>>, vector<1x16x4xbf16>
    %215 = vector.shape_cast %214 : vector<1x16x4xbf16> to vector<16x4xbf16>
    %216 = vector.shape_cast %213 : vector<16x4xbf16> to vector<1x16x4xbf16>
    tpu.vector_store %arg4[%c0_185, %c0_186, %c0_187], %216 {strides = array<i32>} : memref<1x256x4xbf16, #tpu.memory_space<vmem>>, vector<1x16x4xbf16>,
    %217 = vector.extract_strided_slice %211 {offsets = [37, 0], sizes = [16, 4], strides = [1, 1]} : vector<324x128xf32> to vector<16x4xf32>
    %218 = arith.truncf %217 : vector<16x4xf32> to vector<16x4xbf16>
    %c0_188 = arith.constant 0 : index
    %c16_189 = arith.constant 16 : index
    %c0_190 = arith.constant 0 : index
    %219 = vector.load %arg4[%c0_188, %c16_189, %c0_190] : memref<1x256x4xbf16, #tpu.memory_space<vmem>>, vector<1x16x4xbf16>
    %220 = vector.shape_cast %219 : vector<1x16x4xbf16> to vector<16x4xbf16>
    %221 = vector.shape_cast %218 : vector<16x4xbf16> to vector<1x16x4xbf16>
    tpu.vector_store %arg4[%c0_188, %c16_189, %c0_190], %221 {strides = array<i32>} : memref<1x256x4xbf16, #tpu.memory_space<vmem>>, vector<1x16x4xbf16>,
    %222 = vector.extract_strided_slice %211 {offsets = [55, 0], sizes = [16, 4], strides = [1, 1]} : vector<324x128xf32> to vector<16x4xf32>
    %223 = arith.truncf %222 : vector<16x4xf32> to vector<16x4xbf16>
    %c0_191 = arith.constant 0 : index
    %c32_192 = arith.constant 32 : index
    %c0_193 = arith.constant 0 : index
    %224 = vector.load %arg4[%c0_191, %c32_192, %c0_193] : memref<1x256x4xbf16, #tpu.memory_space<vmem>>, vector<1x16x4xbf16>
    %225 = vector.shape_cast %224 : vector<1x16x4xbf16> to vector<16x4xbf16>
    %226 = vector.shape_cast %223 : vector<16x4xbf16> to vector<1x16x4xbf16>
    tpu.vector_store %arg4[%c0_191, %c32_192, %c0_193], %226 {strides = array<i32>} : memref<1x256x4xbf16, #tpu.memory_space<vmem>>, vector<1x16x4xbf16>,
    %227 = vector.extract_strided_slice %211 {offsets = [73, 0], sizes = [16, 4], strides = [1, 1]} : vector<324x128xf32> to vector<16x4xf32>
    %228 = arith.truncf %227 : vector<16x4xf32> to vector<16x4xbf16>
    %c0_194 = arith.constant 0 : index
    %c48_195 = arith.constant 48 : index
    %c0_196 = arith.constant 0 : index
    %229 = vector.load %arg4[%c0_194, %c48_195, %c0_196] : memref<1x256x4xbf16, #tpu.memory_space<vmem>>, vector<1x16x4xbf16>
    %230 = vector.shape_cast %229 : vector<1x16x4xbf16> to vector<16x4xbf16>
    %231 = vector.shape_cast %228 : vector<16x4xbf16> to vector<1x16x4xbf16>
    tpu.vector_store %arg4[%c0_194, %c48_195, %c0_196], %231 {strides = array<i32>} : memref<1x256x4xbf16, #tpu.memory_space<vmem>>, vector<1x16x4xbf16>,
    %232 = vector.extract_strided_slice %211 {offsets = [91, 0], sizes = [16, 4], strides = [1, 1]} : vector<324x128xf32> to vector<16x4xf32>
    %233 = arith.truncf %232 : vector<16x4xf32> to vector<16x4xbf16>
    %c0_197 = arith.constant 0 : index
    %c64_198 = arith.constant 64 : index
    %c0_199 = arith.constant 0 : index
    %234 = vector.load %arg4[%c0_197, %c64_198, %c0_199] : memref<1x256x4xbf16, #tpu.memory_space<vmem>>, vector<1x16x4xbf16>
    %235 = vector.shape_cast %234 : vector<1x16x4xbf16> to vector<16x4xbf16>
    %236 = vector.shape_cast %233 : vector<16x4xbf16> to vector<1x16x4xbf16>
    tpu.vector_store %arg4[%c0_197, %c64_198, %c0_199], %236 {strides = array<i32>} : memref<1x256x4xbf16, #tpu.memory_space<vmem>>, vector<1x16x4xbf16>,
    %237 = vector.extract_strided_slice %211 {offsets = [109, 0], sizes = [16, 4], strides = [1, 1]} : vector<324x128xf32> to vector<16x4xf32>
    %238 = arith.truncf %237 : vector<16x4xf32> to vector<16x4xbf16>
    %c0_200 = arith.constant 0 : index
    %c80_201 = arith.constant 80 : index
    %c0_202 = arith.constant 0 : index
    %239 = vector.load %arg4[%c0_200, %c80_201, %c0_202] : memref<1x256x4xbf16, #tpu.memory_space<vmem>>, vector<1x16x4xbf16>
    %240 = vector.shape_cast %239 : vector<1x16x4xbf16> to vector<16x4xbf16>
    %241 = vector.shape_cast %238 : vector<16x4xbf16> to vector<1x16x4xbf16>
    tpu.vector_store %arg4[%c0_200, %c80_201, %c0_202], %241 {strides = array<i32>} : memref<1x256x4xbf16, #tpu.memory_space<vmem>>, vector<1x16x4xbf16>,
    %242 = vector.extract_strided_slice %211 {offsets = [127, 0], sizes = [16, 4], strides = [1, 1]} : vector<324x128xf32> to vector<16x4xf32>
    %243 = arith.truncf %242 : vector<16x4xf32> to vector<16x4xbf16>
    %c0_203 = arith.constant 0 : index
    %c96_204 = arith.constant 96 : index
    %c0_205 = arith.constant 0 : index
    %244 = vector.load %arg4[%c0_203, %c96_204, %c0_205] : memref<1x256x4xbf16, #tpu.memory_space<vmem>>, vector<1x16x4xbf16>
    %245 = vector.shape_cast %244 : vector<1x16x4xbf16> to vector<16x4xbf16>
    %246 = vector.shape_cast %243 : vector<16x4xbf16> to vector<1x16x4xbf16>
    tpu.vector_store %arg4[%c0_203, %c96_204, %c0_205], %246 {strides = array<i32>} : memref<1x256x4xbf16, #tpu.memory_space<vmem>>, vector<1x16x4xbf16>,
    %247 = vector.extract_strided_slice %211 {offsets = [145, 0], sizes = [16, 4], strides = [1, 1]} : vector<324x128xf32> to vector<16x4xf32>
    %248 = arith.truncf %247 : vector<16x4xf32> to vector<16x4xbf16>
    %c0_206 = arith.constant 0 : index
    %c112_207 = arith.constant 112 : index
    %c0_208 = arith.constant 0 : index
    %249 = vector.load %arg4[%c0_206, %c112_207, %c0_208] : memref<1x256x4xbf16, #tpu.memory_space<vmem>>, vector<1x16x4xbf16>
    %250 = vector.shape_cast %249 : vector<1x16x4xbf16> to vector<16x4xbf16>
    %251 = vector.shape_cast %248 : vector<16x4xbf16> to vector<1x16x4xbf16>
    tpu.vector_store %arg4[%c0_206, %c112_207, %c0_208], %251 {strides = array<i32>} : memref<1x256x4xbf16, #tpu.memory_space<vmem>>, vector<1x16x4xbf16>,
    %252 = vector.extract_strided_slice %211 {offsets = [163, 0], sizes = [16, 4], strides = [1, 1]} : vector<324x128xf32> to vector<16x4xf32>
    %253 = arith.truncf %252 : vector<16x4xf32> to vector<16x4xbf16>
    %c0_209 = arith.constant 0 : index
    %c128_210 = arith.constant 128 : index
    %c0_211 = arith.constant 0 : index
    %254 = vector.load %arg4[%c0_209, %c128_210, %c0_211] : memref<1x256x4xbf16, #tpu.memory_space<vmem>>, vector<1x16x4xbf16>
    %255 = vector.shape_cast %254 : vector<1x16x4xbf16> to vector<16x4xbf16>
    %256 = vector.shape_cast %253 : vector<16x4xbf16> to vector<1x16x4xbf16>
    tpu.vector_store %arg4[%c0_209, %c128_210, %c0_211], %256 {strides = array<i32>} : memref<1x256x4xbf16, #tpu.memory_space<vmem>>, vector<1x16x4xbf16>,
    %257 = vector.extract_strided_slice %211 {offsets = [181, 0], sizes = [16, 4], strides = [1, 1]} : vector<324x128xf32> to vector<16x4xf32>
    %258 = arith.truncf %257 : vector<16x4xf32> to vector<16x4xbf16>
    %c0_212 = arith.constant 0 : index
    %c144_213 = arith.constant 144 : index
    %c0_214 = arith.constant 0 : index
    %259 = vector.load %arg4[%c0_212, %c144_213, %c0_214] : memref<1x256x4xbf16, #tpu.memory_space<vmem>>, vector<1x16x4xbf16>
    %260 = vector.shape_cast %259 : vector<1x16x4xbf16> to vector<16x4xbf16>
    %261 = vector.shape_cast %258 : vector<16x4xbf16> to vector<1x16x4xbf16>
    tpu.vector_store %arg4[%c0_212, %c144_213, %c0_214], %261 {strides = array<i32>} : memref<1x256x4xbf16, #tpu.memory_space<vmem>>, vector<1x16x4xbf16>,
    %262 = vector.extract_strided_slice %211 {offsets = [199, 0], sizes = [16, 4], strides = [1, 1]} : vector<324x128xf32> to vector<16x4xf32>
    %263 = arith.truncf %262 : vector<16x4xf32> to vector<16x4xbf16>
    %c0_215 = arith.constant 0 : index
    %c160_216 = arith.constant 160 : index
    %c0_217 = arith.constant 0 : index
    %264 = vector.load %arg4[%c0_215, %c160_216, %c0_217] : memref<1x256x4xbf16, #tpu.memory_space<vmem>>, vector<1x16x4xbf16>
    %265 = vector.shape_cast %264 : vector<1x16x4xbf16> to vector<16x4xbf16>
    %266 = vector.shape_cast %263 : vector<16x4xbf16> to vector<1x16x4xbf16>
    tpu.vector_store %arg4[%c0_215, %c160_216, %c0_217], %266 {strides = array<i32>} : memref<1x256x4xbf16, #tpu.memory_space<vmem>>, vector<1x16x4xbf16>,
    %267 = vector.extract_strided_slice %211 {offsets = [217, 0], sizes = [16, 4], strides = [1, 1]} : vector<324x128xf32> to vector<16x4xf32>
    %268 = arith.truncf %267 : vector<16x4xf32> to vector<16x4xbf16>
    %c0_218 = arith.constant 0 : index
    %c176_219 = arith.constant 176 : index
    %c0_220 = arith.constant 0 : index
    %269 = vector.load %arg4[%c0_218, %c176_219, %c0_220] : memref<1x256x4xbf16, #tpu.memory_space<vmem>>, vector<1x16x4xbf16>
    %270 = vector.shape_cast %269 : vector<1x16x4xbf16> to vector<16x4xbf16>
    %271 = vector.shape_cast %268 : vector<16x4xbf16> to vector<1x16x4xbf16>
    tpu.vector_store %arg4[%c0_218, %c176_219, %c0_220], %271 {strides = array<i32>} : memref<1x256x4xbf16, #tpu.memory_space<vmem>>, vector<1x16x4xbf16>,
    %272 = vector.extract_strided_slice %211 {offsets = [235, 0], sizes = [16, 4], strides = [1, 1]} : vector<324x128xf32> to vector<16x4xf32>
    %273 = arith.truncf %272 : vector<16x4xf32> to vector<16x4xbf16>
    %c0_221 = arith.constant 0 : index
    %c192_222 = arith.constant 192 : index
    %c0_223 = arith.constant 0 : index
    %274 = vector.load %arg4[%c0_221, %c192_222, %c0_223] : memref<1x256x4xbf16, #tpu.memory_space<vmem>>, vector<1x16x4xbf16>
    %275 = vector.shape_cast %274 : vector<1x16x4xbf16> to vector<16x4xbf16>
    %276 = vector.shape_cast %273 : vector<16x4xbf16> to vector<1x16x4xbf16>
    tpu.vector_store %arg4[%c0_221, %c192_222, %c0_223], %276 {strides = array<i32>} : memref<1x256x4xbf16, #tpu.memory_space<vmem>>, vector<1x16x4xbf16>,
    %277 = vector.extract_strided_slice %211 {offsets = [253, 0], sizes = [16, 4], strides = [1, 1]} : vector<324x128xf32> to vector<16x4xf32>
    %278 = arith.truncf %277 : vector<16x4xf32> to vector<16x4xbf16>
    %c0_224 = arith.constant 0 : index
    %c208_225 = arith.constant 208 : index
    %c0_226 = arith.constant 0 : index
    %279 = vector.load %arg4[%c0_224, %c208_225, %c0_226] : memref<1x256x4xbf16, #tpu.memory_space<vmem>>, vector<1x16x4xbf16>
    %280 = vector.shape_cast %279 : vector<1x16x4xbf16> to vector<16x4xbf16>
    %281 = vector.shape_cast %278 : vector<16x4xbf16> to vector<1x16x4xbf16>
    tpu.vector_store %arg4[%c0_224, %c208_225, %c0_226], %281 {strides = array<i32>} : memref<1x256x4xbf16, #tpu.memory_space<vmem>>, vector<1x16x4xbf16>,
    %282 = vector.extract_strided_slice %211 {offsets = [271, 0], sizes = [16, 4], strides = [1, 1]} : vector<324x128xf32> to vector<16x4xf32>
    %283 = arith.truncf %282 : vector<16x4xf32> to vector<16x4xbf16>
    %c0_227 = arith.constant 0 : index
    %c224_228 = arith.constant 224 : index
    %c0_229 = arith.constant 0 : index
    %284 = vector.load %arg4[%c0_227, %c224_228, %c0_229] : memref<1x256x4xbf16, #tpu.memory_space<vmem>>, vector<1x16x4xbf16>
    %285 = vector.shape_cast %284 : vector<1x16x4xbf16> to vector<16x4xbf16>
    %286 = vector.shape_cast %283 : vector<16x4xbf16> to vector<1x16x4xbf16>
    tpu.vector_store %arg4[%c0_227, %c224_228, %c0_229], %286 {strides = array<i32>} : memref<1x256x4xbf16, #tpu.memory_space<vmem>>, vector<1x16x4xbf16>,
    %287 = vector.extract_strided_slice %211 {offsets = [289, 0], sizes = [16, 4], strides = [1, 1]} : vector<324x128xf32> to vector<16x4xf32>
    %288 = arith.truncf %287 : vector<16x4xf32> to vector<16x4xbf16>
    %c0_230 = arith.constant 0 : index
    %c240_231 = arith.constant 240 : index
    %c0_232 = arith.constant 0 : index
    %289 = vector.load %arg4[%c0_230, %c240_231, %c0_232] : memref<1x256x4xbf16, #tpu.memory_space<vmem>>, vector<1x16x4xbf16>
    %290 = vector.shape_cast %289 : vector<1x16x4xbf16> to vector<16x4xbf16>
    %291 = vector.shape_cast %288 : vector<16x4xbf16> to vector<1x16x4xbf16>
    tpu.vector_store %arg4[%c0_230, %c240_231, %c0_232], %291 {strides = array<i32>} : memref<1x256x4xbf16, #tpu.memory_space<vmem>>, vector<1x16x4xbf16>,
    return
  }
  func.func @transform_0(%arg0: i32) -> (i32, i32, i32) {
    %c0_i32 = arith.constant 0 : i32
    %c0_i32_0 = arith.constant 0 : i32
    %c0_i32_1 = arith.constant 0 : i32
    return %arg0, %c0_i32, %c0_i32_0 : i32, i32, i32
  }
  func.func @transform_1(%arg0: i32) -> (i32, i32, i32) {
    %c0_i32 = arith.constant 0 : i32
    %c0_i32_0 = arith.constant 0 : i32
    %c0_i32_1 = arith.constant 0 : i32
    %c0_i32_2 = arith.constant 0 : i32
    return %c0_i32, %c0_i32_0, %c0_i32_1 : i32, i32, i32
  }
  func.func @transform_2(%arg0: i32) -> (i32, i32, i32) {
    %c0_i32 = arith.constant 0 : i32
    %c0_i32_0 = arith.constant 0 : i32
    %c0_i32_1 = arith.constant 0 : i32
    %c0_i32_2 = arith.constant 0 : i32
    return %c0_i32, %c0_i32_0, %c0_i32_1 : i32, i32, i32
  }
  func.func @transform_3(%arg0: i32) -> (i32, i32, i32) {
    %c0_i32 = arith.constant 0 : i32
    %c0_i32_0 = arith.constant 0 : i32
    %c0_i32_1 = arith.constant 0 : i32
    return %arg0, %c0_i32, %c0_i32_0 : i32, i32, i32
  }
}

</mosaic_0001>

<bundles_post_ra>
// kernel: tpu_custom_call.1
= control target key start
LH: loop header
LB: loop body
LE: loop exit
PB: predicated region body
PF: predicated region fallthrough
CT: control target
= control target key end

     0   :  { %8 = vsyncpa [#allocation5], 0  ;;  %s17525_s0 = inlined_call_operand.vmem [shape: f32[2,256,4], index: 0, kind: input, shape index: {}]   ;;  %s17526_s1 = inlined_call_operand.hbm [shape: bf16[9,128,128], index: 1, kind: input, shape index: {}]   ;;  %s17527_s2 = inlined_call_operand.hbm [shape: bf16[9,128,128], index: 2, kind: input, shape index: {}]   ;;  %s17528_s3 = inlined_call_operand.vmem [shape: bf16[2,256,4], index: 3, kind: output, shape index: {}]  }
   0x1   :  { %9 = vsyncpa [#allocation7], 0  ;;  %s14992_s12 = smov 0  }
   0x2 LB: > { %s14998_s13 = sadd.s32 4294967295, %s14963_s12   ;;  %p10343_p0 = scmp.ge.s32.totalorder %s14963_s12, 1  ;;  %s14963_s12 = sphi %s14992_s12, %s15_s12  }
   0x3   : > { %p114_p1 = scmp.lt.s32.totalorder %s14963_s12, 3  ;;  %s14965_s14 = smov [#allocation4]  }
   0x4   : > { %s126_s15 = sshll.u32 %s14965_s14, 4  ;;  %p17529_p3 = scmp.eq.s32.totalorder %s14998_s13, 0  ;;  %s127_s15 = int_to_ptr.vmem [resolvable:$true] %s126_s15 }
   0x5   : > { %p15002_p2 = pnand %p10343_p0, %p114_p1  ;;  %s14966_s17 = smov [#allocation6]  }
   0x6   : > { %s139_s18 = sshll.u32 %s14966_s17, 4  ;;  %s14893_s22 = scalar_lea.hbm %s17526_s1, 9216  ;;  %s15015_s18 = int_to_ptr.vmem [resolvable:$true] %s139_s18 }
   0x7   : > { %s17541_s16 = scalar_select %p15002_p2, 1, 0 }
   0x8   : > { %p14490_p4 = pneg %p15002_p2  ;;  %p14894_p6 = scmp.ne.s32.totalorder %s17526_s1, %s14893_s22 }
   0x9   : > { %p14900_p10 = scmp.lt.u32.totalorder %s14893_s22, %s17526_s1 }
   0xa   : > { %p15011_p5 = pnand %p17529_p3, %p14490_p4 }
   0xc   : > { %p14895_p7 = pneg %p15011_p5 }
   0xe   : > { %p14896_p8 = pnand %p14895_p7, %p14894_p6 }
  0x10   : > { %p14897_p9 = pneg %p14896_p8 }
  0x12   : > { %p14902_p11 = pnand %p14900_p10, %p14897_p9 }
  0x14   : > { %14905 = shalt.err (!%p14902_p11)
}
  0x15   : > { %s14906_s27 = scalar_lea.vmem %s127_s15, 9216  ;;  %p14914_p1 = scmp.lt.s32.totalorder %s127_s15, %s127_s15 }
  0x16   : > { %p14907_p12 = scmp.ne.s32.totalorder %s127_s15, %s14906_s27  ;;  %p14915_p4 = scmp.lt.s32.totalorder %s14906_s27, %s14906_s27 }
  0x18   : > { %p14909_p13 = pnand %p14907_p12, %p14895_p7  ;;  %p14916_p3 = por %p14915_p4, %p14914_p1 }
  0x1a   : > { %p14910_p0 = pneg %p14909_p13 }
  0x1c   : > { %p14917_p2 = pnand %p14916_p3, %p14910_p0 }
  0x1e   : > { %14920 = shalt.err (!%p14917_p2)
}
  0x1f   : > { %s14967_s28 = smov 64   ;;  %s14968_s29 = smov 4  }
  0x20   : > { %14493 = dma.hbm_to_vmem [thread:$0]  (!%p15011_p5), %s17526_s1, 9216, %s127_s15, [#allocation5], %s14967_s28, %s14967_s28, %s14968_s29  }
  0x21   : > { %s14921_s7 = scalar_lea.hbm %s17527_s2, 9216 }
  0x22   : > { %p14922_p6 = scmp.ne.s32.totalorder %s17527_s2, %s14921_s7  ;;  %p14928_p8 = scmp.lt.u32.totalorder %s14921_s7, %s17527_s2 }
  0x24   : > { %p14924_p2 = pnand %p14922_p6, %p14895_p7 }
  0x26   : > { %p14925_p3 = pneg %p14924_p2 }
  0x28   : > { %p14930_p9 = pnand %p14928_p8, %p14925_p3 }
  0x2a   : > { %14933 = shalt.err (!%p14930_p9)
}
  0x2b   : > { %s14934_s14 = scalar_lea.vmem %s15015_s18, 9216  ;;  %p14942_p13 = scmp.lt.s32.totalorder %s15015_s18, %s15015_s18 }
  0x2c   : > { %p14935_p10 = scmp.ne.s32.totalorder %s15015_s18, %s14934_s14  ;;  %p14943_p0 = scmp.lt.s32.totalorder %s14934_s14, %s14934_s14 }
  0x2e   : > { %p14937_p11 = pnand %p14935_p10, %p14895_p7  ;;  %p14944_p1 = por %p14943_p0, %p14942_p13 }
  0x30   : > { %p14938_p12 = pneg %p14937_p11 }
  0x32   : > { %p14945_p4 = pnand %p14944_p1, %p14938_p12 }
  0x34   : > { %14948 = shalt.err (!%p14945_p4)
}
  0x35   : > { %14496 = dma.hbm_to_vmem [thread:$0]  (!%p15011_p5), %s17527_s2, 9216, %s15015_s18, [#allocation7], %s14967_s28, %s14967_s28, %s14968_s29  }
  0x36   : > { %p17543_p6 = scmp.ne.s32.totalorder %s17541_s16, 0 }
  0x38   : > { %163 = sbr.rel (%p17543_p6) target bundleno = 3427 (0xd63), region = 32 }
  0x3f   : > { %p17544_p2 = scmp.eq.s32.totalorder %s14998_s13, 0 }
  0x41   : > { %14954 = dma.done.wait (%p17544_p2), [#allocation5], 9216   ;;  %p17545_p7 = pmov %p17544_p2 }
  0x42   : > { %p17546_p3 = pmov %p17544_p2 }
  0x43   : > { %14956 = vsyncadd (%p17545_p7), [#allocation5], 4294958080 }
  0x44   : > { %14958 = dma.done.wait (%p17546_p3), [#allocation7], 9216   ;;  %p17547_p8 = pmov %p17544_p2 }
  0x45   : > { %v17537_v0 = vmov 0.0   ;;  %vm14970_vm0 = vmmov 0   ;;  %v14971_v1 = vmov 0   ;;  %p191_p5 = scmp.lt.s32.totalorder %s14998_s13, 1  ;;  %v14516_v2 = vld [vmem:[#allocation4 + $0x40] sm:$0xff]   ;;  %v14517_v3 = vld [vmem:[#allocation4 + $0x48] sm:$0xff]  }
  0x46   : > { %14960 = vsyncadd (%p17547_p8), [#allocation7], 4294958080  ;;  %11466 = vmatprep.subr.bf16.mxu0 %v17537_v0  ;;  %11482 = vmatprep.mubr.msk.bf16.mxu0 %vm14970_vm0, %v17537_v0  ;;  %202 = vst [vmem:[#allocation2] sm:$0xf] %v14971_v1  ;;  %vm302_vm1 = vcmask 1042432   ;;  %v14518_v4 = vld [vmem:[#allocation4 + $0x50] sm:$0xff]  }
  0x47   : > { %203 = vst [vmem:[#allocation2 + $0x4] sm:$0xf] %v14971_v1  ;;  %204 = vst [vmem:[#allocation2 + $0x8] sm:$0xf] %v14971_v1  ;;  %12366 = vmatprep.subr.bf16.mxu1 %v17537_v0  ;;  %12382 = vmatprep.mubr.msk.bf16.mxu1 %vm14970_vm0, %v17537_v0  ;;  %s17598_s13 = smov (!%p191_p5, %s14998_s13), 1  ;;  %vm303_vm2 = vcmask 1046532  }
  0x48   : > { %205 = vst [vmem:[#allocation2 + $0xc] sm:$0xf] %v14971_v1  ;;  %206 = vst [vmem:[#allocation2 + $0x10] sm:$0xf] %v14971_v1  ;;  %11467 = vmatpush3.bf16.msra.mxu0 %v14516_v2  ;;  %s10814_s16 = sshll.u32 %s17598_s13, 8  ;;  %vm313_vm3 = vcmask 27651  }
  0x49   : > { %207 = vst [vmem:[#allocation2 + $0x14] sm:$0xf] %v14971_v1  ;;  %208 = vst [vmem:[#allocation2 + $0x18] sm:$0xf] %v14971_v1  ;;  %11468 = vmatprep.subr.bf16.mxu0 %v17537_v0  ;;  %s15182_s20 = scalar_lea.vmem %s17525_s0, %s10814_s16  ;;  %vm315_vm4 = vcmask 27648   ;;  %vm317_vm6 = vcmask 26624  }
  0x4a   : > { %209 = vst [vmem:[#allocation2 + $0x1c] sm:$0xf] %v14971_v1  ;;  %210 = vst [vmem:[#allocation2 + $0x20] sm:$0xf] %v14971_v1  ;;  %vm350_vm7 = vcmask 27649   ;;  %v14519_v9 = vld [vmem:[#allocation4 + $0x58] sm:$0xff]  }
  0x4b   : > { %211 = vst [vmem:[#allocation2 + $0x24] sm:$0xf] %v14971_v1  ;;  %212 = vst [vmem:[#allocation2 + $0x28] sm:$0xf] %v14971_v1  ;;  %v294_v10 = vld [vmem:[%s15182_s20] sm:$0xff]  ;;  %vm339_vm8 = vcmask 1040384  }
  0x4c   : > { %213 = vst [vmem:[#allocation2 + $0x2c] sm:$0xf] %v14971_v1  ;;  %214 = vst [vmem:[#allocation2 + $0x30] sm:$0xf] %v14971_v1  ;;  %11469 = vmatpush3.bf16.msra.mxu0 %v14517_v3  ;;  %vm340_vm9 = vcmask 1044484   ;;  %v295_v12 = vld [vmem:[%s15182_s20 + $0x8] sm:$0xff]  ;;  %v10816_v13 = vpack.c.bf16 %v294_v10, %v294_v10 }
  0x4d   : > { %215 = vst [vmem:[#allocation2 + $0x34] sm:$0xf] %v14971_v1  ;;  %216 = vst [vmem:[#allocation2 + $0x38] sm:$0xf] %v14971_v1  ;;  %11470 = vmatprep.subr.bf16.mxu0 %v17537_v0  ;;  %v586_v5 = vld [vmem:[#allocation2] sm:$0xf]  ;;  %v10817_v16 = vpack.c.bf16 %v295_v12, %v295_v12 }
  0x4e   : > { %217 = vst [vmem:[#allocation2 + $0x3c] sm:$0xf] %v14971_v1  ;;  %218 = vst [vmem:[#allocation2 + $0x40] sm:$0xf] %v14971_v1  ;;  %v587_v6 = vld [vmem:[#allocation2 + $0x4] sm:$0xf] }
  0x4f   : > { %219 = vst [vmem:[#allocation2 + $0x44] sm:$0xf] %v14971_v1  ;;  %220 = vst [vmem:[#allocation2 + $0x48] sm:$0xf] %v14971_v1  ;;  %v15184_v7 = vcombine.low %v586_v5, %v587_v6  ;;  %v15192_v11 = vld [vmem:[#allocation2 + $0x8] sm:$0xff]   ;;  %v319_v14 = vld [vmem:[%s15182_s20 + $0x10] sm:$0xff] }
  0x50   : > { %221 = vst [vmem:[#allocation2 + $0x4c] sm:$0xf] %v14971_v1  ;;  %222 = vst [vmem:[#allocation2 + $0x50] sm:$0xf] %v14971_v1  ;;  %11471 = vmatpush3.bf16.msra.mxu0 %v14518_v4  ;;  %vm353_vm10 = vcmask 24576   ;;  %vm374_vm11 = vcmask 27650   ;;  %v10818_v17 = vpack.c.bf16 %v319_v14, %v319_v14 }
  0x51   : > { %223 = vst [vmem:[#allocation2 + $0x54] sm:$0xf] %v14971_v1  ;;  %224 = vst [vmem:[#allocation2 + $0x58] sm:$0xf] %v14971_v1  ;;  %11472 = vmatprep.subr.bf16.mxu0 %v17537_v0  ;;  %vm363_vm12 = vcmask 1041408   ;;  %v14520_v15 = vld [vmem:[#allocation4 + $0x60] sm:$0xff]  }
  0x52   : > { %225 = vst [vmem:[#allocation2 + $0x5c] sm:$0xf] %v14971_v1  ;;  %226 = vst [vmem:[#allocation2 + $0x60] sm:$0xf] %v14971_v1  ;;  %v320_v18 = vld [vmem:[%s15182_s20 + $0x18] sm:$0xff]  ;;  %vm364_vm13 = vcmask 1045508  }
  0x53   : > { %227 = vst [vmem:[#allocation2 + $0x64] sm:$0xf] %v14971_v1  ;;  %228 = vst [vmem:[#allocation2 + $0x68] sm:$0xf] %v14971_v1  ;;  %v768_v19 = vshll.u32 %v15184_v7, 16  ;;  %v305_v20 = vrot.slane %v10816_v13, 5  ;;  %v10819_v21 = vpack.c.bf16 %v320_v18, %v320_v18 }
  0x54   : > { %229 = vst [vmem:[#allocation2 + $0x6c] sm:$0xf] %v14971_v1  ;;  %230 = vst [vmem:[#allocation2 + $0x70] sm:$0xf] %v14971_v1  ;;  %v331_v22 = vld [vmem:[%s15182_s20 + $0x20] sm:$0xff]  ;;  %v332_v23 = vld [vmem:[%s15182_s20 + $0x28] sm:$0xff]  ;;  %11473 = vmatpush3.bf16.msra.mxu0 %v14519_v9 }
  0x55   : > { %231 = vst [vmem:[#allocation2 + $0x74] sm:$0xf] %v14971_v1  ;;  %232 = vst [vmem:[#allocation2 + $0x78] sm:$0xf] %v14971_v1  ;;  %v355_v24 = vld [vmem:[%s15182_s20 + $0x30] sm:$0xff]  ;;  %vm377_vm14 = vcmask 25600   ;;  %v10820_v26 = vpack.c.bf16 %v331_v22, %v331_v22  ;;  %v10821_v27 = vpack.c.bf16 %v332_v23, %v332_v23  ;;  %11474 = vmatprep.subr.bf16.mxu0 %v17537_v0 }
  0x56   : > { %233 = vst [vmem:[#allocation2 + $0x7c] sm:$0xf] %v14971_v1  ;;  %234 = vst [vmem:[#allocation2 + $0x80] sm:$0xf] %v14971_v1  ;;  %v307_v25 = vrot.slane %v10817_v16, 5  ;;  %v10822_v28 = vpack.c.bf16 %v355_v24, %v355_v24  ;;  %v356_v29 = vld [vmem:[%s15182_s20 + $0x38] sm:$0xff] }
  0x57   : > { %235 = vst [vmem:[#allocation2 + $0x84] sm:$0xf] %v14971_v1  ;;  %236 = vst [vmem:[#allocation2 + $0x88] sm:$0xf] %v14971_v1  ;;  %v379_v30 = vld [vmem:[%s15182_s20 + $0x40] sm:$0xff]  ;;  %v766_v31 = vshrl.u32 %v15184_v7, 16  ;;  %v10823_v35 = vpack.c.bf16 %v356_v29, %v356_v29 }
  0x58   : > { %237 = vst [vmem:[#allocation2 + $0x8c] sm:$0xf] %v14971_v1  ;;  %238 = vst [vmem:[#allocation2 + $0x90] sm:$0xf] %v14971_v1  ;;  %v773_v32 = vshll.u32 %v15192_v11, 16  ;;  %v306_v33 = vrot.slane %v305_v20, 4  ;;  %v10824_v48 = vpack.c.bf16 %v379_v30, %v379_v30  ;;  %11475 = vmatpush3.bf16.msra.mxu0 %v14520_v15 }
  0x59   : > { %239 = vst [vmem:[#allocation2 + $0x94] sm:$0xf] %v14971_v1  ;;  %240 = vst [vmem:[#allocation2 + $0x98] sm:$0xf] %v14971_v1  ;;  %v380_v36 = vld [vmem:[%s15182_s20 + $0x48] sm:$0xff]  ;;  %v309_v37 = vrot.slane %v307_v25, 4  ;;  %11476 = vmatprep.subr.bf16.mxu0 %v17537_v0 }
  0x5a   : > { %241 = vst [vmem:[#allocation2 + $0x9c] sm:$0xf] %v14971_v1  ;;  %242 = vst [vmem:[#allocation2 + $0xa0] sm:$0xf] %v14971_v1  ;;  %v342_v38 = vrot.slane %v10820_v26, 7  ;;  %v344_v39 = vrot.slane %v10821_v27, 7  ;;  %v10825_v53 = vpack.c.bf16 %v380_v36, %v380_v36 }
  0x5b   : > { %243 = vst [vmem:[#allocation2 + $0xa4] sm:$0xf] %v14971_v1  ;;  %244 = vst [vmem:[#allocation2 + $0xa8] sm:$0xf] %v14971_v1  ;;  %v366_v40 = vrot.slane %v10822_v28, 6  ;;  %v398_v42 = vld [vmem:[%s15182_s20 + $0x50] sm:$0xff] }
  0x5c   : > { %245 = vst [vmem:[#allocation2 + $0xac] sm:$0xf] %v14971_v1  ;;  %246 = vst [vmem:[#allocation2 + $0xb0] sm:$0xf] %v14971_v1  ;;  %v399_v43 = vld [vmem:[%s15182_s20 + $0x58] sm:$0xff]  ;;  %v15224_v45 = vrot.slane %v768_v19, 1  ;;  %v10826_v57 = vpack.c.bf16 %v398_v42, %v398_v42 }
  0x5d   : > { %247 = vst [vmem:[#allocation2 + $0xb4] sm:$0x1] %v14971_v1  ;;  %248 = vst [vmem:[#allocation3] sm:$0xf] %v14971_v1  ;;  %v14521_v44 = vld [vmem:[#allocation4 + $0x68] sm:$0xff]   ;;  %v368_v47 = vrot.slane %v10823_v35, 6  ;;  %v10827_v58 = vpack.c.bf16 %v399_v43, %v399_v43 }
  0x5e   : > { %249 = vst [vmem:[#allocation3 + $0x4] sm:$0xf] %v14971_v1  ;;  %250 = vst [vmem:[#allocation3 + $0x8] sm:$0xf] %v14971_v1  ;;  %v410_v49 = vld [vmem:[%s15182_s20 + $0x60] sm:$0xff]  ;;  %v343_v50 = vrot.slane %v342_v38, 4  ;;  %11477 = vmatpush3.bf16.msra.mxu0 %v14521_v44 }
  0x5f   : > { %251 = vst [vmem:[#allocation3 + $0xc] sm:$0xf] %v14971_v1  ;;  %252 = vst [vmem:[#allocation3 + $0x10] sm:$0xf] %v14971_v1  ;;  %v346_v51 = vrot.slane %v344_v39, 4  ;;  %v367_v52 = vrot.slane %v366_v40, 4  ;;  %v10828_v2 = vpack.c.bf16 %v410_v49, %v410_v49  ;;  %11478 = vmatprep.subr.bf16.mxu0 %v17537_v0 }
  0x60   : > { %253 = vst [vmem:[#allocation3 + $0x14] sm:$0xf] %v14971_v1  ;;  %254 = vst [vmem:[#allocation3 + $0x18] sm:$0xf] %v14971_v1  ;;  %v411_v54 = vld [vmem:[%s15182_s20 + $0x68] sm:$0xff]  ;;  %v370_v55 = vrot.slane %v368_v47, 4 }
  0x61   : > { %255 = vst [vmem:[#allocation3 + $0x1c] sm:$0xf] %v14971_v1  ;;  %256 = vst [vmem:[#allocation3 + $0x20] sm:$0xf] %v14971_v1  ;;  %v387_v56 = vrot.slane %v10824_v48, 5  ;;  %v429_v59 = vld [vmem:[%s15182_s20 + $0x70] sm:$0xff]  ;;  %v10829_v6 = vpack.c.bf16 %v411_v54, %v411_v54 }
  0x62   : > { %257 = vst [vmem:[#allocation3 + $0x24] sm:$0xf] %v14971_v1  ;;  %258 = vst [vmem:[#allocation3 + $0x28] sm:$0xf] %v14971_v1  ;;  %v430_v60 = vld [vmem:[%s15182_s20 + $0x78] sm:$0xff]  ;;  %v448_v61 = vld [vmem:[%s15182_s20 + $0x80] sm:$0xff]  ;;  %v10830_v9 = vpack.c.bf16 %v429_v59, %v429_v59 }
  0x63   : > { %259 = vst [vmem:[#allocation3 + $0x2c] sm:$0xf] %v14971_v1  ;;  %260 = vst [vmem:[#allocation3 + $0x30] sm:$0xf] %v14971_v1  ;;  %v449_v3 = vld [vmem:[%s15182_s20 + $0x88] sm:$0xff]  ;;  %v14522_v4 = vld [vmem:[#allocation4 + $0x70] sm:$0xff]   ;;  %v10831_v10 = vpack.c.bf16 %v430_v60, %v430_v60  ;;  %v10832_v15 = vpack.c.bf16 %v448_v61, %v448_v61 }
  0x64   : > { %261 = vst [vmem:[#allocation3 + $0x34] sm:$0xf] %v14971_v1  ;;  %262 = vst [vmem:[#allocation3 + $0x38] sm:$0xf] %v14971_v1  ;;  %v388_v5 = vrot.slane %v387_v56, 4  ;;  %v467_v12 = vld [vmem:[%s15182_s20 + $0x90] sm:$0xff]  ;;  %v10833_v16 = vpack.c.bf16 %v449_v3, %v449_v3  ;;  %11479 = vmatpush3.bf16.msra.mxu0 %v14522_v4 }
  0x65   : > { %263 = vst [vmem:[#allocation3 + $0x3c] sm:$0xf] %v14971_v1  ;;  %264 = vst [vmem:[#allocation3 + $0x40] sm:$0xf] %v14971_v1  ;;  %v418_v14 = vrot.slane %v10828_v2, 7  ;;  %v420_v19 = vrot.slane %v10829_v6, 7  ;;  %11480 = vmatprep.subr.bf16.mxu0 %v17537_v0 }
  0x66   : > { %265 = vst [vmem:[#allocation3 + $0x44] sm:$0xf] %v14971_v1  ;;  %266 = vst [vmem:[#allocation3 + $0x48] sm:$0xf] %v14971_v1  ;;  %v439_v23 = vrot.slane %v10831_v10, 6  ;;  %v456_v24 = vrot.slane %v10832_v15, 5 }
  0x67   : > { %267 = vst [vmem:[#allocation3 + $0x4c] sm:$0xf] %v14971_v1  ;;  %268 = vst [vmem:[#allocation3 + $0x50] sm:$0xf] %v14971_v1  ;;  %v419_v22 = vrot.slane %v418_v14, 4  ;;  %v479_v26 = vld [vmem:[%s15182_s20 + $0xa0] sm:$0xff] }
  0x68   : > { %269 = vst [vmem:[#allocation3 + $0x54] sm:$0xf] %v14971_v1  ;;  %270 = vst [vmem:[#allocation3 + $0x58] sm:$0xf] %v14971_v1  ;;  %v422_v27 = vrot.slane %v420_v19, 4  ;;  %v458_v28 = vrot.slane %v10833_v16, 5 }
  0x69   : > { %271 = vst [vmem:[#allocation3 + $0x5c] sm:$0xf] %v14971_v1  ;;  %272 = vst [vmem:[#allocation3 + $0x60] sm:$0xf] %v14971_v1  ;;  %v14523_v30 = vld [vmem:[#allocation4 + $0x78] sm:$0xff]   ;;  %v14526_v44 = vld [vmem:[#allocation4] sm:$0xff]  }
  0x6a   : > { %273 = vst [vmem:[#allocation3 + $0x64] sm:$0xf] %v14971_v1  ;;  %274 = vst [vmem:[#allocation3 + $0x68] sm:$0xf] %v14971_v1  ;;  %11481 = vmatpush3.bf16.msra.mxu0 %v14523_v30  ;;  %v14529_v48 = vld [vmem:[#allocation4 + $0x8] sm:$0xff]   ;;  %v480_v49 = vld [vmem:[%s15182_s20 + $0xa8] sm:$0xff] }
  0x6b   : > { %275 = vst [vmem:[#allocation3 + $0x6c] sm:$0xf] %v14971_v1  ;;  %276 = vst [vmem:[#allocation3 + $0x70] sm:$0xf] %v14971_v1  ;;  %11566 = vmatprep.subr.bf16.mxu0 %v17537_v0  ;;  %v549_v30 = vld [vmem:[%s15182_s20 + $0xe8] sm:$0xff]  ;;  %s10815_s21 = sshll.u32 %s17598_s13, 7 }
  0x6c   : > { %277 = vst [vmem:[#allocation3 + $0x74] sm:$0xf] %v14971_v1  ;;  %278 = vst [vmem:[#allocation3 + $0x78] sm:$0xf] %v14971_v1  ;;  %s17384_s24 = scalar_lea.vmem %s17528_s3, %s10815_s21 }
  0x6d   : > { %279 = vst [vmem:[#allocation3 + $0x7c] sm:$0xf] %v14971_v1  ;;  %280 = vst [vmem:[#allocation3 + $0x80] sm:$0xf] %v14971_v1 }
  0x6e   : > { %281 = vst [vmem:[#allocation3 + $0x84] sm:$0xf] %v14971_v1  ;;  %282 = vst [vmem:[#allocation3 + $0x88] sm:$0xf] %v14971_v1 }
  0x6f   : > { %283 = vst [vmem:[#allocation3 + $0x8c] sm:$0xf] %v14971_v1  ;;  %284 = vst [vmem:[#allocation3 + $0x90] sm:$0xf] %v14971_v1 }
  0x70   : > { %285 = vst [vmem:[#allocation3 + $0x94] sm:$0xf] %v14971_v1  ;;  %286 = vst [vmem:[#allocation3 + $0x98] sm:$0xf] %v14971_v1 }
  0x71   : > { %287 = vst [vmem:[#allocation3 + $0x9c] sm:$0xf] %v14971_v1  ;;  %288 = vst [vmem:[#allocation3 + $0xa0] sm:$0xf] %v14971_v1 }
  0x72   : > { %289 = vst [vmem:[#allocation3 + $0xa4] sm:$0xf] %v14971_v1  ;;  %290 = vst [vmem:[#allocation3 + $0xa8] sm:$0xf] %v14971_v1 }
  0x73   : > { %291 = vst [vmem:[#allocation3 + $0xac] sm:$0xf] %v14971_v1  ;;  %292 = vst [vmem:[#allocation3 + $0xb0] sm:$0xf] %v14971_v1 }
  0x74   : > { %293 = vst [vmem:[#allocation3 + $0xb4] sm:$0x1] %v14971_v1  ;;  %vm15186_vm5 = vmor %vm302_vm1, %vm303_vm2  ;;  %v389_v1 = vrot.slane %v10825_v53, 5  ;;  %vm764_vm2 = vsmask.f32 7424 }
  0x75   : > { %329 = vst.msk [vmem:[#allocation2 + $0x1c] sm:$0xf] %vm315_vm4, %v10818_v17  ;;  %330 = vst.msk [vmem:[#allocation2 + $0x20] sm:$0xf] %vm315_vm4, %v10819_v21  ;;  %v308_v46 = vsel %vm15186_vm5, %v306_v33, %v307_v25  ;;  %v775_v17 = vrot.slane %v773_v32, 1  ;;  %v468_v21 = vld [vmem:[%s15182_s20 + $0x98] sm:$0xff]  ;;  %v10834_v25 = vpack.c.bf16 %v467_v12, %v467_v12  ;;  %v771_v32 = vor.u32 %v15224_v45, %v766_v31 }
  0x76   : > { %314 = vst.msk [vmem:[#allocation2 + $0x10] sm:$0x8] %vm313_vm3, %v305_v20  ;;  %vm15211_vm15 = vmor %vm339_vm8, %vm340_vm9  ;;  %v391_v13 = vrot.slane %v389_v1, 4  ;;  %v390_v18 = vsel %vm15186_vm5, %v388_v5, %v389_v1  ;;  %v437_v20 = vrot.slane %v10830_v9, 6  ;;  %v10835_v29 = vpack.c.bf16 %v468_v21, %v468_v21  ;;  %v14537_v5 = vld [vmem:[#allocation4 + $0x18] sm:$0xff]  }
  0x77   : > { %vm15218_vm1 = vmor %vm363_vm12, %vm364_vm13  ;;  %316 = vst.msk [vmem:[#allocation2 + $0x14] sm:$0xf] %vm315_vm4, %v308_v46  ;;  %v345_v62 = vsel %vm15211_vm15, %v343_v50, %v344_v39  ;;  %v421_v35 = vsel %vm15211_vm15, %v419_v22, %v420_v19  ;;  %v460_v31 = vrot.slane %v458_v28, 4  ;;  %v10836_v39 = vpack.c.bf16 %v479_v26, %v479_v26  ;;  %v498_v50 = vld [vmem:[%s15182_s20 + $0xb0] sm:$0xff] }
  0x78   : > { %318 = vst.msk [vmem:[#allocation2 + $0x18] sm:$0x7] %vm317_vm6, %v309_v37  ;;  %v369_v63 = vsel %vm15218_vm1, %v367_v52, %v368_v47  ;;  %397 = vst.msk [vmem:[#allocation2 + $0x3c] sm:$0x7] %vm317_vm6, %v391_v13  ;;  %v438_v36 = vrot.slane %v437_v20, 4  ;;  %v441_v37 = vrot.slane %v439_v23, 4  ;;  %v776_v43 = vsel %vm764_vm2, %v771_v32, %v775_v17 }
  0x79   : > { %351 = vst.msk [vmem:[#allocation2 + $0x24] sm:$0xe] %vm350_vm7, %v342_v38  ;;  %426 = vst.msk [vmem:[#allocation2 + $0x48] sm:$0xe] %vm350_vm7, %v418_v14  ;;  %v457_v38 = vrot.slane %v456_v24, 4  ;;  %v777_v45 = vshrl.u32 %v15192_v11, 16  ;;  %11483 = vmatmul.mubr.bf16.vlgmr.msra.gmra.mrb[0].mxu0 %v776_v43 }
  0x7a   : > { %375 = vst.msk [vmem:[#allocation2 + $0x2c] sm:$0xc] %vm374_vm11, %v366_v40  ;;  %445 = vst.msk [vmem:[#allocation2 + $0x50] sm:$0xc] %vm374_vm11, %v437_v20  ;;  %v440_v40 = vsel %vm15218_vm1, %v438_v36, %v439_v23  ;;  %v487_v47 = vrot.slane %v10836_v39, 7  ;;  %11567 = vmatpush3.bf16.msra.mxu0 %v14526_v44  ;;  %11486 = vmatprep.mubr.msk.bf16.mxu0 %vm14970_vm0, %v17537_v0  ;;  %v499_v13 = vld [vmem:[%s15182_s20 + $0xb8] sm:$0xff] }
  0x7b   : > { %354 = vst.msk [vmem:[#allocation2 + $0x2c] sm:$0x1] %vm353_vm10, %v346_v51  ;;  %428 = vst.msk [vmem:[#allocation2 + $0x50] sm:$0x1] %vm353_vm10, %v422_v27  ;;  %v459_v42 = vsel %vm15186_vm5, %v457_v38, %v458_v28  ;;  %v779_v11 = vor.u32 %v777_v45, %v775_v17  ;;  %11568 = vmatprep.subr.bf16.mxu0 %v17537_v0  ;;  %v517_v14 = vld [vmem:[%s15182_s20 + $0xc0] sm:$0xff]  ;;  %v518_v17 = vld [vmem:[%s15182_s20 + $0xc8] sm:$0xff]  ;;  %v10839_v27 = vpack.c.bf16 %v499_v13, %v499_v13 }
  0x7c   : > { %352 = vst.msk [vmem:[#allocation2 + $0x28] sm:$0xf] %vm315_vm4, %v345_v62  ;;  %376 = vst.msk [vmem:[#allocation2 + $0x30] sm:$0xf] %vm315_vm4, %v369_v63  ;;  %v14533_v62 = vld [vmem:[#allocation4 + $0x10] sm:$0xff]   ;;  %v488_v1 = vrot.slane %v487_v47, 4 }
  0x7d   : > { %378 = vst.msk [vmem:[#allocation2 + $0x34] sm:$0x3] %vm377_vm14, %v370_v55  ;;  %447 = vst.msk [vmem:[#allocation2 + $0x58] sm:$0x3] %vm377_vm14, %v441_v37  ;;  %v536_v22 = vld [vmem:[%s15182_s20 + $0xd0] sm:$0xff]  ;;  %v537_v28 = vld [vmem:[%s15182_s20 + $0xd8] sm:$0xff] }
  0x7e   : > { %395 = vst.msk [vmem:[#allocation2 + $0x34] sm:$0x8] %vm313_vm3, %v387_v56  ;;  %v15263_v33 = vld [vmem:[#allocation2 + $0x10] sm:$0xff]   ;;  %464 = vst.msk [vmem:[#allocation2 + $0x58] sm:$0x8] %vm313_vm3, %v456_v24  ;;  %11569 = vmatpush3.bf16.msra.mxu0 %v14529_v48  ;;  %v508_v38 = vrot.slane %v10839_v27, 6  ;;  %v10843_v43 = vpack.c.bf16 %v537_v28, %v537_v28 }
  0x7f   : > { %408 = vst.msk [vmem:[#allocation2 + $0x40] sm:$0xf] %vm315_vm4, %v10826_v57  ;;  %409 = vst.msk [vmem:[#allocation2 + $0x44] sm:$0xf] %vm315_vm4, %v10827_v58  ;;  %v781_v46 = vshll.u32 %v15263_v33, 16  ;;  %v15287_v51 = vld [vmem:[#allocation2 + $0x18] sm:$0xff]   ;;  %v10837_v57 = vpack.c.bf16 %v480_v49, %v480_v49  ;;  %v10838_v58 = vpack.c.bf16 %v498_v50, %v498_v50  ;;  %11570 = vmatprep.subr.bf16.mxu0 %v17537_v0 }
  0x80   : > { %396 = vst.msk [vmem:[#allocation2 + $0x38] sm:$0xf] %vm315_vm4, %v390_v18  ;;  %477 = vst.msk [vmem:[#allocation2 + $0x64] sm:$0xf] %vm315_vm4, %v10834_v25  ;;  %v15289_v52 = vld [vmem:[#allocation2 + $0x20] sm:$0xff]   ;;  %v789_v55 = vshll.u32 %v15287_v51, 16 }
  0x81   : > { %427 = vst.msk [vmem:[#allocation2 + $0x4c] sm:$0xf] %vm315_vm4, %v421_v35  ;;  %478 = vst.msk [vmem:[#allocation2 + $0x68] sm:$0xf] %vm315_vm4, %v10835_v29  ;;  %v783_v53 = vrot.slane %v781_v46, 1  ;;  %v797_v56 = vshll.u32 %v15289_v52, 16  ;;  %v10841_v35 = vpack.c.bf16 %v518_v17, %v518_v17 }
  0x82   : > { %446 = vst.msk [vmem:[#allocation2 + $0x54] sm:$0xf] %vm315_vm4, %v440_v40  ;;  %465 = vst.msk [vmem:[#allocation2 + $0x5c] sm:$0xf] %vm315_vm4, %v459_v42  ;;  %v785_v60 = vshrl.u32 %v15263_v33, 16  ;;  %v793_v2 = vshrl.u32 %v15287_v51, 16  ;;  %11571 = vmatpush3.bf16.msra.mxu0 %v14533_v62  ;;  %v10840_v33 = vpack.c.bf16 %v517_v14, %v517_v14 }
  0x83   : > { %466 = vst.msk [vmem:[#allocation2 + $0x60] sm:$0x7] %vm317_vm6, %v460_v31  ;;  %v15294_v54 = vld [vmem:[#allocation2 + $0x28] sm:$0xff]   ;;  %v784_v59 = vsel %vm764_vm2, %v779_v11, %v783_v53  ;;  %v801_v3 = vshrl.u32 %v15289_v52, 16  ;;  %v791_v6 = vrot.slane %v789_v55, 1  ;;  %v15309_v9 = vrot.slane %v797_v56, 1  ;;  %11572 = vmatprep.subr.bf16.mxu0 %v17537_v0 }
  0x84   : > { %495 = vst.msk [vmem:[#allocation2 + $0x6c] sm:$0xe] %vm350_vm7, %v487_v47  ;;  %v805_v61 = vshll.u32 %v15294_v54, 16  ;;  %11487 = vmatmul.mubr.bf16.gmra.mrb[4].mxu0 %v784_v59  ;;  %v489_v10 = vrot.slane %v10837_v57, 7  ;;  %v506_v12 = vrot.slane %v10838_v58, 6  ;;  %v787_v15 = vor.u32 %v785_v60, %v783_v53  ;;  %v14540_v26 = vld [vmem:[#allocation4 + $0x20] sm:$0xff]  }
  0x85   : > { %v15302_v63 = vld [vmem:[#allocation2 + $0x30] sm:$0xff]   ;;  %11490 = vmatprep.mubr.msk.bf16.mxu0 %vm14970_vm0, %v17537_v0  ;;  %v809_v16 = vshrl.u32 %v15294_v54, 16  ;;  %v548_v29 = vld [vmem:[%s15182_s20 + $0xe0] sm:$0xff]  ;;  %v10842_v31 = vpack.c.bf16 %v536_v22, %v536_v22  ;;  %v568_v39 = vld [vmem:[%s15182_s20 + $0xf8] sm:$0xff]  ;;  %v525_v40 = vrot.slane %v10840_v33, 5  ;;  %v527_v42 = vrot.slane %v10841_v35, 5 }
  0x86   : > { %v15317_v18 = vrot.slane %v805_v61, 1  ;;  %v813_v19 = vshll.u32 %v15302_v63, 16  ;;  %v490_v20 = vsel %vm15211_vm15, %v488_v1, %v489_v10  ;;  %v491_v21 = vrot.slane %v489_v10, 4  ;;  %514 = vst.msk [vmem:[#allocation2 + $0x74] sm:$0xc] %vm374_vm11, %v506_v12  ;;  %v567_v36 = vld [vmem:[%s15182_s20 + $0xf0] sm:$0xff]  ;;  %11573 = vmatpush3.bf16.msra.mxu0 %v14537_v5 }
  0x87   : > { %v15307_v4 = vld [vmem:[#allocation2 + $0x38] sm:$0xff]   ;;  %v817_v23 = vshrl.u32 %v15302_v63, 16  ;;  %496 = vst.msk [vmem:[#allocation2 + $0x70] sm:$0xf] %vm315_vm4, %v490_v20  ;;  %v507_v32 = vrot.slane %v506_v12, 4  ;;  %v792_v37 = vsel %vm764_vm2, %v787_v15, %v791_v6  ;;  %11574 = vmatprep.subr.bf16.mxu0 %v17537_v0  ;;  %v10844_v44 = vpack.c.bf16 %v548_v29, %v548_v29  ;;  %v15345_v56 = vld [vmem:[#allocation2 + $0x40] sm:$0xff]  }
  0x88   : > { %v821_v24 = vshll.u32 %v15307_v4, 16  ;;  %v825_v25 = vshrl.u32 %v15307_v4, 16  ;;  %497 = vst.msk [vmem:[#allocation2 + $0x74] sm:$0x1] %vm353_vm10, %v491_v21  ;;  %v510_v46 = vrot.slane %v508_v38, 4  ;;  %v10845_v47 = vpack.c.bf16 %v549_v30, %v549_v30  ;;  %v14544_v49 = vld [vmem:[#allocation4 + $0x28] sm:$0xff]  }
  0x89   : > { %v509_v45 = vsel %vm15218_vm1, %v507_v32, %v508_v38  ;;  %546 = vst.msk [vmem:[#allocation2 + $0x88] sm:$0xf] %vm315_vm4, %v10842_v31  ;;  %v10846_v48 = vpack.c.bf16 %v567_v36, %v567_v36  ;;  %v526_v50 = vrot.slane %v525_v40, 4  ;;  %v529_v51 = vrot.slane %v527_v42, 4  ;;  %547 = vst.msk [vmem:[#allocation2 + $0x8c] sm:$0xf] %vm315_vm4, %v10843_v43 }
  0x8a   : > { %515 = vst.msk [vmem:[#allocation2 + $0x78] sm:$0xf] %vm315_vm4, %v509_v45  ;;  %v556_v11 = vrot.slane %v10844_v44, 7  ;;  %v10847_v53 = vpack.c.bf16 %v568_v39, %v568_v39  ;;  %v795_v55 = vor.u32 %v793_v2, %v791_v6  ;;  %11575 = vmatpush3.bf16.msra.mxu0 %v14540_v26  ;;  %v558_v57 = vrot.slane %v10845_v47, 7  ;;  %v15355_v1 = vld [vmem:[#allocation2 + $0x48] sm:$0xff]   ;;  %v15359_v6 = vld [vmem:[#allocation2 + $0x50] sm:$0xff]  }
  0x8b   : > { %533 = vst.msk [vmem:[#allocation2 + $0x7c] sm:$0x8] %vm313_vm3, %v525_v40  ;;  %v575_v58 = vrot.slane %v10846_v48, 6  ;;  %11576 = vmatprep.subr.bf16.mxu0 %v17537_v0  ;;  %v528_v59 = vsel %vm15186_vm5, %v526_v50, %v527_v42  ;;  %v15353_v62 = vrot.slane %v813_v19, 1  ;;  %v15361_v8 = vld [vmem:[#allocation2 + $0x58] sm:$0xff]   ;;  %v15367_v14 = vrot.slane %v821_v24, 1 }
  0x8c   : > { %11491 = vmatmul.mubr.bf16.gmra.mrb[8].mxu0 %v792_v37  ;;  %516 = vst.msk [vmem:[#allocation2 + $0x7c] sm:$0x3] %vm377_vm14, %v510_v46  ;;  %v557_v60 = vrot.slane %v556_v11, 4  ;;  %v577_v61 = vrot.slane %v10847_v53, 6  ;;  %v560_v2 = vrot.slane %v558_v57, 4  ;;  %v800_v13 = vsel %vm764_vm2, %v795_v55, %v15309_v9  ;;  %v15369_v15 = vld [vmem:[#allocation2 + $0x60] sm:$0xff]  }
  0x8d   : > { %11494 = vmatprep.mubr.msk.bf16.mxu0 %vm14970_vm0, %v17537_v0  ;;  %535 = vst.msk [vmem:[#allocation2 + $0x84] sm:$0x7] %vm317_vm6, %v529_v51  ;;  %v576_v5 = vrot.slane %v575_v58, 4  ;;  %v14547_v17 = vld [vmem:[#allocation4 + $0x30] sm:$0xff]   ;;  %v829_v34 = vshll.u32 %v15345_v56, 16  ;;  %v15379_v20 = vld [vmem:[#allocation2 + $0x68] sm:$0xff]   ;;  %v803_v41 = vor.u32 %v801_v3, %v15309_v9  ;;  %v811_v45 = vor.u32 %v809_v16, %v15317_v18 }
  0x8e   : > { %564 = vst.msk [vmem:[#allocation2 + $0x90] sm:$0xe] %vm350_vm7, %v556_v11  ;;  %v559_v10 = vsel %vm15211_vm15, %v557_v60, %v558_v57  ;;  %v579_v12 = vrot.slane %v577_v61, 4  ;;  %11577 = vmatpush3.bf16.msra.mxu0 %v14544_v49  ;;  %v837_v21 = vshll.u32 %v15355_v1, 16  ;;  %v14551_v22 = vld [vmem:[#allocation4 + $0x38] sm:$0xff]   ;;  %v833_v24 = vshrl.u32 %v15345_v56, 16 }
  0x8f   : > { %534 = vst.msk [vmem:[#allocation2 + $0x80] sm:$0xf] %vm315_vm4, %v528_v59  ;;  %565 = vst.msk [vmem:[#allocation2 + $0x94] sm:$0xf] %vm315_vm4, %v559_v10  ;;  %v578_v19 = vsel %vm15218_vm1, %v576_v5, %v577_v61  ;;  %11578 = vmatprep.subr.bf16.mxu0 %v17537_v0  ;;  %v15388_v26 = vld [vmem:[#allocation2 + $0x70] sm:$0xff]   ;;  %v841_v27 = vshrl.u32 %v15355_v1, 16  ;;  %v808_v36 = vsel %vm764_vm2, %v803_v41, %v15317_v18 }
  0x90   : > { %583 = vst.msk [vmem:[#allocation2 + $0x98] sm:$0xc] %vm374_vm11, %v575_v58  ;;  %v845_v28 = vshll.u32 %v15359_v6, 16  ;;  %v853_v29 = vshll.u32 %v15361_v8, 16  ;;  %v15393_v30 = vld [vmem:[#allocation2 + $0x88] sm:$0xff]   ;;  %v861_v32 = vshll.u32 %v15369_v15, 16  ;;  %v816_v54 = vsel %vm764_vm2, %v811_v45, %v15353_v62 }
  0x91   : > { %566 = vst.msk [vmem:[#allocation2 + $0x98] sm:$0x1] %vm353_vm10, %v560_v2  ;;  %v831_v52 = vrot.slane %v829_v34, 1  ;;  %v839_v3 = vrot.slane %v837_v21, 1  ;;  %v849_v9 = vshrl.u32 %v15359_v6, 16  ;;  %v869_v35 = vshll.u32 %v15379_v20, 16 }
  0x92   : > { %584 = vst.msk [vmem:[#allocation2 + $0x9c] sm:$0xf] %vm315_vm4, %v578_v19  ;;  %11579 = vmatpush3.bf16.msra.mxu0 %v14547_v17  ;;  %v857_v37 = vshrl.u32 %v15361_v8, 16  ;;  %v877_v38 = vshll.u32 %v15388_v26, 16  ;;  %v847_v31 = vrot.slane %v845_v28, 1  ;;  %v865_v39 = vshrl.u32 %v15369_v15, 16 }
  0x93   : > { %585 = vst.msk [vmem:[#allocation2 + $0xa0] sm:$0x3] %vm377_vm14, %v579_v12  ;;  %11580 = vmatprep.subr.bf16.mxu0 %v17537_v0  ;;  %v15397_v33 = vld [vmem:[#allocation2 + $0x78] sm:$0xff]   ;;  %v855_v40 = vrot.slane %v853_v29, 1  ;;  %v863_v42 = vrot.slane %v861_v32, 1  ;;  %v901_v44 = vshll.u32 %v15393_v30, 16  ;;  %v819_v56 = vor.u32 %v817_v23, %v15353_v62 }
  0x94   : > { %11495 = vmatmul.mubr.bf16.gmra.mrb[12].mxu0 %v800_v13  ;;  %v885_v43 = vshll.u32 %v15397_v33, 16  ;;  %v871_v46 = vrot.slane %v869_v35, 1  ;;  %v873_v47 = vshrl.u32 %v15379_v20, 16  ;;  %v879_v48 = vrot.slane %v877_v38, 1  ;;  %v14553_v38 = vld [vmem:[#allocation4 + $0x80] sm:$0xff]   ;;  %v14559_v45 = vld [vmem:[#allocation4 + $0xb0] sm:$0xff]  }
  0x95   : > { %11498 = vmatprep.mubr.msk.bf16.mxu0 %vm14970_vm0, %v17537_v0  ;;  %v881_v49 = vshrl.u32 %v15388_v26, 16  ;;  %v889_v50 = vshrl.u32 %v15397_v33, 16  ;;  %v905_v51 = vshrl.u32 %v15393_v30, 16  ;;  %v903_v55 = vrot.slane %v901_v44, 1  ;;  %v14558_v44 = vld [vmem:[#allocation4 + $0xa8] sm:$0xff]  }
  0x96   : > { %11581 = vmatpush3.bf16.msra.mxu0 %v14551_v22  ;;  %v15418_v11 = vld [vmem:[#allocation2 + $0x80] sm:$0xff]   ;;  %v887_v53 = vrot.slane %v885_v43, 1  ;;  %v824_v57 = vsel %vm764_vm2, %v819_v56, %v15367_v14  ;;  %v827_v58 = vor.u32 %v825_v25, %v15367_v14  ;;  %v15436_v59 = vld [vmem:[#allocation2 + $0x90] sm:$0xff]   ;;  %v835_v23 = vor.u32 %v833_v24, %v831_v52  ;;  %v15542_v56 = vld [vmem:[#allocation2 + $0x48] sm:$0xff]  }
  0x97   : > { %11666 = vmatprep.subr.bf16.mxu0 %v17537_v0  ;;  %v893_v16 = vshll.u32 %v15418_v11, 16  ;;  %v897_v18 = vshrl.u32 %v15418_v11, 16  ;;  %v909_v63 = vshll.u32 %v15436_v59, 16  ;;  %v843_v4 = vor.u32 %v841_v27, %v839_v3  ;;  %v15503_v43 = vld [vmem:[#allocation2 + $0x10] sm:$0xff]  }
  0x98   : > { %v832_v60 = vsel %vm764_vm2, %v827_v58, %v831_v52  ;;  %v840_v62 = vsel %vm764_vm2, %v835_v23, %v839_v3  ;;  %v851_v1 = vor.u32 %v849_v9, %v847_v31  ;;  %v859_v6 = vor.u32 %v857_v37, %v855_v40  ;;  %v15552_v58 = vld [vmem:[#allocation2 + $0x58] sm:$0xff]  }
  0x99   : > { %v895_v61 = vrot.slane %v893_v16, 1  ;;  %v848_v25 = vsel %vm764_vm2, %v843_v4, %v847_v31  ;;  %v15449_v5 = vld [vmem:[#allocation2 + $0x98] sm:$0xff]   ;;  %v913_v8 = vshrl.u32 %v15436_v59, 16  ;;  %v867_v13 = vor.u32 %v865_v39, %v863_v42  ;;  %v14555_v39 = vld [vmem:[#allocation4 + $0x90] sm:$0xff]  }
  0x9a   : > { %v856_v2 = vsel %vm764_vm2, %v851_v1, %v855_v40  ;;  %v917_v10 = vshll.u32 %v15449_v5, 16  ;;  %v864_v12 = vsel %vm764_vm2, %v859_v6, %v863_v42  ;;  %v875_v15 = vor.u32 %v873_v47, %v871_v46  ;;  %v15468_v41 = vld [vmem:[#allocation2 + $0xa0] ss:$0 sps:$4 sm:$0x77]   ;;  %v14554_v31 = vld [vmem:[#allocation4 + $0x88] sm:$0xff]   ;;  %v15496_v40 = vld [vmem:[#allocation2 + $0x8] sm:$0xff]  }
  0x9b   : > { %v872_v14 = vsel %vm764_vm2, %v867_v13, %v871_v46  ;;  %v911_v19 = vrot.slane %v909_v63, 1  ;;  %v921_v34 = vshrl.u32 %v15449_v5, 16  ;;  %v883_v20 = vor.u32 %v881_v49, %v879_v48  ;;  %v14557_v42 = vld [vmem:[#allocation4 + $0xa0] sm:$0xff]   ;;  %v15510_v46 = vld [vmem:[#allocation2 + $0x18] sm:$0xff]   ;;  %v14560_v47 = vld [vmem:[#allocation4 + $0xb8] sm:$0xff]  }
  0x9c   : > { %11499 = vmatmul.mubr.bf16.gmra.mrb[16].mxu0 %v808_v36  ;;  %v880_v17 = vsel %vm764_vm2, %v875_v15, %v879_v48  ;;  %v891_v22 = vor.u32 %v889_v50, %v887_v53  ;;  %v919_v26 = vrot.slane %v917_v10, 1  ;;  %v925_v27 = vshll.u32 %v15468_v41, 16  ;;  %v15517_v48 = vld [vmem:[#allocation2 + $0x20] sm:$0xff]   ;;  %v15522_v49 = vld [vmem:[#allocation2 + $0x28] sm:$0xff]   ;;  %v15532_v16 = vld [vmem:[#allocation2 + $0x38] sm:$0xff]  }
  0x9d   : > { %11502 = vmatprep.mubr.msk.bf16.mxu0 %vm14970_vm0, %v17537_v0  ;;  %v888_v21 = vsel %vm764_vm2, %v883_v20, %v887_v53  ;;  %v899_v28 = vor.u32 %v897_v18, %v895_v61  ;;  %v907_v32 = vor.u32 %v905_v51, %v903_v55  ;;  %v915_v52 = vor.u32 %v913_v8, %v911_v19  ;;  %v15537_v18 = vld [vmem:[#allocation2 + $0x40] sm:$0xff]   ;;  %v15567_v63 = vld [vmem:[#allocation2 + $0x70] sm:$0xff]   ;;  %v15572_v23 = vld [vmem:[#allocation2 + $0x78] sm:$0xff]  }
  0x9e   : > { %v896_v24 = vsel %vm764_vm2, %v891_v22, %v895_v61  ;;  %v927_v9 = vrot.slane %v925_v27, 1  ;;  %v929_v35 = vshrl.u32 %v15468_v41, 16  ;;  %v923_v36 = vor.u32 %v921_v34, %v919_v26  ;;  %v15562_v61 = vld [vmem:[#allocation2 + $0x68] sm:$0xff]   ;;  %v14561_v4 = vld [vmem:[#allocation2 + $0xa0] ss:$0 sps:$4 sm:$0x33]  }
  0x9f   : > { %v904_v29 = vsel %vm764_vm2, %v899_v28, %v903_v55  ;;  %v912_v33 = vsel %vm764_vm2, %v907_v32, %v911_v19  ;;  %v920_v3 = vsel %vm764_vm2, %v915_v52, %v919_v26  ;;  %v1488_v6 = vrot.slane %v15496_v40, 1  ;;  %v14562_v8 = vld [vmem:[#allocation4 + $0xc0] sm:$0xff]   ;;  %v14569_v27 = vld [vmem:[#allocation4 + $0xf8] sm:$0xff]  }
  0xa0   : > { %v928_v30 = vsel %vm764_vm2, %v923_v36, %v927_v9  ;;  %v931_v37 = vor.u32 %v929_v35, %v927_v9  ;;  %vm1486_vm3 = vcmask 1046528   ;;  %v1490_v10 = vrot.slane %v15503_v43, 1  ;;  %v14566_v34 = vld [vmem:[#allocation4 + $0xe0] sm:$0xff]  }
  0xa1   : > { %v1492_v15 = vrot.slane %v15510_v46, 1  ;;  %v1494_v20 = vrot.slane %v15517_v48, 1  ;;  %v1496_v26 = vrot.slane %v15522_v49, 1  ;;  %v1500_v35 = vrot.slane %v15532_v16, 1 }
  0xa2   : > { %v1491_v13 = vsel %vm1486_vm3, %v1488_v6, %v1490_v10  ;;  %vm2355_vm5 = vsmask.f32 6400  ;;  %vm2867_vm6 = vcmask 1045504   ;;  %vm3879_vm7 = vsmask.f32 5376 }
  0xa3   : > { %v1493_v19 = vsel %vm1486_vm3, %v1490_v10, %v1492_v15  ;;  %v1495_v22 = vsel %vm1486_vm3, %v1492_v15, %v1494_v20  ;;  %v1497_v28 = vsel %vm1486_vm3, %v1494_v20, %v1496_v26  ;;  %v15691_v10 = vld [vmem:[#allocation2 + $0x18] sm:$0xff]   ;;  %v15698_v15 = vld [vmem:[#allocation2 + $0x20] sm:$0xff]   ;;  %vm4391_vm8 = vcmask 1044480  }
  0xa4   : > { %11503 = vmatmul.mubr.bf16.gmra.mrb[20].mxu0 %v816_v54  ;;  %v15527_v54 = vld [vmem:[#allocation2 + $0x30] sm:$0xff]   ;;  %vm4782_vm9 = vsmask.f32 1280  ;;  %vm4783_vm10 = vsmask.f32 5392 }
  0xa5   : > { %11506 = vmatprep.mubr.msk.bf16.mxu0 %vm14970_vm0, %v17537_v0  ;;  %vm16348_vm11 = vmor %vm4782_vm9, %vm4783_vm10  ;;  %vm9634_vm12 = vsmask.f32 6416  ;;  %vm9720_vm14 = vsmask.f32 256  ;;  %vm9721_vm15 = vsmask.f32 4368 }
  0xa6   : > { %vm17398_vm1 = vmor %vm9720_vm14, %vm9721_vm15 }
  0xac   : > { %11507 = vmatmul.mubr.bf16.gmra.mrb[24].mxu0 %v824_v57  ;;  %v15547_v57 = vld [vmem:[#allocation2 + $0x50] sm:$0xff]  }
  0xad   : > { %11510 = vmatprep.mubr.msk.bf16.mxu0 %vm14970_vm0, %v17537_v0 }
  0xb4   : > { %11511 = vmatmul.mubr.bf16.gmra.mrb[28].mxu0 %v832_v60  ;;  %v15557_v60 = vld [vmem:[#allocation2 + $0x60] sm:$0xff]  }
  0xb5   : > { %11514 = vmatprep.mubr.msk.bf16.mxu0 %vm14970_vm0, %v17537_v0 }
  0xbc   : > { %11515 = vmatmul.mubr.bf16.gmra.mrb[32].mxu0 %v840_v62  ;;  %v15580_v62 = vld [vmem:[#allocation2 + $0x88] sm:$0xff]  }
  0xbd   : > { %11518 = vmatprep.mubr.msk.bf16.mxu0 %vm14970_vm0, %v17537_v0 }
  0xc4   : > { %11519 = vmatmul.mubr.bf16.gmra.mrb[36].mxu0 %v848_v25  ;;  %v14853_v25 = vld [vmem:[#allocation2 + $0x4] sm:$0xf] }
  0xc5   : > { %11522 = vmatprep.mubr.msk.bf16.mxu0 %vm14970_vm0, %v17537_v0 }
  0xcc   : > { %11523 = vmatmul.mubr.bf16.gmra.mrb[40].mxu0 %v856_v2 }
  0xcd   : > { %11526 = vmatprep.mubr.msk.bf16.mxu0 %vm14970_vm0, %v17537_v0 }
  0xd4   : > { %11527 = vmatmul.mubr.bf16.gmra.mrb[44].mxu0 %v864_v12  ;;  %v14563_v12 = vld [vmem:[#allocation4 + $0xc8] sm:$0xff]  }
  0xd5   : > { %11530 = vmatprep.mubr.msk.bf16.mxu0 %vm14970_vm0, %v17537_v0 }
  0xdc   : > { %11531 = vmatmul.mubr.bf16.gmra.mrb[48].mxu0 %v872_v14  ;;  %v14564_v14 = vld [vmem:[#allocation4 + $0xd0] sm:$0xff]  }
  0xdd   : > { %11534 = vmatprep.mubr.msk.bf16.mxu0 %vm14970_vm0, %v17537_v0 }
  0xe4   : > { %11535 = vmatmul.mubr.bf16.gmra.mrb[52].mxu0 %v880_v17  ;;  %v14565_v17 = vld [vmem:[#allocation4 + $0xd8] sm:$0xff]  }
  0xe5   : > { %11538 = vmatprep.mubr.msk.bf16.mxu0 %vm14970_vm0, %v17537_v0 }
  0xec   : > { %11539 = vmatmul.mubr.bf16.gmra.mrb[56].mxu0 %v888_v21  ;;  %v14567_v21 = vld [vmem:[#allocation4 + $0xe8] sm:$0xff]  }
  0xed   : > { %11542 = vmatprep.mubr.msk.bf16.mxu0 %vm14970_vm0, %v17537_v0 }
  0xf4   : > { %11543 = vmatmul.mubr.bf16.gmra.mrb[60].mxu0 %v896_v24  ;;  %v14568_v24 = vld [vmem:[#allocation4 + $0xf0] sm:$0xff]  }
  0xf5   : > { %11546 = vmatprep.mubr.msk.bf16.mxu0 %vm14970_vm0, %v17537_v0 }
  0xfc   : > { %11547 = vmatmul.mubr.bf16.gmra.mrb[64].mxu0 %v904_v29  ;;  %v1498_v29 = vrot.slane %v15527_v54, 1 }
  0xfd   : > { %11550 = vmatprep.mubr.msk.bf16.mxu0 %vm14970_vm0, %v17537_v0 }
 0x104   : > { %11551 = vmatmul.mubr.bf16.gmra.mrb[68].mxu0 %v912_v33 }
 0x105   : > { %11554 = vmatprep.mubr.msk.bf16.mxu0 %vm14970_vm0, %v17537_v0 }
 0x10c   : > { %11555 = vmatmul.mubr.bf16.gmra.mrb[72].mxu0 %v920_v3  ;;  %v1499_v3 = vsel %vm1486_vm3, %v1496_v26, %v1498_v29  ;;  %v14590_v26 = vld [vmem:[#allocation4 + $0x128] sm:$0xff]  }
 0x10d   : > { %11558 = vmatprep.mubr.msk.bf16.mxu0 %vm14970_vm0, %v17537_v0 }
 0x114   : > { %11559 = vmatmul.mubr.bf16.gmra.mrb[76].mxu0 %v928_v30 }
 0x115   : > { %11562 = vmatprep.mubr.msk.bf16.mxu0 %vm14970_vm0, %v17537_v0 }
 0x11c   : > { %11563 = vmatmul.mubr.bf16.gmra.mrb[80].mxu0 %v931_v37 }
 0x11d   : > { %11582 = vmatprep.mubr.msk.bf16.mxu0 %vm14970_vm0, %v17537_v0 }
 0x124   : > { %11583 = vmatmul.mubr.bf16.vlgmr.msra.gmra.mrb[84].mxu0 %v15184_v7  ;;  %v14556_v7 = vld [vmem:[#allocation4 + $0x98] sm:$0xff]  }
 0x125   : > { %11667 = vmatpush3.bf16.msra.mxu0 %v14553_v38  ;;  %11586 = vmatprep.mubr.msk.bf16.mxu0 %vm14970_vm0, %v17537_v0  ;;  %v1501_v38 = vsel %vm1486_vm3, %v1498_v29, %v1500_v35  ;;  %v14593_v29 = vld [vmem:[#allocation4 + $0x130] sm:$0xff]  }
 0x126   : > { %11668 = vmatprep.subr.bf16.mxu0 %v17537_v0 }
 0x129   : > { %11669 = vmatpush3.bf16.msra.mxu0 %v14554_v31 }
 0x12a   : > { %11670 = vmatprep.subr.bf16.mxu0 %v17537_v0 }
 0x12c   : > { %11587 = vmatmul.mubr.bf16.gmra.mrb[4].mxu0 %v15496_v40 }
 0x12d   : > { %11590 = vmatprep.mubr.msk.bf16.mxu0 %vm14970_vm0, %v17537_v0  ;;  %11671 = vmatpush3.bf16.msra.mxu0 %v14555_v39  ;;  %v1502_v39 = vrot.slane %v15537_v18, 1 }
 0x12e   : > { %11672 = vmatprep.subr.bf16.mxu0 %v17537_v0 }
 0x12f   : > { %v1503_v40 = vsel %vm1486_vm3, %v1500_v35, %v1502_v39 }
 0x131   : > { %11673 = vmatpush3.bf16.msra.mxu0 %v14556_v7  ;;  %v1504_v7 = vrot.slane %v15542_v56, 1 }
 0x132   : > { %11674 = vmatprep.subr.bf16.mxu0 %v17537_v0 }
 0x134   : > { %11591 = vmatmul.mubr.bf16.gmra.mrb[8].mxu0 %v15503_v43  ;;  %v1506_v43 = vrot.slane %v15547_v57, 1 }
 0x135   : > { %11594 = vmatprep.mubr.msk.bf16.mxu0 %vm14970_vm0, %v17537_v0  ;;  %11675 = vmatpush3.bf16.msra.mxu0 %v14557_v42  ;;  %v1505_v42 = vsel %vm1486_vm3, %v1502_v39, %v1504_v7 }
 0x136   : > { %11676 = vmatprep.subr.bf16.mxu0 %v17537_v0 }
 0x139   : > { %11677 = vmatpush3.bf16.msra.mxu0 %v14558_v44  ;;  %v1507_v44 = vsel %vm1486_vm3, %v1504_v7, %v1506_v43 }
 0x13a   : > { %11678 = vmatprep.subr.bf16.mxu0 %v17537_v0 }
 0x13c   : > { %11595 = vmatmul.mubr.bf16.gmra.mrb[12].mxu0 %v15510_v46 }
 0x13d   : > { %11598 = vmatprep.mubr.msk.bf16.mxu0 %vm14970_vm0, %v17537_v0  ;;  %11679 = vmatpush3.bf16.msra.mxu0 %v14559_v45  ;;  %v1508_v45 = vrot.slane %v15552_v58, 1 }
 0x13e   : > { %11680 = vmatprep.subr.bf16.mxu0 %v17537_v0 }
 0x13f   : > { %v1509_v46 = vsel %vm1486_vm3, %v1506_v43, %v1508_v45 }
 0x141   : > { %11681 = vmatpush3.bf16.msra.mxu0 %v14560_v47  ;;  %v1510_v47 = vrot.slane %v15557_v60, 1 }
 0x142   : > { %11766 = vmatprep.subr.bf16.mxu0 %v17537_v0 }
 0x144   : > { %11599 = vmatmul.mubr.bf16.gmra.mrb[16].mxu0 %v15517_v48  ;;  %v1511_v48 = vsel %vm1486_vm3, %v1508_v45, %v1510_v47 }
 0x145   : > { %11602 = vmatprep.mubr.msk.bf16.mxu0 %vm14970_vm0, %v17537_v0 }
 0x14c   : > { %11603 = vmatmul.mubr.bf16.gmra.mrb[20].mxu0 %v15522_v49  ;;  %v1035_v50 = vpop.f32.mrb[0].mxu0  ;;  %v1512_v49 = vrot.slane %v15562_v61, 1 }
 0x14d   : > { %11606 = vmatprep.mubr.msk.bf16.mxu0 %vm14970_vm0, %v17537_v0  ;;  %v11484_v51 = vpop.f32.mrb[1].mxu0 }
 0x14e   : > { %v1037_v53 = vpop.f32.mrb[2].mxu0  ;;  %v1513_v50 = vsel %vm1486_vm3, %v1510_v47, %v1512_v49  ;;  %v1514_v51 = vrot.slane %v15567_v63, 1 }
 0x14f   : > { %v11485_v55 = vpop.f32.mrb[3].mxu0 }
 0x150   : > { %v1515_v53 = vsel %vm1486_vm3, %v1512_v49, %v1514_v51  ;;  %v1516_v55 = vrot.slane %v15572_v23, 1 }
 0x154   : > { %11607 = vmatmul.mubr.bf16.gmra.mrb[24].mxu0 %v15527_v54  ;;  %v1517_v54 = vsel %vm1486_vm3, %v1514_v51, %v1516_v55  ;;  %v15747_v51 = vld [vmem:[#allocation2 + $0x58] sm:$0xff]  }
 0x155   : > { %11610 = vmatprep.mubr.msk.bf16.mxu0 %vm14970_vm0, %v17537_v0 }
 0x15c   : > { %11611 = vmatmul.mubr.bf16.gmra.mrb[28].mxu0 %v15532_v16  ;;  %v14854_v16 = vld [vmem:[#allocation2 + $0x80] sm:$0xff]  }
 0x15d   : > { %11614 = vmatprep.mubr.msk.bf16.mxu0 %vm14970_vm0, %v17537_v0 }
 0x164   : > { %11615 = vmatmul.mubr.bf16.gmra.mrb[32].mxu0 %v15537_v18  ;;  %v1518_v18 = vrot.slane %v14854_v16, 1 }
 0x165   : > { %11618 = vmatprep.mubr.msk.bf16.mxu0 %vm14970_vm0, %v17537_v0 }
 0x16c   : > { %11619 = vmatmul.mubr.bf16.gmra.mrb[36].mxu0 %v15542_v56  ;;  %v1519_v56 = vsel %vm1486_vm3, %v1516_v55, %v1518_v18 }
 0x16d   : > { %11622 = vmatprep.mubr.msk.bf16.mxu0 %vm14970_vm0, %v17537_v0 }
 0x174   : > { %11623 = vmatmul.mubr.bf16.gmra.mrb[40].mxu0 %v15547_v57  ;;  %v1520_v57 = vrot.slane %v15580_v62, 1 }
 0x175   : > { %11626 = vmatprep.mubr.msk.bf16.mxu0 %vm14970_vm0, %v17537_v0 }
 0x17c   : > { %11627 = vmatmul.mubr.bf16.gmra.mrb[44].mxu0 %v15552_v58  ;;  %v1521_v58 = vsel %vm1486_vm3, %v1518_v18, %v1520_v57 }
 0x17d   : > { %11630 = vmatprep.mubr.msk.bf16.mxu0 %vm14970_vm0, %v17537_v0 }
 0x184   : > { %11631 = vmatmul.mubr.bf16.gmra.mrb[48].mxu0 %v15557_v60  ;;  %v14855_v60 = vld [vmem:[#allocation2 + $0x90] sm:$0xff]  }
 0x185   : > { %11634 = vmatprep.mubr.msk.bf16.mxu0 %vm14970_vm0, %v17537_v0 }
 0x18c   : > { %11635 = vmatmul.mubr.bf16.gmra.mrb[52].mxu0 %v15562_v61  ;;  %v1522_v61 = vrot.slane %v14855_v60, 1  ;;  %v15765_v60 = vld [vmem:[#allocation2 + $0x70] sm:$0xff]  }
 0x18d   : > { %11638 = vmatprep.mubr.msk.bf16.mxu0 %vm14970_vm0, %v17537_v0 }
 0x194   : > { %11639 = vmatmul.mubr.bf16.gmra.mrb[56].mxu0 %v15567_v63  ;;  %v1523_v63 = vsel %vm1486_vm3, %v1520_v57, %v1522_v61 }
 0x195   : > { %11642 = vmatprep.mubr.msk.bf16.mxu0 %vm14970_vm0, %v17537_v0 }
 0x19c   : > { %11643 = vmatmul.mubr.bf16.gmra.mrb[60].mxu0 %v15572_v23  ;;  %v1524_v23 = vrot.slane %v15449_v5, 1 }
 0x19d   : > { %11646 = vmatprep.mubr.msk.bf16.mxu0 %vm14970_vm0, %v17537_v0 }
 0x1a4   : > { %11647 = vmatmul.mubr.bf16.gmra.mrb[64].mxu0 %v15418_v11  ;;  %v1465_v11 = vld [vmem:[#allocation2] sm:$0xe] }
 0x1a5   : > { %11650 = vmatprep.mubr.msk.bf16.mxu0 %vm14970_vm0, %v17537_v0  ;;  %v10424_v1 = vcombine.low %v1465_v11, %v14853_v25  ;;  %v1525_v11 = vsel %vm1486_vm3, %v1522_v61, %v1524_v23  ;;  %v1830_v25 = vld [vmem:[#allocation2 + $0x8] sm:$0xe]  ;;  %v2016_v61 = vrot.slane %v15765_v60, 1 }
 0x1a7   : > { %v1487_v2 = vrot.slane %v10424_v1, 1  ;;  %v15679_v1 = vld [vmem:[#allocation2 + $0xc] sm:$0xf] }
 0x1ac   : > { %11651 = vmatmul.mubr.bf16.gmra.mrb[68].mxu0 %v15580_v62  ;;  %v1526_v62 = vrot.slane %v15468_v41, 1 }
 0x1ad   : > { %11654 = vmatprep.mubr.msk.bf16.mxu0 %vm14970_vm0, %v17537_v0 }
 0x1b4   : > { %11655 = vmatmul.mubr.bf16.gmra.mrb[72].mxu0 %v15436_v59  ;;  %v1489_v59 = vsel %vm1486_vm3, %v1487_v2, %v1488_v6  ;;  %v15682_v2 = vcombine.low %v1830_v25, %v15679_v1 }
 0x1b5   : > { %11658 = vmatprep.mubr.msk.bf16.mxu0 %vm14970_vm0, %v17537_v0 }
 0x1b6   : > { %v1991_v41 = vrot.slane %v15682_v2, 1 }
 0x1bc   : > { %11659 = vmatmul.mubr.bf16.gmra.mrb[76].mxu0 %v15449_v5  ;;  %v15684_v5 = vld [vmem:[#allocation2 + $0x10] sm:$0xff]  }
 0x1bd   : > { %11662 = vmatprep.mubr.msk.bf16.mxu0 %vm14970_vm0, %v17537_v0  ;;  %v1992_v6 = vrot.slane %v15684_v5, 1 }
 0x1c4   : > { %11663 = vmatmul.mubr.bf16.gmra.mrb[88].mxu0 %v14561_v4  ;;  %v1527_v4 = vsel %vm1486_vm3, %v1524_v23, %v1526_v62  ;;  %v15771_v23 = vld [vmem:[#allocation2 + $0x78] sm:$0xff]  }
 0x1c5   : > { %11682 = vmatprep.mubr.msk.bf16.mxu0 %vm14970_vm0, %v17537_v0 }
 0x1cc   : > { %11683 = vmatmul.mubr.bf16.vlgmr.msra.gmra.mrb[92].mxu0 %v1489_v59  ;;  %v1993_v59 = vsel %vm1486_vm3, %v1991_v41, %v1992_v6 }
 0x1cd   : > { %11767 = vmatpush3.bf16.msra.mxu0 %v14562_v8  ;;  %11686 = vmatprep.mubr.msk.bf16.mxu0 %vm14970_vm0, %v17537_v0  ;;  %v14572_v8 = vld [vmem:[#allocation4 + $0x100] sm:$0xff]  }
 0x1ce   : > { %11768 = vmatprep.subr.bf16.mxu0 %v17537_v0 }
 0x1d1   : > { %11769 = vmatpush3.bf16.msra.mxu0 %v14563_v12  ;;  %v1994_v12 = vrot.slane %v15691_v10, 1 }
 0x1d2   : > { %11770 = vmatprep.subr.bf16.mxu0 %v17537_v0 }
 0x1d4   : > { %11687 = vmatmul.mubr.bf16.gmra.mrb[4].mxu0 %v1491_v13  ;;  %v14575_v13 = vld [vmem:[#allocation4 + $0x108] sm:$0xff]  }
 0x1d5   : > { %11690 = vmatprep.mubr.msk.bf16.mxu0 %vm14970_vm0, %v17537_v0  ;;  %11771 = vmatpush3.bf16.msra.mxu0 %v14564_v14  ;;  %v1995_v14 = vsel %vm1486_vm3, %v1992_v6, %v1994_v12  ;;  %v15783_v6 = vld [vmem:[#allocation2 + $0x88] sm:$0xff]  }
 0x1d6   : > { %11772 = vmatprep.subr.bf16.mxu0 %v17537_v0 }
 0x1d9   : > { %11773 = vmatpush3.bf16.msra.mxu0 %v14565_v17  ;;  %v14579_v17 = vld [vmem:[#allocation4 + $0x110] sm:$0xff]  }
 0x1da   : > { %11774 = vmatprep.subr.bf16.mxu0 %v17537_v0 }
 0x1dc   : > { %11691 = vmatmul.mubr.bf16.gmra.mrb[8].mxu0 %v1493_v19  ;;  %v1996_v19 = vrot.slane %v15698_v15, 1 }
 0x1dd   : > { %11694 = vmatprep.mubr.msk.bf16.mxu0 %vm14970_vm0, %v17537_v0  ;;  %11775 = vmatpush3.bf16.msra.mxu0 %v14566_v34  ;;  %v14583_v34 = vld [vmem:[#allocation4 + $0x118] sm:$0xff]  }
 0x1de   : > { %11776 = vmatprep.subr.bf16.mxu0 %v17537_v0  ;;  %v1997_v20 = vsel %vm1486_vm3, %v1994_v12, %v1996_v19  ;;  %v15789_v12 = vld [vmem:[#allocation2 + $0x90] sm:$0xff]  }
 0x1e1   : > { %11777 = vmatpush3.bf16.msra.mxu0 %v14567_v21  ;;  %v15706_v21 = vld [vmem:[#allocation2 + $0x28] sm:$0xff]  }
 0x1e2   : > { %11778 = vmatprep.subr.bf16.mxu0 %v17537_v0 }
 0x1e4   : > { %11695 = vmatmul.mubr.bf16.gmra.mrb[12].mxu0 %v1495_v22  ;;  %v14586_v22 = vld [vmem:[#allocation4 + $0x120] sm:$0xff]  }
 0x1e5   : > { %11698 = vmatprep.mubr.msk.bf16.mxu0 %vm14970_vm0, %v17537_v0  ;;  %11779 = vmatpush3.bf16.msra.mxu0 %v14568_v24  ;;  %v1998_v24 = vrot.slane %v15706_v21, 1 }
 0x1e6   : > { %11780 = vmatprep.subr.bf16.mxu0 %v17537_v0 }
 0x1e9   : > { %11781 = vmatpush3.bf16.msra.mxu0 %v14569_v27  ;;  %v1999_v27 = vsel %vm1486_vm3, %v1996_v19, %v1998_v24 }
 0x1ea   : > { %11866 = vmatprep.subr.bf16.mxu0 %v17537_v0 }
 0x1ec   : > { %11699 = vmatmul.mubr.bf16.gmra.mrb[16].mxu0 %v1497_v28  ;;  %v15714_v28 = vld [vmem:[#allocation2 + $0x30] sm:$0xff]  }
 0x1ed   : > { %11702 = vmatprep.mubr.msk.bf16.mxu0 %vm14970_vm0, %v17537_v0 }
 0x1ef   : > { %v1192_v32 = vpop.f32.mrb[80].mxu0 }
 0x1f0   : > { %v11564_v33 = vpop.f32.mrb[81].mxu0  ;;  %v2000_v32 = vrot.slane %v15714_v28, 1 }
 0x1f1   : > { %v1194_v52 = vpop.f32.mrb[82].mxu0  ;;  %v14597_v33 = vld [vmem:[#allocation4 + $0x138] sm:$0xff]  }
 0x1f2   : > { %v11565_v9 = vpop.f32.mrb[83].mxu0  ;;  %v2001_v52 = vsel %vm1486_vm3, %v1998_v24, %v2000_v32 }
 0x1f4   : > { %11703 = vmatmul.mubr.bf16.gmra.mrb[20].mxu0 %v1499_v3  ;;  %v15722_v3 = vld [vmem:[#allocation2 + $0x38] sm:$0xff]  }
 0x1f5   : > { %11706 = vmatprep.mubr.msk.bf16.mxu0 %vm14970_vm0, %v17537_v0  ;;  %v2002_v9 = vrot.slane %v15722_v3, 1 }
 0x1f7   : > { %v1303_v36 = vpop.f32.mrb[84].mxu0 }
 0x1f8   : > { %v11584_v30 = vpop.f32.mrb[85].mxu0 }
 0x1f9   : > { %v1305_v37 = vpop.f32.mrb[86].mxu0 }
 0x1fa   : > { %v11585_v31 = vpop.f32.mrb[87].mxu0  ;;  %v2003_v37 = vsel %vm1486_vm3, %v2000_v32, %v2002_v9  ;;  %v2357_v32 = vshrl.u32 %v15682_v2, 16 }
 0x1fc   : > { %11707 = vmatmul.mubr.bf16.gmra.mrb[24].mxu0 %v1501_v38  ;;  %v15729_v38 = vld [vmem:[#allocation2 + $0x40] sm:$0xff]  }
 0x1fd   : > { %11710 = vmatprep.mubr.msk.bf16.mxu0 %vm14970_vm0, %v17537_v0  ;;  %v2004_v39 = vrot.slane %v15729_v38, 1 }
 0x1ff   : > { %v2005_v43 = vsel %vm1486_vm3, %v2002_v9, %v2004_v39  ;;  %v2368_v9 = vshll.u32 %v15684_v5, 16 }
 0x204   : > { %11711 = vmatmul.mubr.bf16.gmra.mrb[28].mxu0 %v1503_v40 }
 0x205   : > { %11714 = vmatprep.mubr.msk.bf16.mxu0 %vm14970_vm0, %v17537_v0 }
 0x20c   : > { %11715 = vmatmul.mubr.bf16.gmra.mrb[32].mxu0 %v1505_v42 }
 0x20d   : > { %11718 = vmatprep.mubr.msk.bf16.mxu0 %vm14970_vm0, %v17537_v0 }
 0x214   : > { %11719 = vmatmul.mubr.bf16.gmra.mrb[36].mxu0 %v1507_v44  ;;  %v15735_v44 = vld [vmem:[#allocation2 + $0x48] sm:$0xff]  }
 0x215   : > { %11722 = vmatprep.mubr.msk.bf16.mxu0 %vm14970_vm0, %v17537_v0 }
 0x21c   : > { %11723 = vmatmul.mubr.bf16.gmra.mrb[40].mxu0 %v1509_v46  ;;  %v2006_v46 = vrot.slane %v15735_v44, 1 }
 0x21d   : > { %11726 = vmatprep.mubr.msk.bf16.mxu0 %vm14970_vm0, %v17537_v0 }
 0x21e   : > { %v2007_v47 = vsel %vm1486_vm3, %v2004_v39, %v2006_v46 }
 0x224   : > { %11727 = vmatmul.mubr.bf16.gmra.mrb[44].mxu0 %v1511_v48  ;;  %v15741_v48 = vld [vmem:[#allocation2 + $0x50] sm:$0xff]  }
 0x225   : > { %11730 = vmatprep.mubr.msk.bf16.mxu0 %vm14970_vm0, %v17537_v0  ;;  %v2008_v49 = vrot.slane %v15741_v48, 1 }
 0x22c   : > { %11731 = vmatmul.mubr.bf16.gmra.mrb[48].mxu0 %v1513_v50  ;;  %v2009_v50 = vsel %vm1486_vm3, %v2006_v46, %v2008_v49 }
 0x22d   : > { %11734 = vmatprep.mubr.msk.bf16.mxu0 %vm14970_vm0, %v17537_v0 }
 0x234   : > { %11735 = vmatmul.mubr.bf16.gmra.mrb[52].mxu0 %v1515_v53  ;;  %v2010_v53 = vrot.slane %v15747_v51, 1 }
 0x235   : > { %11738 = vmatprep.mubr.msk.bf16.mxu0 %vm14970_vm0, %v17537_v0 }
 0x236   : > { %v2011_v55 = vsel %vm1486_vm3, %v2008_v49, %v2010_v53  ;;  %v2386_v49 = vshll.u32 %v15698_v15, 16 }
 0x23c   : > { %11739 = vmatmul.mubr.bf16.gmra.mrb[56].mxu0 %v1517_v54  ;;  %v15753_v54 = vld [vmem:[#allocation2 + $0x60] sm:$0xff]  }
 0x23d   : > { %11742 = vmatprep.mubr.msk.bf16.mxu0 %vm14970_vm0, %v17537_v0  ;;  %v2012_v16 = vrot.slane %v15753_v54, 1 }
 0x23f   : > { %v2013_v18 = vsel %vm1486_vm3, %v2010_v53, %v2012_v16 }
 0x244   : > { %11743 = vmatmul.mubr.bf16.gmra.mrb[60].mxu0 %v1519_v56  ;;  %v15759_v56 = vld [vmem:[#allocation2 + $0x68] sm:$0xff]  }
 0x245   : > { %11746 = vmatprep.mubr.msk.bf16.mxu0 %vm14970_vm0, %v17537_v0  ;;  %v2014_v57 = vrot.slane %v15759_v56, 1 }
 0x24c   : > { %11747 = vmatmul.mubr.bf16.gmra.mrb[64].mxu0 %v1521_v58  ;;  %v2015_v58 = vsel %vm1486_vm3, %v2012_v16, %v2014_v57  ;;  %v2388_v16 = vrot.slane %v2386_v49, 2 }
 0x24d   : > { %11750 = vmatprep.mubr.msk.bf16.mxu0 %vm14970_vm0, %v17537_v0 }
 0x254   : > { %11751 = vmatmul.mubr.bf16.gmra.mrb[68].mxu0 %v1523_v63  ;;  %v2017_v63 = vsel %vm1486_vm3, %v2014_v57, %v2016_v61 }
 0x255   : > { %11754 = vmatprep.mubr.msk.bf16.mxu0 %vm14970_vm0, %v17537_v0 }
 0x25c   : > { %11755 = vmatmul.mubr.bf16.gmra.mrb[72].mxu0 %v1525_v11  ;;  %v2018_v11 = vrot.slane %v15771_v23, 1 }
 0x25d   : > { %11758 = vmatprep.mubr.msk.bf16.mxu0 %vm14970_vm0, %v17537_v0 }
 0x264   : > { %11759 = vmatmul.mubr.bf16.gmra.mrb[76].mxu0 %v1527_v4  ;;  %v15777_v4 = vld [vmem:[#allocation2 + $0x80] sm:$0xff]  }
 0x265   : > { %11762 = vmatprep.mubr.msk.bf16.mxu0 %vm14970_vm0, %v17537_v0  ;;  %v2020_v25 = vrot.slane %v15777_v4, 1 }
 0x267   : > { %v2021_v41 = vsel %vm1486_vm3, %v2018_v11, %v2020_v25 }
 0x26c   : > { %11763 = vmatmul.mubr.bf16.gmra.mrb[96].mxu0 %v1526_v62  ;;  %v2019_v62 = vsel %vm1486_vm3, %v2016_v61, %v2018_v11  ;;  %v2395_v61 = vshll.u32 %v15706_v21, 16 }
 0x26d   : > { %11782 = vmatprep.mubr.msk.bf16.mxu0 %vm14970_vm0, %v17537_v0 }
 0x274   : > { %11783 = vmatmul.mubr.bf16.vlgmr.msra.gmra.mrb[100].mxu0 %v1993_v59  ;;  %v2022_v59 = vrot.slane %v15783_v6, 1 }
 0x275   : > { %11867 = vmatpush3.bf16.msra.mxu0 %v14572_v8  ;;  %11786 = vmatprep.mubr.msk.bf16.mxu0 %vm14970_vm0, %v17537_v0 }
 0x276   : > { %11868 = vmatprep.subr.bf16.mxu0 %v17537_v0  ;;  %v2023_v8 = vsel %vm1486_vm3, %v2020_v25, %v2022_v59  ;;  %v2397_v25 = vrot.slane %v2395_v61, 2  ;;  %v2440_v61 = vshll.u32 %v15741_v48, 16 }
 0x279   : > { %11869 = vmatpush3.bf16.msra.mxu0 %v14575_v13  ;;  %v2024_v13 = vrot.slane %v15789_v12, 1 }
 0x27a   : > { %11870 = vmatprep.subr.bf16.mxu0 %v17537_v0 }
 0x27c   : > { %11787 = vmatmul.mubr.bf16.gmra.mrb[4].mxu0 %v1995_v14  ;;  %v2025_v14 = vsel %vm1486_vm3, %v2022_v59, %v2024_v13 }
 0x27d   : > { %11790 = vmatprep.mubr.msk.bf16.mxu0 %vm14970_vm0, %v17537_v0  ;;  %11871 = vmatpush3.bf16.msra.mxu0 %v14579_v17  ;;  %v15795_v17 = vld [vmem:[#allocation2 + $0x98] sm:$0xff]  }
 0x27e   : > { %11872 = vmatprep.subr.bf16.mxu0 %v17537_v0  ;;  %v2026_v19 = vrot.slane %v15795_v17, 1 }
 0x281   : > { %11873 = vmatpush3.bf16.msra.mxu0 %v14583_v34  ;;  %v2027_v34 = vsel %vm1486_vm3, %v2024_v13, %v2026_v19  ;;  %v2404_v13 = vshll.u32 %v15714_v28, 16 }
 0x282   : > { %11874 = vmatprep.subr.bf16.mxu0 %v17537_v0 }
 0x284   : > { %11791 = vmatmul.mubr.bf16.gmra.mrb[8].mxu0 %v1997_v20  ;;  %v15801_v20 = vld [vmem:[#allocation2 + $0xa0] sm:$0xff]  }
 0x285   : > { %11794 = vmatprep.mubr.msk.bf16.mxu0 %vm14970_vm0, %v17537_v0  ;;  %11875 = vmatpush3.bf16.msra.mxu0 %v14586_v22  ;;  %v2028_v22 = vrot.slane %v15801_v20, 1 }
 0x286   : > { %11876 = vmatprep.subr.bf16.mxu0 %v17537_v0 }
 0x287   : > { %v2029_v24 = vsel %vm1486_vm3, %v2026_v19, %v2028_v22 }
 0x289   : > { %11877 = vmatpush3.bf16.msra.mxu0 %v14590_v26  ;;  %v14598_v26 = vld [vmem:[#allocation2 + $0xa8] ss:$0 sps:$4 sm:$0x77]  }
 0x28a   : > { %11878 = vmatprep.subr.bf16.mxu0 %v17537_v0 }
 0x28c   : > { %11795 = vmatmul.mubr.bf16.gmra.mrb[12].mxu0 %v1999_v27  ;;  %v2030_v27 = vrot.slane %v14598_v26, 1 }
 0x28d   : > { %11798 = vmatprep.mubr.msk.bf16.mxu0 %vm14970_vm0, %v17537_v0  ;;  %11879 = vmatpush3.bf16.msra.mxu0 %v14593_v29 }
 0x28e   : > { %11880 = vmatprep.subr.bf16.mxu0 %v17537_v0  ;;  %v2031_v29 = vsel %vm1486_vm3, %v2028_v22, %v2030_v27  ;;  %v2406_v22 = vrot.slane %v2404_v13, 2 }
 0x291   : > { %11881 = vmatpush3.bf16.msra.mxu0 %v14597_v33  ;;  %v2360_v33 = vshll.u32 %v15682_v2, 16 }
 0x292   : > { %11966 = vmatprep.subr.bf16.mxu0 %v17537_v0 }
 0x294   : > { %11799 = vmatmul.mubr.bf16.gmra.mrb[16].mxu0 %v2001_v52  ;;  %v2365_v52 = vshrl.u32 %v15684_v5, 16 }
 0x295   : > { %11802 = vmatprep.mubr.msk.bf16.mxu0 %vm14970_vm0, %v17537_v0 }
 0x297   : > { %v1460_v35 = vpop.f32.mrb[88].mxu0 }
 0x298   : > { %v11664_v36 = vpop.f32.mrb[89].mxu0  ;;  %v2359_v35 = vrot.slane %v2357_v32, 1  ;;  %v14606_v32 = vld [vmem:[#allocation4 + $0x178] sm:$0xff]  }
 0x299   : > { %v1462_v30 = vpop.f32.mrb[90].mxu0  ;;  %v2362_v36 = vrot.slane %v2360_v33, 2 }
 0x29a   : > { %v11665_v31 = vpop.f32.mrb[91].mxu0  ;;  %v2367_v30 = vrot.slane %v2365_v52, 1 }
 0x29b   : > { %v2363_v31 = vor.u32 %v2362_v36, %v2359_v35  ;;  %v2419_v36 = vshrl.u32 %v15729_v38, 16 }
 0x29c   : > { %11803 = vmatmul.mubr.bf16.gmra.mrb[20].mxu0 %v2003_v37  ;;  %v2370_v37 = vrot.slane %v2368_v9, 2 }
 0x29d   : > { %11806 = vmatprep.mubr.msk.bf16.mxu0 %vm14970_vm0, %v17537_v0 }
 0x29e   : > { %v2371_v39 = vor.u32 %v2370_v37, %v2367_v30  ;;  %v2422_v30 = vshll.u32 %v15729_v38, 16 }
 0x29f   : > { %v1631_v40 = vpop.f32.mrb[92].mxu0 }
 0x2a0   : > { %v11684_v7 = vpop.f32.mrb[93].mxu0  ;;  %v2374_v40 = vshrl.u32 %v15691_v10, 16  ;;  %v2372_v2 = vsel %vm2355_vm5, %v2363_v31, %v2371_v39 }
 0x2a1   : > { %v1633_v42 = vpop.f32.mrb[94].mxu0  ;;  %v2377_v7 = vshll.u32 %v15691_v10, 16 }
 0x2a2   : > { %v11685_v45 = vpop.f32.mrb[95].mxu0  ;;  %v14599_v42 = vld [vmem:[#allocation4 + $0x140] sm:$0xff]  }
 0x2a3   : > { %v2379_v45 = vrot.slane %v2377_v7, 2  ;;  %v2421_v7 = vrot.slane %v2419_v36, 1 }
 0x2a4   : > { %11807 = vmatmul.mubr.bf16.gmra.mrb[24].mxu0 %v2005_v43  ;;  %v2376_v43 = vrot.slane %v2374_v40, 1 }
 0x2a5   : > { %11810 = vmatprep.mubr.msk.bf16.mxu0 %vm14970_vm0, %v17537_v0 }
 0x2a6   : > { %v2380_v46 = vor.u32 %v2379_v45, %v2376_v43  ;;  %v2428_v45 = vshrl.u32 %v15735_v44, 16 }
 0x2a8   : > { %v2381_v53 = vsel %vm2355_vm5, %v2371_v39, %v2380_v46 }
 0x2ac   : > { %11811 = vmatmul.mubr.bf16.gmra.mrb[28].mxu0 %v2007_v47  ;;  %v2383_v47 = vshrl.u32 %v15698_v15, 16 }
 0x2ad   : > { %11814 = vmatprep.mubr.msk.bf16.mxu0 %vm14970_vm0, %v17537_v0 }
 0x2b4   : > { %11815 = vmatmul.mubr.bf16.gmra.mrb[32].mxu0 %v2009_v50  ;;  %v14600_v50 = vld [vmem:[#allocation4 + $0x148] sm:$0xff]  }
 0x2b5   : > { %11818 = vmatprep.mubr.msk.bf16.mxu0 %vm14970_vm0, %v17537_v0 }
 0x2bc   : > { %11819 = vmatmul.mubr.bf16.gmra.mrb[36].mxu0 %v2011_v55  ;;  %v2385_v55 = vrot.slane %v2383_v47, 1 }
 0x2bd   : > { %11822 = vmatprep.mubr.msk.bf16.mxu0 %vm14970_vm0, %v17537_v0 }
 0x2be   : > { %v2389_v57 = vor.u32 %v2388_v16, %v2385_v55  ;;  %v2430_v55 = vrot.slane %v2428_v45, 1 }
 0x2c0   : > { %v2390_v11 = vsel %vm2355_vm5, %v2380_v46, %v2389_v57  ;;  %v2431_v46 = vshll.u32 %v15735_v44, 16 }
 0x2c2   : > { %v2433_v16 = vrot.slane %v2431_v46, 2 }
 0x2c4   : > { %11823 = vmatmul.mubr.bf16.gmra.mrb[40].mxu0 %v2013_v18  ;;  %v14601_v18 = vld [vmem:[#allocation4 + $0x150] sm:$0xff]  }
 0x2c5   : > { %11826 = vmatprep.mubr.msk.bf16.mxu0 %vm14970_vm0, %v17537_v0 }
 0x2cc   : > { %11827 = vmatmul.mubr.bf16.gmra.mrb[44].mxu0 %v2015_v58  ;;  %v2392_v58 = vshrl.u32 %v15706_v21, 16 }
 0x2cd   : > { %11830 = vmatprep.mubr.msk.bf16.mxu0 %vm14970_vm0, %v17537_v0 }
 0x2d4   : > { %11831 = vmatmul.mubr.bf16.gmra.mrb[48].mxu0 %v2017_v63  ;;  %v14602_v63 = vld [vmem:[#allocation4 + $0x158] sm:$0xff]  }
 0x2d5   : > { %11834 = vmatprep.mubr.msk.bf16.mxu0 %vm14970_vm0, %v17537_v0 }
 0x2dc   : > { %11835 = vmatmul.mubr.bf16.gmra.mrb[52].mxu0 %v2019_v62  ;;  %v2394_v62 = vrot.slane %v2392_v58, 1  ;;  %v2437_v58 = vshrl.u32 %v15741_v48, 16 }
 0x2dd   : > { %11838 = vmatprep.mubr.msk.bf16.mxu0 %vm14970_vm0, %v17537_v0 }
 0x2de   : > { %v2398_v59 = vor.u32 %v2397_v25, %v2394_v62  ;;  %v2442_v62 = vrot.slane %v2440_v61, 2 }
 0x2e0   : > { %v2399_v19 = vsel %vm2355_vm5, %v2389_v57, %v2398_v59  ;;  %v2434_v57 = vor.u32 %v2433_v16, %v2430_v55 }
 0x2e4   : > { %11839 = vmatmul.mubr.bf16.gmra.mrb[56].mxu0 %v2021_v41  ;;  %v14603_v41 = vld [vmem:[#allocation4 + $0x160] sm:$0xff]  }
 0x2e5   : > { %11842 = vmatprep.mubr.msk.bf16.mxu0 %vm14970_vm0, %v17537_v0 }
 0x2ec   : > { %11843 = vmatmul.mubr.bf16.gmra.mrb[60].mxu0 %v2023_v8  ;;  %v2401_v8 = vshrl.u32 %v15714_v28, 16 }
 0x2ed   : > { %11846 = vmatprep.mubr.msk.bf16.mxu0 %vm14970_vm0, %v17537_v0 }
 0x2f4   : > { %11847 = vmatmul.mubr.bf16.gmra.mrb[64].mxu0 %v2025_v14  ;;  %v14604_v14 = vld [vmem:[#allocation4 + $0x168] sm:$0xff]  }
 0x2f5   : > { %11850 = vmatprep.mubr.msk.bf16.mxu0 %vm14970_vm0, %v17537_v0 }
 0x2fc   : > { %11851 = vmatmul.mubr.bf16.gmra.mrb[68].mxu0 %v2027_v34  ;;  %v2403_v34 = vrot.slane %v2401_v8, 1 }
 0x2fd   : > { %11854 = vmatprep.mubr.msk.bf16.mxu0 %vm14970_vm0, %v17537_v0 }
 0x2fe   : > { %v2407_v26 = vor.u32 %v2406_v22, %v2403_v34  ;;  %v2455_v34 = vshrl.u32 %v15753_v54, 16  ;;  %v2458_v22 = vshll.u32 %v15753_v54, 16 }
 0x300   : > { %v2408_v33 = vsel %vm2355_vm5, %v2398_v59, %v2407_v26  ;;  %v2449_v59 = vshll.u32 %v15747_v51, 16 }
 0x304   : > { %11855 = vmatmul.mubr.bf16.gmra.mrb[72].mxu0 %v2029_v24  ;;  %v14605_v24 = vld [vmem:[#allocation4 + $0x170] sm:$0xff]  }
 0x305   : > { %11858 = vmatprep.mubr.msk.bf16.mxu0 %vm14970_vm0, %v17537_v0 }
 0x30c   : > { %11859 = vmatmul.mubr.bf16.gmra.mrb[76].mxu0 %v2031_v29  ;;  %v2413_v29 = vshll.u32 %v15722_v3, 16 }
 0x30d   : > { %11862 = vmatprep.mubr.msk.bf16.mxu0 %vm14970_vm0, %v17537_v0 }
 0x30e   : > { %v2415_v9 = vrot.slane %v2413_v29, 2 }
 0x314   : > { %11863 = vmatmul.mubr.bf16.gmra.mrb[104].mxu0 %v2030_v27  ;;  %v2410_v27 = vshrl.u32 %v15722_v3, 16 }
 0x315   : > { %11882 = vmatprep.mubr.msk.bf16.mxu0 %vm14970_vm0, %v17537_v0 }
 0x316   : > { %v2412_v52 = vrot.slane %v2410_v27, 1  ;;  %v2460_v27 = vrot.slane %v2458_v22, 2 }
 0x318   : > { %v2416_v35 = vor.u32 %v2415_v9, %v2412_v52 }
 0x31a   : > { %v2417_v40 = vsel %vm2355_vm5, %v2407_v26, %v2416_v35  ;;  %v2457_v26 = vrot.slane %v2455_v34, 1  ;;  %v2521_v34 = vshll.u32 %v15795_v17, 16 }
 0x31c   : > { %11883 = vmatmul.mubr.bf16.vlgmr.msra.gmra.mrb[108].mxu0 %v2372_v2  ;;  %v2424_v2 = vrot.slane %v2422_v30, 2  ;;  %v2461_v29 = vor.u32 %v2460_v27, %v2457_v26  ;;  %v2473_v30 = vshrl.u32 %v15765_v60, 16  ;;  %v2523_v26 = vrot.slane %v2521_v34, 2 }
 0x31d   : > { %11967 = vmatpush3.bf16.msra.mxu0 %v14599_v42  ;;  %11886 = vmatprep.mubr.msk.bf16.mxu0 %vm14970_vm0, %v17537_v0 }
 0x31e   : > { %11968 = vmatprep.subr.bf16.mxu0 %v17537_v0  ;;  %v2425_v43 = vor.u32 %v2424_v2, %v2421_v7  ;;  %v2482_v2 = vshrl.u32 %v15771_v23, 16 }
 0x320   : > { %v2484_v45 = vrot.slane %v2482_v2, 1 }
 0x321   : > { %11969 = vmatpush3.bf16.msra.mxu0 %v14600_v50 }
 0x322   : > { %11970 = vmatprep.subr.bf16.mxu0 %v17537_v0 }
 0x324   : > { %11887 = vmatmul.mubr.bf16.gmra.mrb[4].mxu0 %v2381_v53  ;;  %v2426_v53 = vsel %vm2355_vm5, %v2416_v35, %v2425_v43 }
 0x325   : > { %11890 = vmatprep.mubr.msk.bf16.mxu0 %vm14970_vm0, %v17537_v0  ;;  %11971 = vmatpush3.bf16.msra.mxu0 %v14601_v18 }
 0x326   : > { %11972 = vmatprep.subr.bf16.mxu0 %v17537_v0 }
 0x329   : > { %11973 = vmatpush3.bf16.msra.mxu0 %v14602_v63  ;;  %v2435_v63 = vsel %vm2355_vm5, %v2425_v43, %v2434_v57 }
 0x32a   : > { %11974 = vmatprep.subr.bf16.mxu0 %v17537_v0 }
 0x32c   : > { %11891 = vmatmul.mubr.bf16.gmra.mrb[8].mxu0 %v2390_v11  ;;  %v2439_v11 = vrot.slane %v2437_v58, 1  ;;  %v2503_v58 = vshll.u32 %v15783_v6, 16 }
 0x32d   : > { %11894 = vmatprep.mubr.msk.bf16.mxu0 %vm14970_vm0, %v17537_v0  ;;  %11975 = vmatpush3.bf16.msra.mxu0 %v14603_v41  ;;  %v2446_v41 = vshrl.u32 %v15747_v51, 16 }
 0x32e   : > { %11976 = vmatprep.subr.bf16.mxu0 %v17537_v0  ;;  %v2443_v25 = vor.u32 %v2442_v62, %v2439_v11  ;;  %v2505_v11 = vrot.slane %v2503_v58, 2  ;;  %v14614_v58 = vld [vmem:[#allocation4 + $0x1a8] sm:$0xff]  }
 0x32f   : > { %v2448_v13 = vrot.slane %v2446_v41, 1  ;;  %v2512_v41 = vshll.u32 %v15789_v12, 16 }
 0x330   : > { %v2444_v8 = vsel %vm2355_vm5, %v2434_v57, %v2443_v25  ;;  %v2500_v57 = vshrl.u32 %v15783_v6, 16 }
 0x331   : > { %11977 = vmatpush3.bf16.msra.mxu0 %v14604_v14  ;;  %v2451_v14 = vrot.slane %v2449_v59, 2 }
 0x332   : > { %11978 = vmatprep.subr.bf16.mxu0 %v17537_v0 }
 0x334   : > { %11895 = vmatmul.mubr.bf16.gmra.mrb[12].mxu0 %v2399_v19  ;;  %v2452_v19 = vor.u32 %v2451_v14, %v2448_v13  ;;  %v2514_v13 = vrot.slane %v2512_v41, 2 }
 0x335   : > { %11898 = vmatprep.mubr.msk.bf16.mxu0 %vm14970_vm0, %v17537_v0  ;;  %11979 = vmatpush3.bf16.msra.mxu0 %v14605_v24 }
 0x336   : > { %11980 = vmatprep.subr.bf16.mxu0 %v17537_v0  ;;  %v2453_v24 = vsel %vm2355_vm5, %v2443_v25, %v2452_v19  ;;  %v2462_v52 = vsel %vm2355_vm5, %v2452_v19, %v2461_v29  ;;  %v2509_v25 = vshrl.u32 %v15789_v12, 16  ;;  %v2518_v19 = vshrl.u32 %v15795_v17, 16 }
 0x339   : > { %11981 = vmatpush3.bf16.msra.mxu0 %v14606_v32  ;;  %v2464_v32 = vshrl.u32 %v15759_v56, 16 }
 0x33a   : > { %12066 = vmatprep.subr.bf16.mxu0 %v17537_v0 }
 0x33b   : > { %v2466_v9 = vrot.slane %v2464_v32, 1  ;;  %v2530_v32 = vshll.u32 %v15801_v20, 16 }
 0x33c   : > { %11899 = vmatmul.mubr.bf16.gmra.mrb[16].mxu0 %v2408_v33  ;;  %v2467_v33 = vshll.u32 %v15759_v56, 16 }
 0x33d   : > { %11902 = vmatprep.mubr.msk.bf16.mxu0 %vm14970_vm0, %v17537_v0 }
 0x33e   : > { %v2469_v35 = vrot.slane %v2467_v33, 2 }
 0x33f   : > { %v1788_v37 = vpop.f32.mrb[96].mxu0 }
 0x340   : > { %v11764_v31 = vpop.f32.mrb[97].mxu0  ;;  %v2470_v36 = vor.u32 %v2469_v35, %v2466_v9  ;;  %v2476_v37 = vshll.u32 %v15765_v60, 16  ;;  %v2532_v9 = vrot.slane %v2530_v32, 2  ;;  %v15914_v35 = vld [vmem:[#allocation2 + $0xa8] ss:$0 sps:$4 sm:$0xff]  }
 0x341   : > { %v1790_v39 = vpop.f32.mrb[98].mxu0 }
 0x342   : > { %v11765_v42 = vpop.f32.mrb[99].mxu0  ;;  %v2471_v31 = vsel %vm2355_vm5, %v2461_v29, %v2470_v36  ;;  %v2475_v39 = vrot.slane %v2473_v30, 1  ;;  %v2527_v29 = vshrl.u32 %v15801_v20, 16  ;;  %v2536_v30 = vshrl.u32 %v15914_v35, 16 }
 0x343   : > { %v2485_v42 = vshll.u32 %v15771_v23, 16 }
 0x344   : > { %11903 = vmatmul.mubr.bf16.gmra.mrb[20].mxu0 %v2417_v40  ;;  %v2478_v40 = vrot.slane %v2476_v37, 2  ;;  %v2539_v37 = vshll.u32 %v15914_v35, 16 }
 0x345   : > { %11906 = vmatprep.mubr.msk.bf16.mxu0 %vm14970_vm0, %v17537_v0  ;;  %v2487_v46 = vrot.slane %v2485_v42, 2  ;;  %v2846_v42 = vld [vmem:[#allocation2 + $0x8] sm:$0xc] }
 0x346   : > { %v2479_v7 = vor.u32 %v2478_v40, %v2475_v39  ;;  %v2538_v39 = vrot.slane %v2536_v30, 1  ;;  %v2541_v40 = vrot.slane %v2539_v37, 2 }
 0x347   : > { %v2135_v47 = vpop.f32.mrb[100].mxu0 }
 0x348   : > { %v11784_v49 = vpop.f32.mrb[101].mxu0  ;;  %v2480_v43 = vsel %vm2355_vm5, %v2470_v36, %v2479_v7  ;;  %v2488_v47 = vor.u32 %v2487_v46, %v2484_v45  ;;  %v2869_v46 = vrot.slane %v15684_v5, 2  ;;  %v2873_v5 = vrot.slane %v15698_v15, 2 }
 0x349   : > { %v2137_v50 = vpop.f32.mrb[102].mxu0  ;;  %v2491_v49 = vshrl.u32 %v15777_v4, 16 }
 0x34a   : > { %v11785_v18 = vpop.f32.mrb[103].mxu0  ;;  %v2494_v50 = vshll.u32 %v15777_v4, 16 }
 0x34b   : > { %v2493_v55 = vrot.slane %v2491_v49, 1  ;;  %v14609_v49 = vld [vmem:[#allocation4 + $0x180] sm:$0xff]  }
 0x34c   : > { %11907 = vmatmul.mubr.bf16.gmra.mrb[24].mxu0 %v2426_v53  ;;  %v2489_v53 = vsel %vm2355_vm5, %v2479_v7, %v2488_v47  ;;  %v2496_v16 = vrot.slane %v2494_v50, 2  ;;  %v2542_v7 = vor.u32 %v2541_v40, %v2538_v39  ;;  %v2871_v50 = vrot.slane %v15691_v10, 2 }
 0x34d   : > { %11910 = vmatprep.mubr.msk.bf16.mxu0 %vm14970_vm0, %v17537_v0 }
 0x34e   : > { %v2497_v18 = vor.u32 %v2496_v16, %v2493_v55  ;;  %v14611_v55 = vld [vmem:[#allocation4 + $0x190] sm:$0xff]   ;;  %v14612_v16 = vld [vmem:[#allocation4 + $0x198] sm:$0xff]   ;;  %v2874_v10 = vsel %vm2867_vm6, %v2871_v50, %v2873_v5 }
 0x350   : > { %v2498_v61 = vsel %vm2355_vm5, %v2488_v47, %v2497_v18 }
 0x354   : > { %11911 = vmatmul.mubr.bf16.gmra.mrb[28].mxu0 %v2435_v63  ;;  %v2502_v63 = vrot.slane %v2500_v57, 1  ;;  %v2875_v57 = vrot.slane %v15706_v21, 2 }
 0x355   : > { %11914 = vmatprep.mubr.msk.bf16.mxu0 %vm14970_vm0, %v17537_v0 }
 0x356   : > { %v2506_v62 = vor.u32 %v2505_v11, %v2502_v63  ;;  %v2876_v15 = vsel %vm2867_vm6, %v2873_v5, %v2875_v57  ;;  %v2877_v63 = vrot.slane %v15714_v28, 2  ;;  %v14616_v11 = vld [vmem:[#allocation4 + $0x1b8] sm:$0xff]  }
 0x358   : > { %v2507_v59 = vsel %vm2355_vm5, %v2497_v18, %v2506_v62  ;;  %v14613_v18 = vld [vmem:[#allocation4 + $0x1a0] sm:$0xff]   ;;  %v2878_v21 = vsel %vm2867_vm6, %v2875_v57, %v2877_v63  ;;  %v14637_v57 = vld [vmem:[#allocation4 + $0x1e8] sm:$0xff]  }
 0x35c   : > { %11915 = vmatmul.mubr.bf16.gmra.mrb[32].mxu0 %v2444_v8  ;;  %v2511_v8 = vrot.slane %v2509_v25, 1 }
 0x35d   : > { %11918 = vmatprep.mubr.msk.bf16.mxu0 %vm14970_vm0, %v17537_v0 }
 0x35e   : > { %v2515_v14 = vor.u32 %v2514_v13, %v2511_v8  ;;  %v2881_v13 = vrot.slane %v15729_v38, 2  ;;  %v2885_v38 = vrot.slane %v15741_v48, 2  ;;  %v2891_v48 = vrot.slane %v15759_v56, 2 }
 0x35f   : > { %v2897_v56 = vrot.slane %v15777_v4, 2  ;;  %v2903_v4 = vrot.slane %v15795_v17, 2  ;;  %v14617_v17 = vld [vmem:[#allocation2 + $0x10] sm:$0xfc]  }
 0x360   : > { %v2516_v22 = vsel %vm2355_vm5, %v2506_v62, %v2515_v14  ;;  %v2879_v62 = vrot.slane %v15722_v3, 2  ;;  %v2883_v3 = vrot.slane %v15735_v44, 2  ;;  %v2889_v44 = vrot.slane %v15753_v54, 2 }
 0x361   : > { %v2895_v54 = vrot.slane %v15771_v23, 2  ;;  %v2901_v23 = vrot.slane %v15789_v12, 2  ;;  %v2907_v12 = vrot.slane %v15914_v35, 2 }
 0x362   : > { %v2880_v28 = vsel %vm2867_vm6, %v2877_v63, %v2879_v62 }
 0x363   : > { %v2898_v30 = vsel %vm2867_vm6, %v2895_v54, %v2897_v56  ;;  %v2904_v39 = vsel %vm2867_vm6, %v2901_v23, %v2903_v4 }
 0x364   : > { %11919 = vmatmul.mubr.bf16.gmra.mrb[36].mxu0 %v2453_v24  ;;  %v2520_v24 = vrot.slane %v2518_v19, 1 }
 0x365   : > { %11922 = vmatprep.mubr.msk.bf16.mxu0 %vm14970_vm0, %v17537_v0 }
 0x366   : > { %v2524_v27 = vor.u32 %v2523_v26, %v2520_v24  ;;  %v2884_v26 = vsel %vm2867_vm6, %v2881_v13, %v2883_v3 }
 0x368   : > { %v2525_v33 = vsel %vm2355_vm5, %v2515_v14, %v2524_v27 }
 0x36c   : > { %11923 = vmatmul.mubr.bf16.gmra.mrb[40].mxu0 %v2462_v52  ;;  %v2529_v52 = vrot.slane %v2527_v29, 1  ;;  %v2887_v29 = vrot.slane %v15747_v51, 2  ;;  %v2893_v51 = vrot.slane %v15765_v60, 2  ;;  %v2899_v60 = vrot.slane %v15783_v6, 2 }
 0x36d   : > { %11926 = vmatprep.mubr.msk.bf16.mxu0 %vm14970_vm0, %v17537_v0  ;;  %v2905_v6 = vrot.slane %v15801_v20, 2  ;;  %v3372_v20 = vrot.slane %v14617_v17, 2  ;;  %v14639_v17 = vld [vmem:[#allocation2 + $0x90] sm:$0xff]  }
 0x36e   : > { %v2533_v36 = vor.u32 %v2532_v9, %v2529_v52  ;;  %v2888_v32 = vsel %vm2867_vm6, %v2885_v38, %v2887_v29  ;;  %v2892_v52 = vsel %vm2867_vm6, %v2889_v44, %v2891_v48  ;;  %v2894_v9 = vsel %vm2867_vm6, %v2891_v48, %v2893_v51  ;;  %v14631_v48 = vld [vmem:[#allocation2 + $0x60] sm:$0xff]  }
 0x36f   : > { %v2900_v37 = vsel %vm2867_vm6, %v2897_v56, %v2899_v60  ;;  %v2906_v40 = vsel %vm2867_vm6, %v2903_v4, %v2905_v6  ;;  %v14634_v56 = vld [vmem:[#allocation2 + $0x70] sm:$0xff]   ;;  %v14636_v4 = vld [vmem:[#allocation2 + $0x80] sm:$0xff]  }
 0x370   : > { %v2543_v2 = vsel %vm2355_vm5, %v2533_v36, %v2542_v7 }
 0x374   : > { %11927 = vmatmul.mubr.bf16.gmra.mrb[44].mxu0 %v2471_v31  ;;  %v2534_v31 = vsel %vm2355_vm5, %v2524_v27, %v2533_v36  ;;  %v2886_v27 = vsel %vm2867_vm6, %v2883_v3, %v2885_v38  ;;  %v2896_v36 = vsel %vm2867_vm6, %v2893_v51, %v2895_v54 }
 0x375   : > { %11930 = vmatprep.mubr.msk.bf16.mxu0 %vm14970_vm0, %v17537_v0 }
 0x37c   : > { %11931 = vmatmul.mubr.bf16.gmra.mrb[48].mxu0 %v2480_v43  ;;  %v10471_v43 = vcombine.low %v2846_v42, %v15679_v1  ;;  %v2872_v1 = vsel %vm2867_vm6, %v2869_v46, %v2871_v50  ;;  %v14621_v50 = vld [vmem:[#allocation2 + $0x28] sm:$0xff]  }
 0x37d   : > { %11934 = vmatprep.mubr.msk.bf16.mxu0 %vm14970_vm0, %v17537_v0 }
 0x37e   : > { %v2868_v45 = vrot.slane %v10471_v43, 2 }
 0x380   : > { %v2870_v47 = vsel %vm2867_vm6, %v2868_v45, %v2869_v46  ;;  %v14619_v45 = vld [vmem:[#allocation4 + $0x1c0] sm:$0xff]   ;;  %v14620_v46 = vld [vmem:[#allocation2 + $0x20] sm:$0xff]  }
 0x381   : > { %v3375_v35 = vrot.slane %v14620_v46, 2  ;;  %v14642_v46 = vld [vmem:[#allocation2 + $0xa0] sm:$0xff]  }
 0x384   : > { %11935 = vmatmul.mubr.bf16.gmra.mrb[52].mxu0 %v2489_v53  ;;  %v14610_v53 = vld [vmem:[#allocation4 + $0x188] sm:$0xff]  }
 0x385   : > { %11938 = vmatprep.mubr.msk.bf16.mxu0 %vm14970_vm0, %v17537_v0 }
 0x38c   : > { %11939 = vmatmul.mubr.bf16.gmra.mrb[56].mxu0 %v2498_v61  ;;  %v14615_v61 = vld [vmem:[#allocation4 + $0x1b0] sm:$0xff]  }
 0x38d   : > { %11942 = vmatprep.mubr.msk.bf16.mxu0 %vm14970_vm0, %v17537_v0 }
 0x394   : > { %11943 = vmatmul.mubr.bf16.gmra.mrb[60].mxu0 %v2507_v59 }
 0x395   : > { %11946 = vmatprep.mubr.msk.bf16.mxu0 %vm14970_vm0, %v17537_v0 }
 0x39c   : > { %11947 = vmatmul.mubr.bf16.gmra.mrb[64].mxu0 %v2516_v22  ;;  %v2882_v22 = vsel %vm2867_vm6, %v2879_v62, %v2881_v13  ;;  %v14625_v62 = vld [vmem:[#allocation2 + $0x40] sm:$0xff]   ;;  %v14627_v13 = vld [vmem:[#allocation2 + $0x48] sm:$0xff]  }
 0x39d   : > { %11950 = vmatprep.mubr.msk.bf16.mxu0 %vm14970_vm0, %v17537_v0 }
 0x3a4   : > { %11951 = vmatmul.mubr.bf16.gmra.mrb[68].mxu0 %v2525_v33  ;;  %v2890_v33 = vsel %vm2867_vm6, %v2887_v29, %v2889_v44 }
 0x3a5   : > { %11954 = vmatprep.mubr.msk.bf16.mxu0 %vm14970_vm0, %v17537_v0 }
 0x3ac   : > { %11955 = vmatmul.mubr.bf16.gmra.mrb[72].mxu0 %v2534_v31  ;;  %v2902_v31 = vsel %vm2867_vm6, %v2899_v60, %v2901_v23 }
 0x3ad   : > { %11958 = vmatprep.mubr.msk.bf16.mxu0 %vm14970_vm0, %v17537_v0 }
 0x3b4   : > { %11959 = vmatmul.mubr.bf16.gmra.mrb[76].mxu0 %v2543_v2  ;;  %v14618_v2 = vld [vmem:[#allocation2 + $0x18] sm:$0xff]  }
 0x3b5   : > { %11962 = vmatprep.mubr.msk.bf16.mxu0 %vm14970_vm0, %v17537_v0  ;;  %v3373_v42 = vrot.slane %v14618_v2, 2  ;;  %v3403_v2 = vrot.slane %v14639_v17, 2  ;;  %v14669_v17 = vld [vmem:[#allocation4 + $0x230] sm:$0xff]  }
 0x3b7   : > { %v3374_v43 = vsel %vm2867_vm6, %v3372_v20, %v3373_v42 }
 0x3bc   : > { %11963 = vmatmul.mubr.bf16.gmra.mrb[112].mxu0 %v2542_v7  ;;  %v2908_v7 = vsel %vm2867_vm6, %v2905_v6, %v2907_v12 }
 0x3bd   : > { %11982 = vmatprep.mubr.msk.bf16.mxu0 %vm14970_vm0, %v17537_v0 }
 0x3c4   : > { %11983 = vmatmul.mubr.bf16.vlgmr.msra.gmra.mrb[116].mxu0 %v2870_v47  ;;  %v14622_v47 = vld [vmem:[#allocation4 + $0x1c8] sm:$0xff]  }
 0x3c5   : > { %12067 = vmatpush3.bf16.msra.mxu0 %v14609_v49  ;;  %11986 = vmatprep.mubr.msk.bf16.mxu0 %vm14970_vm0, %v17537_v0  ;;  %v3376_v49 = vsel %vm2867_vm6, %v3373_v42, %v3375_v35  ;;  %v14641_v42 = vld [vmem:[#allocation2 + $0x98] sm:$0xff]  }
 0x3c6   : > { %12068 = vmatprep.subr.bf16.mxu0 %v17537_v0 }
 0x3c9   : > { %12069 = vmatpush3.bf16.msra.mxu0 %v14610_v53  ;;  %v14626_v53 = vld [vmem:[#allocation4 + $0x1d0] sm:$0xff]  }
 0x3ca   : > { %12070 = vmatprep.subr.bf16.mxu0 %v17537_v0 }
 0x3cc   : > { %11987 = vmatmul.mubr.bf16.gmra.mrb[4].mxu0 %v2872_v1  ;;  %v3377_v1 = vrot.slane %v14621_v50, 2 }
 0x3cd   : > { %11990 = vmatprep.mubr.msk.bf16.mxu0 %vm14970_vm0, %v17537_v0  ;;  %12071 = vmatpush3.bf16.msra.mxu0 %v14611_v55  ;;  %v14630_v55 = vld [vmem:[#allocation4 + $0x1d8] sm:$0xff]  }
 0x3ce   : > { %12072 = vmatprep.subr.bf16.mxu0 %v17537_v0  ;;  %v3378_v5 = vsel %vm2867_vm6, %v3375_v35, %v3377_v1  ;;  %v3407_v35 = vrot.slane %v14642_v46, 2 }
 0x3d1   : > { %12073 = vmatpush3.bf16.msra.mxu0 %v14612_v16  ;;  %v14623_v16 = vld [vmem:[#allocation2 + $0x30] sm:$0xff]  }
 0x3d2   : > { %12074 = vmatprep.subr.bf16.mxu0 %v17537_v0 }
 0x3d4   : > { %11991 = vmatmul.mubr.bf16.gmra.mrb[8].mxu0 %v2874_v10  ;;  %v14633_v10 = vld [vmem:[#allocation4 + $0x1e0] sm:$0xff]  }
 0x3d5   : > { %11994 = vmatprep.mubr.msk.bf16.mxu0 %vm14970_vm0, %v17537_v0  ;;  %12075 = vmatpush3.bf16.msra.mxu0 %v14613_v18  ;;  %v3379_v18 = vrot.slane %v14623_v16, 2  ;;  %v16084_v16 = vld [vmem:[#allocation2 + $0x14] sm:$0xf] }
 0x3d6   : > { %12076 = vmatprep.subr.bf16.mxu0 %v17537_v0 }
 0x3d9   : > { %12077 = vmatpush3.bf16.msra.mxu0 %v14614_v58  ;;  %v3380_v58 = vsel %vm2867_vm6, %v3377_v1, %v3379_v18  ;;  %v14645_v1 = vld [vmem:[#allocation2 + $0xb0] ss:$0 sps:$4 sm:$0xff]  }
 0x3da   : > { %12078 = vmatprep.subr.bf16.mxu0 %v17537_v0 }
 0x3dc   : > { %11995 = vmatmul.mubr.bf16.gmra.mrb[12].mxu0 %v2876_v15  ;;  %v14624_v15 = vld [vmem:[#allocation2 + $0x38] sm:$0xff]  }
 0x3dd   : > { %11998 = vmatprep.mubr.msk.bf16.mxu0 %vm14970_vm0, %v17537_v0  ;;  %12079 = vmatpush3.bf16.msra.mxu0 %v14615_v61  ;;  %v14640_v61 = vld [vmem:[#allocation4 + $0x1f0] sm:$0xff]   ;;  %v3381_v63 = vrot.slane %v14624_v15, 2 }
 0x3de   : > { %12080 = vmatprep.subr.bf16.mxu0 %v17537_v0 }
 0x3e1   : > { %12081 = vmatpush3.bf16.msra.mxu0 %v14616_v11  ;;  %v14644_v11 = vld [vmem:[#allocation4 + $0x1f8] sm:$0xff]  }
 0x3e2   : > { %12166 = vmatprep.subr.bf16.mxu0 %v17537_v0 }
 0x3e4   : > { %11999 = vmatmul.mubr.bf16.gmra.mrb[16].mxu0 %v2878_v21  ;;  %v3382_v21 = vsel %vm2867_vm6, %v3379_v18, %v3381_v63 }
 0x3e5   : > { %12002 = vmatprep.mubr.msk.bf16.mxu0 %vm14970_vm0, %v17537_v0 }
 0x3e7   : > { %v2292_v25 = vpop.f32.mrb[104].mxu0 }
 0x3e8   : > { %v11864_v41 = vpop.f32.mrb[105].mxu0  ;;  %v3383_v25 = vrot.slane %v14625_v62, 2 }
 0x3e9   : > { %v2294_v59 = vpop.f32.mrb[106].mxu0 }
 0x3ea   : > { %v11865_v8 = vpop.f32.mrb[107].mxu0 }
 0x3eb   : > { %v3384_v8 = vsel %vm2867_vm6, %v3381_v63, %v3383_v25 }
 0x3ec   : > { %12003 = vmatmul.mubr.bf16.gmra.mrb[20].mxu0 %v2880_v28 }
 0x3ed   : > { %12006 = vmatprep.mubr.msk.bf16.mxu0 %vm14970_vm0, %v17537_v0 }
 0x3ef   : > { %v2647_v14 = vpop.f32.mrb[108].mxu0 }
 0x3f0   : > { %v11884_v19 = vpop.f32.mrb[109].mxu0 }
 0x3f1   : > { %v2649_v34 = vpop.f32.mrb[110].mxu0  ;;  %v3385_v19 = vrot.slane %v14627_v13, 2 }
 0x3f2   : > { %v11885_v24 = vpop.f32.mrb[111].mxu0 }
 0x3f3   : > { %v3386_v3 = vsel %vm2867_vm6, %v3383_v25, %v3385_v19 }
 0x3f4   : > { %12007 = vmatmul.mubr.bf16.gmra.mrb[24].mxu0 %v2882_v22 }
 0x3f5   : > { %12010 = vmatprep.mubr.msk.bf16.mxu0 %vm14970_vm0, %v17537_v0 }
 0x3fc   : > { %12011 = vmatmul.mubr.bf16.gmra.mrb[28].mxu0 %v2884_v26  ;;  %v14628_v26 = vld [vmem:[#allocation2 + $0x50] sm:$0xff]  }
 0x3fd   : > { %12014 = vmatprep.mubr.msk.bf16.mxu0 %vm14970_vm0, %v17537_v0 }
 0x404   : > { %12015 = vmatmul.mubr.bf16.gmra.mrb[32].mxu0 %v2886_v27  ;;  %v3387_v27 = vrot.slane %v14628_v26, 2 }
 0x405   : > { %12018 = vmatprep.mubr.msk.bf16.mxu0 %vm14970_vm0, %v17537_v0 }
 0x406   : > { %v3388_v29 = vsel %vm2867_vm6, %v3385_v19, %v3387_v27  ;;  %v14648_v19 = vld [vmem:[#allocation4 + $0x200] sm:$0xff]  }
 0x40c   : > { %12019 = vmatmul.mubr.bf16.gmra.mrb[36].mxu0 %v2888_v32  ;;  %v14629_v32 = vld [vmem:[#allocation2 + $0x58] sm:$0xff]  }
 0x40d   : > { %12022 = vmatprep.mubr.msk.bf16.mxu0 %vm14970_vm0, %v17537_v0  ;;  %v3389_v44 = vrot.slane %v14629_v32, 2 }
 0x414   : > { %12023 = vmatmul.mubr.bf16.gmra.mrb[40].mxu0 %v2890_v33  ;;  %v3390_v33 = vsel %vm2867_vm6, %v3387_v27, %v3389_v44  ;;  %v14651_v27 = vld [vmem:[#allocation4 + $0x208] sm:$0xff]  }
 0x415   : > { %12026 = vmatprep.mubr.msk.bf16.mxu0 %vm14970_vm0, %v17537_v0 }
 0x41c   : > { %12027 = vmatmul.mubr.bf16.gmra.mrb[44].mxu0 %v2892_v52  ;;  %v3391_v52 = vrot.slane %v14631_v48, 2  ;;  %v14655_v48 = vld [vmem:[#allocation4 + $0x210] sm:$0xff]  }
 0x41d   : > { %12030 = vmatprep.mubr.msk.bf16.mxu0 %vm14970_vm0, %v17537_v0 }
 0x41e   : > { %v3392_v51 = vsel %vm2867_vm6, %v3389_v44, %v3391_v52 }
 0x424   : > { %12031 = vmatmul.mubr.bf16.gmra.mrb[48].mxu0 %v2894_v9  ;;  %v14632_v9 = vld [vmem:[#allocation2 + $0x68] sm:$0xff]  }
 0x425   : > { %12034 = vmatprep.mubr.msk.bf16.mxu0 %vm14970_vm0, %v17537_v0  ;;  %v3393_v54 = vrot.slane %v14632_v9, 2 }
 0x42c   : > { %12035 = vmatmul.mubr.bf16.gmra.mrb[52].mxu0 %v2896_v36  ;;  %v3394_v36 = vsel %vm2867_vm6, %v3391_v52, %v3393_v54 }
 0x42d   : > { %12038 = vmatprep.mubr.msk.bf16.mxu0 %vm14970_vm0, %v17537_v0 }
 0x434   : > { %12039 = vmatmul.mubr.bf16.gmra.mrb[56].mxu0 %v2898_v30  ;;  %v3395_v30 = vrot.slane %v14634_v56, 2 }
 0x435   : > { %12042 = vmatprep.mubr.msk.bf16.mxu0 %vm14970_vm0, %v17537_v0 }
 0x436   : > { %v3396_v60 = vsel %vm2867_vm6, %v3393_v54, %v3395_v30  ;;  %v14659_v54 = vld [vmem:[#allocation4 + $0x218] sm:$0xff]  }
 0x43c   : > { %12043 = vmatmul.mubr.bf16.gmra.mrb[60].mxu0 %v2900_v37  ;;  %v14635_v37 = vld [vmem:[#allocation2 + $0x78] sm:$0xff]  }
 0x43d   : > { %12046 = vmatprep.mubr.msk.bf16.mxu0 %vm14970_vm0, %v17537_v0  ;;  %v3397_v23 = vrot.slane %v14635_v37, 2  ;;  %v14662_v37 = vld [vmem:[#allocation4 + $0x220] sm:$0xff]  }
 0x444   : > { %12047 = vmatmul.mubr.bf16.gmra.mrb[64].mxu0 %v2902_v31  ;;  %v3398_v31 = vsel %vm2867_vm6, %v3395_v30, %v3397_v23 }
 0x445   : > { %12050 = vmatprep.mubr.msk.bf16.mxu0 %vm14970_vm0, %v17537_v0 }
 0x44c   : > { %12051 = vmatmul.mubr.bf16.gmra.mrb[68].mxu0 %v2904_v39  ;;  %v3399_v39 = vrot.slane %v14636_v4, 2 }
 0x44d   : > { %12054 = vmatprep.mubr.msk.bf16.mxu0 %vm14970_vm0, %v17537_v0 }
 0x44e   : > { %v3400_v6 = vsel %vm2867_vm6, %v3397_v23, %v3399_v39 }
 0x454   : > { %12055 = vmatmul.mubr.bf16.gmra.mrb[72].mxu0 %v2906_v40  ;;  %v14638_v40 = vld [vmem:[#allocation2 + $0x88] sm:$0xff]  }
 0x455   : > { %12058 = vmatprep.mubr.msk.bf16.mxu0 %vm14970_vm0, %v17537_v0 }
 0x45c   : > { %12059 = vmatmul.mubr.bf16.gmra.mrb[76].mxu0 %v2908_v7 }
 0x45d   : > { %12062 = vmatprep.mubr.msk.bf16.mxu0 %vm14970_vm0, %v17537_v0 }
 0x464   : > { %12063 = vmatmul.mubr.bf16.gmra.mrb[120].mxu0 %v2907_v12  ;;  %v3401_v12 = vrot.slane %v14638_v40, 2 }
 0x465   : > { %12082 = vmatprep.mubr.msk.bf16.mxu0 %vm14970_vm0, %v17537_v0 }
 0x466   : > { %v3402_v7 = vsel %vm2867_vm6, %v3399_v39, %v3401_v12  ;;  %v3404_v20 = vsel %vm2867_vm6, %v3401_v12, %v3403_v2  ;;  %v14666_v39 = vld [vmem:[#allocation4 + $0x228] sm:$0xff]  }
 0x46c   : > { %12083 = vmatmul.mubr.bf16.vlgmr.msra.gmra.mrb[124].mxu0 %v3374_v43  ;;  %v3405_v43 = vrot.slane %v14641_v42, 2 }
 0x46d   : > { %12167 = vmatpush3.bf16.msra.mxu0 %v14619_v45  ;;  %12086 = vmatprep.mubr.msk.bf16.mxu0 %vm14970_vm0, %v17537_v0 }
 0x46e   : > { %12168 = vmatprep.subr.bf16.mxu0 %v17537_v0  ;;  %v3406_v45 = vsel %vm2867_vm6, %v3403_v2, %v3405_v43 }
 0x471   : > { %12169 = vmatpush3.bf16.msra.mxu0 %v14622_v47  ;;  %v3408_v47 = vsel %vm2867_vm6, %v3405_v43, %v3407_v35  ;;  %v14673_v43 = vld [vmem:[#allocation4 + $0x238] sm:$0xff]  }
 0x472   : > { %12170 = vmatprep.subr.bf16.mxu0 %v17537_v0 }
 0x474   : > { %12087 = vmatmul.mubr.bf16.gmra.mrb[4].mxu0 %v3376_v49  ;;  %v14643_v49 = vld [vmem:[#allocation2 + $0xa8] sm:$0xff]  }
 0x475   : > { %12090 = vmatprep.mubr.msk.bf16.mxu0 %vm14970_vm0, %v17537_v0  ;;  %12171 = vmatpush3.bf16.msra.mxu0 %v14626_v53  ;;  %v3409_v50 = vrot.slane %v14643_v49, 2 }
 0x476   : > { %12172 = vmatprep.subr.bf16.mxu0 %v17537_v0 }
 0x477   : > { %v3410_v53 = vsel %vm2867_vm6, %v3407_v35, %v3409_v50 }
 0x479   : > { %12173 = vmatpush3.bf16.msra.mxu0 %v14630_v55  ;;  %v3411_v55 = vrot.slane %v14645_v1, 2 }
 0x47a   : > { %12174 = vmatprep.subr.bf16.mxu0 %v17537_v0 }
 0x47c   : > { %12091 = vmatmul.mubr.bf16.gmra.mrb[8].mxu0 %v3378_v5  ;;  %v3715_v5 = vld [vmem:[#allocation2 + $0x10] sm:$0xc] }
 0x47d   : > { %12094 = vmatprep.mubr.msk.bf16.mxu0 %vm14970_vm0, %v17537_v0  ;;  %12175 = vmatpush3.bf16.msra.mxu0 %v14633_v10  ;;  %v3412_v10 = vsel %vm2867_vm6, %v3409_v50, %v3411_v55  ;;  %v10509_v18 = vcombine.low %v3715_v5, %v16084_v16 }
 0x47e   : > { %12176 = vmatprep.subr.bf16.mxu0 %v17537_v0 }
 0x47f   : > { %v3884_v15 = vshll.u32 %v10509_v18, 16 }
 0x481   : > { %12177 = vmatpush3.bf16.msra.mxu0 %v14637_v57  ;;  %v16088_v57 = vld [vmem:[#allocation2 + $0x18] sm:$0xff]  }
 0x482   : > { %12178 = vmatprep.subr.bf16.mxu0 %v17537_v0  ;;  %v3892_v63 = vshll.u32 %v16088_v57, 16 }
 0x484   : > { %12095 = vmatmul.mubr.bf16.gmra.mrb[12].mxu0 %v3380_v58  ;;  %v3881_v58 = vshrl.u32 %v10509_v18, 16  ;;  %v3894_v25 = vrot.slane %v3892_v63, 3 }
 0x485   : > { %12098 = vmatprep.mubr.msk.bf16.mxu0 %vm14970_vm0, %v17537_v0  ;;  %12179 = vmatpush3.bf16.msra.mxu0 %v14640_v61  ;;  %v3889_v61 = vshrl.u32 %v16088_v57, 16 }
 0x486   : > { %12180 = vmatprep.subr.bf16.mxu0 %v17537_v0 }
 0x487   : > { %v3891_v62 = vrot.slane %v3889_v61, 2 }
 0x489   : > { %12181 = vmatpush3.bf16.msra.mxu0 %v14644_v11  ;;  %v3883_v11 = vrot.slane %v3881_v58, 2 }
 0x48a   : > { %12266 = vmatprep.subr.bf16.mxu0 %v17537_v0 }
 0x48c   : > { %12099 = vmatmul.mubr.bf16.gmra.mrb[16].mxu0 %v3382_v21  ;;  %v3886_v21 = vrot.slane %v3884_v15, 3  ;;  %v16143_v15 = vld [vmem:[#allocation2 + $0x50] sm:$0xff]  }
 0x48d   : > { %12102 = vmatprep.mubr.msk.bf16.mxu0 %vm14970_vm0, %v17537_v0 }
 0x48f   : > { %v2804_v41 = vpop.f32.mrb[112].mxu0 }
 0x490   : > { %v11964_v59 = vpop.f32.mrb[113].mxu0  ;;  %v16094_v41 = vld [vmem:[#allocation2 + $0x20] sm:$0xff]  }
 0x491   : > { %v2806_v28 = vpop.f32.mrb[114].mxu0  ;;  %v3887_v59 = vor.u32 %v3886_v21, %v3883_v11  ;;  %v3901_v13 = vshll.u32 %v16094_v41, 16  ;;  %v3952_v11 = vshrl.u32 %v16143_v15, 16  ;;  %v3955_v21 = vshll.u32 %v16143_v15, 16 }
 0x492   : > { %v11965_v14 = vpop.f32.mrb[115].mxu0  ;;  %v3895_v28 = vor.u32 %v3894_v25, %v3891_v62 }
 0x494   : > { %12103 = vmatmul.mubr.bf16.gmra.mrb[20].mxu0 %v3384_v8  ;;  %v3898_v8 = vshrl.u32 %v16094_v41, 16  ;;  %v3896_v14 = vsel %vm3879_vm7, %v3887_v59, %v3895_v28 }
 0x495   : > { %12106 = vmatprep.mubr.msk.bf16.mxu0 %vm14970_vm0, %v17537_v0 }
 0x497   : > { %v3012_v34 = vpop.f32.mrb[116].mxu0 }
 0x498   : > { %v11984_v22 = vpop.f32.mrb[117].mxu0  ;;  %v3900_v34 = vrot.slane %v3898_v8, 2  ;;  %v3954_v8 = vrot.slane %v3952_v11, 2 }
 0x499   : > { %v3014_v24 = vpop.f32.mrb[118].mxu0  ;;  %v3903_v22 = vrot.slane %v3901_v13, 3  ;;  %v3957_v13 = vrot.slane %v3955_v21, 3 }
 0x49a   : > { %v11985_v38 = vpop.f32.mrb[119].mxu0  ;;  %v16101_v24 = vld [vmem:[#allocation2 + $0x28] sm:$0xff]  }
 0x49b   : > { %v3907_v26 = vshrl.u32 %v16101_v24, 16  ;;  %v3910_v38 = vshll.u32 %v16101_v24, 16 }
 0x49c   : > { %12107 = vmatmul.mubr.bf16.gmra.mrb[24].mxu0 %v3386_v3  ;;  %v3904_v3 = vor.u32 %v3903_v22, %v3900_v34  ;;  %v3958_v34 = vor.u32 %v3957_v13, %v3954_v8 }
 0x49d   : > { %12110 = vmatprep.mubr.msk.bf16.mxu0 %vm14970_vm0, %v17537_v0  ;;  %v3909_v32 = vrot.slane %v3907_v26, 2  ;;  %v3912_v44 = vrot.slane %v3910_v38, 3 }
 0x49f   : > { %v3913_v52 = vor.u32 %v3912_v44, %v3909_v32 }
 0x4a4   : > { %12111 = vmatmul.mubr.bf16.gmra.mrb[28].mxu0 %v3388_v29  ;;  %v3905_v29 = vsel %vm3879_vm7, %v3895_v28, %v3904_v3 }
 0x4a5   : > { %12114 = vmatprep.mubr.msk.bf16.mxu0 %vm14970_vm0, %v17537_v0 }
 0x4ac   : > { %12115 = vmatmul.mubr.bf16.gmra.mrb[32].mxu0 %v3390_v33  ;;  %v16109_v33 = vld [vmem:[#allocation2 + $0x30] sm:$0xff]  }
 0x4ad   : > { %12118 = vmatprep.mubr.msk.bf16.mxu0 %vm14970_vm0, %v17537_v0  ;;  %v3919_v9 = vshll.u32 %v16109_v33, 16 }
 0x4af   : > { %v3921_v30 = vrot.slane %v3919_v9, 3 }
 0x4b4   : > { %12119 = vmatmul.mubr.bf16.gmra.mrb[36].mxu0 %v3392_v51  ;;  %v3916_v51 = vshrl.u32 %v16109_v33, 16 }
 0x4b5   : > { %12122 = vmatprep.mubr.msk.bf16.mxu0 %vm14970_vm0, %v17537_v0 }
 0x4b6   : > { %v3918_v56 = vrot.slane %v3916_v51, 2 }
 0x4b8   : > { %v3922_v23 = vor.u32 %v3921_v30, %v3918_v56 }
 0x4bc   : > { %12123 = vmatmul.mubr.bf16.gmra.mrb[40].mxu0 %v3394_v36  ;;  %v3914_v36 = vsel %vm3879_vm7, %v3904_v3, %v3913_v52 }
 0x4bd   : > { %12126 = vmatprep.mubr.msk.bf16.mxu0 %vm14970_vm0, %v17537_v0 }
 0x4c4   : > { %12127 = vmatmul.mubr.bf16.gmra.mrb[44].mxu0 %v3396_v60  ;;  %v16118_v60 = vld [vmem:[#allocation2 + $0x38] sm:$0xff]  }
 0x4c5   : > { %12130 = vmatprep.mubr.msk.bf16.mxu0 %vm14970_vm0, %v17537_v0  ;;  %v3928_v4 = vshll.u32 %v16118_v60, 16 }
 0x4c7   : > { %v3930_v12 = vrot.slane %v3928_v4, 3  ;;  %v16171_v4 = vld [vmem:[#allocation2 + $0x70] sm:$0xff]  }
 0x4cc   : > { %12131 = vmatmul.mubr.bf16.gmra.mrb[48].mxu0 %v3398_v31  ;;  %v3925_v31 = vshrl.u32 %v16118_v60, 16 }
 0x4cd   : > { %12134 = vmatprep.mubr.msk.bf16.mxu0 %vm14970_vm0, %v17537_v0 }
 0x4ce   : > { %v3927_v40 = vrot.slane %v3925_v31, 2 }
 0x4d0   : > { %v3931_v2 = vor.u32 %v3930_v12, %v3927_v40  ;;  %v3991_v40 = vshll.u32 %v16171_v4, 16 }
 0x4d4   : > { %12135 = vmatmul.mubr.bf16.gmra.mrb[52].mxu0 %v3400_v6  ;;  %v3923_v6 = vsel %vm3879_vm7, %v3913_v52, %v3922_v23 }
 0x4d5   : > { %12138 = vmatprep.mubr.msk.bf16.mxu0 %vm14970_vm0, %v17537_v0 }
 0x4dc   : > { %12139 = vmatmul.mubr.bf16.gmra.mrb[56].mxu0 %v3402_v7  ;;  %v16127_v7 = vld [vmem:[#allocation2 + $0x40] sm:$0xff]  }
 0x4dd   : > { %12142 = vmatprep.mubr.msk.bf16.mxu0 %vm14970_vm0, %v17537_v0  ;;  %v3937_v42 = vshll.u32 %v16127_v7, 16 }
 0x4df   : > { %v3939_v35 = vrot.slane %v3937_v42, 3 }
 0x4e4   : > { %12143 = vmatmul.mubr.bf16.gmra.mrb[60].mxu0 %v3404_v20  ;;  %v3934_v20 = vshrl.u32 %v16127_v7, 16 }
 0x4e5   : > { %12146 = vmatprep.mubr.msk.bf16.mxu0 %vm14970_vm0, %v17537_v0 }
 0x4e6   : > { %v3936_v46 = vrot.slane %v3934_v20, 2  ;;  %v16178_v20 = vld [vmem:[#allocation2 + $0x78] sm:$0xff]  }
 0x4e8   : > { %v3940_v49 = vor.u32 %v3939_v35, %v3936_v46 }
 0x4ec   : > { %12147 = vmatmul.mubr.bf16.gmra.mrb[64].mxu0 %v3406_v45  ;;  %v3932_v45 = vsel %vm3879_vm7, %v3922_v23, %v3931_v2 }
 0x4ed   : > { %12150 = vmatprep.mubr.msk.bf16.mxu0 %vm14970_vm0, %v17537_v0 }
 0x4f4   : > { %12151 = vmatmul.mubr.bf16.gmra.mrb[68].mxu0 %v3408_v47  ;;  %v16136_v47 = vld [vmem:[#allocation2 + $0x48] sm:$0xff]  }
 0x4f5   : > { %12154 = vmatprep.mubr.msk.bf16.mxu0 %vm14970_vm0, %v17537_v0  ;;  %v3943_v50 = vshrl.u32 %v16136_v47, 16 }
 0x4f7   : > { %v3945_v18 = vrot.slane %v3943_v50, 2  ;;  %v16185_v50 = vld [vmem:[#allocation2 + $0x80] sm:$0xff]  }
 0x4fc   : > { %12155 = vmatmul.mubr.bf16.gmra.mrb[72].mxu0 %v3410_v53  ;;  %v3946_v53 = vshll.u32 %v16136_v47, 16 }
 0x4fd   : > { %12158 = vmatprep.mubr.msk.bf16.mxu0 %vm14970_vm0, %v17537_v0 }
 0x4fe   : > { %v3948_v58 = vrot.slane %v3946_v53, 3 }
 0x500   : > { %v3949_v63 = vor.u32 %v3948_v58, %v3945_v18  ;;  %v16192_v58 = vld [vmem:[#allocation2 + $0x88] sm:$0xff]  }
 0x501   : > { %v4018_v11 = vshll.u32 %v16192_v58, 16 }
 0x502   : > { %v3950_v28 = vsel %vm3879_vm7, %v3940_v49, %v3949_v63  ;;  %v3959_v26 = vsel %vm3879_vm7, %v3949_v63, %v3958_v34  ;;  %v4015_v63 = vshrl.u32 %v16192_v58, 16 }
 0x504   : > { %12159 = vmatmul.mubr.bf16.gmra.mrb[76].mxu0 %v3412_v10  ;;  %v3941_v10 = vsel %vm3879_vm7, %v3931_v2, %v3940_v49  ;;  %v3993_v2 = vrot.slane %v3991_v40, 3 }
 0x505   : > { %12162 = vmatprep.mubr.msk.bf16.mxu0 %vm14970_vm0, %v17537_v0 }
 0x50c   : > { %12163 = vmatmul.mubr.bf16.gmra.mrb[128].mxu0 %v3411_v55 }
 0x50d   : > { %12182 = vmatprep.mubr.msk.bf16.mxu0 %vm14970_vm0, %v17537_v0 }
 0x514   : > { %12183 = vmatmul.mubr.bf16.vlgmr.msra.gmra.mrb[132].mxu0 %v3896_v14  ;;  %v16150_v14 = vld [vmem:[#allocation2 + $0x58] sm:$0xff]  }
 0x515   : > { %12267 = vmatpush3.bf16.msra.mxu0 %v14648_v19  ;;  %12186 = vmatprep.mubr.msk.bf16.mxu0 %vm14970_vm0, %v17537_v0  ;;  %v3961_v22 = vshrl.u32 %v16150_v14, 16  ;;  %v3964_v3 = vshll.u32 %v16150_v14, 16 }
 0x516   : > { %12268 = vmatprep.subr.bf16.mxu0 %v17537_v0 }
 0x517   : > { %v3963_v38 = vrot.slane %v3961_v22, 2 }
 0x519   : > { %12269 = vmatpush3.bf16.msra.mxu0 %v14651_v27  ;;  %v3966_v27 = vrot.slane %v3964_v3, 3  ;;  %v16206_v3 = vld [vmem:[#allocation2 + $0x98] sm:$0xff]  }
 0x51a   : > { %12270 = vmatprep.subr.bf16.mxu0 %v17537_v0 }
 0x51b   : > { %v3967_v32 = vor.u32 %v3966_v27, %v3963_v38  ;;  %v4033_v38 = vshrl.u32 %v16206_v3, 16  ;;  %v4036_v27 = vshll.u32 %v16206_v3, 16 }
 0x51c   : > { %12187 = vmatmul.mubr.bf16.gmra.mrb[4].mxu0 %v3905_v29  ;;  %v16157_v29 = vld [vmem:[#allocation2 + $0x60] sm:$0xff]  }
 0x51d   : > { %12190 = vmatprep.mubr.msk.bf16.mxu0 %vm14970_vm0, %v17537_v0  ;;  %12271 = vmatpush3.bf16.msra.mxu0 %v14655_v48  ;;  %v3970_v44 = vshrl.u32 %v16157_v29, 16  ;;  %v3973_v48 = vshll.u32 %v16157_v29, 16  ;;  %v3968_v52 = vsel %vm3879_vm7, %v3958_v34, %v3967_v32 }
 0x51e   : > { %12272 = vmatprep.subr.bf16.mxu0 %v17537_v0 }
 0x51f   : > { %v3972_v51 = vrot.slane %v3970_v44, 2  ;;  %v3975_v9 = vrot.slane %v3973_v48, 3  ;;  %v4035_v44 = vrot.slane %v4033_v38, 2  ;;  %v4038_v48 = vrot.slane %v4036_v27, 3 }
 0x521   : > { %12273 = vmatpush3.bf16.msra.mxu0 %v14659_v54  ;;  %v16164_v54 = vld [vmem:[#allocation2 + $0x68] sm:$0xff]  }
 0x522   : > { %12274 = vmatprep.subr.bf16.mxu0 %v17537_v0  ;;  %v3979_v56 = vshrl.u32 %v16164_v54, 16  ;;  %v3982_v30 = vshll.u32 %v16164_v54, 16 }
 0x524   : > { %12191 = vmatmul.mubr.bf16.gmra.mrb[8].mxu0 %v3914_v36  ;;  %v3976_v36 = vor.u32 %v3975_v9, %v3972_v51  ;;  %v3981_v23 = vrot.slane %v3979_v56, 2  ;;  %v3984_v31 = vrot.slane %v3982_v30, 3  ;;  %v4039_v51 = vor.u32 %v4038_v48, %v4035_v44 }
 0x525   : > { %12194 = vmatprep.mubr.msk.bf16.mxu0 %vm14970_vm0, %v17537_v0  ;;  %12275 = vmatpush3.bf16.msra.mxu0 %v14662_v37  ;;  %v4411_v48 = vrot.slane %v16157_v29, 3  ;;  %v4415_v29 = vrot.slane %v16171_v4, 3 }
 0x526   : > { %12276 = vmatprep.subr.bf16.mxu0 %v17537_v0  ;;  %v3977_v37 = vsel %vm3879_vm7, %v3967_v32, %v3976_v36 }
 0x529   : > { %12277 = vmatpush3.bf16.msra.mxu0 %v14666_v39  ;;  %v3985_v39 = vor.u32 %v3984_v31, %v3981_v23  ;;  %v16220_v23 = vld [vmem:[#allocation2 + $0xa8] sm:$0xff]  }
 0x52a   : > { %12278 = vmatprep.subr.bf16.mxu0 %v17537_v0 }
 0x52b   : > { %v3986_v12 = vsel %vm3879_vm7, %v3976_v36, %v3985_v39 }
 0x52c   : > { %12195 = vmatmul.mubr.bf16.gmra.mrb[12].mxu0 %v3923_v6  ;;  %v3988_v6 = vshrl.u32 %v16171_v4, 16  ;;  %v14680_v4 = vld [vmem:[#allocation6 + $0x60] sm:$0xff]  }
 0x52d   : > { %12198 = vmatprep.mubr.msk.bf16.mxu0 %vm14970_vm0, %v17537_v0  ;;  %12279 = vmatpush3.bf16.msra.mxu0 %v14669_v17 }
 0x52e   : > { %12280 = vmatprep.subr.bf16.mxu0 %v17537_v0  ;;  %v3990_v17 = vrot.slane %v3988_v6, 2  ;;  %v4054_v6 = vshll.u32 %v16220_v23, 16 }
 0x530   : > { %v3994_v42 = vor.u32 %v3993_v2, %v3990_v17  ;;  %v4056_v17 = vrot.slane %v4054_v6, 3  ;;  %v16227_v2 = vld [vmem:[#allocation2 + $0xb0] sm:$0x1f]   ;;  %v4419_v6 = vrot.slane %v16185_v50, 3 }
 0x531   : > { %12281 = vmatpush3.bf16.msra.mxu0 %v14673_v43  ;;  %v3997_v43 = vshrl.u32 %v16178_v20, 16 }
 0x532   : > { %v3995_v46 = vsel %vm3879_vm7, %v3985_v39, %v3994_v42  ;;  %v4051_v39 = vshrl.u32 %v16220_v23, 16 }
 0x533   : > { %v3999_v35 = vrot.slane %v3997_v43, 2  ;;  %v4060_v43 = vshrl.u32 %v16227_v2, 16 }
 0x534   : > { %12199 = vmatmul.mubr.bf16.gmra.mrb[16].mxu0 %v3932_v45  ;;  %v4000_v45 = vshll.u32 %v16178_v20, 16 }
 0x535   : > { %12202 = vmatprep.mubr.msk.bf16.mxu0 %vm14970_vm0, %v17537_v0 }
 0x536   : > { %v4002_v49 = vrot.slane %v4000_v45, 3  ;;  %v4063_v45 = vshll.u32 %v16227_v2, 16 }
 0x537   : > { %v3169_v1 = vpop.f32.mrb[120].mxu0 }
 0x538   : > { %v12064_v55 = vpop.f32.mrb[121].mxu0  ;;  %v4003_v53 = vor.u32 %v4002_v49, %v3999_v35  ;;  %v4006_v1 = vshrl.u32 %v16185_v50, 16  ;;  %v4062_v35 = vrot.slane %v4060_v43, 2  ;;  %v4065_v49 = vrot.slane %v4063_v45, 3  ;;  %v16304_v43 = vld [vmem:[#allocation3 + $0x8] sm:$0xff]  }
 0x539   : > { %v3171_v5 = vpop.f32.mrb[122].mxu0  ;;  %v4009_v55 = vshll.u32 %v16185_v50, 16 }
 0x53a   : > { %v12065_v61 = vpop.f32.mrb[123].mxu0  ;;  %v4004_v5 = vsel %vm3879_vm7, %v3994_v42, %v4003_v53 }
 0x53b   : > { %v4011_v18 = vrot.slane %v4009_v55, 3  ;;  %v4370_v55 = vld [vmem:[#allocation2 + $0x10] sm:$0x8] }
 0x53c   : > { %12203 = vmatmul.mubr.bf16.gmra.mrb[20].mxu0 %v3941_v10  ;;  %v4008_v10 = vrot.slane %v4006_v1, 2 }
 0x53d   : > { %12206 = vmatprep.mubr.msk.bf16.mxu0 %vm14970_vm0, %v17537_v0 }
 0x53e   : > { %v4012_v61 = vor.u32 %v4011_v18, %v4008_v10  ;;  %v4393_v18 = vrot.slane %v16088_v57, 3  ;;  %v4399_v57 = vrot.slane %v16109_v33, 3 }
 0x53f   : > { %v3516_v62 = vpop.f32.mrb[124].mxu0 }
 0x540   : > { %v12084_v25 = vpop.f32.mrb[125].mxu0  ;;  %v4013_v21 = vsel %vm3879_vm7, %v4003_v53, %v4012_v61  ;;  %v4017_v62 = vrot.slane %v4015_v63, 2  ;;  %v4066_v53 = vor.u32 %v4065_v49, %v4062_v35  ;;  %v4395_v63 = vrot.slane %v16094_v41, 3 }
 0x541   : > { %v3518_v59 = vpop.f32.mrb[126].mxu0  ;;  %v4020_v25 = vrot.slane %v4018_v11, 3  ;;  %v4401_v41 = vrot.slane %v16118_v60, 3  ;;  %v4405_v60 = vrot.slane %v16136_v47, 3  ;;  %v4409_v47 = vrot.slane %v16150_v14, 3  ;;  %v14677_v14 = vld [vmem:[#allocation6 + $0x48] sm:$0xff]  }
 0x542   : > { %v12085_v19 = vpop.f32.mrb[127].mxu0  ;;  %v16199_v59 = vld [vmem:[#allocation2 + $0x90] sm:$0xff]   ;;  %v4396_v11 = vsel %vm4391_vm8, %v4393_v18, %v4395_v63  ;;  %v5629_v49 = vshll.u32 %v16304_v43, 16 }
 0x543   : > { %v4024_v8 = vshrl.u32 %v16199_v59, 16  ;;  %v4027_v13 = vshll.u32 %v16199_v59, 16 }
 0x544   : > { %12207 = vmatmul.mubr.bf16.gmra.mrb[24].mxu0 %v3950_v28  ;;  %v4021_v28 = vor.u32 %v4020_v25, %v4017_v62  ;;  %v4402_v25 = vsel %vm4391_vm8, %v4399_v57, %v4401_v41 }
 0x545   : > { %12210 = vmatprep.mubr.msk.bf16.mxu0 %vm14970_vm0, %v17537_v0  ;;  %v4026_v34 = vrot.slane %v4024_v8, 2  ;;  %v4029_v22 = vrot.slane %v4027_v13, 3 }
 0x546   : > { %v4022_v19 = vsel %vm3879_vm7, %v4012_v61, %v4021_v28 }
 0x54c   : > { %12211 = vmatmul.mubr.bf16.gmra.mrb[28].mxu0 %v3959_v26  ;;  %v4030_v26 = vor.u32 %v4029_v22, %v4026_v34 }
 0x54d   : > { %12214 = vmatprep.mubr.msk.bf16.mxu0 %vm14970_vm0, %v17537_v0 }
 0x54e   : > { %v4031_v32 = vsel %vm3879_vm7, %v4021_v28, %v4030_v26  ;;  %v4040_v56 = vsel %vm3879_vm7, %v4030_v26, %v4039_v51 }
 0x554   : > { %12215 = vmatmul.mubr.bf16.gmra.mrb[32].mxu0 %v3968_v52  ;;  %v16213_v52 = vld [vmem:[#allocation2 + $0xa0] sm:$0xff]  }
 0x555   : > { %12218 = vmatprep.mubr.msk.bf16.mxu0 %vm14970_vm0, %v17537_v0  ;;  %v4042_v9 = vshrl.u32 %v16213_v52, 16  ;;  %v4045_v36 = vshll.u32 %v16213_v52, 16 }
 0x557   : > { %v4044_v30 = vrot.slane %v4042_v9, 2  ;;  %v14676_v9 = vld [vmem:[#allocation6 + $0x40] sm:$0xff]  }
 0x558   : > { %12367 = vmatpush3.bf16.msra.mxu1 %v14676_v9 }
 0x559   : > { %12368 = vmatprep.subr.bf16.mxu1 %v17537_v0 }
 0x55c   : > { %12219 = vmatmul.mubr.bf16.gmra.mrb[36].mxu0 %v3977_v37  ;;  %v4047_v37 = vrot.slane %v4045_v36, 3  ;;  %12369 = vmatpush3.bf16.msra.mxu1 %v14677_v14  ;;  %v14704_v14 = vld [vmem:[#allocation6 + $0x28] sm:$0xff]  }
 0x55d   : > { %12222 = vmatprep.mubr.msk.bf16.mxu0 %vm14970_vm0, %v17537_v0  ;;  %12370 = vmatprep.subr.bf16.mxu1 %v17537_v0 }
 0x55e   : > { %v4048_v31 = vor.u32 %v4047_v37, %v4044_v30  ;;  %v4417_v37 = vrot.slane %v16178_v20, 3  ;;  %v5443_v20 = vld [vmem:[#allocation3] sm:$0xf] }
 0x560   : > { %v4049_v40 = vsel %vm3879_vm7, %v4039_v51, %v4048_v31  ;;  %v4412_v51 = vsel %vm4391_vm8, %v4409_v47, %v4411_v48 }
 0x564   : > { %12223 = vmatmul.mubr.bf16.gmra.mrb[40].mxu0 %v3986_v12  ;;  %v4053_v12 = vrot.slane %v4051_v39, 2  ;;  %v14681_v39 = vld [vmem:[#allocation6 + $0x68] sm:$0xff]  }
 0x565   : > { %12226 = vmatprep.mubr.msk.bf16.mxu0 %vm14970_vm0, %v17537_v0 }
 0x566   : > { %v4057_v42 = vor.u32 %v4056_v17, %v4053_v12  ;;  %v14682_v12 = vld [vmem:[#allocation6 + $0x70] sm:$0xff]  }
 0x568   : > { %v4067_v1 = vsel %vm3879_vm7, %v4057_v42, %v4066_v53 }
 0x56c   : > { %12227 = vmatmul.mubr.bf16.gmra.mrb[44].mxu0 %v3995_v46  ;;  %v4058_v46 = vsel %vm3879_vm7, %v4048_v31, %v4057_v42  ;;  %v4418_v31 = vsel %vm4391_vm8, %v4415_v29, %v4417_v37  ;;  %v4420_v42 = vsel %vm4391_vm8, %v4417_v37, %v4419_v6 }
 0x56d   : > { %12230 = vmatprep.mubr.msk.bf16.mxu0 %vm14970_vm0, %v17537_v0 }
 0x574   : > { %12231 = vmatmul.mubr.bf16.gmra.mrb[48].mxu0 %v4004_v5  ;;  %v10538_v5 = vcombine.low %v4370_v55, %v16084_v16  ;;  %v4397_v16 = vrot.slane %v16101_v24, 3  ;;  %v4403_v24 = vrot.slane %v16127_v7, 3  ;;  %v4407_v7 = vrot.slane %v16143_v15, 3 }
 0x575   : > { %12234 = vmatprep.mubr.msk.bf16.mxu0 %vm14970_vm0, %v17537_v0  ;;  %v4413_v15 = vrot.slane %v16164_v54, 3  ;;  %v14679_v54 = vld [vmem:[#allocation6 + $0x58] sm:$0xff]   ;;  %v16313_v55 = vrot.slane %v5629_v49, 1  ;;  %v16355_v49 = vld [vmem:[#allocation3 + $0xc] sm:$0xf] }
 0x576   : > { %v4392_v10 = vrot.slane %v10538_v5, 3  ;;  %v4400_v62 = vsel %vm4391_vm8, %v4397_v16, %v4399_v57  ;;  %v4404_v33 = vsel %vm4391_vm8, %v4401_v41, %v4403_v24  ;;  %v4406_v38 = vsel %vm4391_vm8, %v4403_v24, %v4405_v60  ;;  %v14697_v41 = vld [vmem:[#allocation6 + $0x18] sm:$0xff]  }
 0x577   : > { %v4410_v44 = vsel %vm4391_vm8, %v4407_v7, %v4409_v47  ;;  %v4414_v36 = vsel %vm4391_vm8, %v4411_v48, %v4413_v15  ;;  %v4416_v30 = vsel %vm4391_vm8, %v4413_v15, %v4415_v29  ;;  %v4431_v57 = vrot.slane %v16227_v2, 3 }
 0x578   : > { %v4394_v61 = vsel %vm4391_vm8, %v4392_v10, %v4393_v18 }
 0x57c   : > { %12235 = vmatmul.mubr.bf16.gmra.mrb[52].mxu0 %v4013_v21  ;;  %v4398_v21 = vsel %vm4391_vm8, %v4395_v63, %v4397_v16  ;;  %v14686_v63 = vld [vmem:[#allocation6] sm:$0xff]  }
 0x57d   : > { %12238 = vmatprep.mubr.msk.bf16.mxu0 %vm14970_vm0, %v17537_v0 }
 0x584   : > { %12239 = vmatmul.mubr.bf16.gmra.mrb[56].mxu0 %v4022_v19 }
 0x585   : > { %12242 = vmatprep.mubr.msk.bf16.mxu0 %vm14970_vm0, %v17537_v0 }
 0x58c   : > { %12243 = vmatmul.mubr.bf16.gmra.mrb[60].mxu0 %v4031_v32  ;;  %v4408_v32 = vsel %vm4391_vm8, %v4405_v60, %v4407_v7 }
 0x58d   : > { %12246 = vmatprep.mubr.msk.bf16.mxu0 %vm14970_vm0, %v17537_v0 }
 0x594   : > { %12247 = vmatmul.mubr.bf16.gmra.mrb[64].mxu0 %v4040_v56  ;;  %v14678_v56 = vld [vmem:[#allocation6 + $0x50] sm:$0xff]  }
 0x595   : > { %12250 = vmatprep.mubr.msk.bf16.mxu0 %vm14970_vm0, %v17537_v0  ;;  %12371 = vmatpush3.bf16.msra.mxu1 %v14678_v56 }
 0x596   : > { %12372 = vmatprep.subr.bf16.mxu1 %v17537_v0 }
 0x599   : > { %12373 = vmatpush3.bf16.msra.mxu1 %v14679_v54 }
 0x59a   : > { %12374 = vmatprep.subr.bf16.mxu1 %v17537_v0 }
 0x59c   : > { %12251 = vmatmul.mubr.bf16.gmra.mrb[68].mxu0 %v4049_v40  ;;  %v5444_v40 = vld [vmem:[#allocation3 + $0x4] sm:$0xf] }
 0x59d   : > { %12254 = vmatprep.mubr.msk.bf16.mxu0 %vm14970_vm0, %v17537_v0  ;;  %12375 = vmatpush3.bf16.msra.mxu1 %v14680_v4  ;;  %v16301_v17 = vcombine.low %v5443_v20, %v5444_v40 }
 0x59e   : > { %12376 = vmatprep.subr.bf16.mxu1 %v17537_v0 }
 0x59f   : > { %v5624_v45 = vshll.u32 %v16301_v17, 16  ;;  %v5622_v50 = vshrl.u32 %v16301_v17, 16 }
 0x5a1   : > { %12377 = vmatpush3.bf16.msra.mxu1 %v14681_v39  ;;  %v5626_v35 = vrot.slane %v5624_v45, 1 }
 0x5a2   : > { %12378 = vmatprep.subr.bf16.mxu1 %v17537_v0 }
 0x5a4   : > { %12255 = vmatmul.mubr.bf16.gmra.mrb[72].mxu0 %v4058_v46  ;;  %v14683_v46 = vld [vmem:[#allocation6 + $0x78] sm:$0xff]  }
 0x5a5   : > { %12258 = vmatprep.mubr.msk.bf16.mxu0 %vm14970_vm0, %v17537_v0  ;;  %12379 = vmatpush3.bf16.msra.mxu1 %v14682_v12 }
 0x5a6   : > { %12380 = vmatprep.subr.bf16.mxu1 %v17537_v0 }
 0x5a9   : > { %12381 = vmatpush3.bf16.msra.mxu1 %v14683_v46 }
 0x5aa   : > { %12466 = vmatprep.subr.bf16.mxu1 %v17537_v0 }
 0x5ac   : > { %12259 = vmatmul.mubr.bf16.gmra.mrb[76].mxu0 %v4067_v1  ;;  %v5627_v1 = vor.u32 %v5626_v35, %v5622_v50  ;;  %v6685_v35 = vld [vmem:[#allocation3 + $0x8] sm:$0xe] }
 0x5ad   : > { %12262 = vmatprep.mubr.msk.bf16.mxu0 %vm14970_vm0, %v17537_v0 }
 0x5ae   : > { %v5632_v5 = vsel %vm764_vm2, %v5627_v1, %v16313_v55 }
 0x5af   : > { %12383 = vmatmul.mubr.bf16.vlgmr.msra.gmra.mrb[0].mxu1 %v5632_v5 }
 0x5b0   : > { %12386 = vmatprep.mubr.msk.bf16.mxu1 %vm14970_vm0, %v17537_v0  ;;  %12467 = vmatpush3.bf16.msra.mxu1 %v14686_v63 }
 0x5b1   : > { %12468 = vmatprep.subr.bf16.mxu1 %v17537_v0 }
 0x5b4   : > { %12263 = vmatmul.mubr.bf16.gmra.mrb[136].mxu0 %v4066_v53  ;;  %v4421_v53 = vrot.slane %v16192_v58, 3  ;;  %v4423_v58 = vrot.slane %v16199_v59, 3  ;;  %v4427_v59 = vrot.slane %v16213_v52, 3 }
 0x5b5   : > { %12282 = vmatprep.mubr.msk.bf16.mxu0 %vm14970_vm0, %v17537_v0 }
 0x5b6   : > { %v4422_v10 = vsel %vm4391_vm8, %v4419_v6, %v4421_v53  ;;  %v4424_v18 = vsel %vm4391_vm8, %v4421_v53, %v4423_v58 }
 0x5bc   : > { %12283 = vmatmul.mubr.bf16.vlgmr.msra.gmra.mrb[140].mxu0 %v4394_v61  ;;  %v4425_v61 = vrot.slane %v16206_v3, 3  ;;  %v4429_v3 = vrot.slane %v16220_v23, 3  ;;  %v14693_v23 = vld [vmem:[#allocation6 + $0x10] sm:$0xff]  }
 0x5bd   : > { %12286 = vmatprep.mubr.msk.bf16.mxu0 %vm14970_vm0, %v17537_v0 }
 0x5be   : > { %v4428_v16 = vsel %vm4391_vm8, %v4425_v61, %v4427_v59  ;;  %v4432_v52 = vsel %vm4391_vm8, %v4429_v3, %v4431_v57 }
 0x5c4   : > { %12287 = vmatmul.mubr.bf16.gmra.mrb[4].mxu0 %v4396_v11  ;;  %v4426_v11 = vsel %vm4391_vm8, %v4423_v58, %v4425_v61  ;;  %v16358_v61 = vcombine.low %v6685_v35, %v16355_v49 }
 0x5c5   : > { %12290 = vmatprep.mubr.msk.bf16.mxu0 %vm14970_vm0, %v17537_v0 }
 0x5cc   : > { %12291 = vmatmul.mubr.bf16.gmra.mrb[8].mxu0 %v4398_v21  ;;  %v4430_v21 = vsel %vm4391_vm8, %v4427_v59, %v4429_v3 }
 0x5cd   : > { %12294 = vmatprep.mubr.msk.bf16.mxu0 %vm14970_vm0, %v17537_v0 }
 0x5d4   : > { %12295 = vmatmul.mubr.bf16.gmra.mrb[12].mxu0 %v4400_v62  ;;  %v14689_v62 = vld [vmem:[#allocation6 + $0x8] sm:$0xff]  }
 0x5d5   : > { %12298 = vmatprep.mubr.msk.bf16.mxu0 %vm14970_vm0, %v17537_v0  ;;  %12469 = vmatpush3.bf16.msra.mxu1 %v14689_v62 }
 0x5d6   : > { %12470 = vmatprep.subr.bf16.mxu1 %v17537_v0 }
 0x5d9   : > { %12471 = vmatpush3.bf16.msra.mxu1 %v14693_v23 }
 0x5da   : > { %12472 = vmatprep.subr.bf16.mxu1 %v17537_v0 }
 0x5dc   : > { %12299 = vmatmul.mubr.bf16.gmra.mrb[16].mxu0 %v4402_v25 }
 0x5dd   : > { %12302 = vmatprep.mubr.msk.bf16.mxu0 %vm14970_vm0, %v17537_v0  ;;  %12473 = vmatpush3.bf16.msra.mxu1 %v14697_v41 }
 0x5de   : > { %12474 = vmatprep.subr.bf16.mxu1 %v17537_v0 }
 0x5df   : > { %v3673_v28 = vpop.f32.mrb[128].mxu0 }
 0x5e0   : > { %v12164_v8 = vpop.f32.mrb[129].mxu0 }
 0x5e1   : > { %v3675_v13 = vpop.f32.mrb[130].mxu0  ;;  %v14700_v8 = vld [vmem:[#allocation6 + $0x20] sm:$0xff]  }
 0x5e2   : > { %v12165_v19 = vpop.f32.mrb[131].mxu0  ;;  %12475 = vmatpush3.bf16.msra.mxu1 %v14700_v8 }
 0x5e3   : > { %12476 = vmatprep.subr.bf16.mxu1 %v17537_v0 }
 0x5e4   : > { %12303 = vmatmul.mubr.bf16.gmra.mrb[20].mxu0 %v4404_v33 }
 0x5e5   : > { %12306 = vmatprep.mubr.msk.bf16.mxu0 %vm14970_vm0, %v17537_v0 }
 0x5e6   : > { %12477 = vmatpush3.bf16.msra.mxu1 %v14704_v14 }
 0x5e7   : > { %v4171_v34 = vpop.f32.mrb[132].mxu0  ;;  %12478 = vmatprep.subr.bf16.mxu1 %v17537_v0 }
 0x5e8   : > { %v12184_v22 = vpop.f32.mrb[133].mxu0 }
 0x5e9   : > { %v4173_v26 = vpop.f32.mrb[134].mxu0 }
 0x5ea   : > { %v12185_v27 = vpop.f32.mrb[135].mxu0 }
 0x5ec   : > { %12307 = vmatmul.mubr.bf16.gmra.mrb[24].mxu0 %v4406_v38 }
 0x5ed   : > { %12310 = vmatprep.mubr.msk.bf16.mxu0 %vm14970_vm0, %v17537_v0 }
 0x5f4   : > { %12311 = vmatmul.mubr.bf16.gmra.mrb[28].mxu0 %v4408_v32 }
 0x5f5   : > { %12314 = vmatprep.mubr.msk.bf16.mxu0 %vm14970_vm0, %v17537_v0 }
 0x5fc   : > { %12315 = vmatmul.mubr.bf16.gmra.mrb[32].mxu0 %v4410_v44 }
 0x5fd   : > { %12318 = vmatprep.mubr.msk.bf16.mxu0 %vm14970_vm0, %v17537_v0 }
 0x604   : > { %12319 = vmatmul.mubr.bf16.gmra.mrb[36].mxu0 %v4412_v51 }
 0x605   : > { %12322 = vmatprep.mubr.msk.bf16.mxu0 %vm14970_vm0, %v17537_v0 }
 0x60c   : > { %12323 = vmatmul.mubr.bf16.gmra.mrb[40].mxu0 %v4414_v36 }
 0x60d   : > { %12326 = vmatprep.mubr.msk.bf16.mxu0 %vm14970_vm0, %v17537_v0 }
 0x614   : > { %12327 = vmatmul.mubr.bf16.gmra.mrb[44].mxu0 %v4416_v30 }
 0x615   : > { %12330 = vmatprep.mubr.msk.bf16.mxu0 %vm14970_vm0, %v17537_v0 }
 0x61c   : > { %12331 = vmatmul.mubr.bf16.gmra.mrb[48].mxu0 %v4418_v31  ;;  %v17554_v31 = vmov 0 }
 0x61d   : > { %12334 = vmatprep.mubr.msk.bf16.mxu0 %vm14970_vm0, %v17537_v0  ;;  %v17555_v31 = vsel %vm16348_vm11, 4294967295, %v17554_v31 }
 0x61e   : > { %17556 = vst [vmem:[#allocation10_spill] sm:$0xff] %v17555_v31 }
 0x624   : > { %12335 = vmatmul.mubr.bf16.gmra.mrb[52].mxu0 %v4420_v42 }
 0x625   : > { %12338 = vmatprep.mubr.msk.bf16.mxu0 %vm14970_vm0, %v17537_v0 }
 0x62c   : > { %12339 = vmatmul.mubr.bf16.gmra.mrb[56].mxu0 %v4422_v10 }
 0x62d   : > { %12342 = vmatprep.mubr.msk.bf16.mxu0 %vm14970_vm0, %v17537_v0 }
 0x634   : > { %12343 = vmatmul.mubr.bf16.gmra.mrb[60].mxu0 %v4424_v18 }
 0x635   : > { %12346 = vmatprep.mubr.msk.bf16.mxu0 %vm14970_vm0, %v17537_v0 }
 0x63c   : > { %12347 = vmatmul.mubr.bf16.gmra.mrb[64].mxu0 %v4426_v11 }
 0x63d   : > { %12350 = vmatprep.mubr.msk.bf16.mxu0 %vm14970_vm0, %v17537_v0 }
 0x644   : > { %12351 = vmatmul.mubr.bf16.gmra.mrb[68].mxu0 %v4428_v16 }
 0x645   : > { %12354 = vmatprep.mubr.msk.bf16.mxu0 %vm14970_vm0, %v17537_v0 }
 0x64c   : > { %12355 = vmatmul.mubr.bf16.gmra.mrb[72].mxu0 %v4430_v21 }
 0x64d   : > { %12358 = vmatprep.mubr.msk.bf16.mxu0 %vm14970_vm0, %v17537_v0 }
 0x654   : > { %12359 = vmatmul.mubr.bf16.gmra.mrb[76].mxu0 %v4432_v52 }
 0x655   : > { %12362 = vmatprep.mubr.msk.bf16.mxu0 %vm14970_vm0, %v17537_v0 }
 0x65c   : > { %12363 = vmatmul.mubr.bf16.gmra.mrb[144].mxu0 %v4431_v57 }
 0x687   : > { %v4328_v2 = vpop.f32.mrb[136].mxu0 }
 0x688   : > { %v12264_v25 = vpop.f32.mrb[137].mxu0 }
 0x689   : > { %v4330_v24 = vpop.f32.mrb[138].mxu0 }
 0x68a   : > { %v12265_v28 = vpop.f32.mrb[139].mxu0  ;;  %v5633_v24 = vshrl.u32 %v16304_v43, 16 }
 0x68b   : > { %v7211_v28 = vshrl.u32 %v16358_v61, 16 }
 0x68c   : > { %v5635_v43 = vor.u32 %v5633_v24, %v16313_v55 }
 0x68f   : > { %v4536_v13 = vpop.f32.mrb[140].mxu0 }
 0x690   : > { %v12284_v33 = vpop.f32.mrb[141].mxu0 }
 0x691   : > { %v4538_v19 = vpop.f32.mrb[142].mxu0 }
 0x692   : > { %v12285_v60 = vpop.f32.mrb[143].mxu0 }
 0x697   : > { %v4542_v34 = vpop.f32.mrb[4].mxu0 }
 0x698   : > { %v4735_v22 = vmax.f32 %v4542_v34, 0.0  ;;  %v12288_v26 = vpop.f32.mrb[5].mxu0 }
 0x699   : > { %v4545_v38 = vpop.f32.mrb[6].mxu0 }
 0x69a   : > { %v10848_v27 = vpack.c.bf16 %v4735_v22, %v4735_v22  ;;  %v4736_v7 = vmax.f32 %v4545_v38, 0.0  ;;  %v12289_v32 = vpop.f32.mrb[7].mxu0  ;;  %v7214_v22 = vshll.u32 %v16358_v61, 16 }
 0x69c   : > { %v4786_v47 = vshrl.u32 %v10848_v27, 16  ;;  %v4789_v44 = vshll.u32 %v10848_v27, 16  ;;  %v10849_v48 = vpack.c.bf16 %v4736_v7, %v4736_v7 }
 0x69e   : > { %v4788_v51 = vrot.slane %v4786_v47, 6  ;;  %v4791_v15 = vrot.slane %v4789_v44, 7  ;;  %v4795_v9 = vshrl.u32 %v10849_v48, 16  ;;  %v4798_v36 = vshll.u32 %v10849_v48, 16 }
 0x69f   : > { %v4550_v29 = vpop.f32.mrb[8].mxu0  ;;  %v16370_v44 = vrot.slane %v7211_v28, 1 }
 0x6a0   : > { %v4792_v56 = vor.u32 %v4791_v15, %v4788_v51  ;;  %v4797_v30 = vrot.slane %v4795_v9, 6  ;;  %v4800_v54 = vrot.slane %v4798_v36, 7  ;;  %v4737_v37 = vmax.f32 %v4550_v29, 0.0  ;;  %v12292_v4 = vpop.f32.mrb[9].mxu0 }
 0x6a1   : > { %v4553_v39 = vpop.f32.mrb[10].mxu0 }
 0x6a2   : > { %v4793_v6 = vrot.slane %v4792_v56, 4  ;;  %4816 = vst [vmem:[#allocation3 + $0x10] sm:$0x8] %v4792_v56  ;;  %v4801_v20 = vor.u32 %v4800_v54, %v4797_v30  ;;  %v10850_v40 = vpack.c.bf16 %v4737_v37, %v4737_v37  ;;  %v4738_v12 = vmax.f32 %v4553_v39, 0.0  ;;  %v12293_v42 = vpop.f32.mrb[11].mxu0  ;;  %v14707_v30 = vld [vmem:[#allocation6 + $0x30] sm:$0xff]  }
 0x6a3   : > { %v7216_v54 = vrot.slane %v7214_v22, 2  ;;  %12479 = vmatpush3.bf16.msra.mxu1 %v14707_v30 }
 0x6a4   : > { %v4802_v45 = vsel %vm16348_vm11, %v4793_v6, %v4801_v20  ;;  %v4805_v46 = vshrl.u32 %v10850_v40, 16  ;;  %v4808_v50 = vshll.u32 %v10850_v40, 16  ;;  %v10852_v53 = vpack.c.bf16 %v4738_v12, %v4738_v12  ;;  %12480 = vmatprep.subr.bf16.mxu1 %v17537_v0 }
 0x6a5   : > { %4817 = vst [vmem:[#allocation3 + $0x14] sm:$0xf] %v4802_v45  ;;  %v4803_v63 = vrot.slane %v4801_v20, 4 }
 0x6a6   : > { %v4807_v1 = vrot.slane %v4805_v46, 6  ;;  %v4810_v5 = vrot.slane %v4808_v50, 7  ;;  %v4839_v10 = vshrl.u32 %v10852_v53, 16  ;;  %v4842_v58 = vshll.u32 %v10852_v53, 16 }
 0x6a7   : > { %v4558_v18 = vpop.f32.mrb[12].mxu0 }
 0x6a8   : > { %v4811_v11 = vor.u32 %v4810_v5, %v4807_v1  ;;  %v4739_v59 = vmax.f32 %v4558_v18, 0.0  ;;  %v12296_v16 = vpop.f32.mrb[13].mxu0  ;;  %v4841_v3 = vrot.slane %v4839_v10, 6  ;;  %v4844_v21 = vrot.slane %v4842_v58, 7 }
 0x6a9   : > { %v4561_v57 = vpop.f32.mrb[14].mxu0  ;;  %v7217_v1 = vor.u32 %v7216_v54, %v16370_v44 }
 0x6aa   : > { %v4812_v62 = vsel %vm16348_vm11, %v4803_v63, %v4811_v11  ;;  %v4837_v52 = vrot.slane %v4811_v11, 4  ;;  %v10853_v23 = vpack.c.bf16 %v4739_v59, %v4739_v59  ;;  %v4740_v41 = vmax.f32 %v4561_v57, 0.0  ;;  %v12297_v2 = vpop.f32.mrb[15].mxu0 }
 0x6ab   : > { %4818 = vst [vmem:[#allocation3 + $0x18] sm:$0x7] %v4812_v62  ;;  %v4845_v25 = vor.u32 %v4844_v21, %v4841_v3 }
 0x6ac   : > { %v4849_v8 = vshrl.u32 %v10853_v23, 16  ;;  %v4852_v13 = vshll.u32 %v10853_v23, 16  ;;  %v10855_v33 = vpack.c.bf16 %v4740_v41, %v4740_v41  ;;  %v14687_v19 = vld [vmem:[#allocation3 + $0x10] sm:$0xff]  }
 0x6ad   : > { %v4846_v60 = vsel %vm16348_vm11, %v4837_v52, %v4845_v25  ;;  %v16366_v34 = vld [vmem:[#allocation3 + $0x10] sm:$0xff]   ;;  %v5637_v47 = vshll.u32 %v14687_v19, 16  ;;  %v4847_v48 = vrot.slane %v4845_v25, 4  ;;  %v5641_v16 = vshrl.u32 %v14687_v19, 16 }
 0x6ae   : > { %4859 = vst [vmem:[#allocation3 + $0x1c] sm:$0xf] %v4846_v60  ;;  %v4851_v26 = vrot.slane %v4849_v8, 6  ;;  %v4854_v38 = vrot.slane %v4852_v13, 7  ;;  %v4877_v27 = vshrl.u32 %v10855_v33, 16  ;;  %v4880_v7 = vshll.u32 %v10855_v33, 16 }
 0x6af   : > { %v4566_v32 = vpop.f32.mrb[16].mxu0  ;;  %v5639_v56 = vrot.slane %v5637_v47, 1  ;;  %v7219_v37 = vshrl.u32 %v16366_v34, 16  ;;  %v10556_v20 = vrot.slane %v4849_v8, 10  ;;  %v7222_v50 = vshll.u32 %v16366_v34, 16 }
 0x6b0   : > { %v4855_v51 = vor.u32 %v4854_v38, %v4851_v26  ;;  %v4879_v15 = vrot.slane %v4877_v27, 6  ;;  %v4741_v9 = vmax.f32 %v4566_v32, 0.0  ;;  %v12300_v36 = vpop.f32.mrb[17].mxu0  ;;  %v4882_v14 = vrot.slane %v4880_v7, 7  ;;  %v14711_v7 = vld [vmem:[#allocation6 + $0x38] sm:$0xff]  }
 0x6b1   : > { %v4569_v29 = vpop.f32.mrb[18].mxu0  ;;  %v5640_v12 = vsel %vm764_vm2, %v5635_v43, %v5639_v56  ;;  %v7221_v5 = vrot.slane %v7219_v37, 1  ;;  %v7224_v21 = vrot.slane %v7222_v50, 2  ;;  %v5643_v25 = vor.u32 %v5641_v16, %v5639_v56  ;;  %12481 = vmatpush3.bf16.msra.mxu1 %v14711_v7 }
 0x6b2   : > { %v4856_v4 = vsel %vm16348_vm11, %v4847_v48, %v4855_v51  ;;  %v10856_v39 = vpack.c.bf16 %v4741_v9, %v4741_v9  ;;  %v4742_v55 = vmax.f32 %v4569_v29, 0.0  ;;  %v12301_v6 = vpop.f32.mrb[19].mxu0  ;;  %v4883_v40 = vor.u32 %v4882_v14, %v4879_v15  ;;  %12387 = vmatmul.mubr.bf16.gmra.mrb[4].mxu1 %v5640_v12  ;;  %12566 = vmatprep.subr.bf16.mxu1 %v17537_v0 }
 0x6b3   : > { %4860 = vst [vmem:[#allocation3 + $0x20] sm:$0xf] %v4856_v4  ;;  %12390 = vmatprep.mubr.msk.bf16.mxu1 %vm14970_vm0, %v17537_v0  ;;  %v16383_v28 = vor.u32 %v7224_v21, %v7221_v5 }
 0x6b4   : > { %v4887_v42 = vshrl.u32 %v10856_v39, 16  ;;  %v4890_v45 = vshll.u32 %v10856_v39, 16  ;;  %v10857_v46 = vpack.c.bf16 %v4742_v55, %v4742_v55  ;;  %v4884_v35 = vsel %vm16348_vm11, %v10556_v20, %v4883_v40 }
 0x6b5   : > { %v14688_v53 = vld [vmem:[#allocation3 + $0x18] sm:$0xff]   ;;  %4899 = vst [vmem:[#allocation3 + $0x24] sm:$0xe] %v4884_v35  ;;  %v4885_v11 = vrot.slane %v4883_v40, 4  ;;  %v16390_v32 = vsel %vm2355_vm5, %v7217_v1, %v16383_v28 }
 0x6b6   : > { %v4889_v10 = vrot.slane %v4887_v42, 6  ;;  %v4892_v58 = vrot.slane %v4890_v45, 7  ;;  %v4913_v18 = vshrl.u32 %v10857_v46, 16  ;;  %v4916_v63 = vshll.u32 %v10857_v46, 16 }
 0x6b7   : > { %v4574_v59 = vpop.f32.mrb[20].mxu0  ;;  %v5645_v3 = vshll.u32 %v14688_v53, 16  ;;  %v5649_v36 = vshrl.u32 %v14688_v53, 16 }
 0x6b8   : > { %v4893_v57 = vor.u32 %v4892_v58, %v4889_v10  ;;  %v4915_v62 = vrot.slane %v4913_v18, 6  ;;  %v4918_v52 = vrot.slane %v4916_v63, 7  ;;  %v4743_v23 = vmax.f32 %v4574_v59, 0.0  ;;  %v12304_v41 = vpop.f32.mrb[21].mxu0 }
 0x6b9   : > { %v4577_v2 = vpop.f32.mrb[22].mxu0  ;;  %v5647_v24 = vrot.slane %v5645_v3, 1 }
 0x6ba   : > { %v4894_v8 = vsel %vm16348_vm11, %v4885_v11, %v4893_v57  ;;  %v4895_v13 = vrot.slane %v4893_v57, 4  ;;  %v4919_v33 = vor.u32 %v4918_v52, %v4915_v62  ;;  %v10858_v60 = vpack.c.bf16 %v4743_v23, %v4743_v23  ;;  %v12305_v22 = vpop.f32.mrb[23].mxu0 }
 0x6bb   : > { %4900 = vst [vmem:[#allocation3 + $0x28] sm:$0xf] %v4894_v8  ;;  %v4744_v19 = vmax.f32 %v4577_v2, 0.0  ;;  %v5648_v26 = vsel %vm764_vm2, %v5643_v25, %v5647_v24  ;;  %v5651_v55 = vor.u32 %v5649_v36, %v5647_v24 }
 0x6bc   : > { %4901 = vst [vmem:[#allocation3 + $0x2c] sm:$0x1] %v4895_v13  ;;  %4939 = vst [vmem:[#allocation3 + $0x2c] sm:$0xc] %v4919_v33  ;;  %v4922_v38 = vshrl.u32 %v10858_v60, 16  ;;  %v4925_v27 = vshll.u32 %v10858_v60, 16  ;;  %12391 = vmatmul.mubr.bf16.gmra.mrb[8].mxu1 %v5648_v26 }
 0x6bd   : > { %v10859_v43 = vpack.c.bf16 %v4744_v19, %v4744_v19  ;;  %12394 = vmatprep.mubr.msk.bf16.mxu1 %vm14970_vm0, %v17537_v0  ;;  %v14690_v47 = vld [vmem:[#allocation3 + $0x20] sm:$0xff]   ;;  %v4920_v29 = vrot.slane %v4919_v33, 4 }
 0x6be   : > { %v4924_v44 = vrot.slane %v4922_v38, 6  ;;  %v4927_v48 = vrot.slane %v4925_v27, 7  ;;  %v5653_v14 = vshll.u32 %v14690_v47, 16  ;;  %v5657_v58 = vshrl.u32 %v14690_v47, 16 }
 0x6bf   : > { %v4932_v51 = vshll.u32 %v10859_v43, 16  ;;  %v4953_v15 = vshrl.u32 %v10859_v43, 16  ;;  %v4582_v9 = vpop.f32.mrb[24].mxu0 }
 0x6c0   : > { %v4928_v56 = vor.u32 %v4927_v48, %v4924_v44  ;;  %v4745_v30 = vmax.f32 %v4582_v9, 0.0  ;;  %v12308_v54 = vpop.f32.mrb[25].mxu0  ;;  %v5655_v6 = vrot.slane %v5653_v14, 1  ;;  %v7700_v44 = vld [vmem:[#allocation3 + $0x8] sm:$0xc] }
 0x6c1   : > { %v4934_v37 = vrot.slane %v4932_v51, 7  ;;  %v4955_v4 = vrot.slane %v4953_v15, 6  ;;  %v4585_v39 = vpop.f32.mrb[26].mxu0 }
 0x6c2   : > { %v4929_v20 = vsel %vm16348_vm11, %v4920_v29, %v4928_v56  ;;  %v4930_v40 = vrot.slane %v4928_v56, 4  ;;  %v10861_v12 = vpack.c.bf16 %v4745_v30, %v4745_v30  ;;  %v4746_v42 = vmax.f32 %v4585_v39, 0.0  ;;  %v12309_v45 = vpop.f32.mrb[27].mxu0 }
 0x6c3   : > { %4940 = vst [vmem:[#allocation3 + $0x30] sm:$0xf] %v4929_v20  ;;  %v4959_v46 = vor.u32 %v4955_v4, %v4934_v37  ;;  %v5656_v50 = vsel %vm764_vm2, %v5651_v55, %v5655_v6  ;;  %v14691_v35 = vld [vmem:[#allocation3 + $0x28] sm:$0xff]   ;;  %v5659_v57 = vor.u32 %v5657_v58, %v5655_v6 }
 0x6c4   : > { %v4935_v53 = vsel %vm16348_vm11, %v4930_v40, %v4934_v37  ;;  %v4962_v1 = vshrl.u32 %v10861_v12, 16  ;;  %v4965_v5 = vshll.u32 %v10861_v12, 16  ;;  %v10862_v10 = vpack.c.bf16 %v4746_v42, %v4746_v42  ;;  %12395 = vmatmul.mubr.bf16.gmra.mrb[12].mxu1 %v5656_v50 }
 0x6c5   : > { %4941 = vst [vmem:[#allocation3 + $0x34] sm:$0x3] %v4935_v53  ;;  %4983 = vst [vmem:[#allocation3 + $0x34] sm:$0x8] %v4959_v46  ;;  %12398 = vmatprep.mubr.msk.bf16.mxu1 %vm14970_vm0, %v17537_v0  ;;  %v5661_v18 = vshll.u32 %v14691_v35, 16  ;;  %v4960_v3 = vrot.slane %v4959_v46, 4  ;;  %v10684_v40 = vcombine.low %v7700_v44, %v16355_v49 }
 0x6c6   : > { %v4964_v63 = vrot.slane %v4962_v1, 6  ;;  %v4967_v11 = vrot.slane %v4965_v5, 7  ;;  %v4972_v59 = vshrl.u32 %v10862_v10, 16  ;;  %v4975_v16 = vshll.u32 %v10862_v10, 16 }
 0x6c7   : > { %v4590_v21 = vpop.f32.mrb[28].mxu0  ;;  %v5663_v62 = vrot.slane %v5661_v18, 1  ;;  %v5665_v29 = vshrl.u32 %v14691_v35, 16  ;;  %v7721_v49 = vrot.slane %v10684_v40, 2 }
 0x6c8   : > { %v4968_v52 = vor.u32 %v4967_v11, %v4964_v63  ;;  %v4974_v23 = vrot.slane %v4972_v59, 6  ;;  %v4977_v41 = vrot.slane %v4975_v16, 7  ;;  %v4747_v2 = vmax.f32 %v4590_v21, 0.0  ;;  %v12312_v25 = vpop.f32.mrb[29].mxu0 }
 0x6c9   : > { %v4593_v24 = vpop.f32.mrb[30].mxu0  ;;  %v5664_v8 = vsel %vm764_vm2, %v5659_v57, %v5663_v62  ;;  %v5667_v20 = vor.u32 %v5665_v29, %v5663_v62 }
 0x6ca   : > { %v4969_v13 = vsel %vm16348_vm11, %v4960_v3, %v4968_v52  ;;  %v4970_v33 = vrot.slane %v4968_v52, 4  ;;  %v4978_v60 = vor.u32 %v4977_v41, %v4974_v23  ;;  %v10864_v22 = vpack.c.bf16 %v4747_v2, %v4747_v2  ;;  %v12313_v19 = vpop.f32.mrb[31].mxu0 }
 0x6cb   : > { %4984 = vst [vmem:[#allocation3 + $0x38] sm:$0xf] %v4969_v13  ;;  %v4748_v26 = vmax.f32 %v4593_v24, 0.0  ;;  %v17533_v52 = vrot.slane %v16366_v34, 2 }
 0x6cc   : > { %v4979_v38 = vsel %vm16348_vm11, %v4970_v33, %v4978_v60  ;;  %v5006_v27 = vshrl.u32 %v10864_v22, 16  ;;  %v5009_v7 = vshll.u32 %v10864_v22, 16  ;;  %12399 = vmatmul.mubr.bf16.gmra.mrb[16].mxu1 %v5664_v8  ;;  %v14692_v43 = vld [vmem:[#allocation3 + $0x30] sm:$0xff]   ;;  %v5004_v56 = vrot.slane %v4978_v60, 4 }
 0x6cd   : > { %4985 = vst [vmem:[#allocation3 + $0x3c] sm:$0x7] %v4979_v38  ;;  %v10865_v47 = vpack.c.bf16 %v4748_v26, %v4748_v26  ;;  %12402 = vmatprep.mubr.msk.bf16.mxu1 %vm14970_vm0, %v17537_v0  ;;  %v5669_v15 = vshll.u32 %v14692_v43, 16  ;;  %v5673_v57 = vshrl.u32 %v14692_v43, 16 }
 0x6ce   : > { %v5008_v48 = vrot.slane %v5006_v27, 6  ;;  %v5011_v51 = vrot.slane %v5009_v7, 7 }
 0x6cf   : > { %v5016_v9 = vshrl.u32 %v10865_v47, 16  ;;  %v5019_v36 = vshll.u32 %v10865_v47, 16  ;;  %v4598_v14 = vpop.f32.mrb[32].mxu0  ;;  %v5671_v4 = vrot.slane %v5669_v15, 1 }
 0x6d0   : > { %v5012_v30 = vor.u32 %v5011_v51, %v5008_v48  ;;  %v4749_v54 = vmax.f32 %v4598_v14, 0.0  ;;  %v12316_v37 = vpop.f32.mrb[33].mxu0 }
 0x6d1   : > { %v5018_v39 = vrot.slane %v5016_v9, 6  ;;  %v5021_v55 = vrot.slane %v5019_v36, 7  ;;  %v4601_v6 = vpop.f32.mrb[34].mxu0  ;;  %v5672_v53 = vsel %vm764_vm2, %v5667_v20, %v5671_v4  ;;  %v10569_v3 = vrot.slane %v5016_v9, 10 }
 0x6d2   : > { %v5013_v12 = vsel %vm16348_vm11, %v5004_v56, %v5012_v30  ;;  %v5014_v42 = vrot.slane %v5012_v30, 4  ;;  %v10867_v45 = vpack.c.bf16 %v4749_v54, %v4749_v54  ;;  %v4750_v46 = vmax.f32 %v4601_v6, 0.0  ;;  %v12317_v50 = vpop.f32.mrb[35].mxu0 }
 0x6d3   : > { %5026 = vst [vmem:[#allocation3 + $0x40] sm:$0xf] %v5013_v12  ;;  %v5022_v35 = vor.u32 %v5021_v55, %v5018_v39  ;;  %v5675_v13 = vor.u32 %v5673_v57, %v5671_v4  ;;  %v16428_v9 = vsel %vm2867_vm6, %v7721_v49, %v17533_v52 }
 0x6d4   : > { %v5044_v1 = vshrl.u32 %v10867_v45, 16  ;;  %v5047_v5 = vshll.u32 %v10867_v45, 16  ;;  %v10868_v10 = vpack.c.bf16 %v4750_v46, %v4750_v46  ;;  %12403 = vmatmul.mubr.bf16.gmra.mrb[20].mxu1 %v5672_v53  ;;  %v14694_v58 = vld [vmem:[#allocation3 + $0x38] sm:$0xff]  }
 0x6d5   : > { %v5023_v18 = vsel %vm16348_vm11, %v5014_v42, %v5022_v35  ;;  %12406 = vmatprep.mubr.msk.bf16.mxu1 %vm14970_vm0, %v17537_v0  ;;  %v5677_v62 = vshll.u32 %v14694_v58, 16  ;;  %v5681_v54 = vshrl.u32 %v14694_v58, 16 }
 0x6d6   : > { %5027 = vst [vmem:[#allocation3 + $0x44] sm:$0xf] %v5023_v18  ;;  %v5046_v63 = vrot.slane %v5044_v1, 6  ;;  %v5049_v11 = vrot.slane %v5047_v5, 7  ;;  %v5054_v59 = vshrl.u32 %v10868_v10, 16  ;;  %v5057_v16 = vshll.u32 %v10868_v10, 16 }
 0x6d7   : > { %v4606_v21 = vpop.f32.mrb[36].mxu0  ;;  %v5679_v33 = vrot.slane %v5677_v62, 1 }
 0x6d8   : > { %v5050_v23 = vor.u32 %v5049_v11, %v5046_v63  ;;  %v5056_v41 = vrot.slane %v5054_v59, 6  ;;  %v5059_v2 = vrot.slane %v5057_v16, 7  ;;  %v4751_v25 = vmax.f32 %v4606_v21, 0.0  ;;  %v12320_v24 = vpop.f32.mrb[37].mxu0 }
 0x6d9   : > { %v4609_v8 = vpop.f32.mrb[38].mxu0  ;;  %v5680_v7 = vsel %vm764_vm2, %v5675_v13, %v5679_v33  ;;  %v5683_v12 = vor.u32 %v5681_v54, %v5679_v33 }
 0x6da   : > { %v5051_v60 = vsel %vm16348_vm11, %v10569_v3, %v5050_v23  ;;  %v5052_v22 = vrot.slane %v5050_v23, 4  ;;  %v5060_v19 = vor.u32 %v5059_v2, %v5056_v41  ;;  %v10869_v26 = vpack.c.bf16 %v4751_v25, %v4751_v25  ;;  %v12321_v38 = vpop.f32.mrb[39].mxu0 }
 0x6db   : > { %5066 = vst [vmem:[#allocation3 + $0x48] sm:$0xe] %v5051_v60  ;;  %v4752_v27 = vmax.f32 %v4609_v8, 0.0 }
 0x6dc   : > { %v5061_v43 = vsel %vm16348_vm11, %v5052_v22, %v5060_v19  ;;  %v5062_v47 = vrot.slane %v5060_v19, 4  ;;  %v5080_v44 = vshrl.u32 %v10869_v26, 16  ;;  %v5083_v48 = vshll.u32 %v10869_v26, 16  ;;  %12407 = vmatmul.mubr.bf16.gmra.mrb[24].mxu1 %v5680_v7 }
 0x6dd   : > { %5067 = vst [vmem:[#allocation3 + $0x4c] sm:$0xf] %v5061_v43  ;;  %v10870_v51 = vpack.c.bf16 %v4752_v27, %v4752_v27  ;;  %12410 = vmatprep.mubr.msk.bf16.mxu1 %vm14970_vm0, %v17537_v0  ;;  %v14695_v15 = vld [vmem:[#allocation3 + $0x40] sm:$0xff]  }
 0x6de   : > { %5068 = vst [vmem:[#allocation3 + $0x50] sm:$0x1] %v5062_v47  ;;  %v5082_v36 = vrot.slane %v5080_v44, 6  ;;  %v5085_v14 = vrot.slane %v5083_v48, 7  ;;  %v5685_v37 = vshll.u32 %v14695_v15, 16  ;;  %v5689_v57 = vshrl.u32 %v14695_v15, 16 }
 0x6df   : > { %v5089_v29 = vshrl.u32 %v10870_v51, 16  ;;  %v5092_v56 = vshll.u32 %v10870_v51, 16  ;;  %v4614_v30 = vpop.f32.mrb[40].mxu0 }
 0x6e0   : > { %v5086_v4 = vor.u32 %v5085_v14, %v5082_v36  ;;  %v4753_v39 = vmax.f32 %v4614_v30, 0.0  ;;  %v12324_v55 = vpop.f32.mrb[41].mxu0  ;;  %v5687_v42 = vrot.slane %v5685_v37, 1 }
 0x6e1   : > { %v5091_v6 = vrot.slane %v5089_v29, 6  ;;  %v5094_v20 = vrot.slane %v5092_v56, 7  ;;  %v4617_v40 = vpop.f32.mrb[42].mxu0 }
 0x6e2   : > { %v5087_v45 = vrot.slane %v5086_v4, 4  ;;  %5106 = vst [vmem:[#allocation3 + $0x50] sm:$0xc] %v5086_v4  ;;  %v10871_v46 = vpack.c.bf16 %v4753_v39, %v4753_v39  ;;  %v4754_v50 = vmax.f32 %v4617_v40, 0.0  ;;  %v12325_v35 = vpop.f32.mrb[43].mxu0  ;;  %v5688_v1 = vsel %vm764_vm2, %v5683_v12, %v5687_v42 }
 0x6e3   : > { %v5095_v53 = vor.u32 %v5094_v20, %v5091_v6  ;;  %v5691_v33 = vor.u32 %v5689_v57, %v5687_v42 }
 0x6e4   : > { %v5099_v5 = vshll.u32 %v10871_v46, 16  ;;  %v5120_v10 = vshrl.u32 %v10871_v46, 16  ;;  %v10873_v58 = vpack.c.bf16 %v4754_v50, %v4754_v50  ;;  %12411 = vmatmul.mubr.bf16.gmra.mrb[28].mxu1 %v5688_v1  ;;  %v14696_v18 = vld [vmem:[#allocation3 + $0x48] sm:$0xff]  }
 0x6e5   : > { %v5096_v49 = vsel %vm16348_vm11, %v5087_v45, %v5095_v53  ;;  %v5097_v63 = vrot.slane %v5095_v53, 4  ;;  %12414 = vmatprep.mubr.msk.bf16.mxu1 %vm14970_vm0, %v17537_v0  ;;  %v5693_v62 = vshll.u32 %v14696_v18, 16  ;;  %v5697_v30 = vshrl.u32 %v14696_v18, 16 }
 0x6e6   : > { %5107 = vst [vmem:[#allocation3 + $0x54] sm:$0xf] %v5096_v49  ;;  %v5101_v11 = vrot.slane %v5099_v5, 7  ;;  %v5122_v59 = vrot.slane %v5120_v10, 6  ;;  %v5129_v16 = vshrl.u32 %v10873_v58, 16  ;;  %v5132_v3 = vshll.u32 %v10873_v58, 16 }
 0x6e7   : > { %v4622_v21 = vpop.f32.mrb[44].mxu0  ;;  %v5695_v60 = vrot.slane %v5693_v62, 1 }
 0x6e8   : > { %v5102_v23 = vsel %vm16348_vm11, %v5097_v63, %v5101_v11  ;;  %v5126_v41 = vor.u32 %v5122_v59, %v5101_v11  ;;  %v5131_v2 = vrot.slane %v5129_v16, 6  ;;  %v5134_v25 = vrot.slane %v5132_v3, 7  ;;  %v12328_v24 = vpop.f32.mrb[45].mxu0 }
 0x6e9   : > { %5108 = vst [vmem:[#allocation3 + $0x58] sm:$0x3] %v5102_v23  ;;  %v4755_v8 = vmax.f32 %v4622_v21, 0.0  ;;  %v4625_v13 = vpop.f32.mrb[46].mxu0  ;;  %v5696_v7 = vsel %vm764_vm2, %v5691_v33, %v5695_v60  ;;  %v5699_v12 = vor.u32 %v5697_v30, %v5695_v60 }
 0x6ea   : > { %v5127_v22 = vrot.slane %v5126_v41, 4  ;;  %5150 = vst [vmem:[#allocation3 + $0x58] sm:$0x8] %v5126_v41  ;;  %v5135_v19 = vor.u32 %v5134_v25, %v5131_v2  ;;  %v4756_v26 = vmax.f32 %v4625_v13, 0.0  ;;  %v12329_v38 = vpop.f32.mrb[47].mxu0 }
 0x6eb   : > { %v10874_v27 = vpack.c.bf16 %v4755_v8, %v4755_v8 }
 0x6ec   : > { %v5136_v43 = vsel %vm16348_vm11, %v5127_v22, %v5135_v19  ;;  %v10876_v47 = vpack.c.bf16 %v4756_v26, %v4756_v26  ;;  %12415 = vmatmul.mubr.bf16.gmra.mrb[32].mxu1 %v5696_v7  ;;  %v5137_v6 = vrot.slane %v5135_v19, 4 }
 0x6ed   : > { %5151 = vst [vmem:[#allocation3 + $0x5c] sm:$0xf] %v5136_v43  ;;  %v5139_v44 = vshrl.u32 %v10874_v27, 16  ;;  %v5142_v48 = vshll.u32 %v10874_v27, 16  ;;  %12418 = vmatprep.mubr.msk.bf16.mxu1 %vm14970_vm0, %v17537_v0  ;;  %v14698_v51 = vld [vmem:[#allocation3 + $0x50] sm:$0xff]  }
 0x6ee   : > { %v5173_v15 = vshrl.u32 %v10876_v47, 16  ;;  %v5176_v36 = vshll.u32 %v10876_v47, 16  ;;  %v5701_v54 = vshll.u32 %v14698_v51, 16  ;;  %v5705_v57 = vshrl.u32 %v14698_v51, 16  ;;  %v5891_v51 = vpop.f32.mrb[0].mxu1 }
 0x6ef   : > { %v5141_v14 = vrot.slane %v5139_v44, 6  ;;  %v5144_v29 = vrot.slane %v5142_v48, 7  ;;  %v4630_v56 = vpop.f32.mrb[48].mxu0 }
 0x6f0   : > { %v5175_v37 = vrot.slane %v5173_v15, 6  ;;  %v5178_v4 = vrot.slane %v5176_v36, 7  ;;  %v4757_v39 = vmax.f32 %v4630_v56, 0.0  ;;  %v12332_v55 = vpop.f32.mrb[49].mxu0  ;;  %v5703_v42 = vrot.slane %v5701_v54, 1 }
 0x6f1   : > { %v5145_v20 = vor.u32 %v5144_v29, %v5141_v14  ;;  %v4633_v40 = vpop.f32.mrb[50].mxu0  ;;  %v12384_v14 = vpop.f32.mrb[1].mxu1 }
 0x6f2   : > { %v5179_v45 = vor.u32 %v5178_v4, %v5175_v37  ;;  %v10877_v46 = vpack.c.bf16 %v4757_v39, %v4757_v39  ;;  %v4758_v50 = vmax.f32 %v4633_v40, 0.0  ;;  %v12333_v35 = vpop.f32.mrb[51].mxu0  ;;  %v5704_v5 = vsel %vm764_vm2, %v5699_v12, %v5703_v42  ;;  %v5893_v37 = vpop.f32.mrb[2].mxu1 }
 0x6f3   : > { %v5146_v53 = vsel %vm16348_vm11, %v5137_v6, %v5145_v20  ;;  %v5171_v1 = vrot.slane %v5145_v20, 4  ;;  %v5707_v33 = vor.u32 %v5705_v57, %v5703_v42  ;;  %v12385_v20 = vpop.f32.mrb[3].mxu1 }
 0x6f4   : > { %5152 = vst [vmem:[#allocation3 + $0x60] sm:$0x7] %v5146_v53  ;;  %v5183_v10 = vshrl.u32 %v10877_v46, 16  ;;  %v5186_v58 = vshll.u32 %v10877_v46, 16  ;;  %v10879_v18 = vpack.c.bf16 %v4758_v50, %v4758_v50  ;;  %12419 = vmatmul.mubr.bf16.gmra.mrb[36].mxu1 %v5704_v5  ;;  %v14699_v49 = vld [vmem:[#allocation3 + $0x58] sm:$0xff]   ;;  %v5181_v23 = vrot.slane %v5179_v45, 4 }
 0x6f5   : > { %v5180_v63 = vsel %vm16348_vm11, %v5171_v1, %v5179_v45  ;;  %12422 = vmatprep.mubr.msk.bf16.mxu1 %vm14970_vm0, %v17537_v0  ;;  %v5709_v62 = vshll.u32 %v14699_v49, 16  ;;  %v5713_v55 = vshrl.u32 %v14699_v49, 16 }
 0x6f6   : > { %5193 = vst [vmem:[#allocation3 + $0x64] sm:$0xf] %v5180_v63  ;;  %v5185_v11 = vrot.slane %v5183_v10, 6  ;;  %v5188_v59 = vrot.slane %v5186_v58, 7  ;;  %v5211_v16 = vshrl.u32 %v10879_v18, 16  ;;  %v5214_v3 = vshll.u32 %v10879_v18, 16 }
 0x6f7   : > { %v4638_v21 = vpop.f32.mrb[52].mxu0  ;;  %v5711_v60 = vrot.slane %v5709_v62, 1  ;;  %v10582_v27 = vrot.slane %v5183_v10, 10 }
 0x6f8   : > { %v5189_v41 = vor.u32 %v5188_v59, %v5185_v11  ;;  %v5213_v2 = vrot.slane %v5211_v16, 6  ;;  %v4759_v25 = vmax.f32 %v4638_v21, 0.0  ;;  %v12336_v24 = vpop.f32.mrb[53].mxu0  ;;  %v5216_v8 = vrot.slane %v5214_v3, 7 }
 0x6f9   : > { %v4641_v13 = vpop.f32.mrb[54].mxu0  ;;  %v5712_v43 = vsel %vm764_vm2, %v5707_v33, %v5711_v60  ;;  %v5715_v35 = vor.u32 %v5713_v55, %v5711_v60 }
 0x6fa   : > { %v5190_v22 = vsel %vm16348_vm11, %v5181_v23, %v5189_v41  ;;  %v10880_v19 = vpack.c.bf16 %v4759_v25, %v4759_v25  ;;  %v4760_v26 = vmax.f32 %v4641_v13, 0.0  ;;  %v12337_v38 = vpop.f32.mrb[55].mxu0  ;;  %v5217_v7 = vor.u32 %v5216_v8, %v5213_v2 }
 0x6fb   : > { %5194 = vst [vmem:[#allocation3 + $0x68] sm:$0xf] %v5190_v22 }
 0x6fc   : > { %v5221_v47 = vshrl.u32 %v10880_v19, 16  ;;  %v5224_v44 = vshll.u32 %v10880_v19, 16  ;;  %v10881_v48 = vpack.c.bf16 %v4760_v26, %v4760_v26  ;;  %12423 = vmatmul.mubr.bf16.gmra.mrb[40].mxu1 %v5712_v43  ;;  %v5218_v15 = vsel %vm16348_vm11, %v10582_v27, %v5217_v7 }
 0x6fd   : > { %12426 = vmatprep.mubr.msk.bf16.mxu1 %vm14970_vm0, %v17537_v0  ;;  %v16456_v36 = vld [vmem:[#allocation3 + $0x60] sm:$0xff]   ;;  %5233 = vst [vmem:[#allocation3 + $0x6c] sm:$0xe] %v5218_v15  ;;  %v5219_v4 = vrot.slane %v5217_v7, 4 }
 0x6fe   : > { %v5223_v29 = vrot.slane %v5221_v47, 6  ;;  %v5226_v56 = vrot.slane %v5224_v44, 7  ;;  %v5247_v30 = vshrl.u32 %v10881_v48, 16  ;;  %v5250_v54 = vshll.u32 %v10881_v48, 16 }
 0x6ff   : > { %v4646_v39 = vpop.f32.mrb[56].mxu0  ;;  %v5717_v6 = vshll.u32 %v16456_v36, 16  ;;  %v5721_v2 = vshrl.u32 %v16456_v36, 16 }
 0x700   : > { %v5227_v40 = vor.u32 %v5226_v56, %v5223_v29  ;;  %v5249_v12 = vrot.slane %v5247_v30, 6  ;;  %v5252_v42 = vrot.slane %v5250_v54, 7  ;;  %v4761_v45 = vmax.f32 %v4646_v39, 0.0  ;;  %v12340_v46 = vpop.f32.mrb[57].mxu0 }
 0x701   : > { %v4649_v50 = vpop.f32.mrb[58].mxu0  ;;  %v5719_v53 = vrot.slane %v5717_v6, 1 }
 0x702   : > { %v5228_v1 = vsel %vm16348_vm11, %v5219_v4, %v5227_v40  ;;  %v5229_v5 = vrot.slane %v5227_v40, 4  ;;  %v5253_v10 = vor.u32 %v5252_v42, %v5249_v12  ;;  %v10882_v58 = vpack.c.bf16 %v4761_v45, %v4761_v45  ;;  %v12341_v18 = vpop.f32.mrb[59].mxu0 }
 0x703   : > { %5234 = vst [vmem:[#allocation3 + $0x70] sm:$0xf] %v5228_v1  ;;  %v4762_v49 = vmax.f32 %v4649_v50, 0.0  ;;  %v5720_v63 = vsel %vm764_vm2, %v5715_v35, %v5719_v53  ;;  %v5723_v26 = vor.u32 %v5721_v2, %v5719_v53 }
 0x704   : > { %5235 = vst [vmem:[#allocation3 + $0x74] sm:$0x1] %v5229_v5  ;;  %5273 = vst [vmem:[#allocation3 + $0x74] sm:$0xc] %v5253_v10  ;;  %v5256_v11 = vshrl.u32 %v10882_v58, 16  ;;  %v5259_v59 = vshll.u32 %v10882_v58, 16  ;;  %12427 = vmatmul.mubr.bf16.gmra.mrb[44].mxu1 %v5720_v63 }
 0x705   : > { %v10883_v16 = vpack.c.bf16 %v4762_v49, %v4762_v49  ;;  %12430 = vmatprep.mubr.msk.bf16.mxu1 %vm14970_vm0, %v17537_v0  ;;  %v16464_v3 = vld [vmem:[#allocation3 + $0x68] sm:$0xff]   ;;  %v5254_v24 = vrot.slane %v5253_v10, 4 }
 0x706   : > { %v5258_v21 = vrot.slane %v5256_v11, 6  ;;  %v5261_v57 = vrot.slane %v5259_v59, 7  ;;  %v5725_v25 = vshll.u32 %v16464_v3, 16  ;;  %v5729_v54 = vshrl.u32 %v16464_v3, 16 }
 0x707   : > { %v5266_v62 = vshll.u32 %v10883_v16, 16  ;;  %v5287_v23 = vshrl.u32 %v10883_v16, 16  ;;  %v4654_v41 = vpop.f32.mrb[60].mxu0 }
 0x708   : > { %v5262_v8 = vor.u32 %v5261_v57, %v5258_v21  ;;  %v4763_v13 = vmax.f32 %v4654_v41, 0.0  ;;  %v12344_v33 = vpop.f32.mrb[61].mxu0  ;;  %v5727_v38 = vrot.slane %v5725_v25, 1 }
 0x709   : > { %v5268_v60 = vrot.slane %v5266_v62, 7  ;;  %v5289_v22 = vrot.slane %v5287_v23, 6  ;;  %v4657_v19 = vpop.f32.mrb[62].mxu0 }
 0x70a   : > { %v5263_v27 = vsel %vm16348_vm11, %v5254_v24, %v5262_v8  ;;  %v5264_v7 = vrot.slane %v5262_v8, 4  ;;  %v10885_v43 = vpack.c.bf16 %v4763_v13, %v4763_v13  ;;  %v4764_v47 = vmax.f32 %v4657_v19, 0.0  ;;  %v12345_v44 = vpop.f32.mrb[63].mxu0 }
 0x70b   : > { %5274 = vst [vmem:[#allocation3 + $0x78] sm:$0xf] %v5263_v27  ;;  %v5293_v48 = vor.u32 %v5289_v22, %v5268_v60  ;;  %v5728_v51 = vsel %vm764_vm2, %v5723_v26, %v5727_v38  ;;  %v16471_v15 = vld [vmem:[#allocation3 + $0x70] sm:$0xff]   ;;  %v5731_v12 = vor.u32 %v5729_v54, %v5727_v38 }
 0x70c   : > { %v5269_v14 = vsel %vm16348_vm11, %v5264_v7, %v5268_v60  ;;  %v5296_v29 = vshrl.u32 %v10885_v43, 16  ;;  %v5299_v56 = vshll.u32 %v10885_v43, 16  ;;  %v10886_v30 = vpack.c.bf16 %v4764_v47, %v4764_v47  ;;  %12431 = vmatmul.mubr.bf16.gmra.mrb[48].mxu1 %v5728_v51 }
 0x70d   : > { %5275 = vst [vmem:[#allocation3 + $0x7c] sm:$0x3] %v5269_v14  ;;  %5317 = vst [vmem:[#allocation3 + $0x7c] sm:$0x8] %v5293_v48  ;;  %12434 = vmatprep.mubr.msk.bf16.mxu1 %vm14970_vm0, %v17537_v0  ;;  %v5733_v37 = vshll.u32 %v16471_v15, 16  ;;  %v5294_v20 = vrot.slane %v5293_v48, 4 }
 0x70e   : > { %v5298_v4 = vrot.slane %v5296_v29, 6  ;;  %v5301_v39 = vrot.slane %v5299_v56, 7  ;;  %v5306_v55 = vshrl.u32 %v10886_v30, 16  ;;  %v5309_v6 = vshll.u32 %v10886_v30, 16 }
 0x70f   : > { %v4662_v40 = vpop.f32.mrb[64].mxu0  ;;  %v5735_v42 = vrot.slane %v5733_v37, 1  ;;  %v5737_v13 = vshrl.u32 %v16471_v15, 16 }
 0x710   : > { %v5302_v45 = vor.u32 %v5301_v39, %v5298_v4  ;;  %v5308_v46 = vrot.slane %v5306_v55, 6  ;;  %v5311_v50 = vrot.slane %v5309_v6, 7  ;;  %v4765_v35 = vmax.f32 %v4662_v40, 0.0  ;;  %v12348_v53 = vpop.f32.mrb[65].mxu0 }
 0x711   : > { %v4665_v1 = vpop.f32.mrb[66].mxu0  ;;  %v5736_v5 = vsel %vm764_vm2, %v5731_v12, %v5735_v42  ;;  %v5739_v43 = vor.u32 %v5737_v13, %v5735_v42 }
 0x712   : > { %v5303_v10 = vsel %vm16348_vm11, %v5294_v20, %v5302_v45  ;;  %v5304_v58 = vrot.slane %v5302_v45, 4  ;;  %v5312_v18 = vor.u32 %v5311_v50, %v5308_v46  ;;  %v10888_v49 = vpack.c.bf16 %v4765_v35, %v4765_v35  ;;  %v12349_v63 = vpop.f32.mrb[67].mxu0 }
 0x713   : > { %5318 = vst [vmem:[#allocation3 + $0x80] sm:$0xf] %v5303_v10  ;;  %v4766_v11 = vmax.f32 %v4665_v1, 0.0 }
 0x714   : > { %v5313_v59 = vsel %vm16348_vm11, %v5304_v58, %v5312_v18  ;;  %v5340_v16 = vshrl.u32 %v10888_v49, 16  ;;  %v5343_v21 = vshll.u32 %v10888_v49, 16  ;;  %12435 = vmatmul.mubr.bf16.gmra.mrb[52].mxu1 %v5736_v5  ;;  %v16484_v57 = vld [vmem:[#allocation3 + $0x78] sm:$0xff]   ;;  %v5338_v33 = vrot.slane %v5312_v18, 4 }
 0x715   : > { %5319 = vst [vmem:[#allocation3 + $0x84] sm:$0x7] %v5313_v59  ;;  %v10889_v62 = vpack.c.bf16 %v4766_v11, %v4766_v11  ;;  %12438 = vmatprep.mubr.msk.bf16.mxu1 %vm14970_vm0, %v17537_v0  ;;  %v5741_v2 = vshll.u32 %v16484_v57, 16  ;;  %v5745_v45 = vshrl.u32 %v16484_v57, 16 }
 0x716   : > { %v5342_v23 = vrot.slane %v5340_v16, 6  ;;  %v5345_v41 = vrot.slane %v5343_v21, 7 }
 0x717   : > { %v5350_v25 = vshrl.u32 %v10889_v62, 16  ;;  %v5353_v24 = vshll.u32 %v10889_v62, 16  ;;  %v4670_v8 = vpop.f32.mrb[68].mxu0  ;;  %v5743_v26 = vrot.slane %v5741_v2, 1 }
 0x718   : > { %v5346_v60 = vor.u32 %v5345_v41, %v5342_v23  ;;  %v4767_v22 = vmax.f32 %v4670_v8, 0.0  ;;  %v12352_v19 = vpop.f32.mrb[69].mxu0 }
 0x719   : > { %v5352_v38 = vrot.slane %v5350_v25, 6  ;;  %v5355_v27 = vrot.slane %v5353_v24, 7  ;;  %v4673_v7 = vpop.f32.mrb[70].mxu0  ;;  %v5744_v56 = vsel %vm764_vm2, %v5739_v43, %v5743_v26  ;;  %v10595_v12 = vrot.slane %v5350_v25, 10 }
 0x71a   : > { %v5347_v47 = vsel %vm16348_vm11, %v5338_v33, %v5346_v60  ;;  %v5348_v44 = vrot.slane %v5346_v60, 4  ;;  %v10891_v48 = vpack.c.bf16 %v4767_v22, %v4767_v22  ;;  %v4768_v51 = vmax.f32 %v4673_v7, 0.0  ;;  %v12353_v14 = vpop.f32.mrb[71].mxu0 }
 0x71b   : > { %5360 = vst [vmem:[#allocation3 + $0x88] sm:$0xf] %v5347_v47  ;;  %v5356_v29 = vor.u32 %v5355_v27, %v5352_v38  ;;  %v5747_v58 = vor.u32 %v5745_v45, %v5743_v26  ;;  %v16512_v27 = vld [vmem:[#allocation3 + $0x68] sm:$0xff]  }
 0x71c   : > { %v5378_v30 = vshrl.u32 %v10891_v48, 16  ;;  %v5381_v54 = vshll.u32 %v10891_v48, 16  ;;  %v10892_v37 = vpack.c.bf16 %v4768_v51, %v4768_v51  ;;  %12439 = vmatmul.mubr.bf16.gmra.mrb[56].mxu1 %v5744_v56  ;;  %v16493_v4 = vld [vmem:[#allocation3 + $0x80] sm:$0xff]   ;;  %v16514_v56 = vld [vmem:[#allocation3 + $0x70] sm:$0xff]  }
 0x71d   : > { %v5357_v39 = vsel %vm16348_vm11, %v5348_v44, %v5356_v29  ;;  %12442 = vmatprep.mubr.msk.bf16.mxu1 %vm14970_vm0, %v17537_v0  ;;  %v5749_v46 = vshll.u32 %v16493_v4, 16  ;;  %v5753_v26 = vshrl.u32 %v16493_v4, 16 }
 0x71e   : > { %5361 = vst [vmem:[#allocation3 + $0x8c] sm:$0xf] %v5357_v39  ;;  %v5380_v55 = vrot.slane %v5378_v30, 6  ;;  %v5383_v6 = vrot.slane %v5381_v54, 7  ;;  %v5388_v20 = vshrl.u32 %v10892_v37, 16  ;;  %v5391_v40 = vshll.u32 %v10892_v37, 16 }
 0x71f   : > { %v4678_v42 = vpop.f32.mrb[72].mxu0  ;;  %v5751_v18 = vrot.slane %v5749_v46, 1 }
 0x720   : > { %v5384_v50 = vor.u32 %v5383_v6, %v5380_v55  ;;  %v5390_v35 = vrot.slane %v5388_v20, 6  ;;  %v5393_v53 = vrot.slane %v5391_v40, 7  ;;  %v4769_v1 = vmax.f32 %v4678_v42, 0.0  ;;  %v12356_v5 = vpop.f32.mrb[73].mxu0  ;;  %v16517_v6 = vld [vmem:[#allocation3 + $0x78] sm:$0xff]  }
 0x721   : > { %v4681_v10 = vpop.f32.mrb[74].mxu0  ;;  %v5752_v62 = vsel %vm764_vm2, %v5747_v58, %v5751_v18  ;;  %v5755_v14 = vor.u32 %v5753_v26, %v5751_v18  ;;  %v7318_v20 = vshrl.u32 %v16512_v27, 16  ;;  %v7327_v58 = vshrl.u32 %v16514_v56, 16 }
 0x722   : > { %v5385_v49 = vsel %vm16348_vm11, %v10595_v12, %v5384_v50  ;;  %v5386_v63 = vrot.slane %v5384_v50, 4  ;;  %v5394_v11 = vor.u32 %v5393_v53, %v5390_v35  ;;  %v10893_v59 = vpack.c.bf16 %v4769_v1, %v4769_v1  ;;  %v12357_v16 = vpop.f32.mrb[75].mxu0  ;;  %v16528_v53 = vld [vmem:[#allocation3 + $0x80] sm:$0xff]  }
 0x723   : > { %5400 = vst [vmem:[#allocation3 + $0x90] sm:$0xe] %v5385_v49  ;;  %v4770_v21 = vmax.f32 %v4681_v10, 0.0  ;;  %v7321_v10 = vshll.u32 %v16512_v27, 16  ;;  %v7330_v18 = vshll.u32 %v16514_v56, 16 }
 0x724   : > { %v5395_v23 = vsel %vm16348_vm11, %v5386_v63, %v5394_v11  ;;  %v5396_v41 = vrot.slane %v5394_v11, 4  ;;  %v5414_v2 = vshrl.u32 %v10893_v59, 16  ;;  %v5417_v25 = vshll.u32 %v10893_v59, 16  ;;  %12443 = vmatmul.mubr.bf16.gmra.mrb[60].mxu1 %v5752_v62 }
 0x725   : > { %5401 = vst [vmem:[#allocation3 + $0x94] sm:$0xf] %v5395_v23  ;;  %v10894_v24 = vpack.c.bf16 %v4770_v21, %v4770_v21  ;;  %12446 = vmatprep.mubr.msk.bf16.mxu1 %vm14970_vm0, %v17537_v0  ;;  %v16508_v8 = vld [vmem:[#allocation3 + $0x88] sm:$0xff]   ;;  %v7320_v11 = vrot.slane %v7318_v20, 1  ;;  %v7336_v59 = vshrl.u32 %v16517_v6, 16  ;;  %v7323_v21 = vrot.slane %v7321_v10, 2 }
 0x726   : > { %5402 = vst [vmem:[#allocation3 + $0x98] sm:$0x1] %v5396_v41  ;;  %v5416_v13 = vrot.slane %v5414_v2, 6  ;;  %v5419_v33 = vrot.slane %v5417_v25, 7  ;;  %v5757_v38 = vshll.u32 %v16508_v8, 16  ;;  %v5761_v45 = vshrl.u32 %v16508_v8, 16 }
 0x727   : > { %v5423_v60 = vshrl.u32 %v10894_v24, 16  ;;  %v5426_v22 = vshll.u32 %v10894_v24, 16  ;;  %v4686_v19 = vpop.f32.mrb[76].mxu0  ;;  %v16530_v5 = vld [vmem:[#allocation3 + $0x88] sm:$0xff]   ;;  %v7329_v62 = vrot.slane %v7327_v58, 1  ;;  %v7332_v41 = vrot.slane %v7330_v18, 2 }
 0x728   : > { %v5420_v7 = vor.u32 %v5419_v33, %v5416_v13  ;;  %v4771_v43 = vmax.f32 %v4686_v19, 0.0  ;;  %v12360_v47 = vpop.f32.mrb[77].mxu0  ;;  %v5759_v29 = vrot.slane %v5757_v38, 1  ;;  %v7338_v2 = vrot.slane %v7336_v59, 1 }
 0x729   : > { %v5425_v44 = vrot.slane %v5423_v60, 6  ;;  %v5428_v48 = vrot.slane %v5426_v22, 7  ;;  %v4689_v51 = vpop.f32.mrb[78].mxu0  ;;  %v7339_v25 = vshll.u32 %v16517_v6, 16  ;;  %v7345_v24 = vshrl.u32 %v16528_v53, 16 }
 0x72a   : > { %v5421_v30 = vrot.slane %v5420_v7, 4  ;;  %5440 = vst [vmem:[#allocation3 + $0x98] sm:$0xc] %v5420_v7  ;;  %v10895_v54 = vpack.c.bf16 %v4771_v43, %v4771_v43  ;;  %v12361_v37 = vpop.f32.mrb[79].mxu0  ;;  %v5760_v55 = vsel %vm764_vm2, %v5755_v14, %v5759_v29  ;;  %v5763_v1 = vor.u32 %v5761_v45, %v5759_v29 }
 0x72b   : > { %v5429_v39 = vor.u32 %v5428_v48, %v5425_v44  ;;  %v7348_v13 = vshll.u32 %v16528_v53, 16  ;;  %v16544_v22 = vor.u32 %v7323_v21, %v7320_v11  ;;  %v7333_v19 = vor.u32 %v7332_v41, %v7329_v62 }
 0x72c   : > { %v5433_v40 = vshll.u32 %v10895_v54, 16  ;;  %12447 = vmatmul.mubr.bf16.gmra.mrb[64].mxu1 %v5760_v55  ;;  %v16520_v12 = vld [vmem:[#allocation3 + $0x90] sm:$0xff]   ;;  %v7354_v26 = vshrl.u32 %v16530_v5, 16  ;;  %v7341_v43 = vrot.slane %v7339_v25, 2  ;;  %v7347_v44 = vrot.slane %v7345_v24, 1 }
 0x72d   : > { %v5430_v42 = vsel %vm16348_vm11, %v5421_v30, %v5429_v39  ;;  %12450 = vmatprep.mubr.msk.bf16.mxu1 %vm14970_vm0, %v17537_v0  ;;  %v5431_v46 = vrot.slane %v5429_v39, 4  ;;  %v5765_v35 = vshll.u32 %v16520_v12, 16  ;;  %v16542_v60 = vld [vmem:[#allocation3 + $0x90] sm:$0xff]   ;;  %v16553_v47 = vsel %vm2355_vm5, %v16544_v22, %v7333_v19 }
 0x72e   : > { %5441 = vst [vmem:[#allocation3 + $0x9c] sm:$0xf] %v5430_v42  ;;  %v5435_v50 = vrot.slane %v5433_v40, 7  ;;  %v7350_v48 = vrot.slane %v7348_v13, 2  ;;  %v5769_v51 = vshrl.u32 %v16520_v12, 16  ;;  %v7342_v29 = vor.u32 %v7341_v43, %v7338_v2 }
 0x72f   : > { %v5767_v63 = vrot.slane %v5765_v35, 1  ;;  %v4693_v16 = vpop.f32.mrb[144].mxu0  ;;  %v7357_v30 = vshll.u32 %v16530_v5, 16  ;;  %v7363_v55 = vshrl.u32 %v16542_v60, 16 }
 0x730   : > { %v5436_v49 = vsel %vm16348_vm11, %v5431_v46, %v5435_v50  ;;  %v12364_v33 = vpop.f32.mrb[145].mxu0  ;;  %v7351_v39 = vor.u32 %v7350_v48, %v7347_v44  ;;  %v16564_v45 = vsel %vm2355_vm5, %v7333_v19, %v7342_v29  ;;  %v7356_v46 = vrot.slane %v7354_v26, 1 }
 0x731   : > { %5442 = vst [vmem:[#allocation3 + $0xa0] sm:$0x3] %v5436_v49  ;;  %v5768_v23 = vsel %vm764_vm2, %v5763_v1, %v5767_v63  ;;  %v4695_v38 = vpop.f32.mrb[146].mxu0  ;;  %v5771_v20 = vor.u32 %v5769_v51, %v5767_v63  ;;  %v7359_v10 = vrot.slane %v7357_v30, 2  ;;  %v7365_v18 = vrot.slane %v7363_v55, 1 }
 0x732   : > { %v12365_v54 = vpop.f32.mrb[147].mxu0  ;;  %v16569_v1 = vsel %vm2355_vm5, %v7342_v29, %v7351_v39  ;;  %v7366_v63 = vshll.u32 %v16542_v60, 16  ;;  %v16600_v30 = vld [vmem:[#allocation3 + $0xa8] ss:$0 sps:$4 sm:$0xff]   ;;  %v7748_v55 = vrot.slane %v16517_v6, 2 }
 0x733   : > { %v7360_v49 = vor.u32 %v7359_v10, %v7356_v46  ;;  %17557 = vst [vmem:[#allocation11_spill] sm:$0xff] %v16600_v30  ;;  %v17532_v54 = vrot.slane %v16512_v27, 2  ;;  %v7754_v46 = vrot.slane %v16542_v60, 2 }
 0x734   : > { %12451 = vmatmul.mubr.bf16.gmra.mrb[68].mxu1 %v5768_v23  ;;  %v7368_v23 = vrot.slane %v7366_v63, 2 }
 0x735   : > { %12454 = vmatprep.mubr.msk.bf16.mxu1 %vm14970_vm0, %v17537_v0  ;;  %v16549_v7 = vld [vmem:[#allocation3 + $0x98] sm:$0xff]   ;;  %v16580_v62 = vsel %vm2355_vm5, %v7351_v39, %v7360_v49  ;;  %v7746_v39 = vrot.slane %v16514_v56, 2 }
 0x736   : > { %v5773_v14 = vshll.u32 %v16549_v7, 16  ;;  %v16561_v42 = vld [vmem:[#allocation3 + $0x98] sm:$0xff]   ;;  %v5777_v16 = vshrl.u32 %v16549_v7, 16  ;;  %v7369_v33 = vor.u32 %v7368_v23, %v7365_v18 }
 0x737   : > { %v7372_v11 = vshrl.u32 %v16561_v42, 16  ;;  %v7375_v59 = vshll.u32 %v16561_v42, 16  ;;  %v16614_v10 = vsel %vm2867_vm6, %v7746_v39, %v7748_v55 }
 0x738   : > { %v16558_v37 = vld [vmem:[#allocation3 + $0xa0] ss:$0 sps:$4 sm:$0x77]   ;;  %v5775_v40 = vrot.slane %v5773_v14, 1  ;;  %v16586_v44 = vsel %vm2355_vm5, %v7360_v49, %v7369_v33 }
 0x739   : > { %v5781_v50 = vshll.u32 %v16558_v37, 16  ;;  %v16571_v58 = vld [vmem:[#allocation3 + $0xa0] sm:$0xff]   ;;  %v7374_v41 = vrot.slane %v7372_v11, 1  ;;  %v7377_v2 = vrot.slane %v7375_v59, 2  ;;  %v5785_v29 = vshrl.u32 %v16558_v37, 16 }
 0x73a   : > { %v5776_v35 = vsel %vm764_vm2, %v5771_v20, %v5775_v40  ;;  %v7381_v25 = vshrl.u32 %v16571_v58, 16  ;;  %v7384_v24 = vshll.u32 %v16571_v58, 16  ;;  %v5779_v13 = vor.u32 %v5777_v16, %v5775_v40 }
 0x73b   : > { %v5783_v21 = vrot.slane %v5781_v50, 1  ;;  %v7378_v19 = vor.u32 %v7377_v2, %v7374_v41  ;;  %v7750_v20 = vrot.slane %v16528_v53, 2  ;;  %v7752_v40 = vrot.slane %v16530_v5, 2  ;;  %v14713_v2 = vld [vmem:[#allocation6 + $0x80] sm:$0xff]  }
 0x73c   : > { %12455 = vmatmul.mubr.bf16.gmra.mrb[72].mxu1 %v5776_v35  ;;  %v7383_v26 = vrot.slane %v7381_v25, 1  ;;  %v7386_v38 = vrot.slane %v7384_v24, 2  ;;  %v16611_v35 = vsel %vm2867_vm6, %v17532_v54, %v7746_v39  ;;  %v7756_v11 = vrot.slane %v16561_v42, 2  ;;  %v14714_v25 = vld [vmem:[#allocation6 + $0x88] sm:$0xff]   ;;  %v14715_v24 = vld [vmem:[#allocation6 + $0x90] sm:$0xff]  }
 0x73d   : > { %12458 = vmatprep.mubr.msk.bf16.mxu1 %vm14970_vm0, %v17537_v0  ;;  %v5784_v43 = vsel %vm764_vm2, %v5779_v13, %v5783_v21  ;;  %v16589_v48 = vsel %vm2355_vm5, %v7369_v33, %v7378_v19  ;;  %v5787_v50 = vor.u32 %v5785_v29, %v5783_v21  ;;  %v16617_v18 = vsel %vm2867_vm6, %v7748_v55, %v7750_v20  ;;  %v16646_v13 = vld [vmem:[#allocation3 + $0x8] sm:$0xff]   ;;  %v14717_v33 = vld [vmem:[#allocation6 + $0xa0] sm:$0xff]   ;;  %v14720_v29 = vld [vmem:[#allocation6 + $0xb8] sm:$0xff]  }
 0x73e   : > { %v16591_v51 = vor.u32 %v7386_v38, %v7383_v26  ;;  %17558 = vst [vmem:[#allocation12_spill] sm:$0xff] %v16617_v18  ;;  %v16620_v49 = vsel %vm2867_vm6, %v7750_v20, %v7752_v40  ;;  %v16623_v63 = vsel %vm2867_vm6, %v7752_v40, %v7754_v46  ;;  %v7758_v59 = vrot.slane %v16571_v58, 2  ;;  %v14718_v26 = vld [vmem:[#allocation6 + $0xa8] sm:$0xff]   ;;  %v14719_v38 = vld [vmem:[#allocation6 + $0xb0] sm:$0xff]   ;;  %v8569_v39 = vld [vmem:[#allocation3 + $0x14] sm:$0xf] }
 0x73f   : > { %17559 = vst [vmem:[#allocation13_spill] sm:$0xff] %v16620_v49  ;;  %17560 = vst [vmem:[#allocation14_spill] sm:$0xff] %v16623_v63  ;;  %v17531_v16 = vrot.slane %v16600_v30, 2  ;;  %v16631_v21 = vsel %vm2867_vm6, %v7754_v46, %v7756_v11  ;;  %v9222_v55 = vld [vmem:[#allocation3 + $0x10] sm:$0x8]  ;;  %v14808_v20 = vld [vmem:[#allocation3 + $0x18] sm:$0xff]  }
 0x740   : > { %v16597_v14 = vsel %vm2355_vm5, %v7378_v19, %v16591_v51  ;;  %17561 = vst [vmem:[#allocation15_spill] sm:$0xff] %v16631_v21  ;;  %v16634_v23 = vsel %vm2867_vm6, %v7756_v11, %v7758_v59  ;;  %v16653_v19 = vld [vmem:[#allocation3 + $0x10] sm:$0xff]   ;;  %v14810_v40 = vld [vmem:[#allocation3 + $0x20] sm:$0xff]   ;;  %v14811_v46 = vld [vmem:[#allocation3 + $0x28] sm:$0xff]   ;;  %vm9759_vm2 = vsmask.f32 3328 }
 0x741   : > { %17562 = vst [vmem:[#allocation16_spill] sm:$0xff] %v16634_v23  ;;  %v16639_v41 = vsel %vm2867_vm6, %v7758_v59, %v17531_v16  ;;  %v14813_v11 = vld [vmem:[#allocation3 + $0x30] sm:$0xff]   ;;  %v14814_v59 = vld [vmem:[#allocation3 + $0x38] sm:$0xff]   ;;  %v9246_v16 = vrot.slane %v14810_v40, 3  ;;  %v9248_v54 = vrot.slane %v14811_v46, 3  ;;  %v14826_v21 = vld [vmem:[#allocation3 + $0x80] sm:$0xff]  }
 0x742   : > { %17563 = vst [vmem:[#allocation17_spill] sm:$0xff] %v16639_v41  ;;  %v9250_v52 = vrot.slane %v14813_v11, 3  ;;  %v9252_v31 = vrot.slane %v14814_v59, 3  ;;  %v14825_v23 = vld [vmem:[#allocation3 + $0x78] sm:$0xff]   ;;  %v14829_v11 = vld [vmem:[#allocation3 + $0x90] sm:$0xff]   ;;  %v14832_v63 = vld [vmem:[#allocation3 + $0xa0] sm:$0xff]  }
 0x743   : > { %v14831_v59 = vld [vmem:[#allocation3 + $0x98] sm:$0xff]  }
 0x744   : > { %12459 = vmatmul.mubr.bf16.gmra.mrb[76].mxu1 %v5784_v43  ;;  %v16660_v43 = vld [vmem:[#allocation3 + $0x18] sm:$0xff]   ;;  %v16682_v40 = vsel %vm4391_vm8, %v9248_v54, %v9250_v52  ;;  %v16685_v46 = vsel %vm4391_vm8, %v9250_v52, %v9252_v31 }
 0x745   : > { %12462 = vmatprep.mubr.msk.bf16.mxu1 %vm14970_vm0, %v17537_v0 }
 0x74c   : > { %12463 = vmatmul.mubr.bf16.gmra.mrb[80].mxu1 %v5787_v50  ;;  %v10751_v50 = vcombine.low %v9222_v55, %v8569_v39  ;;  %v14822_v39 = vld [vmem:[#allocation3 + $0x68] sm:$0xff]   ;;  %v14824_v55 = vld [vmem:[#allocation3 + $0x70] sm:$0xff]  }
 0x74d   : > { %12482 = vmatprep.mubr.msk.bf16.mxu1 %vm14970_vm0, %v17537_v0  ;;  %v9264_v18 = vrot.slane %v14822_v39, 3 }
 0x754   : > { %12483 = vmatmul.mubr.bf16.vlgmr.msra.gmra.mrb[84].mxu1 %v16301_v17  ;;  %v14716_v17 = vld [vmem:[#allocation6 + $0x98] sm:$0xff]  }
 0x755   : > { %12567 = vmatpush3.bf16.msra.mxu1 %v14713_v2  ;;  %12486 = vmatprep.mubr.msk.bf16.mxu1 %vm14970_vm0, %v17537_v0  ;;  %v14815_v2 = vld [vmem:[#allocation3 + $0x40] sm:$0xff]  }
 0x756   : > { %12568 = vmatprep.subr.bf16.mxu1 %v17537_v0 }
 0x759   : > { %12569 = vmatpush3.bf16.msra.mxu1 %v14714_v25  ;;  %v14817_v25 = vld [vmem:[#allocation3 + $0x48] sm:$0xff]  }
 0x75a   : > { %12570 = vmatprep.subr.bf16.mxu1 %v17537_v0 }
 0x75c   : > { %12487 = vmatmul.mubr.bf16.gmra.mrb[4].mxu1 %v16646_v13 }
 0x75d   : > { %12490 = vmatprep.mubr.msk.bf16.mxu1 %vm14970_vm0, %v17537_v0  ;;  %12571 = vmatpush3.bf16.msra.mxu1 %v14715_v24  ;;  %v16667_v24 = vld [vmem:[#allocation3 + $0x20] sm:$0xff]  }
 0x75e   : > { %12572 = vmatprep.subr.bf16.mxu1 %v17537_v0 }
 0x761   : > { %12573 = vmatpush3.bf16.msra.mxu1 %v14716_v17  ;;  %v14818_v17 = vld [vmem:[#allocation3 + $0x50] sm:$0xff]  }
 0x762   : > { %12574 = vmatprep.subr.bf16.mxu1 %v17537_v0 }
 0x764   : > { %12491 = vmatmul.mubr.bf16.gmra.mrb[8].mxu1 %v16653_v19 }
 0x765   : > { %12494 = vmatprep.mubr.msk.bf16.mxu1 %vm14970_vm0, %v17537_v0  ;;  %12575 = vmatpush3.bf16.msra.mxu1 %v14717_v33  ;;  %v14819_v33 = vld [vmem:[#allocation3 + $0x58] sm:$0xff]  }
 0x766   : > { %12576 = vmatprep.subr.bf16.mxu1 %v17537_v0 }
 0x769   : > { %12577 = vmatpush3.bf16.msra.mxu1 %v14718_v26  ;;  %v9243_v26 = vrot.slane %v10751_v50, 3  ;;  %v14828_v50 = vld [vmem:[#allocation3 + $0x88] sm:$0xff]  }
 0x76a   : > { %12578 = vmatprep.subr.bf16.mxu1 %v17537_v0  ;;  %v9272_v39 = vrot.slane %v14828_v50, 3 }
 0x76c   : > { %12495 = vmatmul.mubr.bf16.gmra.mrb[12].mxu1 %v16660_v43 }
 0x76d   : > { %12498 = vmatprep.mubr.msk.bf16.mxu1 %vm14970_vm0, %v17537_v0  ;;  %12579 = vmatpush3.bf16.msra.mxu1 %v14719_v38  ;;  %v9244_v38 = vrot.slane %v14808_v20, 3  ;;  %v16679_v20 = vsel %vm4391_vm8, %v9246_v16, %v9248_v54 }
 0x76e   : > { %12580 = vmatprep.subr.bf16.mxu1 %v17537_v0  ;;  %17566 = vst [vmem:[#allocation20_spill] sm:$0xff] %v16679_v20 }
 0x76f   : > { %v16673_v30 = vsel %vm4391_vm8, %v9243_v26, %v9244_v38  ;;  %v16676_v41 = vsel %vm4391_vm8, %v9244_v38, %v9246_v16  ;;  %v9256_v26 = vrot.slane %v14817_v25, 3  ;;  %v16687_v38 = vld [vmem:[#allocation3 + $0xa8] sm:$0xff]   ;;  %v9266_v16 = vrot.slane %v14824_v55, 3 }
 0x770   : > { %17564 = vst [vmem:[#allocation18_spill] sm:$0xff] %v16673_v30  ;;  %17565 = vst [vmem:[#allocation19_spill] sm:$0xff] %v16676_v41  ;;  %v9258_v30 = vrot.slane %v14818_v17, 3  ;;  %v9260_v41 = vrot.slane %v14819_v33, 3  ;;  %v9274_v55 = vrot.slane %v14829_v11, 3  ;;  %v16739_v11 = vld [vmem:[#allocation3 + $0x30] sm:$0xff]  }
 0x771   : > { %12581 = vmatpush3.bf16.msra.mxu1 %v14720_v29  ;;  %v14821_v29 = vld [vmem:[#allocation3 + $0x60] sm:$0xff]   ;;  %17567 = vst [vmem:[#allocation21_spill] sm:$0xff] %v16687_v38  ;;  %v16708_v33 = vsel %vm4391_vm8, %v9264_v18, %v9266_v16 }
 0x772   : > { %12666 = vmatprep.subr.bf16.mxu1 %v17537_v0  ;;  %v9262_v49 = vrot.slane %v14821_v29, 3  ;;  %v16696_v52 = vsel %vm4391_vm8, %v9256_v26, %v9258_v30  ;;  %17569 = vst [vmem:[#allocation23_spill] sm:$0xff] %v16708_v33  ;;  %v9270_v29 = vrot.slane %v14826_v21, 3  ;;  %v16726_v21 = vsel %vm4391_vm8, %v9272_v39, %v9274_v55 }
 0x774   : > { %12499 = vmatmul.mubr.bf16.gmra.mrb[16].mxu1 %v16667_v24  ;;  %v16702_v25 = vsel %vm4391_vm8, %v9260_v41, %v9262_v49  ;;  %v16705_v17 = vsel %vm4391_vm8, %v9262_v49, %v9264_v18  ;;  %v16723_v33 = vsel %vm4391_vm8, %v9270_v29, %v9272_v39  ;;  %v16764_v39 = vld [vmem:[#allocation3 + $0x58] sm:$0xff]  }
 0x775   : > { %12502 = vmatprep.mubr.msk.bf16.mxu1 %vm14970_vm0, %v17537_v0  ;;  %v9254_v0 = vrot.slane %v14815_v2, 3  ;;  %v16699_v2 = vsel %vm4391_vm8, %v9258_v30, %v9260_v41  ;;  %17568 = vst [vmem:[#allocation22_spill] sm:$0xff] %v16702_v25  ;;  %v9276_v30 = vrot.slane %v14831_v59, 3  ;;  %v9278_v41 = vrot.slane %v14832_v63, 3  ;;  %v16744_v59 = vld [vmem:[#allocation3 + $0x38] sm:$0xff]  }
 0x776   : > { %v17539_v25 = vrot.slane %v16687_v38, 3  ;;  %v14723_v38 = vld [vmem:[#allocation6 + $0xc0] sm:$0xff]  }
 0x777   : > { %v16690_v20 = vsel %vm4391_vm8, %v9252_v31, %v9254_v0  ;;  %v16693_v54 = vsel %vm4391_vm8, %v9254_v0, %v9256_v26  ;;  %v16710_v31 = vld [vmem:[#allocation3 + $0x28] sm:$0xff]   ;;  %v9268_v0 = vrot.slane %v14825_v23, 3  ;;  %v17570_v26 = vmov 0.0  }
 0x778   : > { %v16729_v23 = vsel %vm4391_vm8, %v9274_v55, %v9276_v30  ;;  %v16732_v50 = vsel %vm4391_vm8, %v9276_v30, %v9278_v41  ;;  %v16737_v63 = vsel %vm4391_vm8, %v9278_v41, %v17539_v25  ;;  %v14721_v55 = vld [vmem:[#allocation3 + $0xa0] ss:$0 sps:$4 sm:$0x33]   ;;  %v6343_v41 = vrot.slane %v16646_v13, 1  ;;  %v14726_v13 = vld [vmem:[#allocation6 + $0xd8] sm:$0xff]  }
 0x779   : > { %v16717_v49 = vsel %vm4391_vm8, %v9266_v16, %v9268_v0  ;;  %v16720_v18 = vsel %vm4391_vm8, %v9268_v0, %v9270_v29  ;;  %17571 = vst [vmem:[#allocation24_spill] sm:$0xff] %v16737_v63  ;;  %v16749_v16 = vld [vmem:[#allocation3 + $0x40] sm:$0xff]   ;;  %v16754_v0 = vld [vmem:[#allocation3 + $0x48] sm:$0xff]   ;;  %v16759_v29 = vld [vmem:[#allocation3 + $0x50] sm:$0xff]  }
 0x77a   : > { %v14724_v63 = vld [vmem:[#allocation6 + $0xc8] sm:$0xff]  }
 0x77c   : > { %12503 = vmatmul.mubr.bf16.gmra.mrb[20].mxu1 %v16710_v31 }
 0x77d   : > { %12506 = vmatprep.mubr.msk.bf16.mxu1 %vm14970_vm0, %v17570_v26 }
 0x784   : > { %12507 = vmatmul.mubr.bf16.gmra.mrb[24].mxu1 %v16739_v11 }
 0x785   : > { %12510 = vmatprep.mubr.msk.bf16.mxu1 %vm14970_vm0, %v17570_v26 }
 0x78c   : > { %12511 = vmatmul.mubr.bf16.gmra.mrb[28].mxu1 %v16744_v59 }
 0x78d   : > { %12514 = vmatprep.mubr.msk.bf16.mxu1 %vm14970_vm0, %v17570_v26 }
 0x794   : > { %12515 = vmatmul.mubr.bf16.gmra.mrb[32].mxu1 %v16749_v16 }
 0x795   : > { %12518 = vmatprep.mubr.msk.bf16.mxu1 %vm14970_vm0, %v17570_v26 }
 0x79c   : > { %12519 = vmatmul.mubr.bf16.gmra.mrb[36].mxu1 %v16754_v0 }
 0x79d   : > { %12522 = vmatprep.mubr.msk.bf16.mxu1 %vm14970_vm0, %v17570_v26 }
 0x7a4   : > { %12523 = vmatmul.mubr.bf16.gmra.mrb[40].mxu1 %v16759_v29 }
 0x7a5   : > { %12526 = vmatprep.mubr.msk.bf16.mxu1 %vm14970_vm0, %v17570_v26 }
 0x7ac   : > { %12527 = vmatmul.mubr.bf16.gmra.mrb[44].mxu1 %v16764_v39 }
 0x7ad   : > { %12530 = vmatprep.mubr.msk.bf16.mxu1 %vm14970_vm0, %v17570_v26 }
 0x7b4   : > { %12531 = vmatmul.mubr.bf16.gmra.mrb[48].mxu1 %v16456_v36  ;;  %v6321_v36 = vld [vmem:[#allocation3] sm:$0xe] }
 0x7b5   : > { %12534 = vmatprep.mubr.msk.bf16.mxu1 %vm14970_vm0, %v17570_v26 }
 0x7bc   : > { %12535 = vmatmul.mubr.bf16.gmra.mrb[52].mxu1 %v16464_v3  ;;  %v14867_v3 = vld [vmem:[#allocation3 + $0x4] sm:$0xf] }
 0x7bd   : > { %12538 = vmatprep.mubr.msk.bf16.mxu1 %vm14970_vm0, %v17570_v26 }
 0x7c4   : > { %12539 = vmatmul.mubr.bf16.gmra.mrb[56].mxu1 %v16471_v15  ;;  %v10637_v15 = vcombine.low %v6321_v36, %v14867_v3  ;;  %v6345_v36 = vrot.slane %v16653_v19, 1  ;;  %v14725_v3 = vld [vmem:[#allocation6 + $0xd0] sm:$0xff]  }
 0x7c5   : > { %12542 = vmatprep.mubr.msk.bf16.mxu1 %vm14970_vm0, %v17570_v26 }
 0x7c6   : > { %v6342_v30 = vrot.slane %v10637_v15, 1  ;;  %v6346_v15 = vsel %vm1486_vm3, %v6343_v41, %v6345_v36 }
 0x7c8   : > { %v6344_v25 = vsel %vm1486_vm3, %v6342_v30, %v6343_v41  ;;  %v14729_v30 = vld [vmem:[#allocation6 + $0xf0] sm:$0xff]   ;;  %v14730_v41 = vld [vmem:[#allocation6 + $0xf8] sm:$0xff]  }
 0x7cc   : > { %12543 = vmatmul.mubr.bf16.gmra.mrb[60].mxu1 %v16484_v57 }
 0x7cd   : > { %12546 = vmatprep.mubr.msk.bf16.mxu1 %vm14970_vm0, %v17570_v26 }
 0x7d4   : > { %12547 = vmatmul.mubr.bf16.gmra.mrb[64].mxu1 %v16493_v4 }
 0x7d5   : > { %12550 = vmatprep.mubr.msk.bf16.mxu1 %vm14970_vm0, %v17570_v26 }
 0x7dc   : > { %12551 = vmatmul.mubr.bf16.gmra.mrb[68].mxu1 %v16508_v8 }
 0x7dd   : > { %12554 = vmatprep.mubr.msk.bf16.mxu1 %vm14970_vm0, %v17570_v26 }
 0x7e4   : > { %12555 = vmatmul.mubr.bf16.gmra.mrb[72].mxu1 %v16520_v12 }
 0x7e5   : > { %12558 = vmatprep.mubr.msk.bf16.mxu1 %vm14970_vm0, %v17570_v26 }
 0x7ec   : > { %12559 = vmatmul.mubr.bf16.gmra.mrb[76].mxu1 %v16549_v7 }
 0x7ed   : > { %12562 = vmatprep.mubr.msk.bf16.mxu1 %vm14970_vm0, %v17570_v26 }
 0x7f4   : > { %12563 = vmatmul.mubr.bf16.gmra.mrb[88].mxu1 %v14721_v55  ;;  %v6349_v55 = vrot.slane %v16667_v24, 1 }
 0x7f5   : > { %12582 = vmatprep.mubr.msk.bf16.mxu1 %vm14970_vm0, %v17570_v26 }
 0x7fc   : > { %12583 = vmatmul.mubr.bf16.vlgmr.msra.gmra.mrb[92].mxu1 %v6344_v25  ;;  %v14727_v25 = vld [vmem:[#allocation6 + $0xe0] sm:$0xff]  }
 0x7fd   : > { %12667 = vmatpush3.bf16.msra.mxu1 %v14723_v38  ;;  %12586 = vmatprep.mubr.msk.bf16.mxu1 %vm14970_vm0, %v17570_v26  ;;  %v6347_v38 = vrot.slane %v16660_v43, 1 }
 0x7fe   : > { %12668 = vmatprep.subr.bf16.mxu1 %v17570_v26 }
 0x7ff   : > { %v6348_v19 = vsel %vm1486_vm3, %v6345_v36, %v6347_v38  ;;  %v6350_v43 = vsel %vm1486_vm3, %v6347_v38, %v6349_v55  ;;  %v6351_v36 = vrot.slane %v16710_v31, 1 }
 0x801   : > { %12669 = vmatpush3.bf16.msra.mxu1 %v14724_v63  ;;  %v14728_v63 = vld [vmem:[#allocation6 + $0xe8] sm:$0xff]   ;;  %v6352_v24 = vsel %vm1486_vm3, %v6349_v55, %v6351_v36 }
 0x802   : > { %12670 = vmatprep.subr.bf16.mxu1 %v17570_v26 }
 0x804   : > { %12587 = vmatmul.mubr.bf16.gmra.mrb[4].mxu1 %v6346_v15  ;;  %v6353_v15 = vrot.slane %v16739_v11, 1  ;;  %v6357_v11 = vrot.slane %v16749_v16, 1  ;;  %v6363_v16 = vrot.slane %v16764_v39, 1  ;;  %v14870_v39 = vld [vmem:[#allocation3 + $0x70] sm:$0xff]  }
 0x805   : > { %12590 = vmatprep.mubr.msk.bf16.mxu1 %vm14970_vm0, %v17570_v26  ;;  %12671 = vmatpush3.bf16.msra.mxu1 %v14725_v3 }
 0x806   : > { %12672 = vmatprep.subr.bf16.mxu1 %v17570_v26 }
 0x809   : > { %12673 = vmatpush3.bf16.msra.mxu1 %v14726_v13 }
 0x80a   : > { %12674 = vmatprep.subr.bf16.mxu1 %v17570_v26 }
 0x80c   : > { %12591 = vmatmul.mubr.bf16.gmra.mrb[8].mxu1 %v6348_v19  ;;  %v6354_v19 = vsel %vm1486_vm3, %v6351_v36, %v6353_v15 }
 0x80d   : > { %12594 = vmatprep.mubr.msk.bf16.mxu1 %vm14970_vm0, %v17570_v26  ;;  %12675 = vmatpush3.bf16.msra.mxu1 %v14727_v25 }
 0x80e   : > { %12676 = vmatprep.subr.bf16.mxu1 %v17570_v26 }
 0x811   : > { %12677 = vmatpush3.bf16.msra.mxu1 %v14728_v63  ;;  %v6355_v63 = vrot.slane %v16744_v59, 1 }
 0x812   : > { %12678 = vmatprep.subr.bf16.mxu1 %v17570_v26 }
 0x813   : > { %v6358_v36 = vsel %vm1486_vm3, %v6355_v63, %v6357_v11 }
 0x814   : > { %12595 = vmatmul.mubr.bf16.gmra.mrb[12].mxu1 %v6350_v43 }
 0x815   : > { %12598 = vmatprep.mubr.msk.bf16.mxu1 %vm14970_vm0, %v17570_v26  ;;  %12679 = vmatpush3.bf16.msra.mxu1 %v14729_v30 }
 0x816   : > { %12680 = vmatprep.subr.bf16.mxu1 %v17570_v26 }
 0x819   : > { %12681 = vmatpush3.bf16.msra.mxu1 %v14730_v41  ;;  %v6356_v41 = vsel %vm1486_vm3, %v6353_v15, %v6355_v63  ;;  %v6369_v63 = vrot.slane %v14870_v39, 1 }
 0x81a   : > { %12766 = vmatprep.subr.bf16.mxu1 %v17570_v26 }
 0x81c   : > { %12599 = vmatmul.mubr.bf16.gmra.mrb[16].mxu1 %v6352_v24  ;;  %v6359_v24 = vrot.slane %v16754_v0, 1  ;;  %v14868_v0 = vld [vmem:[#allocation3 + $0x60] sm:$0xff]  }
 0x81d   : > { %12602 = vmatprep.mubr.msk.bf16.mxu1 %vm14970_vm0, %v17570_v26 }
 0x81e   : > { %v6360_v59 = vsel %vm1486_vm3, %v6357_v11, %v6359_v24 }
 0x81f   : > { %v6048_v3 = vpop.f32.mrb[80].mxu1 }
 0x820   : > { %v12464_v13 = vpop.f32.mrb[81].mxu1  ;;  %v6361_v3 = vrot.slane %v16759_v29, 1  ;;  %v14869_v29 = vld [vmem:[#allocation3 + $0x68] sm:$0xff]  }
 0x821   : > { %v6050_v38 = vpop.f32.mrb[82].mxu1 }
 0x822   : > { %v12465_v25 = vpop.f32.mrb[83].mxu1  ;;  %v6362_v15 = vsel %vm1486_vm3, %v6359_v24, %v6361_v3  ;;  %v6364_v13 = vsel %vm1486_vm3, %v6361_v3, %v6363_v16  ;;  %v6365_v38 = vrot.slane %v14868_v0, 1 }
 0x824   : > { %12603 = vmatmul.mubr.bf16.gmra.mrb[20].mxu1 %v6354_v19  ;;  %v6366_v25 = vsel %vm1486_vm3, %v6363_v16, %v6365_v38  ;;  %v6367_v19 = vrot.slane %v14869_v29, 1  ;;  %v14740_v29 = vld [vmem:[#allocation6 + $0x110] sm:$0xff]  }
 0x825   : > { %12606 = vmatprep.mubr.msk.bf16.mxu1 %vm14970_vm0, %v17570_v26 }
 0x827   : > { %v6159_v31 = vpop.f32.mrb[84].mxu1 }
 0x828   : > { %v12484_v55 = vpop.f32.mrb[85].mxu1  ;;  %v6368_v31 = vsel %vm1486_vm3, %v6365_v38, %v6367_v19  ;;  %v16884_v38 = vld [vmem:[#allocation3 + $0x18] sm:$0xff]  }
 0x829   : > { %v6161_v30 = vpop.f32.mrb[86].mxu1  ;;  %v6370_v55 = vsel %vm1486_vm3, %v6367_v19, %v6369_v63  ;;  %v16892_v19 = vld [vmem:[#allocation3 + $0x20] sm:$0xff]  }
 0x82a   : > { %v12485_v43 = vpop.f32.mrb[87].mxu1  ;;  %v6371_v30 = vrot.slane %v16484_v57, 1  ;;  %v6377_v57 = vrot.slane %v16520_v12, 1  ;;  %v6846_v12 = vrot.slane %v16358_v61, 1  ;;  %v6851_v39 = vrot.slane %v16892_v19, 1 }
 0x82c   : > { %12607 = vmatmul.mubr.bf16.gmra.mrb[24].mxu1 %v6356_v41  ;;  %v6372_v43 = vsel %vm1486_vm3, %v6369_v63, %v6371_v30  ;;  %v6373_v41 = vrot.slane %v16493_v4, 1  ;;  %v6379_v4 = vrot.slane %v16549_v7, 1  ;;  %v14871_v7 = vld [vmem:[#allocation3 + $0x10] sm:$0xff]   ;;  %v14747_v63 = vld [vmem:[#allocation6 + $0x120] sm:$0xff]  }
 0x82d   : > { %12610 = vmatprep.mubr.msk.bf16.mxu1 %vm14970_vm0, %v17570_v26  ;;  %v6847_v16 = vrot.slane %v14871_v7, 1 }
 0x82e   : > { %v6374_v11 = vsel %vm1486_vm3, %v6371_v30, %v6373_v41  ;;  %v6380_v3 = vsel %vm1486_vm3, %v6377_v57, %v6379_v4  ;;  %v16900_v30 = vld [vmem:[#allocation3 + $0x28] sm:$0xff]  }
 0x82f   : > { %v6848_v0 = vsel %vm1486_vm3, %v6846_v12, %v6847_v16 }
 0x834   : > { %12611 = vmatmul.mubr.bf16.gmra.mrb[28].mxu1 %v6358_v36  ;;  %v6375_v36 = vrot.slane %v16508_v8, 1  ;;  %v6381_v8 = vrot.slane %v16558_v37, 1  ;;  %v14736_v37 = vld [vmem:[#allocation6 + $0x108] sm:$0xff]  }
 0x835   : > { %12614 = vmatprep.mubr.msk.bf16.mxu1 %vm14970_vm0, %v17570_v26 }
 0x836   : > { %v6376_v24 = vsel %vm1486_vm3, %v6373_v41, %v6375_v36  ;;  %v6853_v41 = vrot.slane %v16900_v30, 1 }
 0x83c   : > { %12615 = vmatmul.mubr.bf16.gmra.mrb[32].mxu1 %v6360_v59  ;;  %v6378_v59 = vsel %vm1486_vm3, %v6375_v36, %v6377_v57  ;;  %v6854_v36 = vsel %vm1486_vm3, %v6851_v39, %v6853_v41  ;;  %v14758_v57 = vld [vmem:[#allocation6 + $0x138] sm:$0xff]  }
 0x83d   : > { %12618 = vmatprep.mubr.msk.bf16.mxu1 %vm14970_vm0, %v17570_v26 }
 0x844   : > { %12619 = vmatmul.mubr.bf16.gmra.mrb[36].mxu1 %v6362_v15  ;;  %v6382_v15 = vsel %vm1486_vm3, %v6379_v4, %v6381_v8 }
 0x845   : > { %12622 = vmatprep.mubr.msk.bf16.mxu1 %vm14970_vm0, %v17570_v26 }
 0x84c   : > { %12623 = vmatmul.mubr.bf16.gmra.mrb[40].mxu1 %v6364_v13  ;;  %v14733_v13 = vld [vmem:[#allocation6 + $0x100] sm:$0xff]  }
 0x84d   : > { %12626 = vmatprep.mubr.msk.bf16.mxu1 %vm14970_vm0, %v17570_v26 }
 0x854   : > { %12627 = vmatmul.mubr.bf16.gmra.mrb[44].mxu1 %v6366_v25  ;;  %v6849_v25 = vrot.slane %v16884_v38, 1 }
 0x855   : > { %12630 = vmatprep.mubr.msk.bf16.mxu1 %vm14970_vm0, %v17570_v26 }
 0x856   : > { %v6850_v61 = vsel %vm1486_vm3, %v6847_v16, %v6849_v25 }
 0x85c   : > { %12631 = vmatmul.mubr.bf16.gmra.mrb[48].mxu1 %v6368_v31  ;;  %v14744_v31 = vld [vmem:[#allocation6 + $0x118] sm:$0xff]  }
 0x85d   : > { %12634 = vmatprep.mubr.msk.bf16.mxu1 %vm14970_vm0, %v17570_v26 }
 0x864   : > { %12635 = vmatmul.mubr.bf16.gmra.mrb[52].mxu1 %v6370_v55  ;;  %v6852_v55 = vsel %vm1486_vm3, %v6849_v25, %v6851_v39 }
 0x865   : > { %12638 = vmatprep.mubr.msk.bf16.mxu1 %vm14970_vm0, %v17570_v26 }
 0x86c   : > { %12639 = vmatmul.mubr.bf16.gmra.mrb[56].mxu1 %v6372_v43  ;;  %v14751_v43 = vld [vmem:[#allocation6 + $0x128] sm:$0xff]  }
 0x86d   : > { %12642 = vmatprep.mubr.msk.bf16.mxu1 %vm14970_vm0, %v17570_v26 }
 0x874   : > { %12643 = vmatmul.mubr.bf16.gmra.mrb[60].mxu1 %v6374_v11  ;;  %v14754_v11 = vld [vmem:[#allocation6 + $0x130] sm:$0xff]  }
 0x875   : > { %12646 = vmatprep.mubr.msk.bf16.mxu1 %vm14970_vm0, %v17570_v26 }
 0x87c   : > { %12647 = vmatmul.mubr.bf16.gmra.mrb[64].mxu1 %v6376_v24  ;;  %v16908_v24 = vld [vmem:[#allocation3 + $0x30] sm:$0xff]  }
 0x87d   : > { %12650 = vmatprep.mubr.msk.bf16.mxu1 %vm14970_vm0, %v17570_v26 }
 0x884   : > { %12651 = vmatmul.mubr.bf16.gmra.mrb[68].mxu1 %v6378_v59  ;;  %v6855_v59 = vrot.slane %v16908_v24, 1 }
 0x885   : > { %12654 = vmatprep.mubr.msk.bf16.mxu1 %vm14970_vm0, %v17570_v26 }
 0x886   : > { %v6856_v4 = vsel %vm1486_vm3, %v6853_v41, %v6855_v59  ;;  %v16934_v41 = vld [vmem:[#allocation3 + $0x50] sm:$0xff]  }
 0x88c   : > { %12655 = vmatmul.mubr.bf16.gmra.mrb[72].mxu1 %v6380_v3  ;;  %v16916_v3 = vld [vmem:[#allocation3 + $0x38] sm:$0xff]  }
 0x88d   : > { %12658 = vmatprep.mubr.msk.bf16.mxu1 %vm14970_vm0, %v17570_v26 }
 0x894   : > { %12659 = vmatmul.mubr.bf16.gmra.mrb[76].mxu1 %v6382_v15  ;;  %v6857_v15 = vrot.slane %v16916_v3, 1 }
 0x895   : > { %12662 = vmatprep.mubr.msk.bf16.mxu1 %vm14970_vm0, %v17570_v26 }
 0x89c   : > { %12663 = vmatmul.mubr.bf16.gmra.mrb[96].mxu1 %v6381_v8 }
 0x89d   : > { %12682 = vmatprep.mubr.msk.bf16.mxu1 %vm14970_vm0, %v17570_v26 }
 0x8a4   : > { %12683 = vmatmul.mubr.bf16.vlgmr.msra.gmra.mrb[100].mxu1 %v6848_v0  ;;  %v16922_v0 = vld [vmem:[#allocation3 + $0x40] sm:$0xff]  }
 0x8a5   : > { %12767 = vmatpush3.bf16.msra.mxu1 %v14733_v13  ;;  %12686 = vmatprep.mubr.msk.bf16.mxu1 %vm14970_vm0, %v17570_v26  ;;  %v6858_v13 = vsel %vm1486_vm3, %v6855_v59, %v6857_v15  ;;  %v6859_v25 = vrot.slane %v16922_v0, 1 }
 0x8a6   : > { %12768 = vmatprep.subr.bf16.mxu1 %v17570_v26 }
 0x8a7   : > { %v6860_v39 = vsel %vm1486_vm3, %v6857_v15, %v6859_v25 }
 0x8a9   : > { %12769 = vmatpush3.bf16.msra.mxu1 %v14736_v37 }
 0x8aa   : > { %12770 = vmatprep.subr.bf16.mxu1 %v17570_v26 }
 0x8ac   : > { %12687 = vmatmul.mubr.bf16.gmra.mrb[4].mxu1 %v6850_v61 }
 0x8ad   : > { %12690 = vmatprep.mubr.msk.bf16.mxu1 %vm14970_vm0, %v17570_v26  ;;  %12771 = vmatpush3.bf16.msra.mxu1 %v14740_v29 }
 0x8ae   : > { %12772 = vmatprep.subr.bf16.mxu1 %v17570_v26 }
 0x8b1   : > { %12773 = vmatpush3.bf16.msra.mxu1 %v14744_v31 }
 0x8b2   : > { %12774 = vmatprep.subr.bf16.mxu1 %v17570_v26 }
 0x8b4   : > { %12691 = vmatmul.mubr.bf16.gmra.mrb[8].mxu1 %v6852_v55 }
 0x8b5   : > { %12694 = vmatprep.mubr.msk.bf16.mxu1 %vm14970_vm0, %v17570_v26  ;;  %12775 = vmatpush3.bf16.msra.mxu1 %v14747_v63  ;;  %v16928_v63 = vld [vmem:[#allocation3 + $0x48] sm:$0xff]  }
 0x8b6   : > { %12776 = vmatprep.subr.bf16.mxu1 %v17570_v26  ;;  %v6861_v55 = vrot.slane %v16928_v63, 1 }
 0x8b9   : > { %12777 = vmatpush3.bf16.msra.mxu1 %v14751_v43  ;;  %v6862_v43 = vsel %vm1486_vm3, %v6859_v25, %v6861_v55  ;;  %v6873_v25 = vrot.slane %v16517_v6, 1  ;;  %v6879_v6 = vrot.slane %v16542_v60, 1 }
 0x8ba   : > { %12778 = vmatprep.subr.bf16.mxu1 %v17570_v26 }
 0x8bc   : > { %12695 = vmatmul.mubr.bf16.gmra.mrb[12].mxu1 %v6854_v36 }
 0x8bd   : > { %12698 = vmatprep.mubr.msk.bf16.mxu1 %vm14970_vm0, %v17570_v26  ;;  %12779 = vmatpush3.bf16.msra.mxu1 %v14754_v11  ;;  %v6863_v11 = vrot.slane %v16934_v41, 1 }
 0x8be   : > { %12780 = vmatprep.subr.bf16.mxu1 %v17570_v26 }
 0x8bf   : > { %v6864_v36 = vsel %vm1486_vm3, %v6861_v55, %v6863_v11 }
 0x8c1   : > { %12781 = vmatpush3.bf16.msra.mxu1 %v14758_v57  ;;  %v16940_v57 = vld [vmem:[#allocation3 + $0x58] sm:$0xff]  }
 0x8c2   : > { %12866 = vmatprep.subr.bf16.mxu1 %v17570_v26  ;;  %v6865_v59 = vrot.slane %v16940_v57, 1 }
 0x8c4   : > { %12699 = vmatmul.mubr.bf16.gmra.mrb[16].mxu1 %v6856_v4  ;;  %v6866_v4 = vsel %vm1486_vm3, %v6863_v11, %v6865_v59 }
 0x8c5   : > { %12702 = vmatprep.mubr.msk.bf16.mxu1 %vm14970_vm0, %v17570_v26 }
 0x8c7   : > { %v6316_v8 = vpop.f32.mrb[88].mxu1 }
 0x8c8   : > { %v12564_v12 = vpop.f32.mrb[89].mxu1  ;;  %v16946_v8 = vld [vmem:[#allocation3 + $0x60] sm:$0xff]  }
 0x8c9   : > { %v6318_v7 = vpop.f32.mrb[90].mxu1  ;;  %v6867_v15 = vrot.slane %v16946_v8, 1 }
 0x8ca   : > { %v12565_v16 = vpop.f32.mrb[91].mxu1  ;;  %v6869_v7 = vrot.slane %v16512_v27, 1 }
 0x8cb   : > { %v6868_v12 = vsel %vm1486_vm3, %v6865_v59, %v6867_v15 }
 0x8cc   : > { %12703 = vmatmul.mubr.bf16.gmra.mrb[20].mxu1 %v6858_v13  ;;  %v6870_v16 = vsel %vm1486_vm3, %v6867_v15, %v6869_v7  ;;  %v6871_v13 = vrot.slane %v16514_v56, 1  ;;  %v6877_v56 = vrot.slane %v16530_v5, 1  ;;  %v6883_v5 = vrot.slane %v16571_v58, 1 }
 0x8cd   : > { %12706 = vmatprep.mubr.msk.bf16.mxu1 %vm14970_vm0, %v17570_v26  ;;  %v7231_v58 = vshll.u32 %v16884_v38, 16 }
 0x8ce   : > { %v6880_v55 = vsel %vm1486_vm3, %v6877_v56, %v6879_v6 }
 0x8cf   : > { %v6486_v37 = vpop.f32.mrb[92].mxu1 }
 0x8d0   : > { %v12584_v29 = vpop.f32.mrb[93].mxu1  ;;  %v6872_v37 = vsel %vm1486_vm3, %v6869_v7, %v6871_v13  ;;  %v14761_v7 = vld [vmem:[#allocation6 + $0x148] sm:$0xff]  }
 0x8d1   : > { %v6488_v61 = vpop.f32.mrb[94].mxu1  ;;  %v6874_v29 = vsel %vm1486_vm3, %v6871_v13, %v6873_v25  ;;  %v7237_v13 = vshrl.u32 %v16892_v19, 16 }
 0x8d2   : > { %v12585_v31 = vpop.f32.mrb[95].mxu1  ;;  %v6875_v61 = vrot.slane %v16528_v53, 1  ;;  %v6881_v53 = vrot.slane %v16561_v42, 1  ;;  %v7228_v42 = vshrl.u32 %v16884_v38, 16 }
 0x8d4   : > { %12707 = vmatmul.mubr.bf16.gmra.mrb[24].mxu1 %v6860_v39  ;;  %v6876_v31 = vsel %vm1486_vm3, %v6873_v25, %v6875_v61  ;;  %v6878_v39 = vsel %vm1486_vm3, %v6875_v61, %v6877_v56  ;;  %v6884_v11 = vsel %vm1486_vm3, %v6881_v53, %v6883_v5  ;;  %v7230_v15 = vrot.slane %v7228_v42, 1  ;;  %v14762_v25 = vld [vmem:[#allocation6 + $0x150] sm:$0xff]  }
 0x8d5   : > { %12710 = vmatprep.mubr.msk.bf16.mxu1 %vm14970_vm0, %v17570_v26 }
 0x8dc   : > { %12711 = vmatmul.mubr.bf16.gmra.mrb[28].mxu1 %v6862_v43  ;;  %v6882_v43 = vsel %vm1486_vm3, %v6879_v6, %v6881_v53  ;;  %v7249_v6 = vshll.u32 %v16900_v30, 16 }
 0x8dd   : > { %12714 = vmatprep.mubr.msk.bf16.mxu1 %vm14970_vm0, %v17570_v26 }
 0x8e4   : > { %12715 = vmatmul.mubr.bf16.gmra.mrb[32].mxu1 %v6864_v36  ;;  %v14759_v36 = vld [vmem:[#allocation3 + $0xa8] ss:$0 sps:$4 sm:$0x77]  }
 0x8e5   : > { %12718 = vmatprep.mubr.msk.bf16.mxu1 %vm14970_vm0, %v17570_v26  ;;  %v6885_v60 = vrot.slane %v14759_v36, 1  ;;  %v7255_v36 = vshrl.u32 %v16908_v24, 16 }
 0x8e7   : > { %v6886_v59 = vsel %vm1486_vm3, %v6883_v5, %v6885_v60  ;;  %v14765_v5 = vld [vmem:[#allocation6 + $0x168] sm:$0xff]   ;;  %vm9760_vm3 = vsmask.f32 7440 }
 0x8ec   : > { %12719 = vmatmul.mubr.bf16.gmra.mrb[36].mxu1 %v6866_v4  ;;  %v14760_v4 = vld [vmem:[#allocation6 + $0x140] sm:$0xff]  }
 0x8ed   : > { %12722 = vmatprep.mubr.msk.bf16.mxu1 %vm14970_vm0, %v17570_v26 }
 0x8f4   : > { %12723 = vmatmul.mubr.bf16.gmra.mrb[40].mxu1 %v6868_v12  ;;  %v7233_v12 = vrot.slane %v7231_v58, 2  ;;  %v7257_v58 = vrot.slane %v7255_v36, 1  ;;  %v7285_v36 = vshll.u32 %v16928_v63, 16 }
 0x8f5   : > { %12726 = vmatprep.mubr.msk.bf16.mxu1 %vm14970_vm0, %v17570_v26 }
 0x8fc   : > { %12727 = vmatmul.mubr.bf16.gmra.mrb[44].mxu1 %v6870_v16  ;;  %v7234_v16 = vor.u32 %v7233_v12, %v7230_v15  ;;  %v14767_v15 = vld [vmem:[#allocation6 + $0x178] sm:$0xff]  }
 0x8fd   : > { %12730 = vmatprep.mubr.msk.bf16.mxu1 %vm14970_vm0, %v17570_v26 }
 0x904   : > { %12731 = vmatmul.mubr.bf16.gmra.mrb[48].mxu1 %v6872_v37  ;;  %v7240_v37 = vshll.u32 %v16892_v19, 16 }
 0x905   : > { %12734 = vmatprep.mubr.msk.bf16.mxu1 %vm14970_vm0, %v17570_v26 }
 0x906   : > { %v7242_v61 = vrot.slane %v7240_v37, 2 }
 0x90c   : > { %12735 = vmatmul.mubr.bf16.gmra.mrb[52].mxu1 %v6874_v29  ;;  %v7235_v29 = vsel %vm2355_vm5, %v16383_v28, %v7234_v16 }
 0x90d   : > { %12738 = vmatprep.mubr.msk.bf16.mxu1 %vm14970_vm0, %v17570_v26 }
 0x914   : > { %12739 = vmatmul.mubr.bf16.gmra.mrb[56].mxu1 %v6876_v31  ;;  %v14763_v31 = vld [vmem:[#allocation6 + $0x158] sm:$0xff]  }
 0x915   : > { %12742 = vmatprep.mubr.msk.bf16.mxu1 %vm14970_vm0, %v17570_v26 }
 0x91c   : > { %12743 = vmatmul.mubr.bf16.gmra.mrb[60].mxu1 %v6878_v39  ;;  %v7246_v39 = vshrl.u32 %v16900_v30, 16 }
 0x91d   : > { %12746 = vmatprep.mubr.msk.bf16.mxu1 %vm14970_vm0, %v17570_v26 }
 0x91e   : > { %v7248_v53 = vrot.slane %v7246_v39, 1 }
 0x924   : > { %12747 = vmatmul.mubr.bf16.gmra.mrb[64].mxu1 %v6880_v55  ;;  %v14764_v55 = vld [vmem:[#allocation6 + $0x160] sm:$0xff]  }
 0x925   : > { %12750 = vmatprep.mubr.msk.bf16.mxu1 %vm14970_vm0, %v17570_v26 }
 0x92c   : > { %12751 = vmatmul.mubr.bf16.gmra.mrb[68].mxu1 %v6882_v43  ;;  %v7251_v43 = vrot.slane %v7249_v6, 2 }
 0x92d   : > { %12754 = vmatprep.mubr.msk.bf16.mxu1 %vm14970_vm0, %v17570_v26 }
 0x934   : > { %12755 = vmatmul.mubr.bf16.gmra.mrb[72].mxu1 %v6884_v11  ;;  %v7252_v11 = vor.u32 %v7251_v43, %v7248_v53 }
 0x935   : > { %12758 = vmatprep.mubr.msk.bf16.mxu1 %vm14970_vm0, %v17570_v26 }
 0x93c   : > { %12759 = vmatmul.mubr.bf16.gmra.mrb[76].mxu1 %v6886_v59  ;;  %v14766_v59 = vld [vmem:[#allocation6 + $0x170] sm:$0xff]  }
 0x93d   : > { %12762 = vmatprep.mubr.msk.bf16.mxu1 %vm14970_vm0, %v17570_v26 }
 0x944   : > { %12763 = vmatmul.mubr.bf16.gmra.mrb[104].mxu1 %v6885_v60  ;;  %v7258_v60 = vshll.u32 %v16908_v24, 16 }
 0x945   : > { %12782 = vmatprep.mubr.msk.bf16.mxu1 %vm14970_vm0, %v17570_v26 }
 0x94c   : > { %12783 = vmatmul.mubr.bf16.vlgmr.msra.gmra.mrb[108].mxu1 %v16390_v32  ;;  %v7239_v32 = vrot.slane %v7237_v13, 1 }
 0x94d   : > { %12867 = vmatpush3.bf16.msra.mxu1 %v14760_v4  ;;  %12786 = vmatprep.mubr.msk.bf16.mxu1 %vm14970_vm0, %v17570_v26  ;;  %v7260_v4 = vrot.slane %v7258_v60, 2 }
 0x94e   : > { %12868 = vmatprep.subr.bf16.mxu1 %v17570_v26  ;;  %v7243_v56 = vor.u32 %v7242_v61, %v7239_v32  ;;  %v7273_v61 = vshrl.u32 %v16922_v0, 16 }
 0x94f   : > { %v7261_v12 = vor.u32 %v7260_v4, %v7257_v58 }
 0x950   : > { %v7244_v28 = vsel %vm2355_vm5, %v7234_v16, %v7243_v56  ;;  %v7253_v42 = vsel %vm2355_vm5, %v7243_v56, %v7252_v11  ;;  %v7267_v16 = vshll.u32 %v16916_v3, 16 }
 0x951   : > { %12869 = vmatpush3.bf16.msra.mxu1 %v14761_v7  ;;  %v7264_v7 = vshrl.u32 %v16916_v3, 16  ;;  %v7262_v13 = vsel %vm2355_vm5, %v7252_v11, %v7261_v12  ;;  %v7282_v11 = vshrl.u32 %v16928_v63, 16 }
 0x952   : > { %12870 = vmatprep.subr.bf16.mxu1 %v17570_v26 }
 0x953   : > { %v7266_v37 = vrot.slane %v7264_v7, 1  ;;  %v7284_v4 = vrot.slane %v7282_v11, 1  ;;  %v7291_v7 = vshrl.u32 %v16934_v41, 16 }
 0x954   : > { %12787 = vmatmul.mubr.bf16.gmra.mrb[4].mxu1 %v7235_v29 }
 0x955   : > { %12790 = vmatprep.mubr.msk.bf16.mxu1 %vm14970_vm0, %v17570_v26  ;;  %12871 = vmatpush3.bf16.msra.mxu1 %v14762_v25  ;;  %v7269_v25 = vrot.slane %v7267_v16, 2  ;;  %v7294_v16 = vshll.u32 %v16934_v41, 16 }
 0x956   : > { %12872 = vmatprep.subr.bf16.mxu1 %v17570_v26 }
 0x957   : > { %v7270_v32 = vor.u32 %v7269_v25, %v7266_v37  ;;  %v7293_v37 = vrot.slane %v7291_v7, 1  ;;  %v7296_v25 = vrot.slane %v7294_v16, 2  ;;  %v7728_v7 = vrot.slane %v16900_v30, 2  ;;  %v14776_v16 = vld [vmem:[#allocation6 + $0x1b0] sm:$0xff]  }
 0x959   : > { %12873 = vmatpush3.bf16.msra.mxu1 %v14763_v31  ;;  %v7276_v31 = vshll.u32 %v16922_v0, 16 }
 0x95a   : > { %12874 = vmatprep.subr.bf16.mxu1 %v17570_v26 }
 0x95b   : > { %v7278_v53 = vrot.slane %v7276_v31, 2 }
 0x95c   : > { %12791 = vmatmul.mubr.bf16.gmra.mrb[8].mxu1 %v7244_v28  ;;  %v7275_v28 = vrot.slane %v7273_v61, 1  ;;  %v7303_v61 = vshll.u32 %v16940_v57, 16 }
 0x95d   : > { %12794 = vmatprep.mubr.msk.bf16.mxu1 %vm14970_vm0, %v17570_v26  ;;  %12875 = vmatpush3.bf16.msra.mxu1 %v14764_v55  ;;  %v7271_v55 = vsel %vm2355_vm5, %v7261_v12, %v7270_v32 }
 0x95e   : > { %12876 = vmatprep.subr.bf16.mxu1 %v17570_v26 }
 0x961   : > { %12877 = vmatpush3.bf16.msra.mxu1 %v14765_v5  ;;  %v7279_v5 = vor.u32 %v7278_v53, %v7275_v28  ;;  %v7312_v28 = vshll.u32 %v16946_v8, 16 }
 0x962   : > { %12878 = vmatprep.subr.bf16.mxu1 %v17570_v26 }
 0x963   : > { %v7280_v58 = vsel %vm2355_vm5, %v7270_v32, %v7279_v5  ;;  %v7300_v32 = vshrl.u32 %v16940_v57, 16 }
 0x964   : > { %12795 = vmatmul.mubr.bf16.gmra.mrb[12].mxu1 %v7253_v42 }
 0x965   : > { %12798 = vmatprep.mubr.msk.bf16.mxu1 %vm14970_vm0, %v17570_v26  ;;  %12879 = vmatpush3.bf16.msra.mxu1 %v14766_v59 }
 0x966   : > { %12880 = vmatprep.subr.bf16.mxu1 %v17570_v26 }
 0x969   : > { %12881 = vmatpush3.bf16.msra.mxu1 %v14767_v15  ;;  %v7287_v15 = vrot.slane %v7285_v36, 2 }
 0x96a   : > { %12966 = vmatprep.subr.bf16.mxu1 %v17570_v26 }
 0x96b   : > { %v7288_v12 = vor.u32 %v7287_v15, %v7284_v4  ;;  %v7726_v15 = vrot.slane %v16892_v19, 2 }
 0x96c   : > { %12799 = vmatmul.mubr.bf16.gmra.mrb[16].mxu1 %v7262_v13 }
 0x96d   : > { %12802 = vmatprep.mubr.msk.bf16.mxu1 %vm14970_vm0, %v17570_v26  ;;  %v7289_v13 = vsel %vm2355_vm5, %v7279_v5, %v7288_v12  ;;  %v7314_v5 = vrot.slane %v7312_v28, 2  ;;  %v7729_v19 = vsel %vm2867_vm6, %v7726_v15, %v7728_v7 }
 0x96f   : > { %v6643_v29 = vpop.f32.mrb[96].mxu1 }
 0x970   : > { %v12664_v56 = vpop.f32.mrb[97].mxu1  ;;  %v7297_v29 = vor.u32 %v7296_v25, %v7293_v37  ;;  %v7730_v37 = vrot.slane %v16908_v24, 2 }
 0x971   : > { %v6645_v39 = vpop.f32.mrb[98].mxu1  ;;  %v7302_v56 = vrot.slane %v7300_v32, 1 }
 0x972   : > { %v12665_v6 = vpop.f32.mrb[99].mxu1  ;;  %v7298_v31 = vsel %vm2355_vm5, %v7288_v12, %v7297_v29  ;;  %v7305_v39 = vrot.slane %v7303_v61, 2  ;;  %v7731_v30 = vsel %vm2867_vm6, %v7728_v7, %v7730_v37  ;;  %v14794_v7 = vld [vmem:[#allocation6 + $0x1e0] sm:$0xff]  }
 0x974   : > { %12803 = vmatmul.mubr.bf16.gmra.mrb[20].mxu1 %v7271_v55  ;;  %v7306_v6 = vor.u32 %v7305_v39, %v7302_v56  ;;  %v7309_v55 = vshrl.u32 %v16946_v8, 16  ;;  %v7734_v39 = vrot.slane %v16922_v0, 2 }
 0x975   : > { %12806 = vmatprep.mubr.msk.bf16.mxu1 %vm14970_vm0, %v17570_v26 }
 0x976   : > { %v7307_v53 = vsel %vm2355_vm5, %v7297_v29, %v7306_v6  ;;  %v7732_v29 = vrot.slane %v16916_v3, 2  ;;  %v7736_v3 = vrot.slane %v16928_v63, 2  ;;  %v7742_v63 = vrot.slane %v16946_v8, 2  ;;  %v17576_v8 = vld [vmem:[#allocation14_spill] sm:$0xff] }
 0x977   : > { %v6990_v43 = vpop.f32.mrb[100].mxu1 }
 0x978   : > { %v12684_v60 = vpop.f32.mrb[101].mxu1  ;;  %v7311_v43 = vrot.slane %v7309_v55, 1  ;;  %v7733_v56 = vsel %vm2867_vm6, %v7730_v37, %v7732_v29 }
 0x979   : > { %v6992_v59 = vpop.f32.mrb[102].mxu1 }
 0x97a   : > { %v12685_v42 = vpop.f32.mrb[103].mxu1  ;;  %v7315_v11 = vor.u32 %v7314_v5, %v7311_v43  ;;  %v7737_v43 = vsel %vm2867_vm6, %v7734_v39, %v7736_v3  ;;  %v7738_v5 = vrot.slane %v16934_v41, 2  ;;  %v17573_v41 = vrot.slane %v16512_v27, 2  ;;  %v17575_v27 = vld [vmem:[#allocation13_spill] sm:$0xff] }
 0x97b   : > { %v14772_v42 = vld [vmem:[#allocation6 + $0x190] sm:$0xff]  }
 0x97c   : > { %12807 = vmatmul.mubr.bf16.gmra.mrb[24].mxu1 %v7280_v58  ;;  %v7316_v36 = vsel %vm2355_vm5, %v7306_v6, %v7315_v11  ;;  %v7325_v60 = vsel %vm2355_vm5, %v7315_v11, %v16544_v22  ;;  %v14872_v22 = vld [vmem:[#allocation3 + $0xa8] ss:$0 sps:$4 sm:$0xff]   ;;  %v17572_v58 = vrot.slane %v16366_v34, 2  ;;  %v14775_v34 = vld [vmem:[#allocation6 + $0x1a8] sm:$0xff]   ;;  %v7739_v0 = vsel %vm2867_vm6, %v7736_v3, %v7738_v5 }
 0x97d   : > { %12810 = vmatprep.mubr.msk.bf16.mxu1 %vm14970_vm0, %v17570_v26  ;;  %v7740_v11 = vrot.slane %v16940_v57, 2  ;;  %v17574_v57 = vld [vmem:[#allocation12_spill] sm:$0xff] }
 0x97e   : > { %v14788_v3 = vld [vmem:[#allocation3 + $0x48] sm:$0xff]  }
 0x984   : > { %12811 = vmatmul.mubr.bf16.gmra.mrb[28].mxu1 %v7289_v13  ;;  %v14777_v13 = vld [vmem:[#allocation6 + $0x1b8] sm:$0xff]  }
 0x985   : > { %12814 = vmatprep.mubr.msk.bf16.mxu1 %vm14970_vm0, %v17570_v26 }
 0x98c   : > { %12815 = vmatmul.mubr.bf16.gmra.mrb[32].mxu1 %v7298_v31 }
 0x98d   : > { %12818 = vmatprep.mubr.msk.bf16.mxu1 %vm14970_vm0, %v17570_v26 }
 0x994   : > { %12819 = vmatmul.mubr.bf16.gmra.mrb[36].mxu1 %v7307_v53  ;;  %v7735_v53 = vsel %vm2867_vm6, %v7732_v29, %v7734_v39  ;;  %v14785_v29 = vld [vmem:[#allocation3 + $0x38] sm:$0xff]  }
 0x995   : > { %12822 = vmatprep.mubr.msk.bf16.mxu1 %vm14970_vm0, %v17570_v26 }
 0x99c   : > { %12823 = vmatmul.mubr.bf16.gmra.mrb[40].mxu1 %v7316_v36  ;;  %v7741_v36 = vsel %vm2867_vm6, %v7738_v5, %v7740_v11  ;;  %v8238_v5 = vrot.slane %v14788_v3, 2 }
 0x99d   : > { %12826 = vmatprep.mubr.msk.bf16.mxu1 %vm14970_vm0, %v17570_v26 }
 0x9a4   : > { %12827 = vmatmul.mubr.bf16.gmra.mrb[44].mxu1 %v7325_v60  ;;  %v7743_v60 = vsel %vm2867_vm6, %v7740_v11, %v7742_v63 }
 0x9a5   : > { %12830 = vmatprep.mubr.msk.bf16.mxu1 %vm14970_vm0, %v17570_v26 }
 0x9ac   : > { %12831 = vmatmul.mubr.bf16.gmra.mrb[48].mxu1 %v16553_v47  ;;  %v7390_v47 = vshrl.u32 %v14872_v22, 16 }
 0x9ad   : > { %12834 = vmatprep.mubr.msk.bf16.mxu1 %vm14970_vm0, %v17570_v26 }
 0x9b4   : > { %12835 = vmatmul.mubr.bf16.gmra.mrb[52].mxu1 %v16564_v45  ;;  %v7393_v45 = vshll.u32 %v14872_v22, 16  ;;  %v7745_v22 = vsel %vm2867_vm6, %v7742_v63, %v17573_v41 }
 0x9b5   : > { %12838 = vmatprep.mubr.msk.bf16.mxu1 %vm14970_vm0, %v17570_v26 }
 0x9b6   : > { %v7395_v59 = vrot.slane %v7393_v45, 2  ;;  %v14779_v45 = vld [vmem:[#allocation3 + $0x18] sm:$0xff]  }
 0x9bc   : > { %12839 = vmatmul.mubr.bf16.gmra.mrb[56].mxu1 %v16569_v1  ;;  %v7392_v1 = vrot.slane %v7390_v47, 1  ;;  %v17579_v47 = vld [vmem:[#allocation17_spill] sm:$0xff] }
 0x9bd   : > { %12842 = vmatprep.mubr.msk.bf16.mxu1 %vm14970_vm0, %v17570_v26 }
 0x9c4   : > { %12843 = vmatmul.mubr.bf16.gmra.mrb[60].mxu1 %v16580_v62  ;;  %v7396_v62 = vor.u32 %v7395_v59, %v7392_v1  ;;  %v17580_v1 = vld [vmem:[#allocation11_spill] sm:$0xff] }
 0x9c5   : > { %12846 = vmatprep.mubr.msk.bf16.mxu1 %vm14970_vm0, %v17570_v26  ;;  %v17581_v59 = vrot.slane %v17580_v1, 2 }
 0x9cc   : > { %12847 = vmatmul.mubr.bf16.gmra.mrb[64].mxu1 %v16586_v44  ;;  %v7397_v44 = vsel %vm2355_vm5, %v16591_v51, %v7396_v62  ;;  %v7724_v51 = vrot.slane %v16884_v38, 2  ;;  %v14774_v38 = vld [vmem:[#allocation6 + $0x1a0] sm:$0xff]   ;;  %vm17414_vm5 = vmor %vm9759_vm2, %vm9760_vm3 }
 0x9cd   : > { %12850 = vmatprep.mubr.msk.bf16.mxu1 %vm14970_vm0, %v17570_v26 }
 0x9ce   : > { %v7725_v4 = vsel %vm2867_vm6, %v17572_v58, %v7724_v51  ;;  %v7727_v12 = vsel %vm2867_vm6, %v7724_v51, %v7726_v15  ;;  %v14783_v58 = vld [vmem:[#allocation6 + $0x1c8] sm:$0xff]  }
 0x9d4   : > { %12851 = vmatmul.mubr.bf16.gmra.mrb[68].mxu1 %v16589_v48  ;;  %v14770_v48 = vld [vmem:[#allocation6 + $0x180] sm:$0xff]  }
 0x9d5   : > { %12854 = vmatprep.mubr.msk.bf16.mxu1 %vm14970_vm0, %v17570_v26 }
 0x9dc   : > { %12855 = vmatmul.mubr.bf16.gmra.mrb[72].mxu1 %v16597_v14  ;;  %v14771_v14 = vld [vmem:[#allocation6 + $0x188] sm:$0xff]  }
 0x9dd   : > { %12858 = vmatprep.mubr.msk.bf16.mxu1 %vm14970_vm0, %v17570_v26 }
 0x9e4   : > { %12859 = vmatmul.mubr.bf16.gmra.mrb[76].mxu1 %v7397_v44  ;;  %v8226_v44 = vrot.slane %v14779_v45, 2  ;;  %v14793_v45 = vld [vmem:[#allocation3 + $0x68] sm:$0xff]  }
 0x9e5   : > { %12862 = vmatprep.mubr.msk.bf16.mxu1 %vm14970_vm0, %v17570_v26  ;;  %v8246_v1 = vrot.slane %v14793_v45, 2 }
 0x9ec   : > { %12863 = vmatmul.mubr.bf16.gmra.mrb[112].mxu1 %v7396_v62  ;;  %v14778_v62 = vld [vmem:[#allocation3 + $0x10] sm:$0xfc]  }
 0x9ed   : > { %12882 = vmatprep.mubr.msk.bf16.mxu1 %vm14970_vm0, %v17570_v26 }
 0x9f4   : > { %12883 = vmatmul.mubr.bf16.vlgmr.msra.gmra.mrb[116].mxu1 %v16428_v9  ;;  %v14773_v9 = vld [vmem:[#allocation6 + $0x198] sm:$0xff]  }
 0x9f5   : > { %12967 = vmatpush3.bf16.msra.mxu1 %v14770_v48  ;;  %12886 = vmatprep.mubr.msk.bf16.mxu1 %vm14970_vm0, %v17570_v26  ;;  %v8225_v48 = vrot.slane %v14778_v62, 2  ;;  %v14795_v62 = vld [vmem:[#allocation3 + $0x70] sm:$0xff]  }
 0x9f6   : > { %12968 = vmatprep.subr.bf16.mxu1 %v17570_v26 }
 0x9f7   : > { %v8227_v51 = vsel %vm2867_vm6, %v8225_v48, %v8226_v44 }
 0x9f9   : > { %12969 = vmatpush3.bf16.msra.mxu1 %v14771_v14  ;;  %v14780_v14 = vld [vmem:[#allocation6 + $0x1c0] sm:$0xff]  }
 0x9fa   : > { %12970 = vmatprep.subr.bf16.mxu1 %v17570_v26 }
 0x9fc   : > { %12887 = vmatmul.mubr.bf16.gmra.mrb[4].mxu1 %v7725_v4 }
 0x9fd   : > { %12890 = vmatprep.mubr.msk.bf16.mxu1 %vm14970_vm0, %v17570_v26  ;;  %12971 = vmatpush3.bf16.msra.mxu1 %v14772_v42  ;;  %v14781_v42 = vld [vmem:[#allocation3 + $0x20] sm:$0xff]  }
 0x9fe   : > { %12972 = vmatprep.subr.bf16.mxu1 %v17570_v26  ;;  %v8228_v4 = vrot.slane %v14781_v42, 2 }
 0xa00   : > { %v8229_v15 = vsel %vm2867_vm6, %v8226_v44, %v8228_v4  ;;  %v8248_v44 = vrot.slane %v14795_v62, 2  ;;  %v14876_v62 = vld [vmem:[#allocation3 + $0x28] sm:$0xff]  }
 0xa01   : > { %12973 = vmatpush3.bf16.msra.mxu1 %v14773_v9  ;;  %v14787_v9 = vld [vmem:[#allocation6 + $0x1d0] sm:$0xff]  }
 0xa02   : > { %12974 = vmatprep.subr.bf16.mxu1 %v17570_v26  ;;  %v8249_v48 = vsel %vm2867_vm6, %v8246_v1, %v8248_v44 }
 0xa04   : > { %12891 = vmatmul.mubr.bf16.gmra.mrb[8].mxu1 %v7727_v12  ;;  %v14791_v12 = vld [vmem:[#allocation6 + $0x1d8] sm:$0xff]  }
 0xa05   : > { %12894 = vmatprep.mubr.msk.bf16.mxu1 %vm14970_vm0, %v17570_v26  ;;  %12975 = vmatpush3.bf16.msra.mxu1 %v14774_v38  ;;  %v14782_v38 = vld [vmem:[#allocation3 + $0x28] sm:$0xff]  }
 0xa06   : > { %12976 = vmatprep.subr.bf16.mxu1 %v17570_v26 }
 0xa09   : > { %12977 = vmatpush3.bf16.msra.mxu1 %v14775_v34  ;;  %v8230_v34 = vrot.slane %v14782_v38, 2 }
 0xa0a   : > { %12978 = vmatprep.subr.bf16.mxu1 %v17570_v26 }
 0xa0c   : > { %12895 = vmatmul.mubr.bf16.gmra.mrb[12].mxu1 %v7729_v19  ;;  %v14784_v19 = vld [vmem:[#allocation3 + $0x30] sm:$0xff]  }
 0xa0d   : > { %12898 = vmatprep.mubr.msk.bf16.mxu1 %vm14970_vm0, %v17570_v26  ;;  %12979 = vmatpush3.bf16.msra.mxu1 %v14776_v16  ;;  %v8231_v16 = vsel %vm2867_vm6, %v8228_v4, %v8230_v34  ;;  %v8232_v37 = vrot.slane %v14784_v19, 2  ;;  %v14802_v19 = vld [vmem:[#allocation3 + $0x98] sm:$0xff]  }
 0xa0e   : > { %12980 = vmatprep.subr.bf16.mxu1 %v17570_v26 }
 0xa11   : > { %12981 = vmatpush3.bf16.msra.mxu1 %v14777_v13  ;;  %v14798_v13 = vld [vmem:[#allocation6 + $0x1e8] sm:$0xff]  }
 0xa12   : > { %13066 = vmatprep.subr.bf16.mxu1 %v17570_v26 }
 0xa14   : > { %12899 = vmatmul.mubr.bf16.gmra.mrb[16].mxu1 %v7731_v30  ;;  %v14801_v30 = vld [vmem:[#allocation6 + $0x1f0] sm:$0xff]  }
 0xa15   : > { %12902 = vmatprep.mubr.msk.bf16.mxu1 %vm14970_vm0, %v17570_v26 }
 0xa17   : > { %v7147_v25 = vpop.f32.mrb[104].mxu1 }
 0xa18   : > { %v12764_v32 = vpop.f32.mrb[105].mxu1  ;;  %v8233_v25 = vsel %vm2867_vm6, %v8230_v34, %v8232_v37  ;;  %v14800_v34 = vld [vmem:[#allocation3 + $0x90] sm:$0xff]  }
 0xa19   : > { %v7149_v61 = vpop.f32.mrb[106].mxu1  ;;  %v14805_v32 = vld [vmem:[#allocation6 + $0x1f8] sm:$0xff]  }
 0xa1a   : > { %v12765_v31 = vpop.f32.mrb[107].mxu1  ;;  %v8234_v61 = vrot.slane %v14785_v29, 2 }
 0xa1c   : > { %12903 = vmatmul.mubr.bf16.gmra.mrb[20].mxu1 %v7733_v56  ;;  %v8235_v31 = vsel %vm2867_vm6, %v8232_v37, %v8234_v61  ;;  %v14786_v56 = vld [vmem:[#allocation3 + $0x40] sm:$0xff]  }
 0xa1d   : > { %12906 = vmatprep.mubr.msk.bf16.mxu1 %vm14970_vm0, %v17570_v26  ;;  %v8236_v39 = vrot.slane %v14786_v56, 2 }
 0xa1f   : > { %v7501_v24 = vpop.f32.mrb[108].mxu1  ;;  %v8239_v63 = vsel %vm2867_vm6, %v8236_v39, %v8238_v5 }
 0xa20   : > { %v12784_v6 = vpop.f32.mrb[109].mxu1 }
 0xa21   : > { %v7503_v55 = vpop.f32.mrb[110].mxu1 }
 0xa22   : > { %v12785_v28 = vpop.f32.mrb[111].mxu1 }
 0xa24   : > { %12907 = vmatmul.mubr.bf16.gmra.mrb[24].mxu1 %v7735_v53  ;;  %v8237_v53 = vsel %vm2867_vm6, %v8234_v61, %v8236_v39 }
 0xa25   : > { %12910 = vmatprep.mubr.msk.bf16.mxu1 %vm14970_vm0, %v17570_v26 }
 0xa2c   : > { %12911 = vmatmul.mubr.bf16.gmra.mrb[28].mxu1 %v7737_v43 }
 0xa2d   : > { %12914 = vmatprep.mubr.msk.bf16.mxu1 %vm14970_vm0, %v17570_v26 }
 0xa34   : > { %12915 = vmatmul.mubr.bf16.gmra.mrb[32].mxu1 %v7739_v0 }
 0xa35   : > { %12918 = vmatprep.mubr.msk.bf16.mxu1 %vm14970_vm0, %v17570_v26 }
 0xa3c   : > { %12919 = vmatmul.mubr.bf16.gmra.mrb[36].mxu1 %v7741_v36 }
 0xa3d   : > { %12922 = vmatprep.mubr.msk.bf16.mxu1 %vm14970_vm0, %v17570_v26 }
 0xa44   : > { %12923 = vmatmul.mubr.bf16.gmra.mrb[40].mxu1 %v7743_v60  ;;  %v14789_v60 = vld [vmem:[#allocation3 + $0x50] sm:$0xff]  }
 0xa45   : > { %12926 = vmatprep.mubr.msk.bf16.mxu1 %vm14970_vm0, %v17570_v26  ;;  %v8240_v41 = vrot.slane %v14789_v60, 2 }
 0xa4c   : > { %12927 = vmatmul.mubr.bf16.gmra.mrb[44].mxu1 %v7745_v22  ;;  %v8241_v22 = vsel %vm2867_vm6, %v8238_v5, %v8240_v41 }
 0xa4d   : > { %12930 = vmatprep.mubr.msk.bf16.mxu1 %vm14970_vm0, %v17570_v26 }
 0xa54   : > { %12931 = vmatmul.mubr.bf16.gmra.mrb[48].mxu1 %v16611_v35  ;;  %v17577_v35 = vld [vmem:[#allocation15_spill] sm:$0xff] }
 0xa55   : > { %12934 = vmatprep.mubr.msk.bf16.mxu1 %vm14970_vm0, %v17570_v26 }
 0xa5c   : > { %12935 = vmatmul.mubr.bf16.gmra.mrb[52].mxu1 %v16614_v10  ;;  %v17578_v10 = vld [vmem:[#allocation16_spill] sm:$0xff] }
 0xa5d   : > { %12938 = vmatprep.mubr.msk.bf16.mxu1 %vm14970_vm0, %v17570_v26 }
 0xa64   : > { %12939 = vmatmul.mubr.bf16.gmra.mrb[56].mxu1 %v17574_v57  ;;  %v14790_v57 = vld [vmem:[#allocation3 + $0x58] sm:$0xff]  }
 0xa65   : > { %12942 = vmatprep.mubr.msk.bf16.mxu1 %vm14970_vm0, %v17570_v26 }
 0xa6c   : > { %12943 = vmatmul.mubr.bf16.gmra.mrb[60].mxu1 %v17575_v27  ;;  %v8242_v27 = vrot.slane %v14790_v57, 2 }
 0xa6d   : > { %12946 = vmatprep.mubr.msk.bf16.mxu1 %vm14970_vm0, %v17570_v26 }
 0xa74   : > { %12947 = vmatmul.mubr.bf16.gmra.mrb[64].mxu1 %v17576_v8  ;;  %v8243_v8 = vsel %vm2867_vm6, %v8240_v41, %v8242_v27 }
 0xa75   : > { %12950 = vmatprep.mubr.msk.bf16.mxu1 %vm14970_vm0, %v17570_v26 }
 0xa7c   : > { %12951 = vmatmul.mubr.bf16.gmra.mrb[68].mxu1 %v17577_v35  ;;  %v14792_v35 = vld [vmem:[#allocation3 + $0x60] sm:$0xff]  }
 0xa7d   : > { %12954 = vmatprep.mubr.msk.bf16.mxu1 %vm14970_vm0, %v17570_v26 }
 0xa84   : > { %12955 = vmatmul.mubr.bf16.gmra.mrb[72].mxu1 %v17578_v10  ;;  %v8244_v10 = vrot.slane %v14792_v35, 2  ;;  %v14809_v35 = vld [vmem:[#allocation6 + $0x200] sm:$0xff]  }
 0xa85   : > { %12958 = vmatprep.mubr.msk.bf16.mxu1 %vm14970_vm0, %v17570_v26 }
 0xa8c   : > { %12959 = vmatmul.mubr.bf16.gmra.mrb[76].mxu1 %v17579_v47  ;;  %v8245_v47 = vsel %vm2867_vm6, %v8242_v27, %v8244_v10 }
 0xa8d   : > { %12962 = vmatprep.mubr.msk.bf16.mxu1 %vm14970_vm0, %v17570_v26 }
 0xa94   : > { %12963 = vmatmul.mubr.bf16.gmra.mrb[120].mxu1 %v17581_v59  ;;  %v8247_v59 = vsel %vm2867_vm6, %v8244_v10, %v8246_v1  ;;  %v14812_v1 = vld [vmem:[#allocation6 + $0x208] sm:$0xff]  }
 0xa95   : > { %12982 = vmatprep.mubr.msk.bf16.mxu1 %vm14970_vm0, %v17570_v26 }
 0xa9c   : > { %12983 = vmatmul.mubr.bf16.vlgmr.msra.gmra.mrb[124].mxu1 %v8227_v51 }
 0xa9d   : > { %13067 = vmatpush3.bf16.msra.mxu1 %v14780_v14  ;;  %12986 = vmatprep.mubr.msk.bf16.mxu1 %vm14970_vm0, %v17570_v26  ;;  %v14796_v14 = vld [vmem:[#allocation3 + $0x78] sm:$0xff]  }
 0xa9e   : > { %13068 = vmatprep.subr.bf16.mxu1 %v17570_v26  ;;  %v8250_v51 = vrot.slane %v14796_v14, 2  ;;  %v14816_v14 = vld [vmem:[#allocation6 + $0x210] sm:$0xff]  }
 0xaa0   : > { %v8251_v42 = vsel %vm2867_vm6, %v8248_v44, %v8250_v51  ;;  %v8759_v44 = vshrl.u32 %v14876_v62, 16 }
 0xaa1   : > { %13069 = vmatpush3.bf16.msra.mxu1 %v14783_v58  ;;  %v14797_v58 = vld [vmem:[#allocation3 + $0x80] sm:$0xff]  }
 0xaa2   : > { %13070 = vmatprep.subr.bf16.mxu1 %v17570_v26  ;;  %v8252_v4 = vrot.slane %v14797_v58, 2 }
 0xaa4   : > { %12987 = vmatmul.mubr.bf16.gmra.mrb[4].mxu1 %v8229_v15  ;;  %v14799_v15 = vld [vmem:[#allocation3 + $0x88] sm:$0xff]  }
 0xaa5   : > { %12990 = vmatprep.mubr.msk.bf16.mxu1 %vm14970_vm0, %v17570_v26  ;;  %13071 = vmatpush3.bf16.msra.mxu1 %v14787_v9  ;;  %v8253_v9 = vsel %vm2867_vm6, %v8250_v51, %v8252_v4  ;;  %v8254_v38 = vrot.slane %v14799_v15, 2  ;;  %v14877_v15 = vld [vmem:[#allocation3 + $0x30] sm:$0xff]  }
 0xaa6   : > { %13072 = vmatprep.subr.bf16.mxu1 %v17570_v26 }
 0xaa9   : > { %13073 = vmatpush3.bf16.msra.mxu1 %v14791_v12  ;;  %v8255_v12 = vsel %vm2867_vm6, %v8252_v4, %v8254_v38  ;;  %v14820_v4 = vld [vmem:[#allocation6 + $0x218] sm:$0xff]  }
 0xaaa   : > { %13074 = vmatprep.subr.bf16.mxu1 %v17570_v26 }
 0xaac   : > { %12991 = vmatmul.mubr.bf16.gmra.mrb[8].mxu1 %v8231_v16 }
 0xaad   : > { %12994 = vmatprep.mubr.msk.bf16.mxu1 %vm14970_vm0, %v17570_v26  ;;  %13075 = vmatpush3.bf16.msra.mxu1 %v14794_v7  ;;  %v8256_v7 = vrot.slane %v14800_v34, 2  ;;  %v14823_v34 = vld [vmem:[#allocation6 + $0x220] sm:$0xff]  }
 0xaae   : > { %13076 = vmatprep.subr.bf16.mxu1 %v17570_v26 }
 0xaaf   : > { %v8257_v16 = vsel %vm2867_vm6, %v8254_v38, %v8256_v7  ;;  %v8768_v38 = vshrl.u32 %v14877_v15, 16 }
 0xab1   : > { %13077 = vmatpush3.bf16.msra.mxu1 %v14798_v13  ;;  %v8258_v13 = vrot.slane %v14802_v19, 2 }
 0xab2   : > { %13078 = vmatprep.subr.bf16.mxu1 %v17570_v26 }
 0xab3   : > { %v8259_v37 = vsel %vm2867_vm6, %v8256_v7, %v8258_v13 }
 0xab4   : > { %12995 = vmatmul.mubr.bf16.gmra.mrb[12].mxu1 %v8233_v25 }
 0xab5   : > { %12998 = vmatprep.mubr.msk.bf16.mxu1 %vm14970_vm0, %v17570_v26  ;;  %13079 = vmatpush3.bf16.msra.mxu1 %v14801_v30  ;;  %v14803_v30 = vld [vmem:[#allocation3 + $0xa0] sm:$0xff]  }
 0xab6   : > { %13080 = vmatprep.subr.bf16.mxu1 %v17570_v26  ;;  %v8260_v25 = vrot.slane %v14803_v30, 2  ;;  %v14878_v30 = vld [vmem:[#allocation3 + $0x38] sm:$0xff]  }
 0xab8   : > { %v8261_v29 = vsel %vm2867_vm6, %v8258_v13, %v8260_v25  ;;  %v14827_v13 = vld [vmem:[#allocation6 + $0x228] sm:$0xff]  }
 0xab9   : > { %13081 = vmatpush3.bf16.msra.mxu1 %v14805_v32  ;;  %v14804_v32 = vld [vmem:[#allocation3 + $0xa8] sm:$0xff]  }
 0xaba   : > { %13166 = vmatprep.subr.bf16.mxu1 %v17570_v26  ;;  %v8262_v61 = vrot.slane %v14804_v32, 2  ;;  %v14830_v32 = vld [vmem:[#allocation6 + $0x230] sm:$0xff]  }
 0xabc   : > { %12999 = vmatmul.mubr.bf16.gmra.mrb[16].mxu1 %v8235_v31  ;;  %v14806_v31 = vld [vmem:[#allocation3 + $0xb0] ss:$0 sps:$4 sm:$0xff]   ;;  %v8263_v56 = vsel %vm2867_vm6, %v8260_v25, %v8262_v61  ;;  %v8777_v25 = vshrl.u32 %v14878_v30, 16 }
 0xabd   : > { %13002 = vmatprep.mubr.msk.bf16.mxu1 %vm14970_vm0, %v17570_v26 }
 0xabf   : > { %v7658_v24 = vpop.f32.mrb[112].mxu1 }
 0xac0   : > { %v12864_v6 = vpop.f32.mrb[113].mxu1  ;;  %v8264_v24 = vrot.slane %v14806_v31, 2  ;;  %v8779_v31 = vrot.slane %v8777_v25, 2 }
 0xac1   : > { %v7660_v55 = vpop.f32.mrb[114].mxu1  ;;  %v8568_v6 = vld [vmem:[#allocation3 + $0x10] sm:$0xc] }
 0xac2   : > { %v12865_v28 = vpop.f32.mrb[115].mxu1  ;;  %v8265_v39 = vsel %vm2867_vm6, %v8262_v61, %v8264_v24  ;;  %v14873_v55 = vld [vmem:[#allocation3 + $0x14] sm:$0xf] }
 0xac3   : > { %v10722_v28 = vcombine.low %v8568_v6, %v14873_v55  ;;  %v14879_v6 = vld [vmem:[#allocation3 + $0x40] sm:$0xff]  }
 0xac4   : > { %13003 = vmatmul.mubr.bf16.gmra.mrb[20].mxu1 %v8237_v53  ;;  %v14874_v53 = vld [vmem:[#allocation3 + $0x18] sm:$0xff]   ;;  %v8786_v55 = vshrl.u32 %v14879_v6, 16 }
 0xac5   : > { %13006 = vmatprep.mubr.msk.bf16.mxu1 %vm14970_vm0, %v17570_v26  ;;  %v8741_v3 = vshrl.u32 %v14874_v53, 16  ;;  %v8733_v5 = vshrl.u32 %v10722_v28, 16 }
 0xac7   : > { %v7865_v43 = vpop.f32.mrb[116].mxu1 }
 0xac8   : > { %v12884_v0 = vpop.f32.mrb[117].mxu1  ;;  %v8744_v43 = vshll.u32 %v14874_v53, 16 }
 0xac9   : > { %v7867_v11 = vpop.f32.mrb[118].mxu1  ;;  %v8736_v0 = vshll.u32 %v10722_v28, 16  ;;  %v8789_v28 = vshll.u32 %v14879_v6, 16  ;;  %v14885_v6 = vld [vmem:[#allocation3 + $0x70] sm:$0xff]  }
 0xaca   : > { %v12885_v36 = vpop.f32.mrb[119].mxu1  ;;  %v8743_v11 = vrot.slane %v8741_v3, 2  ;;  %v8788_v3 = vrot.slane %v8786_v55, 2  ;;  %v8840_v55 = vshrl.u32 %v14885_v6, 16 }
 0xacb   : > { %v8746_v36 = vrot.slane %v8744_v43, 3  ;;  %v8738_v60 = vrot.slane %v8736_v0, 3  ;;  %v8791_v43 = vrot.slane %v8789_v28, 3  ;;  %v8843_v28 = vshll.u32 %v14885_v6, 16 }
 0xacc   : > { %13007 = vmatmul.mubr.bf16.gmra.mrb[24].mxu1 %v8239_v63  ;;  %v8735_v63 = vrot.slane %v8733_v5, 2 }
 0xacd   : > { %13010 = vmatprep.mubr.msk.bf16.mxu1 %vm14970_vm0, %v17570_v26  ;;  %v8747_v41 = vor.u32 %v8746_v36, %v8743_v11  ;;  %v8792_v0 = vor.u32 %v8791_v43, %v8788_v3  ;;  %v14880_v11 = vld [vmem:[#allocation3 + $0x48] sm:$0xff]   ;;  %v8842_v3 = vrot.slane %v8840_v55, 2  ;;  %v8845_v43 = vrot.slane %v8843_v28, 3  ;;  %v17298_v28 = vld [vmem:[#allocation3 + $0xb0] sm:$0x1f]  }
 0xace   : > { %v8795_v36 = vshrl.u32 %v14880_v11, 16 }
 0xad4   : > { %13011 = vmatmul.mubr.bf16.gmra.mrb[28].mxu1 %v8241_v22  ;;  %v14875_v22 = vld [vmem:[#allocation3 + $0x20] sm:$0xff]  }
 0xad5   : > { %13014 = vmatprep.mubr.msk.bf16.mxu1 %vm14970_vm0, %v17570_v26  ;;  %v8750_v57 = vshrl.u32 %v14875_v22, 16  ;;  %v8753_v27 = vshll.u32 %v14875_v22, 16 }
 0xad7   : > { %v8755_v45 = vrot.slane %v8753_v27, 3  ;;  %v8797_v27 = vrot.slane %v8795_v36, 2 }
 0xadc   : > { %13015 = vmatmul.mubr.bf16.gmra.mrb[32].mxu1 %v8243_v8  ;;  %v8739_v8 = vor.u32 %v8738_v60, %v8735_v63  ;;  %v8798_v63 = vshll.u32 %v14880_v11, 16 }
 0xadd   : > { %13018 = vmatprep.mubr.msk.bf16.mxu1 %vm14970_vm0, %v17570_v26 }
 0xade   : > { %v8748_v10 = vsel %vm3879_vm7, %v8739_v8, %v8747_v41  ;;  %v8800_v8 = vrot.slane %v8798_v63, 3 }
 0xae4   : > { %13019 = vmatmul.mubr.bf16.gmra.mrb[36].mxu1 %v8245_v47  ;;  %v8752_v47 = vrot.slane %v8750_v57, 2 }
 0xae5   : > { %13022 = vmatprep.mubr.msk.bf16.mxu1 %vm14970_vm0, %v17570_v26 }
 0xaec   : > { %13023 = vmatmul.mubr.bf16.gmra.mrb[40].mxu1 %v8247_v59  ;;  %v8756_v59 = vor.u32 %v8755_v45, %v8752_v47  ;;  %v14881_v47 = vld [vmem:[#allocation3 + $0x50] sm:$0xff]  }
 0xaed   : > { %13026 = vmatprep.mubr.msk.bf16.mxu1 %vm14970_vm0, %v17570_v26  ;;  %v8804_v45 = vshrl.u32 %v14881_v47, 16 }
 0xaee   : > { %v8757_v51 = vsel %vm3879_vm7, %v8747_v41, %v8756_v59 }
 0xaf4   : > { %13027 = vmatmul.mubr.bf16.gmra.mrb[44].mxu1 %v8249_v48  ;;  %v8762_v48 = vshll.u32 %v14876_v62, 16 }
 0xaf5   : > { %13030 = vmatprep.mubr.msk.bf16.mxu1 %vm14970_vm0, %v17570_v26 }
 0xaf6   : > { %v8764_v58 = vrot.slane %v8762_v48, 3 }
 0xafc   : > { %13031 = vmatmul.mubr.bf16.gmra.mrb[48].mxu1 %v8251_v42  ;;  %v8761_v42 = vrot.slane %v8759_v44, 2 }
 0xafd   : > { %13034 = vmatprep.mubr.msk.bf16.mxu1 %vm14970_vm0, %v17570_v26 }
 0xb04   : > { %13035 = vmatmul.mubr.bf16.gmra.mrb[52].mxu1 %v8253_v9  ;;  %v8765_v9 = vor.u32 %v8764_v58, %v8761_v42  ;;  %v14882_v58 = vld [vmem:[#allocation3 + $0x58] sm:$0xff]  }
 0xb05   : > { %13038 = vmatprep.mubr.msk.bf16.mxu1 %vm14970_vm0, %v17570_v26 }
 0xb06   : > { %v8766_v7 = vsel %vm3879_vm7, %v8756_v59, %v8765_v9 }
 0xb0c   : > { %13039 = vmatmul.mubr.bf16.gmra.mrb[56].mxu1 %v8255_v12  ;;  %v8771_v12 = vshll.u32 %v14877_v15, 16 }
 0xb0d   : > { %13042 = vmatprep.mubr.msk.bf16.mxu1 %vm14970_vm0, %v17570_v26 }
 0xb0e   : > { %v8773_v19 = vrot.slane %v8771_v12, 3 }
 0xb14   : > { %13043 = vmatmul.mubr.bf16.gmra.mrb[60].mxu1 %v8257_v16  ;;  %v8770_v16 = vrot.slane %v8768_v38, 2 }
 0xb15   : > { %13046 = vmatprep.mubr.msk.bf16.mxu1 %vm14970_vm0, %v17570_v26 }
 0xb1c   : > { %13047 = vmatmul.mubr.bf16.gmra.mrb[64].mxu1 %v8259_v37  ;;  %v8774_v37 = vor.u32 %v8773_v19, %v8770_v16 }
 0xb1d   : > { %13050 = vmatprep.mubr.msk.bf16.mxu1 %vm14970_vm0, %v17570_v26 }
 0xb1e   : > { %v8775_v61 = vsel %vm3879_vm7, %v8765_v9, %v8774_v37  ;;  %v8816_v9 = vshll.u32 %v14882_v58, 16 }
 0xb20   : > { %v8818_v12 = vrot.slane %v8816_v9, 3 }
 0xb24   : > { %13051 = vmatmul.mubr.bf16.gmra.mrb[68].mxu1 %v8261_v29  ;;  %v8780_v29 = vshll.u32 %v14878_v30, 16 }
 0xb25   : > { %13054 = vmatprep.mubr.msk.bf16.mxu1 %vm14970_vm0, %v17570_v26 }
 0xb2c   : > { %13055 = vmatmul.mubr.bf16.gmra.mrb[72].mxu1 %v8263_v56  ;;  %v8782_v56 = vrot.slane %v8780_v29, 3  ;;  %v14884_v29 = vld [vmem:[#allocation3 + $0x68] sm:$0xff]  }
 0xb2d   : > { %13058 = vmatprep.mubr.msk.bf16.mxu1 %vm14970_vm0, %v17570_v26 }
 0xb34   : > { %13059 = vmatmul.mubr.bf16.gmra.mrb[76].mxu1 %v8265_v39  ;;  %v8783_v39 = vor.u32 %v8782_v56, %v8779_v31 }
 0xb35   : > { %13062 = vmatprep.mubr.msk.bf16.mxu1 %vm14970_vm0, %v17570_v26 }
 0xb36   : > { %v8784_v53 = vsel %vm3879_vm7, %v8774_v37, %v8783_v39  ;;  %v8793_v57 = vsel %vm3879_vm7, %v8783_v39, %v8792_v0 }
 0xb3c   : > { %13063 = vmatmul.mubr.bf16.gmra.mrb[128].mxu1 %v8264_v24  ;;  %v14834_v24 = vld [vmem:[#allocation6 + $0x238] sm:$0xff]  }
 0xb3d   : > { %13082 = vmatprep.mubr.msk.bf16.mxu1 %vm14970_vm0, %v17570_v26 }
 0xb44   : > { %13083 = vmatmul.mubr.bf16.vlgmr.msra.gmra.mrb[132].mxu1 %v8748_v10  ;;  %v8801_v10 = vor.u32 %v8800_v8, %v8797_v27 }
 0xb45   : > { %13167 = vmatpush3.bf16.msra.mxu1 %v14809_v35  ;;  %13086 = vmatprep.mubr.msk.bf16.mxu1 %vm14970_vm0, %v17570_v26 }
 0xb46   : > { %13168 = vmatprep.subr.bf16.mxu1 %v17570_v26  ;;  %v8802_v48 = vsel %vm3879_vm7, %v8792_v0, %v8801_v10  ;;  %v14886_v0 = vld [vmem:[#allocation3 + $0x78] sm:$0xff]  }
 0xb47   : > { %v8849_v11 = vshrl.u32 %v14886_v0, 16  ;;  %v8852_v36 = vshll.u32 %v14886_v0, 16  ;;  %v8915_v0 = vshll.u32 %v17298_v28, 16 }
 0xb49   : > { %13169 = vmatpush3.bf16.msra.mxu1 %v14812_v1  ;;  %v8807_v1 = vshll.u32 %v14881_v47, 16 }
 0xb4a   : > { %13170 = vmatprep.subr.bf16.mxu1 %v17570_v26 }
 0xb4c   : > { %13087 = vmatmul.mubr.bf16.gmra.mrb[4].mxu1 %v8757_v51  ;;  %v8809_v51 = vrot.slane %v8807_v1, 3  ;;  %v14888_v1 = vld [vmem:[#allocation3 + $0x88] sm:$0xff]  }
 0xb4d   : > { %13090 = vmatprep.mubr.msk.bf16.mxu1 %vm14970_vm0, %v17570_v26  ;;  %13171 = vmatpush3.bf16.msra.mxu1 %v14816_v14  ;;  %v8806_v14 = vrot.slane %v8804_v45, 2 }
 0xb4e   : > { %13172 = vmatprep.subr.bf16.mxu1 %v17570_v26 }
 0xb4f   : > { %v8810_v42 = vor.u32 %v8809_v51, %v8806_v14 }
 0xb51   : > { %13173 = vmatpush3.bf16.msra.mxu1 %v14820_v4  ;;  %v8813_v4 = vshrl.u32 %v14882_v58, 16  ;;  %v8811_v15 = vsel %vm3879_vm7, %v8801_v10, %v8810_v42 }
 0xb52   : > { %13174 = vmatprep.subr.bf16.mxu1 %v17570_v26 }
 0xb53   : > { %v8815_v38 = vrot.slane %v8813_v4, 2 }
 0xb54   : > { %13091 = vmatmul.mubr.bf16.gmra.mrb[8].mxu1 %v8766_v7  ;;  %v14883_v7 = vld [vmem:[#allocation3 + $0x60] sm:$0xff]  }
 0xb55   : > { %13094 = vmatprep.mubr.msk.bf16.mxu1 %vm14970_vm0, %v17570_v26  ;;  %13175 = vmatpush3.bf16.msra.mxu1 %v14823_v34  ;;  %v8819_v34 = vor.u32 %v8818_v12, %v8815_v38  ;;  %v8822_v16 = vshrl.u32 %v14883_v7, 16  ;;  %v8825_v19 = vshll.u32 %v14883_v7, 16 }
 0xb56   : > { %13176 = vmatprep.subr.bf16.mxu1 %v17570_v26 }
 0xb57   : > { %v8824_v37 = vrot.slane %v8822_v16, 2  ;;  %v8827_v30 = vrot.slane %v8825_v19, 3 }
 0xb59   : > { %13177 = vmatpush3.bf16.msra.mxu1 %v14827_v13  ;;  %v8820_v13 = vsel %vm3879_vm7, %v8810_v42, %v8819_v34  ;;  %v8828_v25 = vor.u32 %v8827_v30, %v8824_v37  ;;  %v14889_v42 = vld [vmem:[#allocation3 + $0x90] sm:$0xff]  }
 0xb5a   : > { %13178 = vmatprep.subr.bf16.mxu1 %v17570_v26  ;;  %v8876_v58 = vshrl.u32 %v14889_v42, 16  ;;  %v8879_v4 = vshll.u32 %v14889_v42, 16 }
 0xb5b   : > { %v8829_v31 = vsel %vm3879_vm7, %v8819_v34, %v8828_v25  ;;  %v14890_v34 = vld [vmem:[#allocation3 + $0x98] sm:$0xff]  }
 0xb5c   : > { %13095 = vmatmul.mubr.bf16.gmra.mrb[12].mxu1 %v8775_v61  ;;  %v8834_v61 = vshll.u32 %v14884_v29, 16  ;;  %v8881_v38 = vrot.slane %v8879_v4, 3  ;;  %v8885_v7 = vshrl.u32 %v14890_v34, 16  ;;  %v8888_v16 = vshll.u32 %v14890_v34, 16 }
 0xb5d   : > { %13098 = vmatprep.mubr.msk.bf16.mxu1 %vm14970_vm0, %v17570_v26  ;;  %13179 = vmatpush3.bf16.msra.mxu1 %v14830_v32  ;;  %v8831_v32 = vshrl.u32 %v14884_v29, 16 }
 0xb5e   : > { %13180 = vmatprep.subr.bf16.mxu1 %v17570_v26  ;;  %v8890_v37 = vrot.slane %v8888_v16, 3 }
 0xb5f   : > { %v8833_v56 = vrot.slane %v8831_v32, 2 }
 0xb61   : > { %13181 = vmatpush3.bf16.msra.mxu1 %v14834_v24  ;;  %v8836_v24 = vrot.slane %v8834_v61, 3 }
 0xb63   : > { %v8837_v39 = vor.u32 %v8836_v24, %v8833_v56 }
 0xb64   : > { %13099 = vmatmul.mubr.bf16.gmra.mrb[16].mxu1 %v8784_v53 }
 0xb65   : > { %13102 = vmatprep.mubr.msk.bf16.mxu1 %vm14970_vm0, %v17570_v26  ;;  %v8838_v53 = vsel %vm3879_vm7, %v8828_v25, %v8837_v39  ;;  %v14891_v25 = vld [vmem:[#allocation3 + $0xa0] sm:$0xff]  }
 0xb66   : > { %v8894_v29 = vshrl.u32 %v14891_v25, 16  ;;  %v8897_v32 = vshll.u32 %v14891_v25, 16 }
 0xb67   : > { %v8022_v5 = vpop.f32.mrb[120].mxu1 }
 0xb68   : > { %v12964_v60 = vpop.f32.mrb[121].mxu1  ;;  %v8846_v5 = vor.u32 %v8845_v43, %v8842_v3  ;;  %v8899_v56 = vrot.slane %v8897_v32, 3 }
 0xb69   : > { %v8024_v41 = vpop.f32.mrb[122].mxu1  ;;  %v8851_v60 = vrot.slane %v8849_v11, 2 }
 0xb6a   : > { %v12965_v22 = vpop.f32.mrb[123].mxu1  ;;  %v8847_v63 = vsel %vm3879_vm7, %v8837_v39, %v8846_v5  ;;  %v8854_v41 = vrot.slane %v8852_v36, 3  ;;  %v14892_v39 = vld [vmem:[#allocation3 + $0xa8] sm:$0xff]  }
 0xb6b   : > { %v8903_v6 = vshrl.u32 %v14892_v39, 16  ;;  %v8906_v55 = vshll.u32 %v14892_v39, 16 }
 0xb6c   : > { %13103 = vmatmul.mubr.bf16.gmra.mrb[20].mxu1 %v8793_v57  ;;  %v8855_v22 = vor.u32 %v8854_v41, %v8851_v60  ;;  %v14887_v57 = vld [vmem:[#allocation3 + $0x80] sm:$0xff]  }
 0xb6d   : > { %13106 = vmatprep.mubr.msk.bf16.mxu1 %vm14970_vm0, %v17570_v26  ;;  %v8858_v27 = vshrl.u32 %v14887_v57, 16  ;;  %v8861_v8 = vshll.u32 %v14887_v57, 16  ;;  %v8905_v3 = vrot.slane %v8903_v6, 2  ;;  %v8908_v43 = vrot.slane %v8906_v55, 3  ;;  %v17582_v57 = vld [vmem:[#allocation18_spill] sm:$0xff] }
 0xb6f   : > { %v8369_v35 = vpop.f32.mrb[124].mxu1  ;;  %v8860_v10 = vrot.slane %v8858_v27, 2  ;;  %v8863_v47 = vrot.slane %v8861_v8, 3  ;;  %v8909_v11 = vor.u32 %v8908_v43, %v8905_v3  ;;  %v17583_v27 = vld [vmem:[#allocation19_spill] sm:$0xff]  ;;  %v17584_v8 = vld [vmem:[#allocation20_spill] sm:$0xff] }
 0xb70   : > { %v12984_v59 = vpop.f32.mrb[125].mxu1  ;;  %v8856_v35 = vsel %vm3879_vm7, %v8846_v5, %v8855_v22  ;;  %v8912_v5 = vshrl.u32 %v17298_v28, 16 }
 0xb71   : > { %v8371_v62 = vpop.f32.mrb[126].mxu1  ;;  %v8864_v45 = vor.u32 %v8863_v47, %v8860_v10  ;;  %v8867_v59 = vshrl.u32 %v14888_v1, 16 }
 0xb72   : > { %v12985_v44 = vpop.f32.mrb[127].mxu1  ;;  %v8870_v62 = vshll.u32 %v14888_v1, 16  ;;  %v8914_v36 = vrot.slane %v8912_v5, 2 }
 0xb73   : > { %v8865_v44 = vsel %vm3879_vm7, %v8855_v22, %v8864_v45 }
 0xb74   : > { %13107 = vmatmul.mubr.bf16.gmra.mrb[24].mxu1 %v8802_v48  ;;  %v8869_v48 = vrot.slane %v8867_v59, 2  ;;  %v8872_v14 = vrot.slane %v8870_v62, 3 }
 0xb75   : > { %13110 = vmatprep.mubr.msk.bf16.mxu1 %vm14970_vm0, %v17570_v26 }
 0xb76   : > { %v8873_v51 = vor.u32 %v8872_v14, %v8869_v48 }
 0xb78   : > { %v8874_v9 = vsel %vm3879_vm7, %v8864_v45, %v8873_v51 }
 0xb7c   : > { %13111 = vmatmul.mubr.bf16.gmra.mrb[28].mxu1 %v8811_v15  ;;  %v8878_v15 = vrot.slane %v8876_v58, 2 }
 0xb7d   : > { %13114 = vmatprep.mubr.msk.bf16.mxu1 %vm14970_vm0, %v17570_v26 }
 0xb7e   : > { %v8882_v12 = vor.u32 %v8881_v38, %v8878_v15 }
 0xb80   : > { %v8883_v19 = vsel %vm3879_vm7, %v8873_v51, %v8882_v12 }
 0xb84   : > { %13115 = vmatmul.mubr.bf16.gmra.mrb[32].mxu1 %v8820_v13  ;;  %v8887_v13 = vrot.slane %v8885_v7, 2 }
 0xb85   : > { %13118 = vmatprep.mubr.msk.bf16.mxu1 %vm14970_vm0, %v17570_v26 }
 0xb86   : > { %v8891_v30 = vor.u32 %v8890_v37, %v8887_v13 }
 0xb88   : > { %v8892_v61 = vsel %vm3879_vm7, %v8882_v12, %v8891_v30 }
 0xb8c   : > { %13119 = vmatmul.mubr.bf16.gmra.mrb[36].mxu1 %v8829_v31  ;;  %v8896_v31 = vrot.slane %v8894_v29, 2 }
 0xb8d   : > { %13122 = vmatprep.mubr.msk.bf16.mxu1 %vm14970_vm0, %v17570_v26 }
 0xb8e   : > { %v8900_v24 = vor.u32 %v8899_v56, %v8896_v31 }
 0xb90   : > { %v8910_v60 = vsel %vm3879_vm7, %v8900_v24, %v8909_v11 }
 0xb94   : > { %13123 = vmatmul.mubr.bf16.gmra.mrb[40].mxu1 %v8838_v53  ;;  %v8901_v53 = vsel %vm3879_vm7, %v8891_v30, %v8900_v24 }
 0xb95   : > { %13126 = vmatprep.mubr.msk.bf16.mxu1 %vm14970_vm0, %v17570_v26 }
 0xb9c   : > { %13127 = vmatmul.mubr.bf16.gmra.mrb[44].mxu1 %v8847_v63  ;;  %v8917_v63 = vrot.slane %v8915_v0, 3 }
 0xb9d   : > { %13130 = vmatprep.mubr.msk.bf16.mxu1 %vm14970_vm0, %v17570_v26 }
 0xb9e   : > { %v8918_v41 = vor.u32 %v8917_v63, %v8914_v36 }
 0xba0   : > { %v8919_v22 = vsel %vm3879_vm7, %v8909_v11, %v8918_v41 }
 0xba4   : > { %13131 = vmatmul.mubr.bf16.gmra.mrb[48].mxu1 %v8856_v35 }
 0xba5   : > { %13134 = vmatprep.mubr.msk.bf16.mxu1 %vm14970_vm0, %v17570_v26 }
 0xbac   : > { %13135 = vmatmul.mubr.bf16.gmra.mrb[52].mxu1 %v8865_v44 }
 0xbad   : > { %13138 = vmatprep.mubr.msk.bf16.mxu1 %vm14970_vm0, %v17570_v26 }
 0xbb4   : > { %13139 = vmatmul.mubr.bf16.gmra.mrb[56].mxu1 %v8874_v9 }
 0xbb5   : > { %13142 = vmatprep.mubr.msk.bf16.mxu1 %vm14970_vm0, %v17570_v26 }
 0xbbc   : > { %13143 = vmatmul.mubr.bf16.gmra.mrb[60].mxu1 %v8883_v19 }
 0xbbd   : > { %13146 = vmatprep.mubr.msk.bf16.mxu1 %vm14970_vm0, %v17570_v26 }
 0xbc4   : > { %13147 = vmatmul.mubr.bf16.gmra.mrb[64].mxu1 %v8892_v61 }
 0xbc5   : > { %13150 = vmatprep.mubr.msk.bf16.mxu1 %vm14970_vm0, %v17570_v26 }
 0xbcc   : > { %13151 = vmatmul.mubr.bf16.gmra.mrb[68].mxu1 %v8901_v53 }
 0xbcd   : > { %13154 = vmatprep.mubr.msk.bf16.mxu1 %vm14970_vm0, %v17570_v26 }
 0xbd4   : > { %13155 = vmatmul.mubr.bf16.gmra.mrb[72].mxu1 %v8910_v60 }
 0xbd5   : > { %13158 = vmatprep.mubr.msk.bf16.mxu1 %vm14970_vm0, %v17570_v26 }
 0xbdc   : > { %13159 = vmatmul.mubr.bf16.gmra.mrb[76].mxu1 %v8919_v22 }
 0xbdd   : > { %13162 = vmatprep.mubr.msk.bf16.mxu1 %vm14970_vm0, %v17570_v26 }
 0xbe4   : > { %13163 = vmatmul.mubr.bf16.gmra.mrb[136].mxu1 %v8918_v41 }
 0xbe5   : > { %13182 = vmatprep.mubr.msk.bf16.mxu1 %vm14970_vm0, %v17570_v26 }
 0xbec   : > { %13183 = vmatmul.mubr.bf16.vlgmr.msra.gmra.mrb[140].mxu1 %v17582_v57 }
 0xbed   : > { %13186 = vmatprep.mubr.msk.bf16.mxu1 %vm14970_vm0, %v17570_v26 }
 0xbf4   : > { %13187 = vmatmul.mubr.bf16.gmra.mrb[4].mxu1 %v17583_v27 }
 0xbf5   : > { %13190 = vmatprep.mubr.msk.bf16.mxu1 %vm14970_vm0, %v17570_v26 }
 0xbfc   : > { %13191 = vmatmul.mubr.bf16.gmra.mrb[8].mxu1 %v17584_v8 }
 0xbfd   : > { %13194 = vmatprep.mubr.msk.bf16.mxu1 %vm14970_vm0, %v17570_v26 }
 0xc04   : > { %13195 = vmatmul.mubr.bf16.gmra.mrb[12].mxu1 %v16682_v40 }
 0xc05   : > { %13198 = vmatprep.mubr.msk.bf16.mxu1 %vm14970_vm0, %v17570_v26 }
 0xc0c   : > { %13199 = vmatmul.mubr.bf16.gmra.mrb[16].mxu1 %v16685_v46  ;;  %v17586_v46 = vld [vmem:[#allocation23_spill] sm:$0xff] }
 0xc0d   : > { %13202 = vmatprep.mubr.msk.bf16.mxu1 %vm14970_vm0, %v17570_v26 }
 0xc0f   : > { %v8526_v35 = vpop.f32.mrb[128].mxu1 }
 0xc10   : > { %v13064_v10 = vpop.f32.mrb[129].mxu1 }
 0xc11   : > { %v8528_v47 = vpop.f32.mrb[130].mxu1 }
 0xc12   : > { %v13065_v45 = vpop.f32.mrb[131].mxu1 }
 0xc14   : > { %13203 = vmatmul.mubr.bf16.gmra.mrb[20].mxu1 %v16690_v20  ;;  %v17585_v20 = vld [vmem:[#allocation22_spill] sm:$0xff] }
 0xc15   : > { %13206 = vmatprep.mubr.msk.bf16.mxu1 %vm14970_vm0, %v17570_v26 }
 0xc17   : > { %v9023_v1 = vpop.f32.mrb[132].mxu1 }
 0xc18   : > { %v13084_v59 = vpop.f32.mrb[133].mxu1 }
 0xc19   : > { %v9025_v40 = vpop.f32.mrb[134].mxu1 }
 0xc1a   : > { %v13085_v62 = vpop.f32.mrb[135].mxu1 }
 0xc1c   : > { %13207 = vmatmul.mubr.bf16.gmra.mrb[24].mxu1 %v16693_v54  ;;  %v17587_v54 = vld [vmem:[#allocation24_spill] sm:$0xff] }
 0xc1d   : > { %13210 = vmatprep.mubr.msk.bf16.mxu1 %vm14970_vm0, %v17570_v26 }
 0xc24   : > { %13211 = vmatmul.mubr.bf16.gmra.mrb[28].mxu1 %v16696_v52  ;;  %v9282_v52 = vrot.slane %v17298_v28, 3 }
 0xc25   : > { %13214 = vmatprep.mubr.msk.bf16.mxu1 %vm14970_vm0, %v17570_v26 }
 0xc2c   : > { %13215 = vmatmul.mubr.bf16.gmra.mrb[32].mxu1 %v16699_v2  ;;  %v17588_v2 = vld [vmem:[#allocation21_spill] sm:$0xff] }
 0xc2d   : > { %13218 = vmatprep.mubr.msk.bf16.mxu1 %vm14970_vm0, %v17570_v26 }
 0xc34   : > { %13219 = vmatmul.mubr.bf16.gmra.mrb[36].mxu1 %v17585_v20 }
 0xc35   : > { %13222 = vmatprep.mubr.msk.bf16.mxu1 %vm14970_vm0, %v17570_v26 }
 0xc3c   : > { %13223 = vmatmul.mubr.bf16.gmra.mrb[40].mxu1 %v16705_v17  ;;  %v17589_v17 = vrot.slane %v17588_v2, 3 }
 0xc3d   : > { %13226 = vmatprep.mubr.msk.bf16.mxu1 %vm14970_vm0, %v17570_v26 }
 0xc44   : > { %13227 = vmatmul.mubr.bf16.gmra.mrb[44].mxu1 %v17586_v46 }
 0xc45   : > { %13230 = vmatprep.mubr.msk.bf16.mxu1 %vm14970_vm0, %v17570_v26 }
 0xc4c   : > { %13231 = vmatmul.mubr.bf16.gmra.mrb[48].mxu1 %v16717_v49 }
 0xc4d   : > { %13234 = vmatprep.mubr.msk.bf16.mxu1 %vm14970_vm0, %v17570_v26 }
 0xc54   : > { %13235 = vmatmul.mubr.bf16.gmra.mrb[52].mxu1 %v16720_v18 }
 0xc55   : > { %13238 = vmatprep.mubr.msk.bf16.mxu1 %vm14970_vm0, %v17570_v26 }
 0xc5c   : > { %13239 = vmatmul.mubr.bf16.gmra.mrb[56].mxu1 %v16723_v33  ;;  %v9283_v33 = vsel %vm4391_vm8, %v17589_v17, %v9282_v52 }
 0xc5d   : > { %13242 = vmatprep.mubr.msk.bf16.mxu1 %vm14970_vm0, %v17570_v26 }
 0xc64   : > { %13243 = vmatmul.mubr.bf16.gmra.mrb[60].mxu1 %v16726_v21 }
 0xc65   : > { %13246 = vmatprep.mubr.msk.bf16.mxu1 %vm14970_vm0, %v17570_v26 }
 0xc6c   : > { %13247 = vmatmul.mubr.bf16.gmra.mrb[64].mxu1 %v16729_v23 }
 0xc6d   : > { %13250 = vmatprep.mubr.msk.bf16.mxu1 %vm14970_vm0, %v17570_v26 }
 0xc74   : > { %13251 = vmatmul.mubr.bf16.gmra.mrb[68].mxu1 %v16732_v50 }
 0xc75   : > { %13254 = vmatprep.mubr.msk.bf16.mxu1 %vm14970_vm0, %v17570_v26 }
 0xc7c   : > { %13255 = vmatmul.mubr.bf16.gmra.mrb[72].mxu1 %v17587_v54 }
 0xc7d   : > { %13258 = vmatprep.mubr.msk.bf16.mxu1 %vm14970_vm0, %v17570_v26 }
 0xc84   : > { %13259 = vmatmul.mubr.bf16.gmra.mrb[76].mxu1 %v9283_v33 }
 0xc85   : > { %13262 = vmatprep.mubr.msk.bf16.mxu1 %vm14970_vm0, %v17570_v26  ;;  %vm9633_vm0 = vsmask.f32 2304 }
 0xc86   : > { %vm17377_vm13 = vmor %vm9633_vm0, %vm9634_vm12 }
 0xc8c   : > { %13263 = vmatmul.mubr.bf16.gmra.mrb[144].mxu1 %v9282_v52 }
 0xcb7   : > { %v9180_v49 = vpop.f32.mrb[136].mxu1 }
 0xcb8   : > { %v13164_v18 = vpop.f32.mrb[137].mxu1 }
 0xcb9   : > { %v9182_v21 = vpop.f32.mrb[138].mxu1 }
 0xcba   : > { %v13165_v23 = vpop.f32.mrb[139].mxu1 }
 0xcbf   : > { %v9387_v50 = vpop.f32.mrb[140].mxu1 }
 0xcc0   : > { %v13184_v44 = vpop.f32.mrb[141].mxu1 }
 0xcc1   : > { %v9389_v48 = vpop.f32.mrb[142].mxu1 }
 0xcc2   : > { %v13185_v14 = vpop.f32.mrb[143].mxu1 }
 0xcc7   : > { %v9393_v51 = vpop.f32.mrb[4].mxu1 }
 0xcc8   : > { %v9586_v42 = vmax.f32 %v9393_v51, 0.0  ;;  %v13188_v58 = vpop.f32.mrb[5].mxu1 }
 0xcc9   : > { %v9396_v4 = vpop.f32.mrb[6].mxu1 }
 0xcca   : > { %v10896_v9 = vpack.c.bf16 %v9586_v42, %v9586_v42  ;;  %v9587_v15 = vmax.f32 %v9396_v4, 0.0  ;;  %v13189_v38 = vpop.f32.mrb[7].mxu1 }
 0xccc   : > { %v9637_v12 = vshrl.u32 %v10896_v9, 16  ;;  %v9640_v34 = vshll.u32 %v10896_v9, 16  ;;  %v10897_v26 = vpack.c.bf16 %v9587_v15, %v9587_v15 }
 0xcce   : > { %v9639_v7 = vrot.slane %v9637_v12, 5  ;;  %v9642_v16 = vrot.slane %v9640_v34, 6  ;;  %v9646_v19 = vshrl.u32 %v10897_v26, 16  ;;  %v9649_v13 = vshll.u32 %v10897_v26, 16 }
 0xccf   : > { %v9401_v37 = vpop.f32.mrb[8].mxu1 }
 0xcd0   : > { %v9643_v30 = vor.u32 %v9642_v16, %v9639_v7  ;;  %v9648_v25 = vrot.slane %v9646_v19, 5  ;;  %v9651_v29 = vrot.slane %v9649_v13, 6  ;;  %v9588_v32 = vmax.f32 %v9401_v37, 0.0  ;;  %v13192_v61 = vpop.f32.mrb[9].mxu1 }
 0xcd1   : > { %v9404_v56 = vpop.f32.mrb[10].mxu1 }
 0xcd2   : > { %v9644_v24 = vrot.slane %v9643_v30, 4  ;;  %v9652_v39 = vor.u32 %v9651_v29, %v9648_v25  ;;  %v10898_v6 = vpack.c.bf16 %v9588_v32, %v9588_v32  ;;  %v9589_v55 = vmax.f32 %v9404_v56, 0.0  ;;  %v13193_v28 = vpop.f32.mrb[11].mxu1 }
 0xcd4   : > { %v9653_v53 = vsel %vm17377_vm13, %v9644_v24, %v9652_v39  ;;  %v9656_v3 = vshrl.u32 %v10898_v6, 16  ;;  %v9659_v43 = vshll.u32 %v10898_v6, 16  ;;  %v10900_v5 = vpack.c.bf16 %v9589_v55, %v9589_v55 }
 0xcd5   : > { %9666 = vst.msk [vmem:[%s17384_s24] sm:$0xf] %vm315_vm4, %v9653_v53  ;;  %v9654_v57 = vrot.slane %v9652_v39, 4 }
 0xcd6   : > { %v9658_v0 = vrot.slane %v9656_v3, 5  ;;  %v9661_v11 = vrot.slane %v9659_v43, 6  ;;  %v9681_v36 = vrot.slane %v9656_v3, 6  ;;  %v9684_v63 = vrot.slane %v9659_v43, 7 }
 0xcd7   : > { %v9688_v60 = vshrl.u32 %v10900_v5, 16  ;;  %v9691_v41 = vshll.u32 %v10900_v5, 16  ;;  %v9409_v22 = vpop.f32.mrb[12].mxu1 }
 0xcd8   : > { %v9662_v27 = vor.u32 %v9661_v11, %v9658_v0  ;;  %v9685_v8 = vor.u32 %v9684_v63, %v9681_v36  ;;  %v9590_v35 = vmax.f32 %v9409_v22, 0.0  ;;  %v13196_v10 = vpop.f32.mrb[13].mxu1 }
 0xcd9   : > { %v9690_v47 = vrot.slane %v9688_v60, 6  ;;  %v9693_v45 = vrot.slane %v9691_v41, 7  ;;  %v9412_v1 = vpop.f32.mrb[14].mxu1 }
 0xcda   : > { %v9663_v59 = vsel %vm17377_vm13, %v9654_v57, %v9662_v27  ;;  %v9686_v40 = vrot.slane %v9685_v8, 4  ;;  %v10901_v62 = vpack.c.bf16 %v9590_v35, %v9590_v35  ;;  %v9591_v20 = vmax.f32 %v9412_v1, 0.0  ;;  %v13197_v46 = vpop.f32.mrb[15].mxu1 }
 0xcdb   : > { %9667 = vst.msk [vmem:[%s17384_s24 + $0x4] sm:$0xf] %vm315_vm4, %v9663_v59  ;;  %v9694_v54 = vor.u32 %v9693_v45, %v9690_v47 }
 0xcdc   : > { %v9698_v52 = vshrl.u32 %v10901_v62, 16  ;;  %v9701_v2 = vshll.u32 %v10901_v62, 16  ;;  %v10903_v17 = vpack.c.bf16 %v9591_v20, %v9591_v20 }
 0xcdd   : > { %v9695_v49 = vsel %vm16348_vm11, %v9686_v40, %v9694_v54  ;;  %v9696_v50 = vrot.slane %v9694_v54, 4 }
 0xcde   : > { %9708 = vst.msk [vmem:[%s17384_s24 + $0x8] sm:$0xf] %vm315_vm4, %v9695_v49  ;;  %v9700_v18 = vrot.slane %v9698_v52, 6  ;;  %v9703_v21 = vrot.slane %v9701_v2, 7  ;;  %v9729_v23 = vshrl.u32 %v10903_v17, 16  ;;  %v9732_v51 = vshll.u32 %v10903_v17, 16 }
 0xcdf   : > { %v9417_v44 = vpop.f32.mrb[16].mxu1  ;;  %v10769_v38 = vrot.slane %v9698_v52, 11 }
 0xce0   : > { %v9704_v48 = vor.u32 %v9703_v21, %v9700_v18  ;;  %v9731_v14 = vrot.slane %v9729_v23, 7  ;;  %v9592_v42 = vmax.f32 %v9417_v44, 0.0  ;;  %v13200_v58 = vpop.f32.mrb[17].mxu1 }
 0xce1   : > { %v9420_v9 = vpop.f32.mrb[18].mxu1 }
 0xce2   : > { %v9705_v15 = vsel %vm16348_vm11, %v9696_v50, %v9704_v48  ;;  %v9734_v12 = vor.u32 %v9732_v51, %v9731_v14  ;;  %v10904_v34 = vpack.c.bf16 %v9592_v42, %v9592_v42  ;;  %v13201_v26 = vpop.f32.mrb[19].mxu1  ;;  %v9593_v7 = vmax.f32 %v9420_v9, 0.0 }
 0xce3   : > { %9709 = vst.msk [vmem:[%s17384_s24 + $0xc] sm:$0xf] %vm315_vm4, %v9705_v15  ;;  %v9736_v61 = vrot.slane %v9731_v14, 4 }
 0xce4   : > { %v9735_v16 = vsel %vm17398_vm1, %v10769_v38, %v9734_v12  ;;  %v9738_v19 = vshrl.u32 %v10904_v34, 16  ;;  %v10905_v13 = vpack.c.bf16 %v9593_v7, %v9593_v7  ;;  %v9741_v30 = vshll.u32 %v10904_v34, 16 }
 0xce5   : > { %9747 = vst.msk [vmem:[%s17384_s24 + $0x10] sm:$0xf] %vm315_vm4, %v9735_v16 }
 0xce6   : > { %v9740_v37 = vrot.slane %v9738_v19, 7  ;;  %v9763_v25 = vshrl.u32 %v10905_v13, 16  ;;  %v9766_v29 = vshll.u32 %v10905_v13, 16 }
 0xce7   : > { %v9425_v32 = vpop.f32.mrb[20].mxu1 }
 0xce8   : > { %v9743_v56 = vor.u32 %v9741_v30, %v9740_v37  ;;  %v9594_v24 = vmax.f32 %v9425_v32, 0.0  ;;  %v13204_v39 = vpop.f32.mrb[21].mxu1  ;;  %v9765_v6 = vrot.slane %v9763_v25, 4  ;;  %v9768_v55 = vrot.slane %v9766_v29, 5 }
 0xce9   : > { %v9428_v28 = vpop.f32.mrb[22].mxu1 }
 0xcea   : > { %v9744_v53 = vsel %vm17398_vm1, %v9736_v61, %v9743_v56  ;;  %v10906_v3 = vpack.c.bf16 %v9594_v24, %v9594_v24  ;;  %v9595_v43 = vmax.f32 %v9428_v28, 0.0  ;;  %v13205_v5 = vpop.f32.mrb[23].mxu1  ;;  %v9769_v0 = vor.u32 %v9768_v55, %v9765_v6 }
 0xceb   : > { %9748 = vst.msk [vmem:[%s17384_s24 + $0x14] sm:$0xf] %vm315_vm4, %v9744_v53 }
 0xcec   : > { %v9772_v11 = vshll.u32 %v10906_v3, 16  ;;  %v9776_v36 = vshrl.u32 %v10906_v3, 16  ;;  %v10907_v63 = vpack.c.bf16 %v9595_v43, %v9595_v43  ;;  %v9770_v60 = vrot.slane %v9769_v0, 4 }
 0xcee   : > { %v9774_v22 = vrot.slane %v9772_v11, 5  ;;  %v9778_v57 = vrot.slane %v9776_v36, 4  ;;  %v9782_v27 = vshll.u32 %v10907_v63, 16  ;;  %v9801_v8 = vshrl.u32 %v10907_v63, 16 }
 0xcef   : > { %v9433_v35 = vpop.f32.mrb[24].mxu1 }
 0xcf0   : > { %v9775_v10 = vsel %vm17414_vm5, %v9770_v60, %v9774_v22  ;;  %v9779_v47 = vor.u32 %v9778_v57, %v9774_v22  ;;  %v9803_v45 = vrot.slane %v9801_v8, 5  ;;  %v13208_v1 = vpop.f32.mrb[25].mxu1  ;;  %v9806_v59 = vrot.slane %v9782_v27, 6 }
 0xcf1   : > { %9788 = vst.msk [vmem:[%s17384_s24 + $0x18] sm:$0xf] %vm315_vm4, %v9775_v10  ;;  %v9596_v40 = vmax.f32 %v9433_v35, 0.0  ;;  %v9436_v62 = vpop.f32.mrb[26].mxu1  ;;  %v9784_v46 = vrot.slane %v9782_v27, 5 }
 0xcf2   : > { %v9780_v20 = vrot.slane %v9779_v47, 4  ;;  %v9597_v54 = vmax.f32 %v9436_v62, 0.0  ;;  %v13209_v52 = vpop.f32.mrb[27].mxu1  ;;  %v9807_v49 = vor.u32 %v9806_v59, %v9803_v45 }
 0xcf3   : > { %v10909_v2 = vpack.c.bf16 %v9596_v40, %v9596_v40 }
 0xcf4   : > { %v9785_v17 = vsel %vm17414_vm5, %v9780_v20, %v9784_v46  ;;  %v10910_v18 = vpack.c.bf16 %v9597_v54, %v9597_v54  ;;  %v9808_v42 = vrot.slane %v9807_v49, 4 }
 0xcf5   : > { %9789 = vst.msk [vmem:[%s17384_s24 + $0x1c] sm:$0xf] %vm315_vm4, %v9785_v17  ;;  %v9810_v21 = vshrl.u32 %v10909_v2, 16  ;;  %v9813_v23 = vshll.u32 %v10909_v2, 16 }
 0xcf6   : > { %v9820_v50 = vshrl.u32 %v10910_v18, 16  ;;  %v9823_v44 = vshll.u32 %v10910_v18, 16 }
 0xcf7   : > { %v9812_v48 = vrot.slane %v9810_v21, 5  ;;  %v9815_v14 = vrot.slane %v9813_v23, 6  ;;  %v9441_v51 = vpop.f32.mrb[28].mxu1 }
 0xcf8   : > { %v9822_v58 = vrot.slane %v9820_v50, 5  ;;  %v9825_v9 = vrot.slane %v9823_v44, 6  ;;  %v13212_v15 = vpop.f32.mrb[29].mxu1  ;;  %v9845_v12 = vrot.slane %v9820_v50, 6  ;;  %v9848_v34 = vrot.slane %v9823_v44, 7 }
 0xcf9   : > { %v9816_v38 = vor.u32 %v9815_v14, %v9812_v48  ;;  %v9598_v26 = vmax.f32 %v9441_v51, 0.0  ;;  %v9444_v7 = vpop.f32.mrb[30].mxu1 }
 0xcfa   : > { %v9826_v16 = vor.u32 %v9825_v9, %v9822_v58  ;;  %v9599_v19 = vmax.f32 %v9444_v7, 0.0  ;;  %v13213_v13 = vpop.f32.mrb[31].mxu1  ;;  %v9849_v61 = vor.u32 %v9848_v34, %v9845_v12 }
 0xcfb   : > { %v9817_v37 = vsel %vm17377_vm13, %v9808_v42, %v9816_v38  ;;  %v9818_v30 = vrot.slane %v9816_v38, 4  ;;  %v10912_v25 = vpack.c.bf16 %v9598_v26, %v9598_v26 }
 0xcfc   : > { %9830 = vst.msk [vmem:[%s17384_s24 + $0x20] sm:$0xf] %vm315_vm4, %v9817_v37  ;;  %v10913_v29 = vpack.c.bf16 %v9599_v19, %v9599_v19  ;;  %v9850_v11 = vrot.slane %v9849_v61, 4 }
 0xcfd   : > { %v9827_v32 = vsel %vm17377_vm13, %v9818_v30, %v9826_v16  ;;  %v9852_v56 = vshrl.u32 %v10912_v25, 16  ;;  %v9855_v24 = vshll.u32 %v10912_v25, 16 }
 0xcfe   : > { %9831 = vst.msk [vmem:[%s17384_s24 + $0x24] sm:$0xf] %vm315_vm4, %v9827_v32  ;;  %v9862_v39 = vshrl.u32 %v10913_v29, 16  ;;  %v9865_v6 = vshll.u32 %v10913_v29, 16 }
 0xcff   : > { %v9854_v55 = vrot.slane %v9852_v56, 6  ;;  %v9857_v28 = vrot.slane %v9855_v24, 7  ;;  %v9449_v53 = vpop.f32.mrb[32].mxu1 }
 0xd00   : > { %v9864_v3 = vrot.slane %v9862_v39, 6  ;;  %v9867_v43 = vrot.slane %v9865_v6, 7  ;;  %v9600_v5 = vmax.f32 %v9449_v53, 0.0  ;;  %v13216_v0 = vpop.f32.mrb[33].mxu1  ;;  %v10782_v62 = vrot.slane %v9862_v39, 11 }
 0xd01   : > { %v9858_v36 = vor.u32 %v9857_v28, %v9854_v55  ;;  %v9452_v63 = vpop.f32.mrb[34].mxu1 }
 0xd02   : > { %v9868_v60 = vor.u32 %v9867_v43, %v9864_v3  ;;  %v10915_v22 = vpack.c.bf16 %v9600_v5, %v9600_v5  ;;  %v9601_v57 = vmax.f32 %v9452_v63, 0.0  ;;  %v13217_v27 = vpop.f32.mrb[35].mxu1 }
 0xd03   : > { %v9859_v8 = vsel %vm16348_vm11, %v9850_v11, %v9858_v36  ;;  %v9860_v35 = vrot.slane %v9858_v36, 4 }
 0xd04   : > { %9872 = vst.msk [vmem:[%s17384_s24 + $0x28] sm:$0xf] %vm315_vm4, %v9859_v8  ;;  %v9890_v10 = vshrl.u32 %v10915_v22, 16  ;;  %v10916_v47 = vpack.c.bf16 %v9601_v57, %v9601_v57  ;;  %v9893_v59 = vshll.u32 %v10915_v22, 16 }
 0xd05   : > { %v9869_v45 = vsel %vm16348_vm11, %v9860_v35, %v9868_v60 }
 0xd06   : > { %9873 = vst.msk [vmem:[%s17384_s24 + $0x2c] sm:$0xf] %vm315_vm4, %v9869_v45  ;;  %v9892_v1 = vrot.slane %v9890_v10, 7  ;;  %v9899_v40 = vshrl.u32 %v10916_v47, 16  ;;  %v9902_v52 = vshll.u32 %v10916_v47, 16 }
 0xd07   : > { %v9457_v20 = vpop.f32.mrb[36].mxu1 }
 0xd08   : > { %v9895_v46 = vor.u32 %v9893_v59, %v9892_v1  ;;  %v9901_v54 = vrot.slane %v9899_v40, 7  ;;  %v9602_v2 = vmax.f32 %v9457_v20, 0.0  ;;  %v13220_v17 = vpop.f32.mrb[37].mxu1  ;;  %v9897_v49 = vrot.slane %v9892_v1, 4 }
 0xd09   : > { %v9460_v18 = vpop.f32.mrb[38].mxu1 }
 0xd0a   : > { %v9896_v21 = vsel %vm17398_vm1, %v10782_v62, %v9895_v46  ;;  %v9904_v23 = vor.u32 %v9902_v52, %v9901_v54  ;;  %v10917_v50 = vpack.c.bf16 %v9602_v2, %v9602_v2  ;;  %v9603_v44 = vmax.f32 %v9460_v18, 0.0  ;;  %v13221_v48 = vpop.f32.mrb[39].mxu1 }
 0xd0b   : > { %9908 = vst.msk [vmem:[%s17384_s24 + $0x30] sm:$0xf] %vm315_vm4, %v9896_v21 }
 0xd0c   : > { %v9905_v14 = vsel %vm17398_vm1, %v9897_v49, %v9904_v23  ;;  %v9921_v51 = vshrl.u32 %v10917_v50, 16  ;;  %v9924_v42 = vshll.u32 %v10917_v50, 16  ;;  %v10918_v58 = vpack.c.bf16 %v9603_v44, %v9603_v44 }
 0xd0d   : > { %9909 = vst.msk [vmem:[%s17384_s24 + $0x34] sm:$0xf] %vm315_vm4, %v9905_v14 }
 0xd0e   : > { %v9923_v9 = vrot.slane %v9921_v51, 4  ;;  %v9926_v15 = vrot.slane %v9924_v42, 5  ;;  %v9930_v38 = vshll.u32 %v10918_v58, 16  ;;  %v9934_v12 = vshrl.u32 %v10918_v58, 16 }
 0xd0f   : > { %v9465_v34 = vpop.f32.mrb[40].mxu1 }
 0xd10   : > { %v9927_v26 = vor.u32 %v9926_v15, %v9923_v9  ;;  %v9932_v7 = vrot.slane %v9930_v38, 5  ;;  %v9936_v16 = vrot.slane %v9934_v12, 4  ;;  %v9604_v19 = vmax.f32 %v9465_v34, 0.0  ;;  %v13224_v13 = vpop.f32.mrb[41].mxu1 }
 0xd11   : > { %v9468_v37 = vpop.f32.mrb[42].mxu1 }
 0xd12   : > { %v9928_v30 = vrot.slane %v9927_v26, 4  ;;  %v9937_v25 = vor.u32 %v9936_v16, %v9932_v7  ;;  %v10919_v29 = vpack.c.bf16 %v9604_v19, %v9604_v19  ;;  %v9605_v32 = vmax.f32 %v9468_v37, 0.0  ;;  %v13225_v61 = vpop.f32.mrb[43].mxu1 }
 0xd14   : > { %v9933_v56 = vsel %vm17414_vm5, %v9928_v30, %v9932_v7  ;;  %v9940_v24 = vshll.u32 %v10919_v29, 16  ;;  %v9959_v39 = vshrl.u32 %v10919_v29, 16  ;;  %v10921_v6 = vpack.c.bf16 %v9605_v32, %v9605_v32 }
 0xd15   : > { %9946 = vst.msk [vmem:[%s17384_s24 + $0x38] sm:$0xf] %vm315_vm4, %v9933_v56  ;;  %v9938_v55 = vrot.slane %v9937_v25, 4 }
 0xd16   : > { %v9942_v28 = vrot.slane %v9940_v24, 5  ;;  %v9961_v53 = vrot.slane %v9959_v39, 5  ;;  %v9964_v3 = vrot.slane %v9940_v24, 6  ;;  %v9968_v43 = vshrl.u32 %v10921_v6, 16 }
 0xd17   : > { %v9971_v5 = vshll.u32 %v10921_v6, 16  ;;  %v9473_v0 = vpop.f32.mrb[44].mxu1 }
 0xd18   : > { %v9943_v11 = vsel %vm17414_vm5, %v9938_v55, %v9942_v28  ;;  %v9965_v36 = vor.u32 %v9964_v3, %v9961_v53  ;;  %v9606_v63 = vmax.f32 %v9473_v0, 0.0  ;;  %v13228_v60 = vpop.f32.mrb[45].mxu1  ;;  %v9970_v22 = vrot.slane %v9968_v43, 5 }
 0xd19   : > { %9947 = vst.msk [vmem:[%s17384_s24 + $0x3c] sm:$0xf] %vm315_vm4, %v9943_v11  ;;  %v9973_v57 = vrot.slane %v9971_v5, 6  ;;  %v9476_v27 = vpop.f32.mrb[46].mxu1 }
 0xd1a   : > { %v9966_v8 = vrot.slane %v9965_v36, 4  ;;  %v10922_v35 = vpack.c.bf16 %v9606_v63, %v9606_v63  ;;  %v9607_v10 = vmax.f32 %v9476_v27, 0.0  ;;  %v13229_v47 = vpop.f32.mrb[47].mxu1 }
 0xd1b   : > { %v9974_v45 = vor.u32 %v9973_v57, %v9970_v22 }
 0xd1c   : > { %v9978_v1 = vshrl.u32 %v10922_v35, 16  ;;  %v9981_v59 = vshll.u32 %v10922_v35, 16  ;;  %v10924_v40 = vpack.c.bf16 %v9607_v10, %v9607_v10 }
 0xd1d   : > { %v9975_v62 = vsel %vm17377_vm13, %v9966_v8, %v9974_v45  ;;  %v9976_v18 = vrot.slane %v9974_v45, 4 }
 0xd1e   : > { %9988 = vst.msk [vmem:[%s17384_s24 + $0x40] sm:$0xf] %vm315_vm4, %v9975_v62  ;;  %v9980_v20 = vrot.slane %v9978_v1, 5  ;;  %v9983_v46 = vrot.slane %v9981_v59, 6  ;;  %v10003_v54 = vrot.slane %v9978_v1, 6  ;;  %v10006_v52 = vrot.slane %v9981_v59, 7 }
 0xd1f   : > { %v10010_v2 = vshrl.u32 %v10924_v40, 16  ;;  %v10013_v17 = vshll.u32 %v10924_v40, 16  ;;  %v9481_v49 = vpop.f32.mrb[48].mxu1 }
 0xd20   : > { %v9984_v21 = vor.u32 %v9983_v46, %v9980_v20  ;;  %v10007_v23 = vor.u32 %v10006_v52, %v10003_v54  ;;  %v9608_v50 = vmax.f32 %v9481_v49, 0.0  ;;  %v13232_v44 = vpop.f32.mrb[49].mxu1 }
 0xd21   : > { %v10012_v48 = vrot.slane %v10010_v2, 6  ;;  %v10015_v14 = vrot.slane %v10013_v17, 7  ;;  %v9484_v51 = vpop.f32.mrb[50].mxu1 }
 0xd22   : > { %v9985_v42 = vsel %vm17377_vm13, %v9976_v18, %v9984_v21  ;;  %v10008_v58 = vrot.slane %v10007_v23, 4  ;;  %v10925_v9 = vpack.c.bf16 %v9608_v50, %v9608_v50  ;;  %v9609_v15 = vmax.f32 %v9484_v51, 0.0  ;;  %v13233_v38 = vpop.f32.mrb[51].mxu1 }
 0xd23   : > { %9989 = vst.msk [vmem:[%s17384_s24 + $0x44] sm:$0xf] %vm315_vm4, %v9985_v42  ;;  %v10016_v12 = vor.u32 %v10015_v14, %v10012_v48 }
 0xd24   : > { %v10020_v34 = vshrl.u32 %v10925_v9, 16  ;;  %v10023_v26 = vshll.u32 %v10925_v9, 16  ;;  %v10927_v7 = vpack.c.bf16 %v9609_v15, %v9609_v15 }
 0xd25   : > { %v10017_v16 = vsel %vm16348_vm11, %v10008_v58, %v10016_v12  ;;  %v10018_v30 = vrot.slane %v10016_v12, 4 }
 0xd26   : > { %10030 = vst.msk [vmem:[%s17384_s24 + $0x48] sm:$0xf] %vm315_vm4, %v10017_v16  ;;  %v10022_v19 = vrot.slane %v10020_v34, 6  ;;  %v10025_v13 = vrot.slane %v10023_v26, 7  ;;  %v10048_v37 = vshrl.u32 %v10927_v7, 16  ;;  %v10051_v61 = vshll.u32 %v10927_v7, 16 }
 0xd27   : > { %v9489_v25 = vpop.f32.mrb[52].mxu1  ;;  %v10795_v55 = vrot.slane %v10020_v34, 11 }
 0xd28   : > { %v10026_v29 = vor.u32 %v10025_v13, %v10022_v19  ;;  %v10050_v32 = vrot.slane %v10048_v37, 7  ;;  %v9610_v56 = vmax.f32 %v9489_v25, 0.0  ;;  %v13236_v24 = vpop.f32.mrb[53].mxu1 }
 0xd29   : > { %v9492_v39 = vpop.f32.mrb[54].mxu1 }
 0xd2a   : > { %v10027_v6 = vsel %vm16348_vm11, %v10018_v30, %v10026_v29  ;;  %v10053_v28 = vor.u32 %v10051_v61, %v10050_v32  ;;  %v10928_v53 = vpack.c.bf16 %v9610_v56, %v9610_v56  ;;  %v13237_v3 = vpop.f32.mrb[55].mxu1  ;;  %v9611_v43 = vmax.f32 %v9492_v39, 0.0 }
 0xd2b   : > { %10031 = vst.msk [vmem:[%s17384_s24 + $0x4c] sm:$0xf] %vm315_vm4, %v10027_v6  ;;  %v10055_v27 = vrot.slane %v10050_v32, 4 }
 0xd2c   : > { %v10054_v5 = vsel %vm17398_vm1, %v10795_v55, %v10053_v28  ;;  %v10057_v0 = vshrl.u32 %v10928_v53, 16  ;;  %v10929_v11 = vpack.c.bf16 %v9611_v43, %v9611_v43  ;;  %v10060_v63 = vshll.u32 %v10928_v53, 16 }
 0xd2d   : > { %10066 = vst.msk [vmem:[%s17384_s24 + $0x50] sm:$0xf] %vm315_vm4, %v10054_v5 }
 0xd2e   : > { %v10059_v36 = vrot.slane %v10057_v0, 7  ;;  %v10079_v60 = vshrl.u32 %v10929_v11, 16  ;;  %v10082_v22 = vshll.u32 %v10929_v11, 16 }
 0xd2f   : > { %v9497_v57 = vpop.f32.mrb[56].mxu1 }
 0xd30   : > { %v10062_v8 = vor.u32 %v10060_v63, %v10059_v36  ;;  %v9612_v35 = vmax.f32 %v9497_v57, 0.0  ;;  %v13240_v10 = vpop.f32.mrb[57].mxu1  ;;  %v10081_v47 = vrot.slane %v10079_v60, 4  ;;  %v10084_v45 = vrot.slane %v10082_v22, 5 }
 0xd31   : > { %v9500_v1 = vpop.f32.mrb[58].mxu1 }
 0xd32   : > { %v10063_v59 = vsel %vm17398_vm1, %v10055_v27, %v10062_v8  ;;  %v10930_v40 = vpack.c.bf16 %v9612_v35, %v9612_v35  ;;  %v9613_v62 = vmax.f32 %v9500_v1, 0.0  ;;  %v13241_v20 = vpop.f32.mrb[59].mxu1  ;;  %v10085_v46 = vor.u32 %v10084_v45, %v10081_v47 }
 0xd33   : > { %10067 = vst.msk [vmem:[%s17384_s24 + $0x54] sm:$0xf] %vm315_vm4, %v10063_v59 }
 0xd34   : > { %v10088_v54 = vshll.u32 %v10930_v40, 16  ;;  %v10092_v52 = vshrl.u32 %v10930_v40, 16  ;;  %v10931_v2 = vpack.c.bf16 %v9613_v62, %v9613_v62  ;;  %v10086_v17 = vrot.slane %v10085_v46, 4 }
 0xd36   : > { %v10090_v49 = vrot.slane %v10088_v54, 5  ;;  %v10094_v18 = vrot.slane %v10092_v52, 4  ;;  %v10098_v21 = vshll.u32 %v10931_v2, 16  ;;  %v10117_v23 = vshrl.u32 %v10931_v2, 16 }
 0xd37   : > { %v9505_v50 = vpop.f32.mrb[60].mxu1 }
 0xd38   : > { %v10091_v44 = vsel %vm17414_vm5, %v10086_v17, %v10090_v49  ;;  %v10095_v48 = vor.u32 %v10094_v18, %v10090_v49  ;;  %v10119_v14 = vrot.slane %v10117_v23, 5  ;;  %v13244_v51 = vpop.f32.mrb[61].mxu1  ;;  %v10122_v42 = vrot.slane %v10098_v21, 6 }
 0xd39   : > { %10104 = vst.msk [vmem:[%s17384_s24 + $0x58] sm:$0xf] %vm315_vm4, %v10091_v44  ;;  %v9614_v58 = vmax.f32 %v9505_v50, 0.0  ;;  %v9508_v9 = vpop.f32.mrb[62].mxu1  ;;  %v10100_v38 = vrot.slane %v10098_v21, 5 }
 0xd3a   : > { %v10096_v15 = vrot.slane %v10095_v48, 4  ;;  %v9615_v12 = vmax.f32 %v9508_v9, 0.0  ;;  %v13245_v34 = vpop.f32.mrb[63].mxu1  ;;  %v10123_v16 = vor.u32 %v10122_v42, %v10119_v14 }
 0xd3b   : > { %v10933_v26 = vpack.c.bf16 %v9614_v58, %v9614_v58 }
 0xd3c   : > { %v10101_v7 = vsel %vm17414_vm5, %v10096_v15, %v10100_v38  ;;  %v10934_v19 = vpack.c.bf16 %v9615_v12, %v9615_v12  ;;  %v10124_v56 = vrot.slane %v10123_v16, 4 }
 0xd3d   : > { %10105 = vst.msk [vmem:[%s17384_s24 + $0x5c] sm:$0xf] %vm315_vm4, %v10101_v7  ;;  %v10126_v13 = vshrl.u32 %v10933_v26, 16  ;;  %v10129_v37 = vshll.u32 %v10933_v26, 16 }
 0xd3e   : > { %v10136_v30 = vshrl.u32 %v10934_v19, 16  ;;  %v10139_v25 = vshll.u32 %v10934_v19, 16 }
 0xd3f   : > { %v10128_v29 = vrot.slane %v10126_v13, 5  ;;  %v10131_v32 = vrot.slane %v10129_v37, 6  ;;  %v9513_v61 = vpop.f32.mrb[64].mxu1 }
 0xd40   : > { %v10138_v24 = vrot.slane %v10136_v30, 5  ;;  %v10141_v39 = vrot.slane %v10139_v25, 6  ;;  %v13248_v6 = vpop.f32.mrb[65].mxu1  ;;  %v10161_v28 = vrot.slane %v10136_v30, 6  ;;  %v10164_v53 = vrot.slane %v10139_v25, 7 }
 0xd41   : > { %v10132_v55 = vor.u32 %v10131_v32, %v10128_v29  ;;  %v9616_v3 = vmax.f32 %v9513_v61, 0.0  ;;  %v9516_v43 = vpop.f32.mrb[66].mxu1 }
 0xd42   : > { %v10142_v5 = vor.u32 %v10141_v39, %v10138_v24  ;;  %v9617_v0 = vmax.f32 %v9516_v43, 0.0  ;;  %v13249_v11 = vpop.f32.mrb[67].mxu1  ;;  %v10165_v27 = vor.u32 %v10164_v53, %v10161_v28 }
 0xd43   : > { %v10133_v36 = vsel %vm17377_vm13, %v10124_v56, %v10132_v55  ;;  %v10134_v63 = vrot.slane %v10132_v55, 4  ;;  %v10936_v60 = vpack.c.bf16 %v9616_v3, %v9616_v3 }
 0xd44   : > { %10146 = vst.msk [vmem:[%s17384_s24 + $0x60] sm:$0xf] %vm315_vm4, %v10133_v36  ;;  %v10937_v22 = vpack.c.bf16 %v9617_v0, %v9617_v0  ;;  %v10166_v54 = vrot.slane %v10165_v27, 4 }
 0xd45   : > { %v10143_v57 = vsel %vm17377_vm13, %v10134_v63, %v10142_v5  ;;  %v10168_v8 = vshrl.u32 %v10936_v60, 16  ;;  %v10171_v35 = vshll.u32 %v10936_v60, 16 }
 0xd46   : > { %10147 = vst.msk [vmem:[%s17384_s24 + $0x64] sm:$0xf] %vm315_vm4, %v10143_v57  ;;  %v10178_v10 = vshrl.u32 %v10937_v22, 16  ;;  %v10181_v47 = vshll.u32 %v10937_v22, 16 }
 0xd47   : > { %v10170_v45 = vrot.slane %v10168_v8, 6  ;;  %v10173_v1 = vrot.slane %v10171_v35, 7  ;;  %v9521_v59 = vpop.f32.mrb[68].mxu1 }
 0xd48   : > { %v10180_v40 = vrot.slane %v10178_v10, 6  ;;  %v10183_v62 = vrot.slane %v10181_v47, 7  ;;  %v9618_v20 = vmax.f32 %v9521_v59, 0.0  ;;  %v13252_v46 = vpop.f32.mrb[69].mxu1  ;;  %v10808_v58 = vrot.slane %v10178_v10, 11 }
 0xd49   : > { %v10174_v52 = vor.u32 %v10173_v1, %v10170_v45  ;;  %v9524_v31 = vpop.f32.mrb[70].mxu1 }
 0xd4a   : > { %v10184_v2 = vor.u32 %v10183_v62, %v10180_v40  ;;  %v10939_v17 = vpack.c.bf16 %v9618_v20, %v9618_v20  ;;  %v9619_v49 = vmax.f32 %v9524_v31, 0.0  ;;  %v13253_v18 = vpop.f32.mrb[71].mxu1 }
 0xd4b   : > { %v10175_v21 = vsel %vm16348_vm11, %v10166_v54, %v10174_v52  ;;  %v10176_v23 = vrot.slane %v10174_v52, 4 }
 0xd4c   : > { %10188 = vst.msk [vmem:[%s17384_s24 + $0x68] sm:$0xf] %vm315_vm4, %v10175_v21  ;;  %v10206_v50 = vshrl.u32 %v10939_v17, 16  ;;  %v10940_v44 = vpack.c.bf16 %v9619_v49, %v9619_v49  ;;  %v10209_v51 = vshll.u32 %v10939_v17, 16 }
 0xd4d   : > { %v10185_v48 = vsel %vm16348_vm11, %v10176_v23, %v10184_v2 }
 0xd4e   : > { %10189 = vst.msk [vmem:[%s17384_s24 + $0x6c] sm:$0xf] %vm315_vm4, %v10185_v48  ;;  %v10208_v14 = vrot.slane %v10206_v50, 7  ;;  %v10215_v42 = vshrl.u32 %v10940_v44, 16  ;;  %v10218_v12 = vshll.u32 %v10940_v44, 16 }
 0xd4f   : > { %v9529_v9 = vpop.f32.mrb[72].mxu1 }
 0xd50   : > { %v10211_v15 = vor.u32 %v10209_v51, %v10208_v14  ;;  %v10217_v38 = vrot.slane %v10215_v42, 7  ;;  %v9620_v34 = vmax.f32 %v9529_v9, 0.0  ;;  %v13256_v26 = vpop.f32.mrb[73].mxu1  ;;  %v10213_v7 = vrot.slane %v10208_v14, 4 }
 0xd51   : > { %v9532_v16 = vpop.f32.mrb[74].mxu1 }
 0xd52   : > { %v10212_v33 = vsel %vm17398_vm1, %v10808_v58, %v10211_v15  ;;  %v10220_v19 = vor.u32 %v10218_v12, %v10217_v38  ;;  %v10941_v13 = vpack.c.bf16 %v9620_v34, %v9620_v34  ;;  %v9621_v37 = vmax.f32 %v9532_v16, 0.0  ;;  %v13257_v30 = vpop.f32.mrb[75].mxu1 }
 0xd53   : > { %10224 = vst.msk [vmem:[%s17384_s24 + $0x70] sm:$0xf] %vm315_vm4, %v10212_v33 }
 0xd54   : > { %v10221_v25 = vsel %vm17398_vm1, %v10213_v7, %v10220_v19  ;;  %v10237_v29 = vshrl.u32 %v10941_v13, 16  ;;  %v10240_v32 = vshll.u32 %v10941_v13, 16  ;;  %v10942_v61 = vpack.c.bf16 %v9621_v37, %v9621_v37 }
 0xd55   : > { %10225 = vst.msk [vmem:[%s17384_s24 + $0x74] sm:$0xf] %vm315_vm4, %v10221_v25 }
 0xd56   : > { %v10239_v56 = vrot.slane %v10237_v29, 4  ;;  %v10242_v24 = vrot.slane %v10240_v32, 5  ;;  %v10246_v39 = vshll.u32 %v10942_v61, 16  ;;  %v10250_v6 = vshrl.u32 %v10942_v61, 16 }
 0xd57   : > { %v9537_v55 = vpop.f32.mrb[76].mxu1 }
 0xd58   : > { %v10243_v28 = vor.u32 %v10242_v24, %v10239_v56  ;;  %v10248_v53 = vrot.slane %v10246_v39, 5  ;;  %v10252_v3 = vrot.slane %v10250_v6, 4  ;;  %v9622_v43 = vmax.f32 %v9537_v55, 0.0  ;;  %v13260_v5 = vpop.f32.mrb[77].mxu1 }
 0xd59   : > { %v9540_v0 = vpop.f32.mrb[78].mxu1 }
 0xd5a   : > { %v10244_v4 = vrot.slane %v10243_v28, 4  ;;  %v10253_v11 = vor.u32 %v10252_v3, %v10248_v53  ;;  %v10943_v36 = vpack.c.bf16 %v9622_v43, %v9622_v43  ;;  %v13261_v63 = vpop.f32.mrb[79].mxu1 }
 0xd5c   : > { %v10249_v60 = vsel %vm17414_vm5, %v10244_v4, %v10248_v53  ;;  %v10256_v22 = vshll.u32 %v10943_v36, 16  ;;  %v10254_v57 = vrot.slane %v10253_v11, 4 }
 0xd5d   : > { %10262 = vst.msk [vmem:[%s17384_s24 + $0x78] sm:$0xf] %vm315_vm4, %v10249_v60 }
 0xd5e   : > { %v10258_v27 = vrot.slane %v10256_v22, 5 }
 0xd5f   : > { %v9544_v8 = vpop.f32.mrb[144].mxu1 }
 0xd60   : > { %v10259_v35 = vsel %vm17414_vm5, %v10254_v57, %v10258_v27  ;;  %v13264_v10 = vpop.f32.mrb[145].mxu1 }
 0xd61   : > { %10263 = vst.msk [vmem:[%s17384_s24 + $0x7c] sm:$0xf] %vm315_vm4, %v10259_v35  ;;  %v9546_v47 = vpop.f32.mrb[146].mxu1 }
 0xd62   : > { %v13265_v45 = vpop.f32.mrb[147].mxu1 }
 0xd63 PF: > { %s15_s12 = sadd.s32 1, %s14963_s12  }
 0xd64   : > { %p12_p9 = scmp.ge.s32.totalorder %s15_s12, 4  }
 0xd66   :  { %14 = sbr.rel (!%p12_p9) target bundleno = 2 (0x2), region = 87 }
 0xd6d   :  { %10285 = vsyncpa [#allocation5], 1 }
 0xd6e   :  { %10287 = vsyncpa [#allocation5 + $0x1], 1 }
 0xd6f   :  { %10288 = vsyncpa [#allocation7], 1 }

</bundles_post_ra>
